<compile_context>
chip_gen: v7x
topology: tpu7x:2x2x1
jax: 0.10.0
libtpu: 0.0.40
codegen_flags: <defaults>
</compile_context>

<pallas_src>
import math

import jax
import jax.numpy as jnp
from jax.experimental import pallas as pl
from jax.experimental.pallas import tpu as pltpu

# ----------------------------- small synthetic config -----------------------------
B, T = 2, 2                 # batch, frames (T == num_frames -> no interpolate path)
NUM_FRAMES = T
IMG = 32                    # image height/width
PATCH = 16                  # patch size -> 2x2 = 4 patches
CIN = 3
D = 128                     # feature_dim
NUM_HEADS = 4               # head dim 32
NUM_LAYERS = 2
HIDDEN = 4 * D              # CLIP MLP hidden
NUM_EMP = 2                 # num_event_modality_prompts
OUT_DIM = 64                # visual.proj / proj_low_level output dim (synthetic "512")
PROJ_PAD = 128              # lane-dense padded projection width
LOW_LEVEL_IDX = (1,)
NUM_LL = len(LOW_LEVEL_IDX)
EPS = 1e-5

NUM_PATCH = (IMG // PATCH) ** 2        # 4
N0 = 1 + NUM_PATCH                     # cls + patches
LMAX = 1 + NUM_EMP + NUM_PATCH + 1     # cls + event prompts + patches + cross-frame prompt
CP = CIN * PATCH * PATCH               # patchified feature size (768)

MXU_DTYPE = jnp.bfloat16               # MXU operand dtype (f32 accumulation everywhere)

# -------------------- packed weight layout (column units of D / rows) --------------------
# big_w: (L, D, 13*D) bf16, lane-packed per layer
W_QKV, W_OUT, W_CF_QKV, W_CF_O, W_CLS_PROJ, W_MLP1 = 0, 3, 4, 7, 8, 9
BIG_COLS = 13
# small per-layer pack: (L, S_ROWS, D) f32
S_CLSPROJ_B = 0
S_CF_LN_G, S_CF_LN_B = 1, 2
S_CF_QKV_B = 3              # 3 rows (q, k, v); q row pre-scaled
S_CF_O_B = 6
S_LN1_G, S_LN1_B = 7, 8
S_QKV_B = 9                 # 3 rows (q, k, v); q row pre-scaled
S_OUT_B = 12
S_LN2_G, S_LN2_B = 13, 14
S_MLP_B2 = 15
S_EMP = 16                  # NUM_EMP rows of event-modality prompts
S_ROWS = S_EMP + NUM_EMP
# global pack: (G_ROWS, D) f32
G_CLS = 0
G_POS = 1
G_TIME = G_POS + N0
G_LNPRE_G = G_TIME + NUM_FRAMES
G_LNPRE_B = G_LNPRE_G + 1
G_LNPOST_G = G_LNPRE_B + 1
G_LNPOST_B = G_LNPOST_G + 1
G_LL = G_LNPOST_B + 1       # 2 rows (gamma, beta) per low-level head
G_ROWS = G_LL + 2 * NUM_LL


# ================================ in-kernel helpers ================================
def _mm(a, w):
    """MXU matmul: activation cast to bf16 once; weight is already bf16; f32 accumulation."""
    return jnp.dot(a.astype(MXU_DTYPE), w, preferred_element_type=jnp.float32)


def _layernorm(x, g, b):
    """LayerNorm over the last dim; statistics in f32. g/b are (1, D) rows."""
    g = g.reshape((1,) * (x.ndim - 1) + (x.shape[-1],))
    b = b.reshape((1,) * (x.ndim - 1) + (x.shape[-1],))
    mu = jnp.mean(x, axis=-1, keepdims=True)
    var = jnp.mean(jnp.square(x - mu), axis=-1, keepdims=True)
    return (x - mu) * jax.lax.rsqrt(var + EPS) * g + b


def _attention(x, qkv_w, qkv_b, o_w, o_b):
    """Multi-head self-attention on an (n, l, D) f32 value.

    qkv_w: (D, 3D) bf16 with the 1/sqrt(head_dim) scale pre-folded into the q columns.
    qkv_b: (3, D) f32 rows (q, k, v; q row pre-scaled).  o_w: (D, D) bf16.  o_b: (1, D) f32.

    Heads are merged into the batch axis so all heads share one batched score matmul,
    one softmax (one EUP reciprocal), one value matmul and one K=128 output projection.
    Matches both nn.MultiheadAttention and the module's generalized Attention
    (softmax over keys, scale 1/sqrt(head_dim)).
    """
    n, l, d = x.shape
    nl = n * l
    dh = d // NUM_HEADS

    qkv = _mm(x.reshape(nl, d), qkv_w).reshape(n, l, 3 * d)          # f32
    q = (qkv[:, :, 0 * d:1 * d] + qkv_b[0:1, :]).astype(MXU_DTYPE)   # cast once
    k = (qkv[:, :, 1 * d:2 * d] + qkv_b[1:2, :]).astype(MXU_DTYPE)
    v = (qkv[:, :, 2 * d:3 * d] + qkv_b[2:3, :]).astype(MXU_DTYPE)

    qh = jnp.concatenate([q[:, :, h * dh:(h + 1) * dh] for h in range(NUM_HEADS)], axis=0)
    kh = jnp.concatenate([k[:, :, h * dh:(h + 1) * dh] for h in range(NUM_HEADS)], axis=0)
    vh = jnp.concatenate([v[:, :, h * dh:(h + 1) * dh] for h in range(NUM_HEADS)], axis=0)

    s = jnp.einsum('bqd,bkd->bqk', qh, kh, preferred_element_type=jnp.float32)
    s = s - jnp.max(s, axis=-1, keepdims=True)
    p = jnp.exp(s)
    p = p * pl.reciprocal(jnp.sum(p, axis=-1, keepdims=True), approx=True)
    mix = jnp.einsum('bqk,bkd->bqd', p.astype(MXU_DTYPE), vh,
                     preferred_element_type=jnp.float32)             # (H*n, l, dh) f32

    # lane-concat heads back and apply ONE (nl, D) @ (D, D) output projection
    mix = jnp.concatenate([mix[h * n:(h + 1) * n] for h in range(NUM_HEADS)], axis=-1)
    out = _mm(mix.reshape(nl, d), o_w) + o_b
    return out.reshape(n, l, d)


# ================================ fused forward kernel =============================
def _fused_kernel(patches_ref, conv_w_ref, big_w_ref, mlp_w2_ref, proj_ref,
                  small_ref, mlp_b1_ref, glob_ref, cls_out_ref, ll_out_ref):
    nb = patches_ref.shape[0]          # batch elements handled by this grid step
    nt = nb * T

    # ---------------- global rows ----------------
    cls_emb = glob_ref[G_CLS:G_CLS + 1, :]             # (1, D)
    pos = glob_ref[G_POS:G_POS + N0, :]                # (N0, D)
    t_emb = glob_ref[G_TIME:G_TIME + T, :]             # (T, D)
    ln_pre_g = glob_ref[G_LNPRE_G:G_LNPRE_G + 1, :]
    ln_pre_b = glob_ref[G_LNPRE_B:G_LNPRE_B + 1, :]
    ln_post_g = glob_ref[G_LNPOST_G:G_LNPOST_G + 1, :]
    ln_post_b = glob_ref[G_LNPOST_B:G_LNPOST_B + 1, :]

    # ---------------- stem: patchify matmul + embeddings + ln_pre ----------------
    patches = patches_ref[...].reshape(nt * NUM_PATCH, CP)
    feat = _mm(patches, conv_w_ref[...]).reshape(nt, NUM_PATCH, D)   # visual.conv1

    t_full = jnp.broadcast_to(t_emb[None], (nb, T, D)).reshape(nt, 1, D)
    x_cls = cls_emb[None] + pos[0:1, :][None] + t_full               # (nt, 1, D)
    x_pat = feat + pos[1:N0, :][None] + t_full                       # (nt, NUM_PATCH, D)
    # LayerNorm is per-token, so normalizing cls and patch tokens separately is
    # identical to normalizing the concatenated sequence (ln_pre).
    x_cls = _layernorm(x_cls, ln_pre_g, ln_pre_b)
    x_pat = _layernorm(x_pat, ln_pre_g, ln_pre_b)

    low_cls = []
    for li in range(NUM_LAYERS):
        sm = small_ref[li]                                           # (S_ROWS, D) f32

        # ------------------------- InsertEventPrompt -------------------------
        ct = x_cls.reshape(nt, D)                                    # cls per (b, t)
        cls_proj = (_mm(ct, big_w_ref[li, :, W_CLS_PROJ * D:(W_CLS_PROJ + 1) * D])
                    + sm[S_CLSPROJ_B:S_CLSPROJ_B + 1, :]).reshape(nb, T, D)
        cf_norm = _layernorm(cls_proj, sm[S_CF_LN_G:S_CF_LN_G + 1, :],
                             sm[S_CF_LN_B:S_CF_LN_B + 1, :])
        cross = cls_proj + _attention(
            cf_norm,
            big_w_ref[li, :, W_CF_QKV * D:(W_CF_QKV + 3) * D],
            sm[S_CF_QKV_B:S_CF_QKV_B + 3, :],
            big_w_ref[li, :, W_CF_O * D:(W_CF_O + 1) * D],
            sm[S_CF_O_B:S_CF_O_B + 1, :])
        cross = cross.reshape(nt, 1, D)

        # token order: [cls | event-modality prompts | patches | cross-frame prompt]
        emp = jnp.broadcast_to(sm[S_EMP:S_EMP + NUM_EMP, :][None], (nt, NUM_EMP, D))
        xfull = jnp.concatenate([x_cls, emp, x_pat, cross], axis=1)  # (nt, LMAX, D)

        # --------------------- CLIP ResidualAttentionBlock ---------------------
        y = _layernorm(xfull, sm[S_LN1_G:S_LN1_G + 1, :], sm[S_LN1_B:S_LN1_B + 1, :])
        xfull = xfull + _attention(
            y,
            big_w_ref[li, :, W_QKV * D:(W_QKV + 3) * D],
            sm[S_QKV_B:S_QKV_B + 3, :],
            big_w_ref[li, :, W_OUT * D:(W_OUT + 1) * D],
            sm[S_OUT_B:S_OUT_B + 1, :])
        y = _layernorm(xfull, sm[S_LN2_G:S_LN2_G + 1, :], sm[S_LN2_B:S_LN2_B + 1, :])
        h1 = (_mm(y.reshape(nt * LMAX, D),
                  big_w_ref[li, :, W_MLP1 * D:(W_MLP1 + 4) * D]) + mlp_b1_ref[li])
        h1 = h1 * jax.nn.sigmoid(1.702 * h1)                         # QuickGELU (f32)
        xfull = xfull + (_mm(h1, mlp_w2_ref[li])
                         + sm[S_MLP_B2:S_MLP_B2 + 1, :]).reshape(nt, LMAX, D)

        # ---- drop prompts: keep cls + patch tokens (stays in vregs, no scratch) ----
        x_cls = xfull[:, 0:1, :]
        x_pat = xfull[:, 1 + NUM_EMP:1 + NUM_EMP + NUM_PATCH, :]
        if (li + 1) in LOW_LEVEL_IDX:
            low_cls.append(x_cls.reshape(nt, D))       # heads only consume the cls token

    # ----------------------------- output heads -----------------------------
    clsf = _layernorm(x_cls.reshape(nt, D), ln_post_g, ln_post_b)
    cls_p = _mm(clsf, proj_ref[0]).reshape(nb, T, PROJ_PAD)          # lane-dense (padded)
    cls_out_ref[...] = jnp.mean(cls_p, axis=1, keepdims=True)        # temporal mean

    for j in range(NUM_LL):
        g = glob_ref[G_LL + 2 * j:G_LL + 2 * j + 1, :]
        bb = glob_ref[G_LL + 2 * j + 1:G_LL + 2 * j + 2, :]
        cj = _mm(_layernorm(low_cls[j], g, bb), proj_ref[1 + j]).reshape(nb, T, PROJ_PAD)
        ll_out_ref[j] = jnp.mean(cj, axis=1, keepdims=True)


# ================================ wrapper ==========================================
def _const_spec(shape):
    zeros = (0,) * len(shape)
    return pl.BlockSpec(shape, lambda i, _z=zeros: _z)


def _num_tensorcores():
    """Best-effort TensorCore count; falls back to 1 (fold the batch)."""
    try:
        info = pltpu.get_tpu_info()
        for attr in ("num_cores", "core_count", "num_tensorcores"):
            n = getattr(info, attr, None)
            if n:
                return int(n)
    except Exception:
        pass
    try:
        n = getattr(jax.devices()[0], "num_cores", None)
        if n:
            return int(n)
    except Exception:
        pass
    return 1


def _batch_per_step(b):
    # v7x (2 TCs): one batch element per grid step so the "parallel" axis shards across
    # cores.  v5e/v6e (1 TC) or unknown: fold the whole batch into a single step (bigger
    # matmul M, no per-step overhead; "parallel" buys nothing on single-TC chips).
    if _num_tensorcores() >= 2 and b > 1:
        return 1
    return b


def event_encoder_forward(params, x, b, t):
    # TODO(synk): F.interpolate(nearest) resize of time_embed when t != num_frames.
    assert (b, t) == (B, T)
    c, h, w = x.shape[2:]
    hp, wp = h // PATCH, w // PATCH
    # Patchify reorder (single tiny host-side op); visual.conv1 (kernel=stride=PATCH)
    # becomes a matmul inside the fused kernel.
    patches = x.reshape(b, t, c, hp, PATCH, wp, PATCH)
    patches = patches.transpose(0, 1, 3, 5, 2, 4, 6).reshape(b, t * hp * wp, c * PATCH * PATCH)

    nb = _batch_per_step(b)
    if b % nb:
        nb = b
    grid = (b // nb,)

    names = ('conv_w', 'big_w', 'mlp_w2', 'proj_all', 'small', 'mlp_b1', 'glob')
    in_specs = [pl.BlockSpec((nb, t * hp * wp, c * PATCH * PATCH), lambda i: (i, 0, 0))]
    in_specs += [_const_spec(params[n].shape) for n in names]

    cls_out, ll_out = pl.pallas_call(
        _fused_kernel,
        out_shape=(jax.ShapeDtypeStruct((b, 1, PROJ_PAD), jnp.float32),
                   jax.ShapeDtypeStruct((NUM_LL, b, 1, PROJ_PAD), jnp.float32)),
        grid=grid,
        in_specs=in_specs,
        out_specs=(pl.BlockSpec((nb, 1, PROJ_PAD), lambda i: (i, 0, 0)),
                   pl.BlockSpec((NUM_LL, nb, 1, PROJ_PAD), lambda i: (0, i, 0, 0))),
        compiler_params=pltpu.CompilerParams(dimension_semantics=("parallel",)),
    )(patches, *[params[n] for n in names])

    cls_x = cls_out.reshape(b, PROJ_PAD)[:, :OUT_DIM]
    cls_low = [ll_out[j].reshape(b, PROJ_PAD)[:, :OUT_DIM] for j in range(NUM_LL)]
    return cls_x, cls_low


# ================================ parameters =======================================
def init_params(key):
    keys = iter(jax.random.split(key, 64))

    def rnd(shape, std=0.02):
        return std * jax.random.normal(next(keys), shape, dtype=jnp.float32)

    L = NUM_LAYERS
    q_scale = 1.0 / math.sqrt(D // NUM_HEADS)
    val = math.sqrt(6.0 / float(3 * PATCH * PATCH + D))   # prompt init range (as in module)

    def qkv_w():
        w = rnd((D, 3 * D))
        # Fold the 1/sqrt(head_dim) scale into the q columns (q bias rows are zero, so
        # there is nothing else to scale).  The kernel does NOT apply the scale again.
        return w.at[:, :D].multiply(q_scale)

    # big MXU weight slab per layer, lane-packed, stored bf16
    big_w = jnp.stack([
        jnp.concatenate([qkv_w(),              # [0D:3D)   block attn qkv (scaled q)
                         rnd((D, D)),          # [3D:4D)   block attn out
                         qkv_w(),              # [4D:7D)   cross-frame attn qkv (scaled q)
                         rnd((D, D)),          # [7D:8D)   cross-frame attn out
                         rnd((D, D)),          # [8D:9D)   cls_proj
                         rnd((D, HIDDEN))],    # [9D:13D)  mlp fc1
                        axis=1)
        for _ in range(L)]).astype(jnp.bfloat16)

    mlp_w2 = jnp.stack([rnd((HIDDEN, D)) for _ in range(L)]).astype(jnp.bfloat16)
    conv_w = rnd((CP, D)).astype(jnp.bfloat16)

    # 64-wide projections zero-padded to 128 lanes (lane-dense stores in the kernel).
    proj_all = jnp.zeros((1 + NUM_LL, D, PROJ_PAD), jnp.float32)
    for j in range(1 + NUM_LL):
        proj_all = proj_all.at[j, :, :OUT_DIM].set(rnd((D, OUT_DIM), std=D ** -0.5))
    proj_all = proj_all.astype(jnp.bfloat16)

    # small per-layer rows (biases zero, LN gammas one, event prompts uniform(-val, val))
    small = jnp.zeros((L, S_ROWS, D), jnp.float32)
    for r in (S_CF_LN_G, S_LN1_G, S_LN2_G):
        small = small.at[:, r].set(1.0)
    emp = jax.random.uniform(next(keys), (L, NUM_EMP, D), jnp.float32, -val, val)
    small = small.at[:, S_EMP:S_EMP + NUM_EMP].set(emp)

    mlp_b1 = jnp.zeros((L, 1, HIDDEN), jnp.float32)

    # global rows
    glob = jnp.zeros((G_ROWS, D), jnp.float32)
    glob = glob.at[G_CLS].set(rnd((D,)))
    glob = glob.at[G_POS:G_POS + N0].set(rnd((N0, D)))
    glob = glob.at[G_TIME:G_TIME + NUM_FRAMES].set(rnd((NUM_FRAMES, D)))
    glob = glob.at[G_LNPRE_G].set(1.0)
    glob = glob.at[G_LNPOST_G].set(1.0)
    for j in range(NUM_LL):
        glob = glob.at[G_LL + 2 * j].set(1.0)

    return dict(conv_w=conv_w, big_w=big_w, mlp_w2=mlp_w2, proj_all=proj_all,
                small=small, mlp_b1=mlp_b1, glob=glob)


# ================================== main ===========================================
if __name__ == "__main__":
    key = jax.random.PRNGKey(0)
    pkey, xkey = jax.random.split(key)
    params = init_params(pkey)
    x = jax.random.normal(xkey, (B, T, CIN, IMG, IMG), dtype=jnp.float32)

    fwd = jax.jit(event_encoder_forward, static_argnums=(2, 3))
    cls_x, cls_low = fwd(params, x, B, T)
    cls_x = jax.block_until_ready(cls_x)
    cls_low = [jax.block_until_ready(c) for c in cls_low]

    assert cls_x.shape == (B, OUT_DIM)
    assert len(cls_low) == len(LOW_LEVEL_IDX) and cls_low[0].shape == (B, OUT_DIM)
    assert bool(jnp.all(jnp.isfinite(cls_x))) and bool(jnp.all(jnp.isfinite(cls_low[0])))
    print("KERNEL_OK")
</pallas_src>

<mosaic_0001>
module attributes {stable_mosaic.version = 11 : i64} {
  func.func @_fused_kernel(%arg0: i32, %arg1: memref<2x8x768xf32, #tpu.memory_space<vmem>>, %arg2: memref<768x128xbf16, #tpu.memory_space<vmem>>, %arg3: memref<2x128x1664xbf16, #tpu.memory_space<vmem>>, %arg4: memref<2x512x128xbf16, #tpu.memory_space<vmem>>, %arg5: memref<2x128x128xbf16, #tpu.memory_space<vmem>>, %arg6: memref<2x18x128xf32, #tpu.memory_space<vmem>>, %arg7: memref<2x1x512xf32, #tpu.memory_space<vmem>>, %arg8: memref<14x128xf32, #tpu.memory_space<vmem>>, %arg9: memref<2x1x128xf32, #tpu.memory_space<vmem>>, %arg10: memref<1x2x1x128xf32, #tpu.memory_space<vmem>>) attributes {dimension_semantics = [#tpu.dimension_semantics<parallel>], iteration_bounds = array<i64: 1>, scalar_prefetch = 0 : i64, scratch_operands = 0 : i64, tpu.core_type = #tpu.core_type<tc>, window_params = [{transform_indices = @transform_0, window_bounds = array<i64: 2, 8, 768>}, {pipeline_mode = #tpu.pipeline_mode<synchronous>, transform_indices = @transform_1, window_bounds = array<i64: 768, 128>}, {pipeline_mode = #tpu.pipeline_mode<synchronous>, transform_indices = @transform_2, window_bounds = array<i64: 2, 128, 1664>}, {pipeline_mode = #tpu.pipeline_mode<synchronous>, transform_indices = @transform_3, window_bounds = array<i64: 2, 512, 128>}, {pipeline_mode = #tpu.pipeline_mode<synchronous>, transform_indices = @transform_4, window_bounds = array<i64: 2, 128, 128>}, {pipeline_mode = #tpu.pipeline_mode<synchronous>, transform_indices = @transform_5, window_bounds = array<i64: 2, 18, 128>}, {pipeline_mode = #tpu.pipeline_mode<synchronous>, transform_indices = @transform_6, window_bounds = array<i64: 2, 1, 512>}, {pipeline_mode = #tpu.pipeline_mode<synchronous>, transform_indices = @transform_7, window_bounds = array<i64: 14, 128>}, {transform_indices = @transform_8, window_bounds = array<i64: 2, 1, 128>}, {transform_indices = @transform_9, window_bounds = array<i64: 1, 2, 1, 128>}]} {
    %c0 = arith.constant 0 : index
    %c0_0 = arith.constant 0 : index
    %0 = vector.load %arg8[%c0, %c0_0] : memref<14x128xf32, #tpu.memory_space<vmem>>, vector<1x128xf32>
    %c1 = arith.constant 1 : index
    %c0_1 = arith.constant 0 : index
    %1 = vector.load %arg8[%c1, %c0_1] : memref<14x128xf32, #tpu.memory_space<vmem>>, vector<5x128xf32>
    %c6 = arith.constant 6 : index
    %c0_2 = arith.constant 0 : index
    %2 = vector.load %arg8[%c6, %c0_2] : memref<14x128xf32, #tpu.memory_space<vmem>>, vector<2x128xf32>
    %c8 = arith.constant 8 : index
    %c0_3 = arith.constant 0 : index
    %3 = vector.load %arg8[%c8, %c0_3] : memref<14x128xf32, #tpu.memory_space<vmem>>, vector<1x128xf32>
    %c9 = arith.constant 9 : index
    %c0_4 = arith.constant 0 : index
    %4 = vector.load %arg8[%c9, %c0_4] : memref<14x128xf32, #tpu.memory_space<vmem>>, vector<1x128xf32>
    %c10 = arith.constant 10 : index
    %c0_5 = arith.constant 0 : index
    %5 = vector.load %arg8[%c10, %c0_5] : memref<14x128xf32, #tpu.memory_space<vmem>>, vector<1x128xf32>
    %c11 = arith.constant 11 : index
    %c0_6 = arith.constant 0 : index
    %6 = vector.load %arg8[%c11, %c0_6] : memref<14x128xf32, #tpu.memory_space<vmem>>, vector<1x128xf32>
    %c0_7 = arith.constant 0 : index
    %c0_8 = arith.constant 0 : index
    %c0_9 = arith.constant 0 : index
    %7 = vector.load %arg1[%c0_7, %c0_8, %c0_9] : memref<2x8x768xf32, #tpu.memory_space<vmem>>, vector<2x8x768xf32>
    %8 = vector.shape_cast %7 : vector<2x8x768xf32> to vector<16x768xf32>
    %c0_10 = arith.constant 0 : index
    %c0_11 = arith.constant 0 : index
    %9 = vector.load %arg2[%c0_10, %c0_11] : memref<768x128xbf16, #tpu.memory_space<vmem>>, vector<768x128xbf16>
    %10 = arith.truncf %8 : vector<16x768xf32> to vector<16x768xbf16>
    %cst = arith.constant dense<0.000000e+00> : vector<16x128xf32>
    %11 = tpu.matmul %10, %9, %cst {dimension_numbers = #tpu.dot_dimension_numbers<[1], [0], [0], [1], [0, 0, 1, 1], [], []>} : vector<16x768xbf16>, vector<768x128xbf16>, vector<16x128xf32> -> vector<16x128xf32>
    %12 = vector.shape_cast %11 : vector<16x128xf32> to vector<4x4x128xf32>
    %13 = vector.shape_cast %2 : vector<2x128xf32> to vector<1x2x128xf32>
    %14 = vector.shape_cast %13 : vector<1x2x128xf32> to vector<1x2x128xf32>
    %15 = vector.broadcast %14 : vector<1x2x128xf32> to vector<2x2x128xf32>
    %16 = vector.shape_cast %15 : vector<2x2x128xf32> to vector<4x1x128xf32>
    %17 = vector.shape_cast %0 : vector<1x128xf32> to vector<1x1x128xf32>
    %18 = vector.extract_strided_slice %1 {offsets = [0, 0], sizes = [1, 128], strides = [1, 1]} : vector<5x128xf32> to vector<1x128xf32>
    %19 = vector.shape_cast %18 : vector<1x128xf32> to vector<1x1x128xf32>
    %20 = arith.addf %17, %19 : vector<1x1x128xf32>
    %21 = vector.broadcast %20 : vector<1x1x128xf32> to vector<4x1x128xf32>
    %22 = arith.addf %21, %16 : vector<4x1x128xf32>
    %23 = vector.extract_strided_slice %1 {offsets = [1, 0], sizes = [4, 128], strides = [1, 1]} : vector<5x128xf32> to vector<4x128xf32>
    %24 = vector.shape_cast %23 : vector<4x128xf32> to vector<1x4x128xf32>
    %25 = vector.broadcast %24 : vector<1x4x128xf32> to vector<4x4x128xf32>
    %26 = arith.addf %12, %25 : vector<4x4x128xf32>
    %27 = vector.broadcast %16 : vector<4x1x128xf32> to vector<4x4x128xf32>
    %28 = arith.addf %26, %27 : vector<4x4x128xf32>
    %29 = vector.shape_cast %3 : vector<1x128xf32> to vector<1x1x128xf32>
    %30 = vector.shape_cast %4 : vector<1x128xf32> to vector<1x1x128xf32>
    %cst_12 = arith.constant dense<0.000000e+00> : vector<4x1xf32>
    %31 = vector.multi_reduction <add>, %22, %cst_12 [2] : vector<4x1x128xf32> to vector<4x1xf32>
    %32 = vector.shape_cast %31 : vector<4x1xf32> to vector<4x1x1xf32>
    %cst_13 = arith.constant 1.280000e+02 : f32
    %33 = vector.broadcast %cst_13 : f32 to vector<4x1x1xf32>
    %34 = arith.divf %32, %33 : vector<4x1x1xf32>
    %35 = vector.broadcast %34 : vector<4x1x1xf32> to vector<4x1x128xf32>
    %36 = arith.subf %22, %35 : vector<4x1x128xf32>
    %37 = arith.mulf %36, %36 : vector<4x1x128xf32>
    %cst_14 = arith.constant dense<0.000000e+00> : vector<4x1xf32>
    %38 = vector.multi_reduction <add>, %37, %cst_14 [2] : vector<4x1x128xf32> to vector<4x1xf32>
    %39 = vector.shape_cast %38 : vector<4x1xf32> to vector<4x1x1xf32>
    %cst_15 = arith.constant 1.280000e+02 : f32
    %40 = vector.broadcast %cst_15 : f32 to vector<4x1x1xf32>
    %41 = arith.divf %39, %40 : vector<4x1x1xf32>
    %42 = vector.broadcast %34 : vector<4x1x1xf32> to vector<4x1x128xf32>
    %43 = arith.subf %22, %42 : vector<4x1x128xf32>
    %cst_16 = arith.constant 9.99999974E-6 : f32
    %44 = vector.broadcast %cst_16 : f32 to vector<4x1x1xf32>
    %45 = arith.addf %41, %44 : vector<4x1x1xf32>
    %46 = math.rsqrt %45 : vector<4x1x1xf32>
    %47 = vector.broadcast %46 : vector<4x1x1xf32> to vector<4x1x128xf32>
    %48 = arith.mulf %43, %47 : vector<4x1x128xf32>
    %49 = vector.broadcast %29 : vector<1x1x128xf32> to vector<4x1x128xf32>
    %50 = arith.mulf %48, %49 : vector<4x1x128xf32>
    %51 = vector.broadcast %30 : vector<1x1x128xf32> to vector<4x1x128xf32>
    %52 = arith.addf %50, %51 : vector<4x1x128xf32>
    %53 = vector.shape_cast %3 : vector<1x128xf32> to vector<1x1x128xf32>
    %54 = vector.shape_cast %4 : vector<1x128xf32> to vector<1x1x128xf32>
    %cst_17 = arith.constant dense<0.000000e+00> : vector<4x4xf32>
    %55 = vector.multi_reduction <add>, %28, %cst_17 [2] : vector<4x4x128xf32> to vector<4x4xf32>
    %56 = vector.shape_cast %55 : vector<4x4xf32> to vector<4x4x1xf32>
    %cst_18 = arith.constant 1.280000e+02 : f32
    %57 = vector.broadcast %cst_18 : f32 to vector<4x4x1xf32>
    %58 = arith.divf %56, %57 : vector<4x4x1xf32>
    %59 = vector.broadcast %58 : vector<4x4x1xf32> to vector<4x4x128xf32>
    %60 = arith.subf %28, %59 : vector<4x4x128xf32>
    %61 = arith.mulf %60, %60 : vector<4x4x128xf32>
    %cst_19 = arith.constant dense<0.000000e+00> : vector<4x4xf32>
    %62 = vector.multi_reduction <add>, %61, %cst_19 [2] : vector<4x4x128xf32> to vector<4x4xf32>
    %63 = vector.shape_cast %62 : vector<4x4xf32> to vector<4x4x1xf32>
    %cst_20 = arith.constant 1.280000e+02 : f32
    %64 = vector.broadcast %cst_20 : f32 to vector<4x4x1xf32>
    %65 = arith.divf %63, %64 : vector<4x4x1xf32>
    %66 = vector.broadcast %58 : vector<4x4x1xf32> to vector<4x4x128xf32>
    %67 = arith.subf %28, %66 : vector<4x4x128xf32>
    %cst_21 = arith.constant 9.99999974E-6 : f32
    %68 = vector.broadcast %cst_21 : f32 to vector<4x4x1xf32>
    %69 = arith.addf %65, %68 : vector<4x4x1xf32>
    %70 = math.rsqrt %69 : vector<4x4x1xf32>
    %71 = vector.broadcast %70 : vector<4x4x1xf32> to vector<4x4x128xf32>
    %72 = arith.mulf %67, %71 : vector<4x4x128xf32>
    %73 = vector.broadcast %53 : vector<1x1x128xf32> to vector<4x4x128xf32>
    %74 = arith.mulf %72, %73 : vector<4x4x128xf32>
    %75 = vector.broadcast %54 : vector<1x1x128xf32> to vector<4x4x128xf32>
    %76 = arith.addf %74, %75 : vector<4x4x128xf32>
    %c0_22 = arith.constant 0 : index
    %c0_23 = arith.constant 0 : index
    %c0_24 = arith.constant 0 : index
    %77 = vector.load %arg6[%c0_22, %c0_23, %c0_24] : memref<2x18x128xf32, #tpu.memory_space<vmem>>, vector<1x18x128xf32>
    %78 = vector.shape_cast %77 : vector<1x18x128xf32> to vector<18x128xf32>
    %79 = vector.shape_cast %52 : vector<4x1x128xf32> to vector<4x128xf32>
    %c0_25 = arith.constant 0 : index
    %c0_26 = arith.constant 0 : index
    %c1024 = arith.constant 1024 : index
    %80 = vector.load %arg3[%c0_25, %c0_26, %c1024] : memref<2x128x1664xbf16, #tpu.memory_space<vmem>>, vector<1x128x128xbf16>
    %81 = vector.shape_cast %80 : vector<1x128x128xbf16> to vector<128x128xbf16>
    %82 = arith.truncf %79 : vector<4x128xf32> to vector<4x128xbf16>
    %cst_27 = arith.constant dense<0.000000e+00> : vector<4x128xf32>
    %83 = tpu.matmul %82, %81, %cst_27 {dimension_numbers = #tpu.dot_dimension_numbers<[1], [0], [0], [1], [0, 0, 1, 1], [], []>} : vector<4x128xbf16>, vector<128x128xbf16>, vector<4x128xf32> -> vector<4x128xf32>
    %84 = vector.extract_strided_slice %78 {offsets = [0, 0], sizes = [1, 128], strides = [1, 1]} : vector<18x128xf32> to vector<1x128xf32>
    %85 = vector.broadcast %84 : vector<1x128xf32> to vector<4x128xf32>
    %86 = arith.addf %83, %85 : vector<4x128xf32>
    %87 = vector.shape_cast %86 : vector<4x128xf32> to vector<2x2x128xf32>
    %88 = vector.extract_strided_slice %78 {offsets = [1, 0], sizes = [1, 128], strides = [1, 1]} : vector<18x128xf32> to vector<1x128xf32>
    %89 = vector.extract_strided_slice %78 {offsets = [2, 0], sizes = [1, 128], strides = [1, 1]} : vector<18x128xf32> to vector<1x128xf32>
    %90 = vector.shape_cast %88 : vector<1x128xf32> to vector<1x1x128xf32>
    %91 = vector.shape_cast %89 : vector<1x128xf32> to vector<1x1x128xf32>
    %cst_28 = arith.constant dense<0.000000e+00> : vector<2x2xf32>
    %92 = vector.multi_reduction <add>, %87, %cst_28 [2] : vector<2x2x128xf32> to vector<2x2xf32>
    %93 = vector.shape_cast %92 : vector<2x2xf32> to vector<2x2x1xf32>
    %cst_29 = arith.constant 1.280000e+02 : f32
    %94 = vector.broadcast %cst_29 : f32 to vector<2x2x1xf32>
    %95 = arith.divf %93, %94 : vector<2x2x1xf32>
    %96 = vector.broadcast %95 : vector<2x2x1xf32> to vector<2x2x128xf32>
    %97 = arith.subf %87, %96 : vector<2x2x128xf32>
    %98 = arith.mulf %97, %97 : vector<2x2x128xf32>
    %cst_30 = arith.constant dense<0.000000e+00> : vector<2x2xf32>
    %99 = vector.multi_reduction <add>, %98, %cst_30 [2] : vector<2x2x128xf32> to vector<2x2xf32>
    %100 = vector.shape_cast %99 : vector<2x2xf32> to vector<2x2x1xf32>
    %cst_31 = arith.constant 1.280000e+02 : f32
    %101 = vector.broadcast %cst_31 : f32 to vector<2x2x1xf32>
    %102 = arith.divf %100, %101 : vector<2x2x1xf32>
    %103 = vector.broadcast %95 : vector<2x2x1xf32> to vector<2x2x128xf32>
    %104 = arith.subf %87, %103 : vector<2x2x128xf32>
    %cst_32 = arith.constant 9.99999974E-6 : f32
    %105 = vector.broadcast %cst_32 : f32 to vector<2x2x1xf32>
    %106 = arith.addf %102, %105 : vector<2x2x1xf32>
    %107 = math.rsqrt %106 : vector<2x2x1xf32>
    %108 = vector.broadcast %107 : vector<2x2x1xf32> to vector<2x2x128xf32>
    %109 = arith.mulf %104, %108 : vector<2x2x128xf32>
    %110 = vector.broadcast %90 : vector<1x1x128xf32> to vector<2x2x128xf32>
    %111 = arith.mulf %109, %110 : vector<2x2x128xf32>
    %112 = vector.broadcast %91 : vector<1x1x128xf32> to vector<2x2x128xf32>
    %113 = arith.addf %111, %112 : vector<2x2x128xf32>
    %c0_33 = arith.constant 0 : index
    %c0_34 = arith.constant 0 : index
    %c512 = arith.constant 512 : index
    %114 = vector.load %arg3[%c0_33, %c0_34, %c512] : memref<2x128x1664xbf16, #tpu.memory_space<vmem>>, vector<1x128x384xbf16>
    %115 = vector.shape_cast %114 : vector<1x128x384xbf16> to vector<128x384xbf16>
    %116 = vector.extract_strided_slice %78 {offsets = [3, 0], sizes = [3, 128], strides = [1, 1]} : vector<18x128xf32> to vector<3x128xf32>
    %c0_35 = arith.constant 0 : index
    %c0_36 = arith.constant 0 : index
    %c896 = arith.constant 896 : index
    %117 = vector.load %arg3[%c0_35, %c0_36, %c896] : memref<2x128x1664xbf16, #tpu.memory_space<vmem>>, vector<1x128x128xbf16>
    %118 = vector.shape_cast %117 : vector<1x128x128xbf16> to vector<128x128xbf16>
    %119 = vector.extract_strided_slice %78 {offsets = [6, 0], sizes = [1, 128], strides = [1, 1]} : vector<18x128xf32> to vector<1x128xf32>
    %120 = vector.shape_cast %113 : vector<2x2x128xf32> to vector<4x128xf32>
    %121 = arith.truncf %120 : vector<4x128xf32> to vector<4x128xbf16>
    %cst_37 = arith.constant dense<0.000000e+00> : vector<4x384xf32>
    %122 = tpu.matmul %121, %115, %cst_37 {dimension_numbers = #tpu.dot_dimension_numbers<[1], [0], [0], [1], [0, 0, 1, 1], [], []>} : vector<4x128xbf16>, vector<128x384xbf16>, vector<4x384xf32> -> vector<4x384xf32>
    %123 = vector.shape_cast %122 : vector<4x384xf32> to vector<2x2x384xf32>
    %124 = vector.extract_strided_slice %123 {offsets = [0, 0, 0], sizes = [2, 2, 128], strides = [1, 1, 1]} : vector<2x2x384xf32> to vector<2x2x128xf32>
    %125 = vector.extract_strided_slice %116 {offsets = [0, 0], sizes = [1, 128], strides = [1, 1]} : vector<3x128xf32> to vector<1x128xf32>
    %126 = vector.shape_cast %125 : vector<1x128xf32> to vector<1x1x128xf32>
    %127 = vector.broadcast %126 : vector<1x1x128xf32> to vector<2x2x128xf32>
    %128 = arith.addf %124, %127 : vector<2x2x128xf32>
    %129 = arith.truncf %128 : vector<2x2x128xf32> to vector<2x2x128xbf16>
    %130 = vector.extract_strided_slice %123 {offsets = [0, 0, 128], sizes = [2, 2, 128], strides = [1, 1, 1]} : vector<2x2x384xf32> to vector<2x2x128xf32>
    %131 = vector.extract_strided_slice %116 {offsets = [1, 0], sizes = [1, 128], strides = [1, 1]} : vector<3x128xf32> to vector<1x128xf32>
    %132 = vector.shape_cast %131 : vector<1x128xf32> to vector<1x1x128xf32>
    %133 = vector.broadcast %132 : vector<1x1x128xf32> to vector<2x2x128xf32>
    %134 = arith.addf %130, %133 : vector<2x2x128xf32>
    %135 = arith.truncf %134 : vector<2x2x128xf32> to vector<2x2x128xbf16>
    %136 = vector.extract_strided_slice %123 {offsets = [0, 0, 256], sizes = [2, 2, 128], strides = [1, 1, 1]} : vector<2x2x384xf32> to vector<2x2x128xf32>
    %137 = vector.extract_strided_slice %116 {offsets = [2, 0], sizes = [1, 128], strides = [1, 1]} : vector<3x128xf32> to vector<1x128xf32>
    %138 = vector.shape_cast %137 : vector<1x128xf32> to vector<1x1x128xf32>
    %139 = vector.broadcast %138 : vector<1x1x128xf32> to vector<2x2x128xf32>
    %140 = arith.addf %136, %139 : vector<2x2x128xf32>
    %141 = arith.truncf %140 : vector<2x2x128xf32> to vector<2x2x128xbf16>
    %142 = vector.extract_strided_slice %129 {offsets = [0, 0, 0], sizes = [2, 2, 32], strides = [1, 1, 1]} : vector<2x2x128xbf16> to vector<2x2x32xbf16>
    %143 = vector.extract_strided_slice %129 {offsets = [0, 0, 32], sizes = [2, 2, 32], strides = [1, 1, 1]} : vector<2x2x128xbf16> to vector<2x2x32xbf16>
    %144 = vector.extract_strided_slice %129 {offsets = [0, 0, 64], sizes = [2, 2, 32], strides = [1, 1, 1]} : vector<2x2x128xbf16> to vector<2x2x32xbf16>
    %145 = vector.extract_strided_slice %129 {offsets = [0, 0, 96], sizes = [2, 2, 32], strides = [1, 1, 1]} : vector<2x2x128xbf16> to vector<2x2x32xbf16>
    %146 = tpu.concatenate %142, %143, %144, %145 in 0 : vector<2x2x32xbf16>, vector<2x2x32xbf16>, vector<2x2x32xbf16>, vector<2x2x32xbf16> -> vector<8x2x32xbf16>
    %147 = vector.extract_strided_slice %135 {offsets = [0, 0, 0], sizes = [2, 2, 32], strides = [1, 1, 1]} : vector<2x2x128xbf16> to vector<2x2x32xbf16>
    %148 = vector.extract_strided_slice %135 {offsets = [0, 0, 32], sizes = [2, 2, 32], strides = [1, 1, 1]} : vector<2x2x128xbf16> to vector<2x2x32xbf16>
    %149 = vector.extract_strided_slice %135 {offsets = [0, 0, 64], sizes = [2, 2, 32], strides = [1, 1, 1]} : vector<2x2x128xbf16> to vector<2x2x32xbf16>
    %150 = vector.extract_strided_slice %135 {offsets = [0, 0, 96], sizes = [2, 2, 32], strides = [1, 1, 1]} : vector<2x2x128xbf16> to vector<2x2x32xbf16>
    %151 = tpu.concatenate %147, %148, %149, %150 in 0 : vector<2x2x32xbf16>, vector<2x2x32xbf16>, vector<2x2x32xbf16>, vector<2x2x32xbf16> -> vector<8x2x32xbf16>
    %152 = vector.extract_strided_slice %141 {offsets = [0, 0, 0], sizes = [2, 2, 32], strides = [1, 1, 1]} : vector<2x2x128xbf16> to vector<2x2x32xbf16>
    %153 = vector.extract_strided_slice %141 {offsets = [0, 0, 32], sizes = [2, 2, 32], strides = [1, 1, 1]} : vector<2x2x128xbf16> to vector<2x2x32xbf16>
    %154 = vector.extract_strided_slice %141 {offsets = [0, 0, 64], sizes = [2, 2, 32], strides = [1, 1, 1]} : vector<2x2x128xbf16> to vector<2x2x32xbf16>
    %155 = vector.extract_strided_slice %141 {offsets = [0, 0, 96], sizes = [2, 2, 32], strides = [1, 1, 1]} : vector<2x2x128xbf16> to vector<2x2x32xbf16>
    %156 = tpu.concatenate %152, %153, %154, %155 in 0 : vector<2x2x32xbf16>, vector<2x2x32xbf16>, vector<2x2x32xbf16>, vector<2x2x32xbf16> -> vector<8x2x32xbf16>
    "tpu.trace_start"() <{level = 10 : i32, message = "bqd,bkd->bqk"}> : () -> ()
    %cst_38 = arith.constant dense<0.000000e+00> : vector<8x2x2xf32>
    %157 = tpu.matmul %146, %151, %cst_38 {dimension_numbers = #tpu.dot_dimension_numbers<[2], [2], [1], [1], [0, 0, 0, 1, 1, 1], [0], [0]>} : vector<8x2x32xbf16>, vector<8x2x32xbf16>, vector<8x2x2xf32> -> vector<8x2x2xf32>
    "tpu.trace_stop"() : () -> ()
    %cst_39 = arith.constant dense<0xFF800000> : vector<8x2xf32>
    %158 = vector.multi_reduction <maximumf>, %157, %cst_39 [2] : vector<8x2x2xf32> to vector<8x2xf32>
    %159 = vector.shape_cast %158 : vector<8x2xf32> to vector<8x2x1xf32>
    %160 = vector.broadcast %159 : vector<8x2x1xf32> to vector<8x2x2xf32>
    %161 = arith.subf %157, %160 : vector<8x2x2xf32>
    %162 = math.exp %161 : vector<8x2x2xf32>
    %cst_40 = arith.constant dense<0.000000e+00> : vector<8x2xf32>
    %163 = vector.multi_reduction <add>, %162, %cst_40 [2] : vector<8x2x2xf32> to vector<8x2xf32>
    %164 = vector.shape_cast %163 : vector<8x2xf32> to vector<8x2x1xf32>
    %165 = tpu.reciprocal %164 {approx = true} : vector<8x2x1xf32> -> vector<8x2x1xf32>
    %166 = vector.broadcast %165 : vector<8x2x1xf32> to vector<8x2x2xf32>
    %167 = arith.mulf %162, %166 : vector<8x2x2xf32>
    %168 = arith.truncf %167 : vector<8x2x2xf32> to vector<8x2x2xbf16>
    "tpu.trace_start"() <{level = 10 : i32, message = "bqk,bkd->bqd"}> : () -> ()
    %cst_41 = arith.constant dense<0.000000e+00> : vector<8x2x32xf32>
    %169 = tpu.matmul %168, %156, %cst_41 {dimension_numbers = #tpu.dot_dimension_numbers<[2], [1], [1], [2], [0, 0, 0, 1, 1, 2], [0], [0]>} : vector<8x2x2xbf16>, vector<8x2x32xbf16>, vector<8x2x32xf32> -> vector<8x2x32xf32>
    "tpu.trace_stop"() : () -> ()
    %170 = vector.extract_strided_slice %169 {offsets = [0, 0, 0], sizes = [2, 2, 32], strides = [1, 1, 1]} : vector<8x2x32xf32> to vector<2x2x32xf32>
    %171 = vector.extract_strided_slice %169 {offsets = [2, 0, 0], sizes = [2, 2, 32], strides = [1, 1, 1]} : vector<8x2x32xf32> to vector<2x2x32xf32>
    %172 = vector.extract_strided_slice %169 {offsets = [4, 0, 0], sizes = [2, 2, 32], strides = [1, 1, 1]} : vector<8x2x32xf32> to vector<2x2x32xf32>
    %173 = vector.extract_strided_slice %169 {offsets = [6, 0, 0], sizes = [2, 2, 32], strides = [1, 1, 1]} : vector<8x2x32xf32> to vector<2x2x32xf32>
    %174 = tpu.concatenate %170, %171, %172, %173 in 2 : vector<2x2x32xf32>, vector<2x2x32xf32>, vector<2x2x32xf32>, vector<2x2x32xf32> -> vector<2x2x128xf32>
    %175 = vector.shape_cast %174 : vector<2x2x128xf32> to vector<4x128xf32>
    %176 = arith.truncf %175 : vector<4x128xf32> to vector<4x128xbf16>
    %cst_42 = arith.constant dense<0.000000e+00> : vector<4x128xf32>
    %177 = tpu.matmul %176, %118, %cst_42 {dimension_numbers = #tpu.dot_dimension_numbers<[1], [0], [0], [1], [0, 0, 1, 1], [], []>} : vector<4x128xbf16>, vector<128x128xbf16>, vector<4x128xf32> -> vector<4x128xf32>
    %178 = vector.broadcast %119 : vector<1x128xf32> to vector<4x128xf32>
    %179 = arith.addf %177, %178 : vector<4x128xf32>
    %180 = vector.shape_cast %179 : vector<4x128xf32> to vector<2x2x128xf32>
    %181 = arith.addf %87, %180 : vector<2x2x128xf32>
    %182 = vector.shape_cast %181 : vector<2x2x128xf32> to vector<4x1x128xf32>
    %183 = vector.extract_strided_slice %78 {offsets = [16, 0], sizes = [2, 128], strides = [1, 1]} : vector<18x128xf32> to vector<2x128xf32>
    %184 = vector.shape_cast %183 : vector<2x128xf32> to vector<1x2x128xf32>
    %185 = vector.shape_cast %184 : vector<1x2x128xf32> to vector<1x2x128xf32>
    %186 = vector.broadcast %185 : vector<1x2x128xf32> to vector<4x2x128xf32>
    %187 = tpu.concatenate %52, %186, %76, %182 in 1 : vector<4x1x128xf32>, vector<4x2x128xf32>, vector<4x4x128xf32>, vector<4x1x128xf32> -> vector<4x8x128xf32>
    %188 = vector.extract_strided_slice %78 {offsets = [7, 0], sizes = [1, 128], strides = [1, 1]} : vector<18x128xf32> to vector<1x128xf32>
    %189 = vector.extract_strided_slice %78 {offsets = [8, 0], sizes = [1, 128], strides = [1, 1]} : vector<18x128xf32> to vector<1x128xf32>
    %190 = vector.shape_cast %188 : vector<1x128xf32> to vector<1x1x128xf32>
    %191 = vector.shape_cast %189 : vector<1x128xf32> to vector<1x1x128xf32>
    %cst_43 = arith.constant dense<0.000000e+00> : vector<4x8xf32>
    %192 = vector.multi_reduction <add>, %187, %cst_43 [2] : vector<4x8x128xf32> to vector<4x8xf32>
    %193 = vector.shape_cast %192 : vector<4x8xf32> to vector<4x8x1xf32>
    %cst_44 = arith.constant 1.280000e+02 : f32
    %194 = vector.broadcast %cst_44 : f32 to vector<4x8x1xf32>
    %195 = arith.divf %193, %194 : vector<4x8x1xf32>
    %196 = vector.broadcast %195 : vector<4x8x1xf32> to vector<4x8x128xf32>
    %197 = arith.subf %187, %196 : vector<4x8x128xf32>
    %198 = arith.mulf %197, %197 : vector<4x8x128xf32>
    %cst_45 = arith.constant dense<0.000000e+00> : vector<4x8xf32>
    %199 = vector.multi_reduction <add>, %198, %cst_45 [2] : vector<4x8x128xf32> to vector<4x8xf32>
    %200 = vector.shape_cast %199 : vector<4x8xf32> to vector<4x8x1xf32>
    %cst_46 = arith.constant 1.280000e+02 : f32
    %201 = vector.broadcast %cst_46 : f32 to vector<4x8x1xf32>
    %202 = arith.divf %200, %201 : vector<4x8x1xf32>
    %203 = vector.broadcast %195 : vector<4x8x1xf32> to vector<4x8x128xf32>
    %204 = arith.subf %187, %203 : vector<4x8x128xf32>
    %cst_47 = arith.constant 9.99999974E-6 : f32
    %205 = vector.broadcast %cst_47 : f32 to vector<4x8x1xf32>
    %206 = arith.addf %202, %205 : vector<4x8x1xf32>
    %207 = math.rsqrt %206 : vector<4x8x1xf32>
    %208 = vector.broadcast %207 : vector<4x8x1xf32> to vector<4x8x128xf32>
    %209 = arith.mulf %204, %208 : vector<4x8x128xf32>
    %210 = vector.broadcast %190 : vector<1x1x128xf32> to vector<4x8x128xf32>
    %211 = arith.mulf %209, %210 : vector<4x8x128xf32>
    %212 = vector.broadcast %191 : vector<1x1x128xf32> to vector<4x8x128xf32>
    %213 = arith.addf %211, %212 : vector<4x8x128xf32>
    %c0_48 = arith.constant 0 : index
    %c0_49 = arith.constant 0 : index
    %c0_50 = arith.constant 0 : index
    %214 = vector.load %arg3[%c0_48, %c0_49, %c0_50] : memref<2x128x1664xbf16, #tpu.memory_space<vmem>>, vector<1x128x384xbf16>
    %215 = vector.shape_cast %214 : vector<1x128x384xbf16> to vector<128x384xbf16>
    %216 = vector.extract_strided_slice %78 {offsets = [9, 0], sizes = [3, 128], strides = [1, 1]} : vector<18x128xf32> to vector<3x128xf32>
    %c0_51 = arith.constant 0 : index
    %c0_52 = arith.constant 0 : index
    %c384 = arith.constant 384 : index
    %217 = vector.load %arg3[%c0_51, %c0_52, %c384] : memref<2x128x1664xbf16, #tpu.memory_space<vmem>>, vector<1x128x128xbf16>
    %218 = vector.shape_cast %217 : vector<1x128x128xbf16> to vector<128x128xbf16>
    %219 = vector.extract_strided_slice %78 {offsets = [12, 0], sizes = [1, 128], strides = [1, 1]} : vector<18x128xf32> to vector<1x128xf32>
    %220 = vector.shape_cast %213 : vector<4x8x128xf32> to vector<32x128xf32>
    %221 = arith.truncf %220 : vector<32x128xf32> to vector<32x128xbf16>
    %cst_53 = arith.constant dense<0.000000e+00> : vector<32x384xf32>
    %222 = tpu.matmul %221, %215, %cst_53 {dimension_numbers = #tpu.dot_dimension_numbers<[1], [0], [0], [1], [0, 0, 1, 1], [], []>} : vector<32x128xbf16>, vector<128x384xbf16>, vector<32x384xf32> -> vector<32x384xf32>
    %223 = vector.shape_cast %222 : vector<32x384xf32> to vector<4x8x384xf32>
    %224 = vector.extract_strided_slice %223 {offsets = [0, 0, 0], sizes = [4, 8, 128], strides = [1, 1, 1]} : vector<4x8x384xf32> to vector<4x8x128xf32>
    %225 = vector.extract_strided_slice %216 {offsets = [0, 0], sizes = [1, 128], strides = [1, 1]} : vector<3x128xf32> to vector<1x128xf32>
    %226 = vector.shape_cast %225 : vector<1x128xf32> to vector<1x1x128xf32>
    %227 = vector.broadcast %226 : vector<1x1x128xf32> to vector<4x8x128xf32>
    %228 = arith.addf %224, %227 : vector<4x8x128xf32>
    %229 = arith.truncf %228 : vector<4x8x128xf32> to vector<4x8x128xbf16>
    %230 = vector.extract_strided_slice %223 {offsets = [0, 0, 128], sizes = [4, 8, 128], strides = [1, 1, 1]} : vector<4x8x384xf32> to vector<4x8x128xf32>
    %231 = vector.extract_strided_slice %216 {offsets = [1, 0], sizes = [1, 128], strides = [1, 1]} : vector<3x128xf32> to vector<1x128xf32>
    %232 = vector.shape_cast %231 : vector<1x128xf32> to vector<1x1x128xf32>
    %233 = vector.broadcast %232 : vector<1x1x128xf32> to vector<4x8x128xf32>
    %234 = arith.addf %230, %233 : vector<4x8x128xf32>
    %235 = arith.truncf %234 : vector<4x8x128xf32> to vector<4x8x128xbf16>
    %236 = vector.extract_strided_slice %223 {offsets = [0, 0, 256], sizes = [4, 8, 128], strides = [1, 1, 1]} : vector<4x8x384xf32> to vector<4x8x128xf32>
    %237 = vector.extract_strided_slice %216 {offsets = [2, 0], sizes = [1, 128], strides = [1, 1]} : vector<3x128xf32> to vector<1x128xf32>
    %238 = vector.shape_cast %237 : vector<1x128xf32> to vector<1x1x128xf32>
    %239 = vector.broadcast %238 : vector<1x1x128xf32> to vector<4x8x128xf32>
    %240 = arith.addf %236, %239 : vector<4x8x128xf32>
    %241 = arith.truncf %240 : vector<4x8x128xf32> to vector<4x8x128xbf16>
    %242 = vector.extract_strided_slice %229 {offsets = [0, 0, 0], sizes = [4, 8, 32], strides = [1, 1, 1]} : vector<4x8x128xbf16> to vector<4x8x32xbf16>
    %243 = vector.extract_strided_slice %229 {offsets = [0, 0, 32], sizes = [4, 8, 32], strides = [1, 1, 1]} : vector<4x8x128xbf16> to vector<4x8x32xbf16>
    %244 = vector.extract_strided_slice %229 {offsets = [0, 0, 64], sizes = [4, 8, 32], strides = [1, 1, 1]} : vector<4x8x128xbf16> to vector<4x8x32xbf16>
    %245 = vector.extract_strided_slice %229 {offsets = [0, 0, 96], sizes = [4, 8, 32], strides = [1, 1, 1]} : vector<4x8x128xbf16> to vector<4x8x32xbf16>
    %246 = tpu.concatenate %242, %243, %244, %245 in 0 : vector<4x8x32xbf16>, vector<4x8x32xbf16>, vector<4x8x32xbf16>, vector<4x8x32xbf16> -> vector<16x8x32xbf16>
    %247 = vector.extract_strided_slice %235 {offsets = [0, 0, 0], sizes = [4, 8, 32], strides = [1, 1, 1]} : vector<4x8x128xbf16> to vector<4x8x32xbf16>
    %248 = vector.extract_strided_slice %235 {offsets = [0, 0, 32], sizes = [4, 8, 32], strides = [1, 1, 1]} : vector<4x8x128xbf16> to vector<4x8x32xbf16>
    %249 = vector.extract_strided_slice %235 {offsets = [0, 0, 64], sizes = [4, 8, 32], strides = [1, 1, 1]} : vector<4x8x128xbf16> to vector<4x8x32xbf16>
    %250 = vector.extract_strided_slice %235 {offsets = [0, 0, 96], sizes = [4, 8, 32], strides = [1, 1, 1]} : vector<4x8x128xbf16> to vector<4x8x32xbf16>
    %251 = tpu.concatenate %247, %248, %249, %250 in 0 : vector<4x8x32xbf16>, vector<4x8x32xbf16>, vector<4x8x32xbf16>, vector<4x8x32xbf16> -> vector<16x8x32xbf16>
    %252 = vector.extract_strided_slice %241 {offsets = [0, 0, 0], sizes = [4, 8, 32], strides = [1, 1, 1]} : vector<4x8x128xbf16> to vector<4x8x32xbf16>
    %253 = vector.extract_strided_slice %241 {offsets = [0, 0, 32], sizes = [4, 8, 32], strides = [1, 1, 1]} : vector<4x8x128xbf16> to vector<4x8x32xbf16>
    %254 = vector.extract_strided_slice %241 {offsets = [0, 0, 64], sizes = [4, 8, 32], strides = [1, 1, 1]} : vector<4x8x128xbf16> to vector<4x8x32xbf16>
    %255 = vector.extract_strided_slice %241 {offsets = [0, 0, 96], sizes = [4, 8, 32], strides = [1, 1, 1]} : vector<4x8x128xbf16> to vector<4x8x32xbf16>
    %256 = tpu.concatenate %252, %253, %254, %255 in 0 : vector<4x8x32xbf16>, vector<4x8x32xbf16>, vector<4x8x32xbf16>, vector<4x8x32xbf16> -> vector<16x8x32xbf16>
    "tpu.trace_start"() <{level = 10 : i32, message = "bqd,bkd->bqk"}> : () -> ()
    %cst_54 = arith.constant dense<0.000000e+00> : vector<16x8x8xf32>
    %257 = tpu.matmul %246, %251, %cst_54 {dimension_numbers = #tpu.dot_dimension_numbers<[2], [2], [1], [1], [0, 0, 0, 1, 1, 1], [0], [0]>} : vector<16x8x32xbf16>, vector<16x8x32xbf16>, vector<16x8x8xf32> -> vector<16x8x8xf32>
    "tpu.trace_stop"() : () -> ()
    %cst_55 = arith.constant dense<0xFF800000> : vector<16x8xf32>
    %258 = vector.multi_reduction <maximumf>, %257, %cst_55 [2] : vector<16x8x8xf32> to vector<16x8xf32>
    %259 = vector.shape_cast %258 : vector<16x8xf32> to vector<16x8x1xf32>
    %260 = vector.broadcast %259 : vector<16x8x1xf32> to vector<16x8x8xf32>
    %261 = arith.subf %257, %260 : vector<16x8x8xf32>
    %262 = math.exp %261 : vector<16x8x8xf32>
    %cst_56 = arith.constant dense<0.000000e+00> : vector<16x8xf32>
    %263 = vector.multi_reduction <add>, %262, %cst_56 [2] : vector<16x8x8xf32> to vector<16x8xf32>
    %264 = vector.shape_cast %263 : vector<16x8xf32> to vector<16x8x1xf32>
    %265 = tpu.reciprocal %264 {approx = true} : vector<16x8x1xf32> -> vector<16x8x1xf32>
    %266 = vector.broadcast %265 : vector<16x8x1xf32> to vector<16x8x8xf32>
    %267 = arith.mulf %262, %266 : vector<16x8x8xf32>
    %268 = arith.truncf %267 : vector<16x8x8xf32> to vector<16x8x8xbf16>
    "tpu.trace_start"() <{level = 10 : i32, message = "bqk,bkd->bqd"}> : () -> ()
    %cst_57 = arith.constant dense<0.000000e+00> : vector<16x8x32xf32>
    %269 = tpu.matmul %268, %256, %cst_57 {dimension_numbers = #tpu.dot_dimension_numbers<[2], [1], [1], [2], [0, 0, 0, 1, 1, 2], [0], [0]>} : vector<16x8x8xbf16>, vector<16x8x32xbf16>, vector<16x8x32xf32> -> vector<16x8x32xf32>
    "tpu.trace_stop"() : () -> ()
    %270 = vector.extract_strided_slice %269 {offsets = [0, 0, 0], sizes = [4, 8, 32], strides = [1, 1, 1]} : vector<16x8x32xf32> to vector<4x8x32xf32>
    %271 = vector.extract_strided_slice %269 {offsets = [4, 0, 0], sizes = [4, 8, 32], strides = [1, 1, 1]} : vector<16x8x32xf32> to vector<4x8x32xf32>
    %272 = vector.extract_strided_slice %269 {offsets = [8, 0, 0], sizes = [4, 8, 32], strides = [1, 1, 1]} : vector<16x8x32xf32> to vector<4x8x32xf32>
    %273 = vector.extract_strided_slice %269 {offsets = [12, 0, 0], sizes = [4, 8, 32], strides = [1, 1, 1]} : vector<16x8x32xf32> to vector<4x8x32xf32>
    %274 = tpu.concatenate %270, %271, %272, %273 in 2 : vector<4x8x32xf32>, vector<4x8x32xf32>, vector<4x8x32xf32>, vector<4x8x32xf32> -> vector<4x8x128xf32>
    %275 = vector.shape_cast %274 : vector<4x8x128xf32> to vector<32x128xf32>
    %276 = arith.truncf %275 : vector<32x128xf32> to vector<32x128xbf16>
    %cst_58 = arith.constant dense<0.000000e+00> : vector<32x128xf32>
    %277 = tpu.matmul %276, %218, %cst_58 {dimension_numbers = #tpu.dot_dimension_numbers<[1], [0], [0], [1], [0, 0, 1, 1], [], []>} : vector<32x128xbf16>, vector<128x128xbf16>, vector<32x128xf32> -> vector<32x128xf32>
    %278 = vector.broadcast %219 : vector<1x128xf32> to vector<32x128xf32>
    %279 = arith.addf %277, %278 : vector<32x128xf32>
    %280 = vector.shape_cast %279 : vector<32x128xf32> to vector<4x8x128xf32>
    %281 = arith.addf %187, %280 : vector<4x8x128xf32>
    %282 = vector.extract_strided_slice %78 {offsets = [13, 0], sizes = [1, 128], strides = [1, 1]} : vector<18x128xf32> to vector<1x128xf32>
    %283 = vector.extract_strided_slice %78 {offsets = [14, 0], sizes = [1, 128], strides = [1, 1]} : vector<18x128xf32> to vector<1x128xf32>
    %284 = vector.shape_cast %282 : vector<1x128xf32> to vector<1x1x128xf32>
    %285 = vector.shape_cast %283 : vector<1x128xf32> to vector<1x1x128xf32>
    %cst_59 = arith.constant dense<0.000000e+00> : vector<4x8xf32>
    %286 = vector.multi_reduction <add>, %281, %cst_59 [2] : vector<4x8x128xf32> to vector<4x8xf32>
    %287 = vector.shape_cast %286 : vector<4x8xf32> to vector<4x8x1xf32>
    %cst_60 = arith.constant 1.280000e+02 : f32
    %288 = vector.broadcast %cst_60 : f32 to vector<4x8x1xf32>
    %289 = arith.divf %287, %288 : vector<4x8x1xf32>
    %290 = vector.broadcast %289 : vector<4x8x1xf32> to vector<4x8x128xf32>
    %291 = arith.subf %281, %290 : vector<4x8x128xf32>
    %292 = arith.mulf %291, %291 : vector<4x8x128xf32>
    %cst_61 = arith.constant dense<0.000000e+00> : vector<4x8xf32>
    %293 = vector.multi_reduction <add>, %292, %cst_61 [2] : vector<4x8x128xf32> to vector<4x8xf32>
    %294 = vector.shape_cast %293 : vector<4x8xf32> to vector<4x8x1xf32>
    %cst_62 = arith.constant 1.280000e+02 : f32
    %295 = vector.broadcast %cst_62 : f32 to vector<4x8x1xf32>
    %296 = arith.divf %294, %295 : vector<4x8x1xf32>
    %297 = vector.broadcast %289 : vector<4x8x1xf32> to vector<4x8x128xf32>
    %298 = arith.subf %281, %297 : vector<4x8x128xf32>
    %cst_63 = arith.constant 9.99999974E-6 : f32
    %299 = vector.broadcast %cst_63 : f32 to vector<4x8x1xf32>
    %300 = arith.addf %296, %299 : vector<4x8x1xf32>
    %301 = math.rsqrt %300 : vector<4x8x1xf32>
    %302 = vector.broadcast %301 : vector<4x8x1xf32> to vector<4x8x128xf32>
    %303 = arith.mulf %298, %302 : vector<4x8x128xf32>
    %304 = vector.broadcast %284 : vector<1x1x128xf32> to vector<4x8x128xf32>
    %305 = arith.mulf %303, %304 : vector<4x8x128xf32>
    %306 = vector.broadcast %285 : vector<1x1x128xf32> to vector<4x8x128xf32>
    %307 = arith.addf %305, %306 : vector<4x8x128xf32>
    %308 = vector.shape_cast %307 : vector<4x8x128xf32> to vector<32x128xf32>
    %c0_64 = arith.constant 0 : index
    %c0_65 = arith.constant 0 : index
    %c1152 = arith.constant 1152 : index
    %309 = vector.load %arg3[%c0_64, %c0_65, %c1152] : memref<2x128x1664xbf16, #tpu.memory_space<vmem>>, vector<1x128x512xbf16>
    %310 = vector.shape_cast %309 : vector<1x128x512xbf16> to vector<128x512xbf16>
    %311 = arith.truncf %308 : vector<32x128xf32> to vector<32x128xbf16>
    %cst_66 = arith.constant dense<0.000000e+00> : vector<32x512xf32>
    %312 = tpu.matmul %311, %310, %cst_66 {dimension_numbers = #tpu.dot_dimension_numbers<[1], [0], [0], [1], [0, 0, 1, 1], [], []>} : vector<32x128xbf16>, vector<128x512xbf16>, vector<32x512xf32> -> vector<32x512xf32>
    %c0_67 = arith.constant 0 : index
    %c0_68 = arith.constant 0 : index
    %c0_69 = arith.constant 0 : index
    %313 = vector.load %arg7[%c0_67, %c0_68, %c0_69] : memref<2x1x512xf32, #tpu.memory_space<vmem>>, vector<1x1x512xf32>
    %314 = vector.shape_cast %313 : vector<1x1x512xf32> to vector<1x512xf32>
    %315 = vector.broadcast %314 : vector<1x512xf32> to vector<32x512xf32>
    %316 = arith.addf %312, %315 : vector<32x512xf32>
    %cst_70 = arith.constant 1.702000e+00 : f32
    %317 = vector.broadcast %cst_70 : f32 to vector<32x512xf32>
    %318 = arith.mulf %317, %316 : vector<32x512xf32>
    %319 = arith.negf %318 : vector<32x512xf32>
    %320 = math.exp %319 : vector<32x512xf32>
    %cst_71 = arith.constant 1.000000e+00 : f32
    %321 = vector.broadcast %cst_71 : f32 to vector<32x512xf32>
    %322 = arith.addf %321, %320 : vector<32x512xf32>
    %323 = arith.divf %321, %322 : vector<32x512xf32>
    %324 = arith.mulf %316, %323 : vector<32x512xf32>
    %c0_72 = arith.constant 0 : index
    %c0_73 = arith.constant 0 : index
    %c0_74 = arith.constant 0 : index
    %325 = vector.load %arg4[%c0_72, %c0_73, %c0_74] : memref<2x512x128xbf16, #tpu.memory_space<vmem>>, vector<1x512x128xbf16>
    %326 = vector.shape_cast %325 : vector<1x512x128xbf16> to vector<512x128xbf16>
    %327 = arith.truncf %324 : vector<32x512xf32> to vector<32x512xbf16>
    %cst_75 = arith.constant dense<0.000000e+00> : vector<32x128xf32>
    %328 = tpu.matmul %327, %326, %cst_75 {dimension_numbers = #tpu.dot_dimension_numbers<[1], [0], [0], [1], [0, 0, 1, 1], [], []>} : vector<32x512xbf16>, vector<512x128xbf16>, vector<32x128xf32> -> vector<32x128xf32>
    %329 = vector.extract_strided_slice %78 {offsets = [15, 0], sizes = [1, 128], strides = [1, 1]} : vector<18x128xf32> to vector<1x128xf32>
    %330 = vector.broadcast %329 : vector<1x128xf32> to vector<32x128xf32>
    %331 = arith.addf %328, %330 : vector<32x128xf32>
    %332 = vector.shape_cast %331 : vector<32x128xf32> to vector<4x8x128xf32>
    %333 = arith.addf %281, %332 : vector<4x8x128xf32>
    %334 = vector.extract_strided_slice %333 {offsets = [0, 0, 0], sizes = [4, 1, 128], strides = [1, 1, 1]} : vector<4x8x128xf32> to vector<4x1x128xf32>
    %335 = vector.extract_strided_slice %333 {offsets = [0, 3, 0], sizes = [4, 4, 128], strides = [1, 1, 1]} : vector<4x8x128xf32> to vector<4x4x128xf32>
    %336 = vector.shape_cast %334 : vector<4x1x128xf32> to vector<4x128xf32>
    %c1_76 = arith.constant 1 : index
    %c0_77 = arith.constant 0 : index
    %c0_78 = arith.constant 0 : index
    %337 = vector.load %arg6[%c1_76, %c0_77, %c0_78] : memref<2x18x128xf32, #tpu.memory_space<vmem>>, vector<1x18x128xf32>
    %338 = vector.shape_cast %337 : vector<1x18x128xf32> to vector<18x128xf32>
    %339 = vector.shape_cast %334 : vector<4x1x128xf32> to vector<4x128xf32>
    %c1_79 = arith.constant 1 : index
    %c0_80 = arith.constant 0 : index
    %c1024_81 = arith.constant 1024 : index
    %340 = vector.load %arg3[%c1_79, %c0_80, %c1024_81] : memref<2x128x1664xbf16, #tpu.memory_space<vmem>>, vector<1x128x128xbf16>
    %341 = vector.shape_cast %340 : vector<1x128x128xbf16> to vector<128x128xbf16>
    %342 = arith.truncf %339 : vector<4x128xf32> to vector<4x128xbf16>
    %cst_82 = arith.constant dense<0.000000e+00> : vector<4x128xf32>
    %343 = tpu.matmul %342, %341, %cst_82 {dimension_numbers = #tpu.dot_dimension_numbers<[1], [0], [0], [1], [0, 0, 1, 1], [], []>} : vector<4x128xbf16>, vector<128x128xbf16>, vector<4x128xf32> -> vector<4x128xf32>
    %344 = vector.extract_strided_slice %338 {offsets = [0, 0], sizes = [1, 128], strides = [1, 1]} : vector<18x128xf32> to vector<1x128xf32>
    %345 = vector.broadcast %344 : vector<1x128xf32> to vector<4x128xf32>
    %346 = arith.addf %343, %345 : vector<4x128xf32>
    %347 = vector.shape_cast %346 : vector<4x128xf32> to vector<2x2x128xf32>
    %348 = vector.extract_strided_slice %338 {offsets = [1, 0], sizes = [1, 128], strides = [1, 1]} : vector<18x128xf32> to vector<1x128xf32>
    %349 = vector.extract_strided_slice %338 {offsets = [2, 0], sizes = [1, 128], strides = [1, 1]} : vector<18x128xf32> to vector<1x128xf32>
    %350 = vector.shape_cast %348 : vector<1x128xf32> to vector<1x1x128xf32>
    %351 = vector.shape_cast %349 : vector<1x128xf32> to vector<1x1x128xf32>
    %cst_83 = arith.constant dense<0.000000e+00> : vector<2x2xf32>
    %352 = vector.multi_reduction <add>, %347, %cst_83 [2] : vector<2x2x128xf32> to vector<2x2xf32>
    %353 = vector.shape_cast %352 : vector<2x2xf32> to vector<2x2x1xf32>
    %cst_84 = arith.constant 1.280000e+02 : f32
    %354 = vector.broadcast %cst_84 : f32 to vector<2x2x1xf32>
    %355 = arith.divf %353, %354 : vector<2x2x1xf32>
    %356 = vector.broadcast %355 : vector<2x2x1xf32> to vector<2x2x128xf32>
    %357 = arith.subf %347, %356 : vector<2x2x128xf32>
    %358 = arith.mulf %357, %357 : vector<2x2x128xf32>
    %cst_85 = arith.constant dense<0.000000e+00> : vector<2x2xf32>
    %359 = vector.multi_reduction <add>, %358, %cst_85 [2] : vector<2x2x128xf32> to vector<2x2xf32>
    %360 = vector.shape_cast %359 : vector<2x2xf32> to vector<2x2x1xf32>
    %cst_86 = arith.constant 1.280000e+02 : f32
    %361 = vector.broadcast %cst_86 : f32 to vector<2x2x1xf32>
    %362 = arith.divf %360, %361 : vector<2x2x1xf32>
    %363 = vector.broadcast %355 : vector<2x2x1xf32> to vector<2x2x128xf32>
    %364 = arith.subf %347, %363 : vector<2x2x128xf32>
    %cst_87 = arith.constant 9.99999974E-6 : f32
    %365 = vector.broadcast %cst_87 : f32 to vector<2x2x1xf32>
    %366 = arith.addf %362, %365 : vector<2x2x1xf32>
    %367 = math.rsqrt %366 : vector<2x2x1xf32>
    %368 = vector.broadcast %367 : vector<2x2x1xf32> to vector<2x2x128xf32>
    %369 = arith.mulf %364, %368 : vector<2x2x128xf32>
    %370 = vector.broadcast %350 : vector<1x1x128xf32> to vector<2x2x128xf32>
    %371 = arith.mulf %369, %370 : vector<2x2x128xf32>
    %372 = vector.broadcast %351 : vector<1x1x128xf32> to vector<2x2x128xf32>
    %373 = arith.addf %371, %372 : vector<2x2x128xf32>
    %c1_88 = arith.constant 1 : index
    %c0_89 = arith.constant 0 : index
    %c512_90 = arith.constant 512 : index
    %374 = vector.load %arg3[%c1_88, %c0_89, %c512_90] : memref<2x128x1664xbf16, #tpu.memory_space<vmem>>, vector<1x128x384xbf16>
    %375 = vector.shape_cast %374 : vector<1x128x384xbf16> to vector<128x384xbf16>
    %376 = vector.extract_strided_slice %338 {offsets = [3, 0], sizes = [3, 128], strides = [1, 1]} : vector<18x128xf32> to vector<3x128xf32>
    %c1_91 = arith.constant 1 : index
    %c0_92 = arith.constant 0 : index
    %c896_93 = arith.constant 896 : index
    %377 = vector.load %arg3[%c1_91, %c0_92, %c896_93] : memref<2x128x1664xbf16, #tpu.memory_space<vmem>>, vector<1x128x128xbf16>
    %378 = vector.shape_cast %377 : vector<1x128x128xbf16> to vector<128x128xbf16>
    %379 = vector.extract_strided_slice %338 {offsets = [6, 0], sizes = [1, 128], strides = [1, 1]} : vector<18x128xf32> to vector<1x128xf32>
    %380 = vector.shape_cast %373 : vector<2x2x128xf32> to vector<4x128xf32>
    %381 = arith.truncf %380 : vector<4x128xf32> to vector<4x128xbf16>
    %cst_94 = arith.constant dense<0.000000e+00> : vector<4x384xf32>
    %382 = tpu.matmul %381, %375, %cst_94 {dimension_numbers = #tpu.dot_dimension_numbers<[1], [0], [0], [1], [0, 0, 1, 1], [], []>} : vector<4x128xbf16>, vector<128x384xbf16>, vector<4x384xf32> -> vector<4x384xf32>
    %383 = vector.shape_cast %382 : vector<4x384xf32> to vector<2x2x384xf32>
    %384 = vector.extract_strided_slice %383 {offsets = [0, 0, 0], sizes = [2, 2, 128], strides = [1, 1, 1]} : vector<2x2x384xf32> to vector<2x2x128xf32>
    %385 = vector.extract_strided_slice %376 {offsets = [0, 0], sizes = [1, 128], strides = [1, 1]} : vector<3x128xf32> to vector<1x128xf32>
    %386 = vector.shape_cast %385 : vector<1x128xf32> to vector<1x1x128xf32>
    %387 = vector.broadcast %386 : vector<1x1x128xf32> to vector<2x2x128xf32>
    %388 = arith.addf %384, %387 : vector<2x2x128xf32>
    %389 = arith.truncf %388 : vector<2x2x128xf32> to vector<2x2x128xbf16>
    %390 = vector.extract_strided_slice %383 {offsets = [0, 0, 128], sizes = [2, 2, 128], strides = [1, 1, 1]} : vector<2x2x384xf32> to vector<2x2x128xf32>
    %391 = vector.extract_strided_slice %376 {offsets = [1, 0], sizes = [1, 128], strides = [1, 1]} : vector<3x128xf32> to vector<1x128xf32>
    %392 = vector.shape_cast %391 : vector<1x128xf32> to vector<1x1x128xf32>
    %393 = vector.broadcast %392 : vector<1x1x128xf32> to vector<2x2x128xf32>
    %394 = arith.addf %390, %393 : vector<2x2x128xf32>
    %395 = arith.truncf %394 : vector<2x2x128xf32> to vector<2x2x128xbf16>
    %396 = vector.extract_strided_slice %383 {offsets = [0, 0, 256], sizes = [2, 2, 128], strides = [1, 1, 1]} : vector<2x2x384xf32> to vector<2x2x128xf32>
    %397 = vector.extract_strided_slice %376 {offsets = [2, 0], sizes = [1, 128], strides = [1, 1]} : vector<3x128xf32> to vector<1x128xf32>
    %398 = vector.shape_cast %397 : vector<1x128xf32> to vector<1x1x128xf32>
    %399 = vector.broadcast %398 : vector<1x1x128xf32> to vector<2x2x128xf32>
    %400 = arith.addf %396, %399 : vector<2x2x128xf32>
    %401 = arith.truncf %400 : vector<2x2x128xf32> to vector<2x2x128xbf16>
    %402 = vector.extract_strided_slice %389 {offsets = [0, 0, 0], sizes = [2, 2, 32], strides = [1, 1, 1]} : vector<2x2x128xbf16> to vector<2x2x32xbf16>
    %403 = vector.extract_strided_slice %389 {offsets = [0, 0, 32], sizes = [2, 2, 32], strides = [1, 1, 1]} : vector<2x2x128xbf16> to vector<2x2x32xbf16>
    %404 = vector.extract_strided_slice %389 {offsets = [0, 0, 64], sizes = [2, 2, 32], strides = [1, 1, 1]} : vector<2x2x128xbf16> to vector<2x2x32xbf16>
    %405 = vector.extract_strided_slice %389 {offsets = [0, 0, 96], sizes = [2, 2, 32], strides = [1, 1, 1]} : vector<2x2x128xbf16> to vector<2x2x32xbf16>
    %406 = tpu.concatenate %402, %403, %404, %405 in 0 : vector<2x2x32xbf16>, vector<2x2x32xbf16>, vector<2x2x32xbf16>, vector<2x2x32xbf16> -> vector<8x2x32xbf16>
    %407 = vector.extract_strided_slice %395 {offsets = [0, 0, 0], sizes = [2, 2, 32], strides = [1, 1, 1]} : vector<2x2x128xbf16> to vector<2x2x32xbf16>
    %408 = vector.extract_strided_slice %395 {offsets = [0, 0, 32], sizes = [2, 2, 32], strides = [1, 1, 1]} : vector<2x2x128xbf16> to vector<2x2x32xbf16>
    %409 = vector.extract_strided_slice %395 {offsets = [0, 0, 64], sizes = [2, 2, 32], strides = [1, 1, 1]} : vector<2x2x128xbf16> to vector<2x2x32xbf16>
    %410 = vector.extract_strided_slice %395 {offsets = [0, 0, 96], sizes = [2, 2, 32], strides = [1, 1, 1]} : vector<2x2x128xbf16> to vector<2x2x32xbf16>
    %411 = tpu.concatenate %407, %408, %409, %410 in 0 : vector<2x2x32xbf16>, vector<2x2x32xbf16>, vector<2x2x32xbf16>, vector<2x2x32xbf16> -> vector<8x2x32xbf16>
    %412 = vector.extract_strided_slice %401 {offsets = [0, 0, 0], sizes = [2, 2, 32], strides = [1, 1, 1]} : vector<2x2x128xbf16> to vector<2x2x32xbf16>
    %413 = vector.extract_strided_slice %401 {offsets = [0, 0, 32], sizes = [2, 2, 32], strides = [1, 1, 1]} : vector<2x2x128xbf16> to vector<2x2x32xbf16>
    %414 = vector.extract_strided_slice %401 {offsets = [0, 0, 64], sizes = [2, 2, 32], strides = [1, 1, 1]} : vector<2x2x128xbf16> to vector<2x2x32xbf16>
    %415 = vector.extract_strided_slice %401 {offsets = [0, 0, 96], sizes = [2, 2, 32], strides = [1, 1, 1]} : vector<2x2x128xbf16> to vector<2x2x32xbf16>
    %416 = tpu.concatenate %412, %413, %414, %415 in 0 : vector<2x2x32xbf16>, vector<2x2x32xbf16>, vector<2x2x32xbf16>, vector<2x2x32xbf16> -> vector<8x2x32xbf16>
    "tpu.trace_start"() <{level = 10 : i32, message = "bqd,bkd->bqk"}> : () -> ()
    %cst_95 = arith.constant dense<0.000000e+00> : vector<8x2x2xf32>
    %417 = tpu.matmul %406, %411, %cst_95 {dimension_numbers = #tpu.dot_dimension_numbers<[2], [2], [1], [1], [0, 0, 0, 1, 1, 1], [0], [0]>} : vector<8x2x32xbf16>, vector<8x2x32xbf16>, vector<8x2x2xf32> -> vector<8x2x2xf32>
    "tpu.trace_stop"() : () -> ()
    %cst_96 = arith.constant dense<0xFF800000> : vector<8x2xf32>
    %418 = vector.multi_reduction <maximumf>, %417, %cst_96 [2] : vector<8x2x2xf32> to vector<8x2xf32>
    %419 = vector.shape_cast %418 : vector<8x2xf32> to vector<8x2x1xf32>
    %420 = vector.broadcast %419 : vector<8x2x1xf32> to vector<8x2x2xf32>
    %421 = arith.subf %417, %420 : vector<8x2x2xf32>
    %422 = math.exp %421 : vector<8x2x2xf32>
    %cst_97 = arith.constant dense<0.000000e+00> : vector<8x2xf32>
    %423 = vector.multi_reduction <add>, %422, %cst_97 [2] : vector<8x2x2xf32> to vector<8x2xf32>
    %424 = vector.shape_cast %423 : vector<8x2xf32> to vector<8x2x1xf32>
    %425 = tpu.reciprocal %424 {approx = true} : vector<8x2x1xf32> -> vector<8x2x1xf32>
    %426 = vector.broadcast %425 : vector<8x2x1xf32> to vector<8x2x2xf32>
    %427 = arith.mulf %422, %426 : vector<8x2x2xf32>
    %428 = arith.truncf %427 : vector<8x2x2xf32> to vector<8x2x2xbf16>
    "tpu.trace_start"() <{level = 10 : i32, message = "bqk,bkd->bqd"}> : () -> ()
    %cst_98 = arith.constant dense<0.000000e+00> : vector<8x2x32xf32>
    %429 = tpu.matmul %428, %416, %cst_98 {dimension_numbers = #tpu.dot_dimension_numbers<[2], [1], [1], [2], [0, 0, 0, 1, 1, 2], [0], [0]>} : vector<8x2x2xbf16>, vector<8x2x32xbf16>, vector<8x2x32xf32> -> vector<8x2x32xf32>
    "tpu.trace_stop"() : () -> ()
    %430 = vector.extract_strided_slice %429 {offsets = [0, 0, 0], sizes = [2, 2, 32], strides = [1, 1, 1]} : vector<8x2x32xf32> to vector<2x2x32xf32>
    %431 = vector.extract_strided_slice %429 {offsets = [2, 0, 0], sizes = [2, 2, 32], strides = [1, 1, 1]} : vector<8x2x32xf32> to vector<2x2x32xf32>
    %432 = vector.extract_strided_slice %429 {offsets = [4, 0, 0], sizes = [2, 2, 32], strides = [1, 1, 1]} : vector<8x2x32xf32> to vector<2x2x32xf32>
    %433 = vector.extract_strided_slice %429 {offsets = [6, 0, 0], sizes = [2, 2, 32], strides = [1, 1, 1]} : vector<8x2x32xf32> to vector<2x2x32xf32>
    %434 = tpu.concatenate %430, %431, %432, %433 in 2 : vector<2x2x32xf32>, vector<2x2x32xf32>, vector<2x2x32xf32>, vector<2x2x32xf32> -> vector<2x2x128xf32>
    %435 = vector.shape_cast %434 : vector<2x2x128xf32> to vector<4x128xf32>
    %436 = arith.truncf %435 : vector<4x128xf32> to vector<4x128xbf16>
    %cst_99 = arith.constant dense<0.000000e+00> : vector<4x128xf32>
    %437 = tpu.matmul %436, %378, %cst_99 {dimension_numbers = #tpu.dot_dimension_numbers<[1], [0], [0], [1], [0, 0, 1, 1], [], []>} : vector<4x128xbf16>, vector<128x128xbf16>, vector<4x128xf32> -> vector<4x128xf32>
    %438 = vector.broadcast %379 : vector<1x128xf32> to vector<4x128xf32>
    %439 = arith.addf %437, %438 : vector<4x128xf32>
    %440 = vector.shape_cast %439 : vector<4x128xf32> to vector<2x2x128xf32>
    %441 = arith.addf %347, %440 : vector<2x2x128xf32>
    %442 = vector.shape_cast %441 : vector<2x2x128xf32> to vector<4x1x128xf32>
    %443 = vector.extract_strided_slice %338 {offsets = [16, 0], sizes = [2, 128], strides = [1, 1]} : vector<18x128xf32> to vector<2x128xf32>
    %444 = vector.shape_cast %443 : vector<2x128xf32> to vector<1x2x128xf32>
    %445 = vector.shape_cast %444 : vector<1x2x128xf32> to vector<1x2x128xf32>
    %446 = vector.broadcast %445 : vector<1x2x128xf32> to vector<4x2x128xf32>
    %447 = tpu.concatenate %334, %446, %335, %442 in 1 : vector<4x1x128xf32>, vector<4x2x128xf32>, vector<4x4x128xf32>, vector<4x1x128xf32> -> vector<4x8x128xf32>
    %448 = vector.extract_strided_slice %338 {offsets = [7, 0], sizes = [1, 128], strides = [1, 1]} : vector<18x128xf32> to vector<1x128xf32>
    %449 = vector.extract_strided_slice %338 {offsets = [8, 0], sizes = [1, 128], strides = [1, 1]} : vector<18x128xf32> to vector<1x128xf32>
    %450 = vector.shape_cast %448 : vector<1x128xf32> to vector<1x1x128xf32>
    %451 = vector.shape_cast %449 : vector<1x128xf32> to vector<1x1x128xf32>
    %cst_100 = arith.constant dense<0.000000e+00> : vector<4x8xf32>
    %452 = vector.multi_reduction <add>, %447, %cst_100 [2] : vector<4x8x128xf32> to vector<4x8xf32>
    %453 = vector.shape_cast %452 : vector<4x8xf32> to vector<4x8x1xf32>
    %cst_101 = arith.constant 1.280000e+02 : f32
    %454 = vector.broadcast %cst_101 : f32 to vector<4x8x1xf32>
    %455 = arith.divf %453, %454 : vector<4x8x1xf32>
    %456 = vector.broadcast %455 : vector<4x8x1xf32> to vector<4x8x128xf32>
    %457 = arith.subf %447, %456 : vector<4x8x128xf32>
    %458 = arith.mulf %457, %457 : vector<4x8x128xf32>
    %cst_102 = arith.constant dense<0.000000e+00> : vector<4x8xf32>
    %459 = vector.multi_reduction <add>, %458, %cst_102 [2] : vector<4x8x128xf32> to vector<4x8xf32>
    %460 = vector.shape_cast %459 : vector<4x8xf32> to vector<4x8x1xf32>
    %cst_103 = arith.constant 1.280000e+02 : f32
    %461 = vector.broadcast %cst_103 : f32 to vector<4x8x1xf32>
    %462 = arith.divf %460, %461 : vector<4x8x1xf32>
    %463 = vector.broadcast %455 : vector<4x8x1xf32> to vector<4x8x128xf32>
    %464 = arith.subf %447, %463 : vector<4x8x128xf32>
    %cst_104 = arith.constant 9.99999974E-6 : f32
    %465 = vector.broadcast %cst_104 : f32 to vector<4x8x1xf32>
    %466 = arith.addf %462, %465 : vector<4x8x1xf32>
    %467 = math.rsqrt %466 : vector<4x8x1xf32>
    %468 = vector.broadcast %467 : vector<4x8x1xf32> to vector<4x8x128xf32>
    %469 = arith.mulf %464, %468 : vector<4x8x128xf32>
    %470 = vector.broadcast %450 : vector<1x1x128xf32> to vector<4x8x128xf32>
    %471 = arith.mulf %469, %470 : vector<4x8x128xf32>
    %472 = vector.broadcast %451 : vector<1x1x128xf32> to vector<4x8x128xf32>
    %473 = arith.addf %471, %472 : vector<4x8x128xf32>
    %c1_105 = arith.constant 1 : index
    %c0_106 = arith.constant 0 : index
    %c0_107 = arith.constant 0 : index
    %474 = vector.load %arg3[%c1_105, %c0_106, %c0_107] : memref<2x128x1664xbf16, #tpu.memory_space<vmem>>, vector<1x128x384xbf16>
    %475 = vector.shape_cast %474 : vector<1x128x384xbf16> to vector<128x384xbf16>
    %476 = vector.extract_strided_slice %338 {offsets = [9, 0], sizes = [3, 128], strides = [1, 1]} : vector<18x128xf32> to vector<3x128xf32>
    %c1_108 = arith.constant 1 : index
    %c0_109 = arith.constant 0 : index
    %c384_110 = arith.constant 384 : index
    %477 = vector.load %arg3[%c1_108, %c0_109, %c384_110] : memref<2x128x1664xbf16, #tpu.memory_space<vmem>>, vector<1x128x128xbf16>
    %478 = vector.shape_cast %477 : vector<1x128x128xbf16> to vector<128x128xbf16>
    %479 = vector.extract_strided_slice %338 {offsets = [12, 0], sizes = [1, 128], strides = [1, 1]} : vector<18x128xf32> to vector<1x128xf32>
    %480 = vector.shape_cast %473 : vector<4x8x128xf32> to vector<32x128xf32>
    %481 = arith.truncf %480 : vector<32x128xf32> to vector<32x128xbf16>
    %cst_111 = arith.constant dense<0.000000e+00> : vector<32x384xf32>
    %482 = tpu.matmul %481, %475, %cst_111 {dimension_numbers = #tpu.dot_dimension_numbers<[1], [0], [0], [1], [0, 0, 1, 1], [], []>} : vector<32x128xbf16>, vector<128x384xbf16>, vector<32x384xf32> -> vector<32x384xf32>
    %483 = vector.shape_cast %482 : vector<32x384xf32> to vector<4x8x384xf32>
    %484 = vector.extract_strided_slice %483 {offsets = [0, 0, 0], sizes = [4, 8, 128], strides = [1, 1, 1]} : vector<4x8x384xf32> to vector<4x8x128xf32>
    %485 = vector.extract_strided_slice %476 {offsets = [0, 0], sizes = [1, 128], strides = [1, 1]} : vector<3x128xf32> to vector<1x128xf32>
    %486 = vector.shape_cast %485 : vector<1x128xf32> to vector<1x1x128xf32>
    %487 = vector.broadcast %486 : vector<1x1x128xf32> to vector<4x8x128xf32>
    %488 = arith.addf %484, %487 : vector<4x8x128xf32>
    %489 = arith.truncf %488 : vector<4x8x128xf32> to vector<4x8x128xbf16>
    %490 = vector.extract_strided_slice %483 {offsets = [0, 0, 128], sizes = [4, 8, 128], strides = [1, 1, 1]} : vector<4x8x384xf32> to vector<4x8x128xf32>
    %491 = vector.extract_strided_slice %476 {offsets = [1, 0], sizes = [1, 128], strides = [1, 1]} : vector<3x128xf32> to vector<1x128xf32>
    %492 = vector.shape_cast %491 : vector<1x128xf32> to vector<1x1x128xf32>
    %493 = vector.broadcast %492 : vector<1x1x128xf32> to vector<4x8x128xf32>
    %494 = arith.addf %490, %493 : vector<4x8x128xf32>
    %495 = arith.truncf %494 : vector<4x8x128xf32> to vector<4x8x128xbf16>
    %496 = vector.extract_strided_slice %483 {offsets = [0, 0, 256], sizes = [4, 8, 128], strides = [1, 1, 1]} : vector<4x8x384xf32> to vector<4x8x128xf32>
    %497 = vector.extract_strided_slice %476 {offsets = [2, 0], sizes = [1, 128], strides = [1, 1]} : vector<3x128xf32> to vector<1x128xf32>
    %498 = vector.shape_cast %497 : vector<1x128xf32> to vector<1x1x128xf32>
    %499 = vector.broadcast %498 : vector<1x1x128xf32> to vector<4x8x128xf32>
    %500 = arith.addf %496, %499 : vector<4x8x128xf32>
    %501 = arith.truncf %500 : vector<4x8x128xf32> to vector<4x8x128xbf16>
    %502 = vector.extract_strided_slice %489 {offsets = [0, 0, 0], sizes = [4, 8, 32], strides = [1, 1, 1]} : vector<4x8x128xbf16> to vector<4x8x32xbf16>
    %503 = vector.extract_strided_slice %489 {offsets = [0, 0, 32], sizes = [4, 8, 32], strides = [1, 1, 1]} : vector<4x8x128xbf16> to vector<4x8x32xbf16>
    %504 = vector.extract_strided_slice %489 {offsets = [0, 0, 64], sizes = [4, 8, 32], strides = [1, 1, 1]} : vector<4x8x128xbf16> to vector<4x8x32xbf16>
    %505 = vector.extract_strided_slice %489 {offsets = [0, 0, 96], sizes = [4, 8, 32], strides = [1, 1, 1]} : vector<4x8x128xbf16> to vector<4x8x32xbf16>
    %506 = tpu.concatenate %502, %503, %504, %505 in 0 : vector<4x8x32xbf16>, vector<4x8x32xbf16>, vector<4x8x32xbf16>, vector<4x8x32xbf16> -> vector<16x8x32xbf16>
    %507 = vector.extract_strided_slice %495 {offsets = [0, 0, 0], sizes = [4, 8, 32], strides = [1, 1, 1]} : vector<4x8x128xbf16> to vector<4x8x32xbf16>
    %508 = vector.extract_strided_slice %495 {offsets = [0, 0, 32], sizes = [4, 8, 32], strides = [1, 1, 1]} : vector<4x8x128xbf16> to vector<4x8x32xbf16>
    %509 = vector.extract_strided_slice %495 {offsets = [0, 0, 64], sizes = [4, 8, 32], strides = [1, 1, 1]} : vector<4x8x128xbf16> to vector<4x8x32xbf16>
    %510 = vector.extract_strided_slice %495 {offsets = [0, 0, 96], sizes = [4, 8, 32], strides = [1, 1, 1]} : vector<4x8x128xbf16> to vector<4x8x32xbf16>
    %511 = tpu.concatenate %507, %508, %509, %510 in 0 : vector<4x8x32xbf16>, vector<4x8x32xbf16>, vector<4x8x32xbf16>, vector<4x8x32xbf16> -> vector<16x8x32xbf16>
    %512 = vector.extract_strided_slice %501 {offsets = [0, 0, 0], sizes = [4, 8, 32], strides = [1, 1, 1]} : vector<4x8x128xbf16> to vector<4x8x32xbf16>
    %513 = vector.extract_strided_slice %501 {offsets = [0, 0, 32], sizes = [4, 8, 32], strides = [1, 1, 1]} : vector<4x8x128xbf16> to vector<4x8x32xbf16>
    %514 = vector.extract_strided_slice %501 {offsets = [0, 0, 64], sizes = [4, 8, 32], strides = [1, 1, 1]} : vector<4x8x128xbf16> to vector<4x8x32xbf16>
    %515 = vector.extract_strided_slice %501 {offsets = [0, 0, 96], sizes = [4, 8, 32], strides = [1, 1, 1]} : vector<4x8x128xbf16> to vector<4x8x32xbf16>
    %516 = tpu.concatenate %512, %513, %514, %515 in 0 : vector<4x8x32xbf16>, vector<4x8x32xbf16>, vector<4x8x32xbf16>, vector<4x8x32xbf16> -> vector<16x8x32xbf16>
    "tpu.trace_start"() <{level = 10 : i32, message = "bqd,bkd->bqk"}> : () -> ()
    %cst_112 = arith.constant dense<0.000000e+00> : vector<16x8x8xf32>
    %517 = tpu.matmul %506, %511, %cst_112 {dimension_numbers = #tpu.dot_dimension_numbers<[2], [2], [1], [1], [0, 0, 0, 1, 1, 1], [0], [0]>} : vector<16x8x32xbf16>, vector<16x8x32xbf16>, vector<16x8x8xf32> -> vector<16x8x8xf32>
    "tpu.trace_stop"() : () -> ()
    %cst_113 = arith.constant dense<0xFF800000> : vector<16x8xf32>
    %518 = vector.multi_reduction <maximumf>, %517, %cst_113 [2] : vector<16x8x8xf32> to vector<16x8xf32>
    %519 = vector.shape_cast %518 : vector<16x8xf32> to vector<16x8x1xf32>
    %520 = vector.broadcast %519 : vector<16x8x1xf32> to vector<16x8x8xf32>
    %521 = arith.subf %517, %520 : vector<16x8x8xf32>
    %522 = math.exp %521 : vector<16x8x8xf32>
    %cst_114 = arith.constant dense<0.000000e+00> : vector<16x8xf32>
    %523 = vector.multi_reduction <add>, %522, %cst_114 [2] : vector<16x8x8xf32> to vector<16x8xf32>
    %524 = vector.shape_cast %523 : vector<16x8xf32> to vector<16x8x1xf32>
    %525 = tpu.reciprocal %524 {approx = true} : vector<16x8x1xf32> -> vector<16x8x1xf32>
    %526 = vector.broadcast %525 : vector<16x8x1xf32> to vector<16x8x8xf32>
    %527 = arith.mulf %522, %526 : vector<16x8x8xf32>
    %528 = arith.truncf %527 : vector<16x8x8xf32> to vector<16x8x8xbf16>
    "tpu.trace_start"() <{level = 10 : i32, message = "bqk,bkd->bqd"}> : () -> ()
    %cst_115 = arith.constant dense<0.000000e+00> : vector<16x8x32xf32>
    %529 = tpu.matmul %528, %516, %cst_115 {dimension_numbers = #tpu.dot_dimension_numbers<[2], [1], [1], [2], [0, 0, 0, 1, 1, 2], [0], [0]>} : vector<16x8x8xbf16>, vector<16x8x32xbf16>, vector<16x8x32xf32> -> vector<16x8x32xf32>
    "tpu.trace_stop"() : () -> ()
    %530 = vector.extract_strided_slice %529 {offsets = [0, 0, 0], sizes = [4, 8, 32], strides = [1, 1, 1]} : vector<16x8x32xf32> to vector<4x8x32xf32>
    %531 = vector.extract_strided_slice %529 {offsets = [4, 0, 0], sizes = [4, 8, 32], strides = [1, 1, 1]} : vector<16x8x32xf32> to vector<4x8x32xf32>
    %532 = vector.extract_strided_slice %529 {offsets = [8, 0, 0], sizes = [4, 8, 32], strides = [1, 1, 1]} : vector<16x8x32xf32> to vector<4x8x32xf32>
    %533 = vector.extract_strided_slice %529 {offsets = [12, 0, 0], sizes = [4, 8, 32], strides = [1, 1, 1]} : vector<16x8x32xf32> to vector<4x8x32xf32>
    %534 = tpu.concatenate %530, %531, %532, %533 in 2 : vector<4x8x32xf32>, vector<4x8x32xf32>, vector<4x8x32xf32>, vector<4x8x32xf32> -> vector<4x8x128xf32>
    %535 = vector.shape_cast %534 : vector<4x8x128xf32> to vector<32x128xf32>
    %536 = arith.truncf %535 : vector<32x128xf32> to vector<32x128xbf16>
    %cst_116 = arith.constant dense<0.000000e+00> : vector<32x128xf32>
    %537 = tpu.matmul %536, %478, %cst_116 {dimension_numbers = #tpu.dot_dimension_numbers<[1], [0], [0], [1], [0, 0, 1, 1], [], []>} : vector<32x128xbf16>, vector<128x128xbf16>, vector<32x128xf32> -> vector<32x128xf32>
    %538 = vector.broadcast %479 : vector<1x128xf32> to vector<32x128xf32>
    %539 = arith.addf %537, %538 : vector<32x128xf32>
    %540 = vector.shape_cast %539 : vector<32x128xf32> to vector<4x8x128xf32>
    %541 = arith.addf %447, %540 : vector<4x8x128xf32>
    %542 = vector.extract_strided_slice %338 {offsets = [13, 0], sizes = [1, 128], strides = [1, 1]} : vector<18x128xf32> to vector<1x128xf32>
    %543 = vector.extract_strided_slice %338 {offsets = [14, 0], sizes = [1, 128], strides = [1, 1]} : vector<18x128xf32> to vector<1x128xf32>
    %544 = vector.shape_cast %542 : vector<1x128xf32> to vector<1x1x128xf32>
    %545 = vector.shape_cast %543 : vector<1x128xf32> to vector<1x1x128xf32>
    %cst_117 = arith.constant dense<0.000000e+00> : vector<4x8xf32>
    %546 = vector.multi_reduction <add>, %541, %cst_117 [2] : vector<4x8x128xf32> to vector<4x8xf32>
    %547 = vector.shape_cast %546 : vector<4x8xf32> to vector<4x8x1xf32>
    %cst_118 = arith.constant 1.280000e+02 : f32
    %548 = vector.broadcast %cst_118 : f32 to vector<4x8x1xf32>
    %549 = arith.divf %547, %548 : vector<4x8x1xf32>
    %550 = vector.broadcast %549 : vector<4x8x1xf32> to vector<4x8x128xf32>
    %551 = arith.subf %541, %550 : vector<4x8x128xf32>
    %552 = arith.mulf %551, %551 : vector<4x8x128xf32>
    %cst_119 = arith.constant dense<0.000000e+00> : vector<4x8xf32>
    %553 = vector.multi_reduction <add>, %552, %cst_119 [2] : vector<4x8x128xf32> to vector<4x8xf32>
    %554 = vector.shape_cast %553 : vector<4x8xf32> to vector<4x8x1xf32>
    %cst_120 = arith.constant 1.280000e+02 : f32
    %555 = vector.broadcast %cst_120 : f32 to vector<4x8x1xf32>
    %556 = arith.divf %554, %555 : vector<4x8x1xf32>
    %557 = vector.broadcast %549 : vector<4x8x1xf32> to vector<4x8x128xf32>
    %558 = arith.subf %541, %557 : vector<4x8x128xf32>
    %cst_121 = arith.constant 9.99999974E-6 : f32
    %559 = vector.broadcast %cst_121 : f32 to vector<4x8x1xf32>
    %560 = arith.addf %556, %559 : vector<4x8x1xf32>
    %561 = math.rsqrt %560 : vector<4x8x1xf32>
    %562 = vector.broadcast %561 : vector<4x8x1xf32> to vector<4x8x128xf32>
    %563 = arith.mulf %558, %562 : vector<4x8x128xf32>
    %564 = vector.broadcast %544 : vector<1x1x128xf32> to vector<4x8x128xf32>
    %565 = arith.mulf %563, %564 : vector<4x8x128xf32>
    %566 = vector.broadcast %545 : vector<1x1x128xf32> to vector<4x8x128xf32>
    %567 = arith.addf %565, %566 : vector<4x8x128xf32>
    %568 = vector.shape_cast %567 : vector<4x8x128xf32> to vector<32x128xf32>
    %c1_122 = arith.constant 1 : index
    %c0_123 = arith.constant 0 : index
    %c1152_124 = arith.constant 1152 : index
    %569 = vector.load %arg3[%c1_122, %c0_123, %c1152_124] : memref<2x128x1664xbf16, #tpu.memory_space<vmem>>, vector<1x128x512xbf16>
    %570 = vector.shape_cast %569 : vector<1x128x512xbf16> to vector<128x512xbf16>
    %571 = arith.truncf %568 : vector<32x128xf32> to vector<32x128xbf16>
    %cst_125 = arith.constant dense<0.000000e+00> : vector<32x512xf32>
    %572 = tpu.matmul %571, %570, %cst_125 {dimension_numbers = #tpu.dot_dimension_numbers<[1], [0], [0], [1], [0, 0, 1, 1], [], []>} : vector<32x128xbf16>, vector<128x512xbf16>, vector<32x512xf32> -> vector<32x512xf32>
    %c1_126 = arith.constant 1 : index
    %c0_127 = arith.constant 0 : index
    %c0_128 = arith.constant 0 : index
    %573 = vector.load %arg7[%c1_126, %c0_127, %c0_128] : memref<2x1x512xf32, #tpu.memory_space<vmem>>, vector<1x1x512xf32>
    %574 = vector.shape_cast %573 : vector<1x1x512xf32> to vector<1x512xf32>
    %575 = vector.broadcast %574 : vector<1x512xf32> to vector<32x512xf32>
    %576 = arith.addf %572, %575 : vector<32x512xf32>
    %cst_129 = arith.constant 1.702000e+00 : f32
    %577 = vector.broadcast %cst_129 : f32 to vector<32x512xf32>
    %578 = arith.mulf %577, %576 : vector<32x512xf32>
    %579 = arith.negf %578 : vector<32x512xf32>
    %580 = math.exp %579 : vector<32x512xf32>
    %cst_130 = arith.constant 1.000000e+00 : f32
    %581 = vector.broadcast %cst_130 : f32 to vector<32x512xf32>
    %582 = arith.addf %581, %580 : vector<32x512xf32>
    %583 = arith.divf %581, %582 : vector<32x512xf32>
    %584 = arith.mulf %576, %583 : vector<32x512xf32>
    %c1_131 = arith.constant 1 : index
    %c0_132 = arith.constant 0 : index
    %c0_133 = arith.constant 0 : index
    %585 = vector.load %arg4[%c1_131, %c0_132, %c0_133] : memref<2x512x128xbf16, #tpu.memory_space<vmem>>, vector<1x512x128xbf16>
    %586 = vector.shape_cast %585 : vector<1x512x128xbf16> to vector<512x128xbf16>
    %587 = arith.truncf %584 : vector<32x512xf32> to vector<32x512xbf16>
    %cst_134 = arith.constant dense<0.000000e+00> : vector<32x128xf32>
    %588 = tpu.matmul %587, %586, %cst_134 {dimension_numbers = #tpu.dot_dimension_numbers<[1], [0], [0], [1], [0, 0, 1, 1], [], []>} : vector<32x512xbf16>, vector<512x128xbf16>, vector<32x128xf32> -> vector<32x128xf32>
    %589 = vector.extract_strided_slice %338 {offsets = [15, 0], sizes = [1, 128], strides = [1, 1]} : vector<18x128xf32> to vector<1x128xf32>
    %590 = vector.broadcast %589 : vector<1x128xf32> to vector<32x128xf32>
    %591 = arith.addf %588, %590 : vector<32x128xf32>
    %592 = vector.shape_cast %591 : vector<32x128xf32> to vector<4x8x128xf32>
    %593 = arith.addf %541, %592 : vector<4x8x128xf32>
    %594 = vector.extract_strided_slice %593 {offsets = [0, 0, 0], sizes = [4, 1, 128], strides = [1, 1, 1]} : vector<4x8x128xf32> to vector<4x1x128xf32>
    %595 = vector.shape_cast %594 : vector<4x1x128xf32> to vector<4x128xf32>
    %cst_135 = arith.constant dense<0.000000e+00> : vector<4xf32>
    %596 = vector.multi_reduction <add>, %595, %cst_135 [1] : vector<4x128xf32> to vector<4xf32>
    %597 = vector.shape_cast %596 : vector<4xf32> to vector<4x1xf32>
    %cst_136 = arith.constant 1.280000e+02 : f32
    %598 = vector.broadcast %cst_136 : f32 to vector<4x1xf32>
    %599 = arith.divf %597, %598 : vector<4x1xf32>
    %600 = vector.broadcast %599 : vector<4x1xf32> to vector<4x128xf32>
    %601 = arith.subf %595, %600 : vector<4x128xf32>
    %602 = arith.mulf %601, %601 : vector<4x128xf32>
    %cst_137 = arith.constant dense<0.000000e+00> : vector<4xf32>
    %603 = vector.multi_reduction <add>, %602, %cst_137 [1] : vector<4x128xf32> to vector<4xf32>
    %604 = vector.shape_cast %603 : vector<4xf32> to vector<4x1xf32>
    %cst_138 = arith.constant 1.280000e+02 : f32
    %605 = vector.broadcast %cst_138 : f32 to vector<4x1xf32>
    %606 = arith.divf %604, %605 : vector<4x1xf32>
    %607 = vector.broadcast %599 : vector<4x1xf32> to vector<4x128xf32>
    %608 = arith.subf %595, %607 : vector<4x128xf32>
    %cst_139 = arith.constant 9.99999974E-6 : f32
    %609 = vector.broadcast %cst_139 : f32 to vector<4x1xf32>
    %610 = arith.addf %606, %609 : vector<4x1xf32>
    %611 = math.rsqrt %610 : vector<4x1xf32>
    %612 = vector.broadcast %611 : vector<4x1xf32> to vector<4x128xf32>
    %613 = arith.mulf %608, %612 : vector<4x128xf32>
    %614 = vector.broadcast %5 : vector<1x128xf32> to vector<4x128xf32>
    %615 = arith.mulf %613, %614 : vector<4x128xf32>
    %616 = vector.broadcast %6 : vector<1x128xf32> to vector<4x128xf32>
    %617 = arith.addf %615, %616 : vector<4x128xf32>
    %c0_140 = arith.constant 0 : index
    %c0_141 = arith.constant 0 : index
    %c0_142 = arith.constant 0 : index
    %618 = vector.load %arg5[%c0_140, %c0_141, %c0_142] : memref<2x128x128xbf16, #tpu.memory_space<vmem>>, vector<1x128x128xbf16>
    %619 = vector.shape_cast %618 : vector<1x128x128xbf16> to vector<128x128xbf16>
    %620 = arith.truncf %617 : vector<4x128xf32> to vector<4x128xbf16>
    %cst_143 = arith.constant dense<0.000000e+00> : vector<4x128xf32>
    %621 = tpu.matmul %620, %619, %cst_143 {dimension_numbers = #tpu.dot_dimension_numbers<[1], [0], [0], [1], [0, 0, 1, 1], [], []>} : vector<4x128xbf16>, vector<128x128xbf16>, vector<4x128xf32> -> vector<4x128xf32>
    %622 = vector.shape_cast %621 : vector<4x128xf32> to vector<2x2x128xf32>
    %cst_144 = arith.constant dense<0.000000e+00> : vector<2x128xf32>
    %623 = vector.multi_reduction <add>, %622, %cst_144 [1] : vector<2x2x128xf32> to vector<2x128xf32>
    %624 = vector.shape_cast %623 : vector<2x128xf32> to vector<2x1x128xf32>
    %cst_145 = arith.constant 2.000000e+00 : f32
    %625 = vector.broadcast %cst_145 : f32 to vector<2x1x128xf32>
    %626 = arith.divf %624, %625 : vector<2x1x128xf32>
    %c0_146 = arith.constant 0 : index
    %c0_147 = arith.constant 0 : index
    %c0_148 = arith.constant 0 : index
    %627 = vector.load %arg9[%c0_146, %c0_147, %c0_148] : memref<2x1x128xf32, #tpu.memory_space<vmem>>, vector<2x1x128xf32>
    tpu.vector_store %arg9[%c0_146, %c0_147, %c0_148], %626 {strides = array<i32>} : memref<2x1x128xf32, #tpu.memory_space<vmem>>, vector<2x1x128xf32>,
    %c12 = arith.constant 12 : index
    %c0_149 = arith.constant 0 : index
    %628 = vector.load %arg8[%c12, %c0_149] : memref<14x128xf32, #tpu.memory_space<vmem>>, vector<1x128xf32>
    %c13 = arith.constant 13 : index
    %c0_150 = arith.constant 0 : index
    %629 = vector.load %arg8[%c13, %c0_150] : memref<14x128xf32, #tpu.memory_space<vmem>>, vector<1x128xf32>
    %cst_151 = arith.constant dense<0.000000e+00> : vector<4xf32>
    %630 = vector.multi_reduction <add>, %336, %cst_151 [1] : vector<4x128xf32> to vector<4xf32>
    %631 = vector.shape_cast %630 : vector<4xf32> to vector<4x1xf32>
    %cst_152 = arith.constant 1.280000e+02 : f32
    %632 = vector.broadcast %cst_152 : f32 to vector<4x1xf32>
    %633 = arith.divf %631, %632 : vector<4x1xf32>
    %634 = vector.broadcast %633 : vector<4x1xf32> to vector<4x128xf32>
    %635 = arith.subf %336, %634 : vector<4x128xf32>
    %636 = arith.mulf %635, %635 : vector<4x128xf32>
    %cst_153 = arith.constant dense<0.000000e+00> : vector<4xf32>
    %637 = vector.multi_reduction <add>, %636, %cst_153 [1] : vector<4x128xf32> to vector<4xf32>
    %638 = vector.shape_cast %637 : vector<4xf32> to vector<4x1xf32>
    %cst_154 = arith.constant 1.280000e+02 : f32
    %639 = vector.broadcast %cst_154 : f32 to vector<4x1xf32>
    %640 = arith.divf %638, %639 : vector<4x1xf32>
    %641 = vector.broadcast %633 : vector<4x1xf32> to vector<4x128xf32>
    %642 = arith.subf %336, %641 : vector<4x128xf32>
    %cst_155 = arith.constant 9.99999974E-6 : f32
    %643 = vector.broadcast %cst_155 : f32 to vector<4x1xf32>
    %644 = arith.addf %640, %643 : vector<4x1xf32>
    %645 = math.rsqrt %644 : vector<4x1xf32>
    %646 = vector.broadcast %645 : vector<4x1xf32> to vector<4x128xf32>
    %647 = arith.mulf %642, %646 : vector<4x128xf32>
    %648 = vector.broadcast %628 : vector<1x128xf32> to vector<4x128xf32>
    %649 = arith.mulf %647, %648 : vector<4x128xf32>
    %650 = vector.broadcast %629 : vector<1x128xf32> to vector<4x128xf32>
    %651 = arith.addf %649, %650 : vector<4x128xf32>
    %c1_156 = arith.constant 1 : index
    %c0_157 = arith.constant 0 : index
    %c0_158 = arith.constant 0 : index
    %652 = vector.load %arg5[%c1_156, %c0_157, %c0_158] : memref<2x128x128xbf16, #tpu.memory_space<vmem>>, vector<1x128x128xbf16>
    %653 = vector.shape_cast %652 : vector<1x128x128xbf16> to vector<128x128xbf16>
    %654 = arith.truncf %651 : vector<4x128xf32> to vector<4x128xbf16>
    %cst_159 = arith.constant dense<0.000000e+00> : vector<4x128xf32>
    %655 = tpu.matmul %654, %653, %cst_159 {dimension_numbers = #tpu.dot_dimension_numbers<[1], [0], [0], [1], [0, 0, 1, 1], [], []>} : vector<4x128xbf16>, vector<128x128xbf16>, vector<4x128xf32> -> vector<4x128xf32>
    %656 = vector.shape_cast %655 : vector<4x128xf32> to vector<2x2x128xf32>
    %cst_160 = arith.constant dense<0.000000e+00> : vector<2x128xf32>
    %657 = vector.multi_reduction <add>, %656, %cst_160 [1] : vector<2x2x128xf32> to vector<2x128xf32>
    %658 = vector.shape_cast %657 : vector<2x128xf32> to vector<2x1x128xf32>
    %cst_161 = arith.constant 2.000000e+00 : f32
    %659 = vector.broadcast %cst_161 : f32 to vector<2x1x128xf32>
    %660 = arith.divf %658, %659 : vector<2x1x128xf32>
    %c0_162 = arith.constant 0 : index
    %c0_163 = arith.constant 0 : index
    %c0_164 = arith.constant 0 : index
    %c0_165 = arith.constant 0 : index
    %661 = vector.load %arg10[%c0_162, %c0_163, %c0_164, %c0_165] : memref<1x2x1x128xf32, #tpu.memory_space<vmem>>, vector<1x2x1x128xf32>
    %662 = vector.shape_cast %661 : vector<1x2x1x128xf32> to vector<2x1x128xf32>
    %663 = vector.shape_cast %660 : vector<2x1x128xf32> to vector<1x2x1x128xf32>
    tpu.vector_store %arg10[%c0_162, %c0_163, %c0_164, %c0_165], %663 {strides = array<i32>} : memref<1x2x1x128xf32, #tpu.memory_space<vmem>>, vector<1x2x1x128xf32>,
    return
  }
  func.func @transform_0(%arg0: i32) -> (i32, i32, i32) {
    %c0_i32 = arith.constant 0 : i32
    %c0_i32_0 = arith.constant 0 : i32
    %c0_i32_1 = arith.constant 0 : i32
    return %arg0, %c0_i32, %c0_i32_0 : i32, i32, i32
  }
  func.func @transform_1(%arg0: i32) -> (i32, i32) {
    %c0_i32 = arith.constant 0 : i32
    %c0_i32_0 = arith.constant 0 : i32
    %c0_i32_1 = arith.constant 0 : i32
    return %c0_i32, %c0_i32_0 : i32, i32
  }
  func.func @transform_2(%arg0: i32) -> (i32, i32, i32) {
    %c0_i32 = arith.constant 0 : i32
    %c0_i32_0 = arith.constant 0 : i32
    %c0_i32_1 = arith.constant 0 : i32
    %c0_i32_2 = arith.constant 0 : i32
    return %c0_i32, %c0_i32_0, %c0_i32_1 : i32, i32, i32
  }
  func.func @transform_3(%arg0: i32) -> (i32, i32, i32) {
    %c0_i32 = arith.constant 0 : i32
    %c0_i32_0 = arith.constant 0 : i32
    %c0_i32_1 = arith.constant 0 : i32
    %c0_i32_2 = arith.constant 0 : i32
    return %c0_i32, %c0_i32_0, %c0_i32_1 : i32, i32, i32
  }
  func.func @transform_4(%arg0: i32) -> (i32, i32, i32) {
    %c0_i32 = arith.constant 0 : i32
    %c0_i32_0 = arith.constant 0 : i32
    %c0_i32_1 = arith.constant 0 : i32
    %c0_i32_2 = arith.constant 0 : i32
    return %c0_i32, %c0_i32_0, %c0_i32_1 : i32, i32, i32
  }
  func.func @transform_5(%arg0: i32) -> (i32, i32, i32) {
    %c0_i32 = arith.constant 0 : i32
    %c0_i32_0 = arith.constant 0 : i32
    %c0_i32_1 = arith.constant 0 : i32
    %c0_i32_2 = arith.constant 0 : i32
    return %c0_i32, %c0_i32_0, %c0_i32_1 : i32, i32, i32
  }
  func.func @transform_6(%arg0: i32) -> (i32, i32, i32) {
    %c0_i32 = arith.constant 0 : i32
    %c0_i32_0 = arith.constant 0 : i32
    %c0_i32_1 = arith.constant 0 : i32
    %c0_i32_2 = arith.constant 0 : i32
    return %c0_i32, %c0_i32_0, %c0_i32_1 : i32, i32, i32
  }
  func.func @transform_7(%arg0: i32) -> (i32, i32) {
    %c0_i32 = arith.constant 0 : i32
    %c0_i32_0 = arith.constant 0 : i32
    %c0_i32_1 = arith.constant 0 : i32
    return %c0_i32, %c0_i32_0 : i32, i32
  }
  func.func @transform_8(%arg0: i32) -> (i32, i32, i32) {
    %c0_i32 = arith.constant 0 : i32
    %c0_i32_0 = arith.constant 0 : i32
    %c0_i32_1 = arith.constant 0 : i32
    return %arg0, %c0_i32, %c0_i32_0 : i32, i32, i32
  }
  func.func @transform_9(%arg0: i32) -> (i32, i32, i32, i32) {
    %c0_i32 = arith.constant 0 : i32
    %c0_i32_0 = arith.constant 0 : i32
    %c0_i32_1 = arith.constant 0 : i32
    %c0_i32_2 = arith.constant 0 : i32
    return %c0_i32, %arg0, %c0_i32_0, %c0_i32_1 : i32, i32, i32, i32
  }
}

</mosaic_0001>

<bundles_post_ra>
// kernel: event_encoder_forward.1
= control target key start
LH: loop header
LB: loop body
LE: loop exit
PB: predicated region body
PF: predicated region fallthrough
CT: control target
= control target key end

     0   :  { %15 = vsyncpa [#allocation3], 0  ;;  %v584_v2 = vlaneseq  ;;  %v13640_v4 = vmov 1966171168   ;;  %vm628_vm0 = vcmask 1040384   ;;  %vm13642_vm1 = vmmov 0   ;;  %s16871_s0 = inlined_call_operand.vmem [shape: f32[2,8,768], index: 0, kind: input, shape index: {}]   ;;  %s16872_s1 = inlined_call_operand.vmem [shape: bf16[768,128], index: 1, kind: input, shape index: {}]   ;;  %s16873_s2 = inlined_call_operand.vmem [shape: bf16[2,128,1664], index: 2, kind: input, shape index: {}]   ;;  %s16874_s3 = inlined_call_operand.vmem [shape: bf16[2,512,128], index: 3, kind: input, shape index: {}]   ;;  %s16875_s4 = inlined_call_operand.vmem [shape: bf16[2,128,128], index: 4, kind: input, shape index: {}]   ;;  %s16876_s5 = inlined_call_operand.vmem [shape: f32[2,18,128], index: 5, kind: input, shape index: {}]   ;;  %s16877_s6 = inlined_call_operand.vmem [shape: f32[2,1,512], index: 6, kind: input, shape index: {}]   ;;  %s16878_s7 = inlined_call_operand.vmem [shape: f32[14,128], index: 7, kind: input, shape index: {}]   ;;  %s16879_s8 = inlined_call_operand.hbm [shape: f32[2,1,128], index: 8, kind: output, shape index: {0}]   ;;  %s16880_s9 = inlined_call_operand.hbm [shape: f32[1,2,1,128], index: 9, kind: output, shape index: {1}]  }
   0x1   :  { %v34_v0 = vld [vmem:[%s16878_s7] sm:$0x1]  ;;  %v35_v1 = vld [vmem:[%s16878_s7 + $0x1] sm:$0x1f]  ;;  %v582_v5 = vunpack.c.l.s4 %v13640_v4  ;;  %v12809_v19 = vld [vmem:[%s16872_s1 + $0x48] sm:$0xff]  }
   0x2   :  { %v10786_v3 = vld.sshfl [vmem:[%s16878_s7 + $0x6] sm:$0x11 pattern:$0x75316420]  ;;  %v13711_v6 = vshrl.u32 %v584_v2, 7  ;;  %v597_v10 = vadd.f32 %v35_v1, %v34_v0  ;;  %v12810_v20 = vld [vmem:[%s16872_s1 + $0x8] sm:$0xff]  }
   0x3   :  { %v580_v7 = vcombine.high %v10786_v3, %v10786_v3  ;;  %v583_v8 = vunpack.c.0.s8 %v582_v5  ;;  %v12807_v17 = vld [vmem:[%s16872_s1 + $0x40] sm:$0xff]   ;;  %v12811_v21 = vld [vmem:[%s16872_s1 + $0x50] sm:$0xff]   ;;  %v42_v24 = vld [vmem:[%s16871_s0 + $0x8] sm:$0xff] }
   0x4   :  { %v12808_v18 = vld [vmem:[%s16872_s1] sm:$0xff]   ;;  %11436 = vmatprep.subr.bf16.mxu0 %v12807_v17  ;;  %v48_v25 = vld [vmem:[%s16871_s0 + $0x38] sm:$0xff]  ;;  %v12812_v26 = vld [vmem:[%s16872_s1 + $0x10] sm:$0xff]  }
   0x5   :  { %v13714_v9 = vsub.s32 %v583_v8, %v13711_v6  ;;  %11437 = vmatpush3.bf16.msra.mxu0 %v12808_v18  ;;  %v12823_v22 = vld [vmem:[%s16872_s1 + $0xc0] sm:$0xff]   ;;  %v150_v27 = vpack.c.bf16 %v48_v25, %v42_v24  ;;  %v12813_v28 = vld [vmem:[%s16872_s1 + $0x58] sm:$0xff]   ;;  %v12827_v29 = vld [vmem:[%s16872_s1 + $0xc8] sm:$0xff]  }
   0x6   :  { %11438 = vmatprep.subr.bf16.mxu0 %v12809_v19  ;;  %v12824_v23 = vld [vmem:[%s16872_s1 + $0x80] sm:$0xff]   ;;  %11458 = vmatprep.subr.bf16.mxu1 %v12823_v22  ;;  %v12828_v30 = vld [vmem:[%s16872_s1 + $0x88] sm:$0xff]   ;;  %v12831_v31 = vld [vmem:[%s16872_s1 + $0xd0] sm:$0xff]  }
   0x7   :  { %v13717_v11 = vrot.slane %v580_v7, %v13714_v9  ;;  %v13720_v12 = vrot.slane %v10786_v3, %v13714_v9  ;;  %11459 = vmatpush3.bf16.msra.mxu1 %v12824_v23  ;;  %475 = vmatprep.mubr.bf16.mxu0 %v150_v27  ;;  %v12814_v32 = vld [vmem:[%s16872_s1 + $0x18] sm:$0xff]   ;;  %v12815_v33 = vld [vmem:[%s16872_s1 + $0x60] sm:$0xff]   ;;  %v12832_v34 = vld [vmem:[%s16872_s1 + $0x90] sm:$0xff]  }
   0x8   :  { %11460 = vmatprep.subr.bf16.mxu1 %v12827_v29  ;;  %v12835_v35 = vld [vmem:[%s16872_s1 + $0xd8] sm:$0xff]   ;;  %v12816_v36 = vld [vmem:[%s16872_s1 + $0x20] sm:$0xff]   ;;  %v12817_v37 = vld [vmem:[%s16872_s1 + $0x68] sm:$0xff]  }
   0x9   :  { %v13723_v13 = vadd.f32 %v597_v10, %v13717_v11  ;;  %v13726_v14 = vadd.f32 %v597_v10, %v13720_v12  ;;  %11439 = vmatpush3.bf16.msra.mxu0 %v12810_v20  ;;  %v12836_v38 = vld [vmem:[%s16872_s1 + $0x98] sm:$0xff]   ;;  %v12818_v39 = vld [vmem:[%s16872_s1 + $0x28] sm:$0xff]   ;;  %v12839_v40 = vld [vmem:[%s16872_s1 + $0xe0] sm:$0xff]  }
   0xa   :  { %11440 = vmatprep.subr.bf16.mxu0 %v12811_v21  ;;  %v12819_v41 = vld [vmem:[%s16872_s1 + $0x70] sm:$0xff]   ;;  %v12840_v42 = vld [vmem:[%s16872_s1 + $0xa0] sm:$0xff]   ;;  %v12843_v43 = vld [vmem:[%s16872_s1 + $0xe8] sm:$0xff]  }
   0xb   :  { %v632_v15 = vsel %vm628_vm0, %v13723_v13, 0.0  ;;  %v629_v16 = vsel %vm628_vm0, %v13726_v14, 0.0  ;;  %11461 = vmatpush3.bf16.msra.mxu1 %v12828_v30  ;;  %v12820_v44 = vld [vmem:[%s16872_s1 + $0x30] sm:$0xff]   ;;  %v12821_v45 = vld [vmem:[%s16872_s1 + $0x78] sm:$0xff]   ;;  %v12844_v46 = vld [vmem:[%s16872_s1 + $0xa8] sm:$0xff]  }
   0xc   :  { %633 = vadd.xlane.f32.xlu0 %v632_v15  ;;  %11462 = vmatprep.subr.bf16.mxu1 %v12831_v31  ;;  %v12847_v47 = vld [vmem:[%s16872_s1 + $0xf0] sm:$0xff]   ;;  %v12822_v48 = vld [vmem:[%s16872_s1 + $0x38] sm:$0xff]   ;;  %v41_v49 = vld [vmem:[%s16871_s0] sm:$0xff] }
   0xd   :  { %11441 = vmatpush3.bf16.msra.mxu0 %v12812_v26  ;;  %v47_v50 = vld [vmem:[%s16871_s0 + $0x30] sm:$0xff]  ;;  %v12825_v51 = vld [vmem:[%s16872_s1 + $0x140] sm:$0xff]   ;;  %v12851_v53 = vld [vmem:[%s16872_s1 + $0xf8] sm:$0xff]  }
   0xe   :  { %11442 = vmatprep.subr.bf16.mxu0 %v12813_v28  ;;  %v12848_v52 = vld [vmem:[%s16872_s1 + $0xb0] sm:$0xff]   ;;  %v12826_v54 = vld [vmem:[%s16872_s1 + $0x100] sm:$0xff]   ;;  %v149_v55 = vpack.c.bf16 %v47_v50, %v41_v49  ;;  %v12829_v56 = vld [vmem:[%s16872_s1 + $0x148] sm:$0xff]  }
   0xf   :  { %11463 = vmatpush3.bf16.msra.mxu1 %v12832_v34  ;;  %v12852_v57 = vld [vmem:[%s16872_s1 + $0xb8] sm:$0xff]   ;;  %v12830_v58 = vld [vmem:[%s16872_s1 + $0x108] sm:$0xff]   ;;  %v12833_v59 = vld [vmem:[%s16872_s1 + $0x150] sm:$0xff]   ;;  %v13641_v34 = vmov 0.0  }
  0x10   :  { %630 = vadd.xlane.f32.xlu0 %v629_v16  ;;  %11464 = vmatprep.subr.bf16.mxu1 %v12835_v35  ;;  %v12834_v60 = vld [vmem:[%s16872_s1 + $0x110] sm:$0xff]   ;;  %v12837_v61 = vld [vmem:[%s16872_s1 + $0x158] sm:$0xff]   ;;  %v12841_v63 = vld [vmem:[%s16872_s1 + $0x160] sm:$0xff]  }
  0x11   :  { %11443 = vmatpush3.bf16.msra.mxu0 %v12814_v32  ;;  %v12838_v62 = vld [vmem:[%s16872_s1 + $0x118] sm:$0xff]   ;;  %v12842_v0 = vld [vmem:[%s16872_s1 + $0x120] sm:$0xff]   ;;  %v12845_v1 = vld [vmem:[%s16872_s1 + $0x168] sm:$0xff]  }
  0x12   :  { %11444 = vmatprep.subr.bf16.mxu0 %v12815_v33  ;;  %v12846_v2 = vld [vmem:[%s16872_s1 + $0x128] sm:$0xff]   ;;  %v12849_v3 = vld [vmem:[%s16872_s1 + $0x170] sm:$0xff]   ;;  %v12853_v5 = vld [vmem:[%s16872_s1 + $0x178] sm:$0xff]  }
  0x13   :  { %11465 = vmatpush3.bf16.msra.mxu1 %v12836_v38  ;;  %v12850_v4 = vld [vmem:[%s16872_s1 + $0x130] sm:$0xff]   ;;  %v50_v22 = vld [vmem:[%s16871_s0 + $0x48] sm:$0xff]  ;;  %v49_v25 = vld [vmem:[%s16871_s0 + $0x40] sm:$0xff] }
  0x14   :  { %11466 = vmatprep.subr.bf16.mxu1 %v12839_v40  ;;  %v43_v24 = vld [vmem:[%s16871_s0 + $0x10] sm:$0xff]  ;;  %v46_v27 = vld [vmem:[%s16871_s0 + $0x28] sm:$0xff]  ;;  %v52_v28 = vld [vmem:[%s16871_s0 + $0x58] sm:$0xff] }
  0x15   :  { %11445 = vmatpush3.bf16.msra.mxu0 %v12816_v36  ;;  %v151_v26 = vpack.c.bf16 %v49_v25, %v43_v24  ;;  %v154_v29 = vpack.c.bf16 %v52_v28, %v46_v27  ;;  %v45_v30 = vld [vmem:[%s16871_s0 + $0x20] sm:$0xff]  ;;  %v51_v31 = vld [vmem:[%s16871_s0 + $0x50] sm:$0xff]  ;;  %v12856_v35 = vld [vmem:[%s16873_s2 + $0x88] ss:$52 sps:$4 sm:$0xff]  }
  0x16   :  { %11446 = vmatprep.subr.bf16.mxu0 %v12817_v37  ;;  %v153_v32 = vpack.c.bf16 %v51_v31, %v45_v30  ;;  %v12855_v33 = vld [vmem:[%s16873_s2 + $0x20] ss:$52 sps:$4 sm:$0xff]   ;;  %v12857_v36 = vld [vmem:[%s16873_s2 + $0xf0] ss:$52 sps:$4 sm:$0xff]   ;;  %v12858_v37 = vld [vmem:[%s16873_s2 + $0x158] ss:$52 sps:$4 sm:$0xff]  }
  0x17   :  { %11467 = vmatpush3.bf16.msra.mxu1 %v12840_v42  ;;  %v12859_v38 = vld [vmem:[%s16873_s2 + $0x1c0] ss:$52 sps:$4 sm:$0xff]   ;;  %v12861_v40 = vld [vmem:[%s16873_s2 + $0x290] ss:$52 sps:$4 sm:$0xff]  }
  0x18   :  { %11468 = vmatprep.subr.bf16.mxu1 %v12843_v43 }
  0x19   :  { %11447 = vmatpush3.bf16.msra.mxu0 %v12818_v39  ;;  %v12860_v39 = vld [vmem:[%s16873_s2 + $0x228] ss:$52 sps:$4 sm:$0xff]  }
  0x1a   :  { %11448 = vmatprep.subr.bf16.mxu0 %v12819_v41  ;;  %v12862_v41 = vld [vmem:[%s16873_s2 + $0x2f8] ss:$52 sps:$4 sm:$0xff]  }
  0x1b   :  { %11469 = vmatpush3.bf16.msra.mxu1 %v12844_v46 }
  0x1c   :  { %11470 = vmatprep.subr.bf16.mxu1 %v12847_v47 }
  0x1d   :  { %11449 = vmatpush3.bf16.msra.mxu0 %v12820_v44 }
  0x1e   :  { %11450 = vmatprep.subr.bf16.mxu0 %v12821_v45 }
  0x1f   :  { %11471 = vmatpush3.bf16.msra.mxu1 %v12848_v52 }
  0x20   :  { %11472 = vmatprep.subr.bf16.mxu1 %v12851_v53 }
  0x21   :  { %11451 = vmatpush3.bf16.msra.mxu0 %v12822_v48 }
  0x22   :  { %11480 = vmatprep.subr.bf16.mxu0 %v12825_v51 }
  0x23   :  { %11473 = vmatpush3.bf16.msra.mxu1 %v12852_v57 }
  0x24   :  { %476 = vmatmul.mubr.bf16.vlgmr.msra.gmra.mrb[0].mxu0 %v149_v55  ;;  %11918 = vmatprep.subr.bf16.mxu1 %v13641_v34 }
  0x25   :  { %11481 = vmatpush3.bf16.msra.mxu0 %v12826_v54  ;;  %557 = vmatprep.mubr.bf16.mxu0 %v154_v29 }
  0x26   :  { %11482 = vmatprep.subr.bf16.mxu0 %v12829_v56 }
  0x29   :  { %11483 = vmatpush3.bf16.msra.mxu0 %v12830_v58 }
  0x2a   :  { %11484 = vmatprep.subr.bf16.mxu0 %v12833_v59 }
  0x2d   :  { %11485 = vmatpush3.bf16.msra.mxu0 %v12834_v60 }
  0x2e   :  { %11486 = vmatprep.subr.bf16.mxu0 %v12837_v61 }
  0x31   :  { %11487 = vmatpush3.bf16.msra.mxu0 %v12838_v62 }
  0x32   :  { %11488 = vmatprep.subr.bf16.mxu0 %v12841_v63 }
  0x35   :  { %11489 = vmatpush3.bf16.msra.mxu0 %v12842_v0 }
  0x36   :  { %11490 = vmatprep.subr.bf16.mxu0 %v12845_v1 }
  0x39   :  { %11491 = vmatpush3.bf16.msra.mxu0 %v12846_v2 }
  0x3a   :  { %11492 = vmatprep.subr.bf16.mxu0 %v12849_v3 }
  0x3d   :  { %11493 = vmatpush3.bf16.msra.mxu0 %v12850_v4 }
  0x3e   :  { %11494 = vmatprep.subr.bf16.mxu0 %v12853_v5 }
  0x99   :  { %v634_v7 = vpop.xlane.xlu0 %633 }
  0x9a   :  { %v637_v8 = vmul.f32 0.0078125, %v634_v7 }
  0x9c   :  { %v13886_v10 = vsub.f32 %v13723_v13, %v637_v8  ;;  %v44_v13 = vld [vmem:[%s16871_s0 + $0x18] sm:$0xff] }
  0x9d   :  { %v631_v15 = vpop.xlane.xlu0 %630  ;;  %v152_v23 = vpack.c.bf16 %v50_v22, %v44_v13 }
  0x9e   :  { %v636_v16 = vmul.f32 0.0078125, %v631_v15  ;;  %v641_v17 = vmul.f32 %v13886_v10, %v13886_v10 }
  0x9f   :  { %516 = vmatprep.mubr.bf16.mxu1 %v152_v23 }
  0xa0   :  { %v13891_v18 = vsub.f32 %v13726_v14, %v636_v16  ;;  %v645_v19 = vsel %vm628_vm0, %v641_v17, 0.0  ;;  %v12854_v14 = vld [vmem:[%s16872_s1 + $0x138] sm:$0xff]   ;;  %517 = vmatmul.mubr.bf16.vlgmr.msra.gmra.mrb[0].mxu1 %v151_v26 }
  0xa1   :  { %646 = vadd.xlane.f32.xlu1 %v645_v19  ;;  %11495 = vmatpush3.bf16.msra.mxu0 %v12854_v14 }
  0xa2   :  { %v640_v20 = vmul.f32 %v13891_v18, %v13891_v18  ;;  %11919 = vmatpush3.bf16.msra.mxu1 %v12855_v33  ;;  %11934 = vmatprep.mubr.msk.bf16.mxu1 %vm13642_vm1, %v13641_v34 }
  0xa3   :  { %11920 = vmatprep.subr.bf16.mxu1 %v13641_v34 }
  0xa4   :  { %v642_v21 = vsel %vm628_vm0, %v640_v20, 0.0  ;;  %558 = vmatmul.mubr.bf16.vlgmr.msra.gmra.mrb[4].mxu0 %v153_v32 }
  0xa5   :  { %643 = vadd.xlane.f32.xlu1 %v642_v21 }
  0xa6   :  { %11921 = vmatpush3.bf16.msra.mxu1 %v12856_v35 }
  0xa7   :  { %11922 = vmatprep.subr.bf16.mxu1 %v13641_v34 }
  0xaa   :  { %11923 = vmatpush3.bf16.msra.mxu1 %v12857_v36 }
  0xab   :  { %11924 = vmatprep.subr.bf16.mxu1 %v13641_v34 }
  0xae   :  { %11925 = vmatpush3.bf16.msra.mxu1 %v12858_v37 }
  0xaf   :  { %11926 = vmatprep.subr.bf16.mxu1 %v13641_v34 }
  0xb2   :  { %11927 = vmatpush3.bf16.msra.mxu1 %v12859_v38 }
  0xb3   :  { %11928 = vmatprep.subr.bf16.mxu1 %v13641_v34 }
  0xb6   :  { %11929 = vmatpush3.bf16.msra.mxu1 %v12860_v39 }
  0xb7   :  { %11930 = vmatprep.subr.bf16.mxu1 %v13641_v34 }
  0xba   :  { %11931 = vmatpush3.bf16.msra.mxu1 %v12861_v40 }
  0xbb   :  { %11932 = vmatprep.subr.bf16.mxu1 %v13641_v34 }
  0xbe   :  { %11933 = vmatpush3.bf16.msra.mxu1 %v12862_v41 }
  0xbf   :  { %11938 = vmatprep.subr.bf16.mxu1 %v13641_v34 }
  0xc0   :  { %16 = vsyncpa [#allocation5], 0  ;;  %v37_v55 = vld [vmem:[%s16878_s7 + $0x8] sm:$0x1]  ;;  %v38_v57 = vld [vmem:[%s16878_s7 + $0x9] sm:$0x1] }
  0xc1   :  { %vm759_vm2 = vcmask 1041409   ;;  %vm762_vm3 = vcmask 1042434   ;;  %vm765_vm4 = vcmask 1043459   ;;  %v13583_v13 = vld [vmem:[%s16878_s7 + $0x1] sm:$0x1f]  ;;  %vm602_vm5 = vcmask 1042432  }
  0xc2   :  { %v601_v22 = vcombine.high %v13583_v13, %v13583_v13  ;;  %v10787_v32 = vrot.slane %v13583_v13, 9  ;;  %vm603_vm6 = vcmask 1046532   ;;  %vm868_vm8 = vcmask 1041408   ;;  %v12877_v13 = vld [vmem:[%s16873_s2 + $0x14c] ss:$52 sps:$4 sm:$0xff]   ;;  %s13645_s11 = smov 96  }
  0xc3   :  { %vm604_vm7 = vmor %vm602_vm5, %vm603_vm6  ;;  %vm1272_vm9 = vcmask 261120   ;;  %s13646_s0 = smov 64   ;;  %s13647_s12 = smov 32   ;;  %vm1641_vm10 = vcmask 9216   ;;  %vm1738_vm11 = vcmask 15360   ;;  %vm660_vm12 = vcmask 1043456  }
  0xc4   :  { %v607_v33 = vrot.slane %v601_v22, 5  ;;  %v12875_v22 = vld [vmem:[%s16873_s2 + $0x148] ss:$52 sps:$4 sm:$0xff]   ;;  %vm2133_vm13 = vcmask 523264   ;;  %vm2136_vm14 = vcmask 785408   ;;  %vm2315_vm15 = vcmask 1046528  }
  0xc5   :  { %vm3516_vm6 = vcmask 64512  }
  0xc6   :  { %v608_v38 = vsel %vm604_vm7, %v10787_v32, %v607_v33  ;;  %v12893_v32 = vld [vmem:[%s16873_s2 + $0x2ec] ss:$52 sps:$4 sm:$0xff]   ;;  %v13644_v33 = vmov 0  }
  0xc7   :  { %1127 = vmatprep.mubr.bf16.mxu0 %v13644_v33 }
  0xf7   :  { %v11452_v42 = vpop.f32.mrb[0].mxu0 }
  0xf8   :  { %v11453_v43 = vpop.f32.mrb[1].mxu0 }
  0xf9   :  { %v11454_v44 = vadd.f32 %v11453_v43, %v11452_v42  ;;  %v11455_v45 = vpop.f32.mrb[2].mxu0  ;;  %v13643_v43 = vmov 1983009808  }
  0xfa   :  { %v11456_v46 = vpop.f32.mrb[3].mxu0 }
  0xfb   :  { %v11457_v47 = vadd.f32 %v11456_v46, %v11455_v45  ;;  %v13995_v45 = vld [vmem:[%s16876_s5] sm:$0xff]  ;;  %v13998_v46 = vsub.s32 0, %v13711_v6 }
 0x12e   :  { %v647_v48 = vpop.xlane.xlu1 %646 }
 0x12f   :  { %v649_v49 = vmul.f32 0.0078125, %v647_v48  ;;  %v753_v48 = vrot.slane %v13995_v45, %v13998_v46 }
 0x131   :  { %v651_v50 = vadd.f32 1e-05, %v649_v49 }
 0x132   :  { %v644_v51 = vpop.xlane.xlu1 %643 }
 0x133   :  { %13207 = vrsqrt.f32 %v651_v50  ;;  %v648_v52 = vmul.f32 0.0078125, %v644_v51 }
 0x135   :  { %v650_v53 = vadd.f32 1e-05, %v648_v52 }
 0x137   :  { %13209 = vrsqrt.f32 %v650_v53 }
 0x13d   :  { %v13208_v54 = vpop.eup %13207 }
 0x13e   :  { %v655_v56 = vmul.f32 %v13208_v54, %v13886_v10 }
 0x140   :  { %v657_v58 = vmul.f32 %v655_v56, %v37_v55 }
 0x141   :  { %v13210_v59 = vpop.eup %13209 }
 0x142   :  { %v654_v60 = vmul.f32 %v13210_v59, %v13891_v18  ;;  %v13967_v61 = vadd.f32 %v657_v58, %v38_v57  ;;  %v12863_v59 = vld [vmem:[%s16873_s2 + $0x10] ss:$52 sps:$4 sm:$0xff]  }
 0x144   :  { %v656_v62 = vmul.f32 %v654_v60, %v37_v55  ;;  %v749_v63 = vpack.c.bf16 %v13967_v61, %v13967_v61  ;;  %v12865_v60 = vld [vmem:[%s16873_s2 + $0x14] ss:$52 sps:$4 sm:$0xff]  }
 0x145   :  { %1095 = vmatprep.subr.bf16.mxu0 %v12865_v60 }
 0x146   :  { %v13971_v0 = vadd.f32 %v656_v62, %v38_v57  ;;  %v757_v1 = vunpack.c.l.b16 %v749_v63  ;;  %v12866_v62 = vld [vmem:[%s16873_s2 + $0x18] ss:$52 sps:$4 sm:$0xff]   ;;  %1096 = vmatpush1.bf16.msra.mxu0 %v12863_v59 }
 0x148   :  { %v748_v2 = vpack.c.bf16 %v13971_v0, %v13971_v0  ;;  %v758_v4 = vrot.slane %v757_v1, 7  ;;  %v764_v8 = vrot.slane %v757_v1, 5 }
 0x14a   :  { %v756_v3 = vunpack.c.l.b16 %v748_v2 }
 0x14c   :  { %v760_v5 = vsel %vm759_vm2, %v758_v4, %v756_v3  ;;  %v761_v7 = vrot.slane %v756_v3, 6 }
 0x14e   :  { %v763_v10 = vsel %vm762_vm3, %v761_v7, %v760_v5 }
 0x14f   :  { %v766_v15 = vsel %vm765_vm4, %v764_v8, %v763_v10 }
 0x150   :  { %v767_v16 = vpack.c.b16 %v766_v15, %v766_v15 }
 0x152   :  { %11935 = vmatmul.mubr.bf16.vlgmr.msra.gmra.mrb[4].mxu1 %v767_v16  ;;  %v12869_v16 = vld [vmem:[%s16873_s2 + $0x7c] ss:$52 sps:$4 sm:$0xff]  }
 0x153   :  { %11954 = vmatprep.mubr.msk.bf16.mxu1 %vm13642_vm1, %v13641_v34  ;;  %11939 = vmatpush3.bf16.msra.mxu1 %v12866_v62 }
 0x154   :  { %11940 = vmatprep.subr.bf16.mxu1 %v13641_v34  ;;  %1097 = vmatprep.subr.bf16.mxu0 %v12869_v16 }
 0x173   :  { %v11474_v17 = vpop.f32.mrb[0].mxu1 }
 0x174   :  { %v11475_v18 = vpop.f32.mrb[1].mxu1 }
 0x175   :  { %v11476_v19 = vadd.f32 %v11475_v18, %v11474_v17  ;;  %v11477_v20 = vpop.f32.mrb[2].mxu1  ;;  %v12867_v17 = vld [vmem:[%s16873_s2 + $0x78] ss:$52 sps:$4 sm:$0xff]   ;;  %v12870_v18 = vld [vmem:[%s16873_s2 + $0x80] ss:$52 sps:$4 sm:$0xff]  }
 0x176   :  { %v11478_v23 = vpop.f32.mrb[3].mxu1  ;;  %1098 = vmatpush1.bf16.msra.mxu0 %v12867_v17  ;;  %11941 = vmatpush3.bf16.msra.mxu1 %v12870_v18 }
 0x177   :  { %v11496_v21 = vpop.f32.mrb[4].mxu0  ;;  %v11479_v24 = vadd.f32 %v11478_v23, %v11477_v20  ;;  %v519_v25 = vadd.f32 %v11476_v19, %v11454_v44  ;;  %v859_v44 = vunpack.c.l.s4 %v13643_v43  ;;  %v12873_v19 = vld [vmem:[%s16873_s2 + $0xe4] ss:$52 sps:$4 sm:$0xff]   ;;  %11942 = vmatprep.subr.bf16.mxu1 %v13641_v34  ;;  %v12871_v20 = vld [vmem:[%s16873_s2 + $0xe0] ss:$52 sps:$4 sm:$0xff]  }
 0x178   :  { %v11497_v14 = vpop.f32.mrb[5].mxu0  ;;  %1099 = vmatprep.subr.bf16.mxu0 %v12873_v19  ;;  %v12878_v23 = vld [vmem:[%s16873_s2 + $0x150] ss:$52 sps:$4 sm:$0xff]   ;;  %v14131_v19 = vsub.s32 4, %v13711_v6 }
 0x179   :  { %v11498_v26 = vadd.f32 %v11497_v14, %v11496_v21  ;;  %v11499_v27 = vpop.f32.mrb[6].mxu0  ;;  %v522_v30 = vadd.f32 %v11479_v24, %v11457_v47  ;;  %v860_v47 = vunpack.c.0.s8 %v859_v44  ;;  %v12874_v21 = vld [vmem:[%s16873_s2 + $0xe8] ss:$52 sps:$4 sm:$0xff]   ;;  %v12879_v24 = vld [vmem:[%s16873_s2 + $0x1b0] ss:$52 sps:$4 sm:$0xff]  }
 0x17a   :  { %v11500_v28 = vpop.f32.mrb[7].mxu0  ;;  %1100 = vmatpush1.bf16.msra.mxu0 %v12871_v20  ;;  %11943 = vmatpush3.bf16.msra.mxu1 %v12874_v21  ;;  %v12881_v14 = vld [vmem:[%s16873_s2 + $0x1b4] ss:$52 sps:$4 sm:$0xff]  }
 0x17b   :  { %v560_v29 = vadd.f32 %v11498_v26, %v519_v25  ;;  %v11501_v31 = vadd.f32 %v11500_v28, %v11499_v27  ;;  %v14003_v49 = vsub.s32 %v860_v47, %v13711_v6  ;;  %11944 = vmatprep.subr.bf16.mxu1 %v13641_v34  ;;  %1101 = vmatprep.subr.bf16.mxu0 %v12877_v13  ;;  %v12882_v25 = vld [vmem:[%s16873_s2 + $0x1b8] ss:$52 sps:$4 sm:$0xff]   ;;  %v12885_v26 = vld [vmem:[%s16873_s2 + $0x21c] ss:$52 sps:$4 sm:$0xff]   ;;  %v12886_v28 = vld [vmem:[%s16873_s2 + $0x220] ss:$52 sps:$4 sm:$0xff]  }
 0x17c   :  { %v12883_v27 = vld [vmem:[%s16873_s2 + $0x218] ss:$52 sps:$4 sm:$0xff]  }
 0x17d   :  { %v563_v35 = vadd.f32 %v11501_v31, %v522_v30  ;;  %v568_v36 = vcombine.high %v560_v29, %v560_v29  ;;  %v13984_v39 = vadd.f32 %v608_v38, %v560_v29  ;;  %v12889_v29 = vld [vmem:[%s16873_s2 + $0x284] ss:$52 sps:$4 sm:$0xff]   ;;  %v12887_v30 = vld [vmem:[%s16873_s2 + $0x280] ss:$52 sps:$4 sm:$0xff]   ;;  %v12890_v31 = vld [vmem:[%s16873_s2 + $0x288] ss:$52 sps:$4 sm:$0xff]  }
 0x17e   :  { %1102 = vmatpush1.bf16.msra.mxu0 %v12875_v22  ;;  %11945 = vmatpush3.bf16.msra.mxu1 %v12878_v23 }
 0x17f   :  { %v569_v37 = vcombine.high %v563_v35, %v563_v35  ;;  %v13986_v40 = vadd.f32 %v608_v38, %v563_v35  ;;  %v13988_v41 = vadd.f32 %v608_v38, %v568_v36  ;;  %11946 = vmatprep.subr.bf16.mxu1 %v13641_v34  ;;  %1103 = vmatprep.subr.bf16.mxu0 %v12881_v14  ;;  %v12891_v35 = vld [vmem:[%s16873_s2 + $0x2e8] ss:$52 sps:$4 sm:$0xff]   ;;  %v12894_v36 = vld [vmem:[%s16873_s2 + $0x2f0] ss:$52 sps:$4 sm:$0xff]  }
 0x181   :  { %v13990_v42 = vadd.f32 %v608_v38, %v569_v37 }
 0x182   :  { %1104 = vmatpush1.bf16.msra.mxu0 %v12879_v24  ;;  %11947 = vmatpush3.bf16.msra.mxu1 %v12882_v25  ;;  %v1209_v25 = vrot.slane %v13995_v45, %v14131_v19 }
 0x183   :  { %11948 = vmatprep.subr.bf16.mxu1 %v13641_v34  ;;  %1105 = vmatprep.subr.bf16.mxu0 %v12885_v26 }
 0x186   :  { %1106 = vmatpush1.bf16.msra.mxu0 %v12883_v27  ;;  %11949 = vmatpush3.bf16.msra.mxu1 %v12886_v28 }
 0x187   :  { %1107 = vmatprep.subr.bf16.mxu0 %v12889_v29  ;;  %11950 = vmatprep.subr.bf16.mxu1 %v13641_v34 }
 0x18a   :  { %1108 = vmatpush1.bf16.msra.mxu0 %v12887_v30  ;;  %11951 = vmatpush3.bf16.msra.mxu1 %v12890_v31 }
 0x18b   :  { %1109 = vmatprep.subr.bf16.mxu0 %v12893_v32  ;;  %11952 = vmatprep.subr.bf16.mxu1 %v13641_v34 }
 0x18e   :  { %1110 = vmatpush1.bf16.msra.mxu0 %v12891_v35  ;;  %11953 = vmatpush3.bf16.msra.mxu1 %v12894_v36 }
 0x18f   :  { %11958 = vmatprep.subr.bf16.mxu1 %v13641_v34  ;;  %11982 = vmatprep.subr.bf16.mxu0 %v13641_v34 }
 0x225   :  { %v851_v50 = vpop.f32.mrb[4].mxu1 }
 0x226   :  { %v852_v51 = vadd.f32 %v851_v50, %v753_v48  ;;  %v11936_v52 = vpop.f32.mrb[5].mxu1  ;;  %v14111_v50 = vsub.s32 1, %v13711_v6 }
 0x227   :  { %v854_v53 = vpop.f32.mrb[6].mxu1  ;;  %v14116_v52 = vsub.s32 2, %v13711_v6 }
 0x228   :  { %v14006_v54 = vrot.slane %v852_v51, %v14003_v49  ;;  %v11937_v55 = vpop.f32.mrb[7].mxu1  ;;  %v898_v51 = vrot.slane %v13995_v45, %v14111_v50 }
 0x229   :  { %v904_v60 = vrot.slane %v13995_v45, %v14116_v52 }
 0x22a   :  { %v869_v56 = vsel %vm868_vm8, %v14006_v54, 0.0  ;;  %v14012_v57 = vcombine.high %v14006_v54, %v14006_v54 }
 0x22b   :  { %870 = vadd.xlane.f32.xlu0 %v869_v56 }
 0x22c   :  { %v872_v58 = vsel %vm868_vm8, %v14012_v57, 0.0 }
 0x22d   :  { %873 = vadd.xlane.f32.xlu1 %v872_v58 }
 0x2b8   :  { %v871_v63 = vpop.xlane.xlu0 %870 }
 0x2b9   :  { %v875_v1 = vmul.f32 0.0078125, %v871_v63 }
 0x2ba   :  { %v874_v2 = vpop.xlane.xlu1 %873 }
 0x2bb   :  { %v14027_v3 = vsub.f32 %v14006_v54, %v875_v1  ;;  %v876_v4 = vmul.f32 0.0078125, %v874_v2 }
 0x2bd   :  { %v14030_v5 = vsub.f32 %v14012_v57, %v876_v4  ;;  %v879_v7 = vmul.f32 %v14027_v3, %v14027_v3 }
 0x2bf   :  { %v881_v8 = vsel %vm868_vm8, %v879_v7, 0.0  ;;  %v880_v10 = vmul.f32 %v14030_v5, %v14030_v5 }
 0x2c0   :  { %882 = vadd.xlane.f32.xlu0 %v881_v8 }
 0x2c1   :  { %v884_v15 = vsel %vm868_vm8, %v880_v10, 0.0 }
 0x2c2   :  { %885 = vadd.xlane.f32.xlu1 %v884_v15  ;;  %v14128_v15 = vsub.s32 3, %v13711_v6 }
 0x2c4   :  { %v1201_v23 = vrot.slane %v13995_v45, %v14128_v15 }
 0x34d   :  { %v883_v37 = vpop.xlane.xlu0 %882 }
 0x34e   :  { %v887_v38 = vmul.f32 0.0078125, %v883_v37 }
 0x34f   :  { %v886_v43 = vpop.xlane.xlu1 %885 }
 0x350   :  { %v889_v44 = vadd.f32 1e-05, %v887_v38  ;;  %v888_v47 = vmul.f32 0.0078125, %v886_v43 }
 0x352   :  { %13211 = vrsqrt.f32 %v889_v44  ;;  %v890_v48 = vadd.f32 1e-05, %v888_v47 }
 0x354   :  { %13213 = vrsqrt.f32 %v890_v48 }
 0x35c   :  { %v13212_v53 = vpop.eup %13211 }
 0x35d   :  { %v893_v55 = vmul.f32 %v13212_v53, %v14027_v3 }
 0x35e   :  { %v13214_v56 = vpop.eup %13213 }
 0x35f   :  { %v894_v58 = vmul.f32 %v13214_v56, %v14030_v5  ;;  %v899_v59 = vmul.f32 %v898_v51, %v893_v55  ;;  %v14168_v55 = vsub.s32 5, %v13711_v6 }
 0x361   :  { %v900_v62 = vmul.f32 %v898_v51, %v894_v58  ;;  %v905_v63 = vadd.f32 %v904_v60, %v899_v59 }
 0x363   :  { %v906_v1 = vadd.f32 %v904_v60, %v900_v62  ;;  %v1221_v60 = vrot.slane %v13995_v45, %v14168_v55 }
 0x365   :  { %v957_v2 = vcombine.low %v905_v63, %v906_v1 }
 0x367   :  { %v964_v4 = vrot.slane %v957_v2, %v14003_v49 }
 0x369   :  { %v966_v7 = vpack.c.bf16 %v964_v4, %v964_v4 }
 0x36b   :  { %1128 = vmatmul.mubr.bf16.vlgmr.msra.gmra.mrb[8].mxu0 %v966_v7  ;;  %11955 = vmatmul.mubr.bf16.vlgmr.msra.gmra.mrb[8].mxu1 %v966_v7 }
 0x36c   :  { %11960 = vmatprep.mubr.msk.bf16.mxu1 %vm13642_vm1, %v13641_v34  ;;  %11984 = vmatprep.mubr.msk.bf16.mxu0 %vm13642_vm1, %v13641_v34 }
 0x43e   :  { %v1129_v3 = vpop.f32.mrb[8].mxu0  ;;  %v1170_v5 = vpop.f32.mrb[8].mxu1 }
 0x43f   :  { %v1131_v8 = vpop.f32.mrb[9].mxu0  ;;  %v11956_v10 = vpop.f32.mrb[9].mxu1  ;;  %v1193_v13 = vrot.slane %v1170_v5, %v14003_v49 }
 0x440   :  { %v1179_v16 = vcombine.low %v1129_v3, %v1131_v8  ;;  %v1133_v17 = vpop.f32.mrb[10].mxu0  ;;  %v1173_v18 = vpop.f32.mrb[10].mxu1 }
 0x441   :  { %v1134_v20 = vpop.f32.mrb[11].mxu0  ;;  %v11957_v21 = vpop.f32.mrb[11].mxu1 }
 0x442   :  { %v1186_v22 = vrot.slane %v1179_v16, %v14003_v49 }
 0x444   :  { %v1194_v14 = vcombine.low %v1186_v22, %v1193_v13  ;;  %v14137_v24 = vcombine.high %v1186_v22, %v1193_v13 }
 0x446   :  { %v1210_v26 = vrot.slane %v1194_v14, 2  ;;  %v1211_v27 = vrot.slane %v14137_v24, 2  ;;  %v1202_v28 = vadd.f32 %v1201_v23, %v1194_v14  ;;  %v1203_v37 = vadd.f32 %v1201_v23, %v14137_v24 }
 0x447   :  { %v1222_v62 = vrot.slane %v1194_v14, 4  ;;  %v1223_v10 = vrot.slane %v14137_v24, 4 }
 0x448   :  { %v1214_v29 = vadd.f32 %v1210_v26, %v1209_v25  ;;  %v1204_v30 = vpack.c.bf16 %v1202_v28, %v1202_v28  ;;  %v1215_v31 = vadd.f32 %v1211_v27, %v1209_v25  ;;  %v1205_v38 = vpack.c.bf16 %v1203_v37, %v1203_v37 }
 0x449   :  { %v1226_v4 = vadd.f32 %v1222_v62, %v1221_v60  ;;  %v1227_v18 = vadd.f32 %v1223_v10, %v1221_v60 }
 0x44a   :  { %v1216_v32 = vpack.c.bf16 %v1214_v29, %v1214_v29  ;;  %1232 = vrot.lane.b32.xlu1 %v1204_v30, %s13645_s11  ;;  %v1217_v36 = vpack.c.bf16 %v1215_v31, %v1215_v31 }
 0x44b   :  { %v14186_v5 = vpack.c.bf16 %v1226_v4, %v1226_v4  ;;  %v14203_v21 = vpack.c.bf16 %v1227_v18, %v1227_v18 }
 0x44c   :  { %1246 = vrot.lane.b32.xlu0 %v1216_v32, %s13645_s11  ;;  %v1277_v35 = vsel %vm1272_vm9, %v1216_v32, 0  ;;  %v1323_v43 = vsel %vm1272_vm9, %v1217_v36, 0 }
 0x44d   :  { %11959 = vmatpush3.bf16.xpose.msra.mxu1 %v1277_v35  ;;  %v1743_v16 = vsel %vm628_vm0, %v14186_v5, 0  ;;  %v1789_v22 = vsel %vm628_vm0, %v14203_v21, 0 }
 0x44e   :  { %11964 = vmatprep.subr.bf16.mxu1 %v13641_v34  ;;  %1248 = vrot.lane.b32.xlu1 %v1217_v36, %s13645_s11 }
 0x450   :  { %1250 = vrot.lane.b32.xlu0 %v1216_v32, %s13646_s0 }
 0x452   :  { %1234 = vrot.lane.b32.xlu1 %v1205_v38, %s13645_s11 }
 0x454   :  { %1236 = vrot.lane.b32.xlu0 %v1204_v30, %s13646_s0  ;;  %11961 = vmatmul.mubr.msk.bf16.vlgmr.msra.gmra.mrb[12].mxu1 %vm1272_vm9, %v1204_v30 }
 0x455   :  { %11965 = vmatpush3.bf16.xpose.msra.mxu1 %v1323_v43  ;;  %11966 = vmatprep.mubr.msk.bf16.mxu1 %vm13642_vm1, %v13641_v34 }
 0x456   :  { %11970 = vmatprep.subr.bf16.mxu1 %v13641_v34  ;;  %1252 = vrot.lane.b32.xlu1 %v1217_v36, %s13646_s0 }
 0x458   :  { %1254 = vrot.lane.b32.xlu0 %v1216_v32, %s13647_s12 }
 0x45a   :  { %1238 = vrot.lane.b32.xlu1 %v1205_v38, %s13646_s0 }
 0x45c   :  { %1240 = vrot.lane.b32.xlu0 %v1204_v30, %s13647_s12  ;;  %11967 = vmatmul.mubr.msk.bf16.vlgmr.msra.gmra.mrb[16].mxu1 %vm1272_vm9, %v1205_v38 }
 0x45d   :  { %11972 = vmatprep.mubr.msk.bf16.mxu1 %vm13642_vm1, %v13641_v34 }
 0x45e   :  { %1256 = vrot.lane.b32.xlu1 %v1217_v36, %s13647_s12 }
 0x462   :  { %1242 = vrot.lane.b32.xlu1 %v1205_v38, %s13647_s12 }
 0x4bc   :  { %v1233_v44 = vpop.permute.xlu1 %1232 }
 0x4be   :  { %v1247_v47 = vpop.permute.xlu0 %1246 }
 0x4bf   :  { %v1369_v48 = vsel %vm1272_vm9, %v1247_v47, 0 }
 0x4c0   :  { %11971 = vmatpush3.bf16.xpose.msra.mxu1 %v1369_v48  ;;  %v1249_v51 = vpop.permute.xlu1 %1248 }
 0x4c1   :  { %11976 = vmatprep.subr.bf16.mxu1 %v13641_v34  ;;  %v1415_v63 = vsel %vm1272_vm9, %v1249_v51, 0 }
 0x4c2   :  { %v1251_v53 = vpop.permute.xlu0 %1250 }
 0x4c3   :  { %v1461_v56 = vsel %vm1272_vm9, %v1251_v53, 0 }
 0x4c4   :  { %11983 = vmatpush3.bf16.xpose.msra.mxu0 %v1461_v56  ;;  %v1235_v58 = vpop.permute.xlu1 %1234 }
 0x4c5   :  { %11994 = vmatprep.subr.bf16.mxu0 %v13641_v34 }
 0x4c6   :  { %v1237_v59 = vpop.permute.xlu0 %1236 }
 0x4c7   :  { %11973 = vmatmul.mubr.msk.bf16.vlgmr.msra.gmra.mrb[20].mxu1 %vm1272_vm9, %v1233_v44 }
 0x4c8   :  { %11977 = vmatpush3.bf16.xpose.msra.mxu1 %v1415_v63  ;;  %11978 = vmatprep.mubr.msk.bf16.mxu1 %vm13642_vm1, %v13641_v34  ;;  %v1253_v1 = vpop.permute.xlu1 %1252 }
 0x4c9   :  { %11988 = vmatprep.subr.bf16.mxu1 %v13641_v34  ;;  %v1507_v3 = vsel %vm1272_vm9, %v1253_v1, 0 }
 0x4ca   :  { %v1255_v2 = vpop.permute.xlu0 %1254 }
 0x4cb   :  { %v1553_v7 = vsel %vm1272_vm9, %v1255_v2, 0  ;;  %11985 = vmatmul.mubr.msk.bf16.vlgmr.msra.gmra.mrb[12].mxu0 %vm1272_vm9, %v1237_v59 }
 0x4cc   :  { %11995 = vmatpush3.bf16.xpose.msra.mxu0 %v1553_v7  ;;  %11996 = vmatprep.mubr.msk.bf16.mxu0 %vm13642_vm1, %v13641_v34  ;;  %v1239_v45 = vpop.permute.xlu1 %1238 }
 0x4cd   :  { %12006 = vmatprep.subr.bf16.mxu0 %v13641_v34 }
 0x4ce   :  { %v1241_v8 = vpop.permute.xlu0 %1240 }
 0x4cf   :  { %11979 = vmatmul.mubr.msk.bf16.vlgmr.msra.gmra.mrb[24].mxu1 %vm1272_vm9, %v1235_v58 }
 0x4d0   :  { %11989 = vmatpush3.bf16.xpose.msra.mxu1 %v1507_v3  ;;  %11990 = vmatprep.mubr.msk.bf16.mxu1 %vm13642_vm1, %v13641_v34  ;;  %v1257_v17 = vpop.permute.xlu1 %1256 }
 0x4d1   :  { %12000 = vmatprep.subr.bf16.mxu1 %v13641_v34  ;;  %v1599_v20 = vsel %vm1272_vm9, %v1257_v17, 0 }
 0x4d3   :  { %11997 = vmatmul.mubr.msk.bf16.vlgmr.msra.gmra.mrb[16].mxu0 %vm1272_vm9, %v1241_v8 }
 0x4d4   :  { %12007 = vmatpush3.bf16.msra.mxu0 %v1743_v16  ;;  %12008 = vmatprep.mubr.msk.bf16.mxu0 %vm13642_vm1, %v13641_v34  ;;  %v1243_v13 = vpop.permute.xlu1 %1242 }
 0x4d5   :  { %12018 = vmatprep.subr.bf16.mxu0 %v13641_v34 }
 0x4d7   :  { %11991 = vmatmul.mubr.msk.bf16.vlgmr.msra.gmra.mrb[28].mxu1 %vm1272_vm9, %v1239_v45 }
 0x4d8   :  { %12001 = vmatpush3.bf16.xpose.msra.mxu1 %v1599_v20  ;;  %12002 = vmatprep.mubr.msk.bf16.mxu1 %vm13642_vm1, %v13641_v34 }
 0x4d9   :  { %12012 = vmatprep.subr.bf16.mxu1 %v13641_v34 }
 0x4df   :  { %12003 = vmatmul.mubr.msk.bf16.vlgmr.msra.gmra.mrb[32].mxu1 %vm1272_vm9, %v1243_v13 }
 0x4e0   :  { %12013 = vmatpush3.bf16.msra.mxu1 %v1789_v22  ;;  %12014 = vmatprep.mubr.msk.bf16.mxu1 %vm13642_vm1, %v13641_v34 }
 0x4e1   :  { %12024 = vmatprep.subr.bf16.mxu1 %v13641_v34 }
 0x527   :  { %v1313_v23 = vpop.f32.mrb[12].mxu1 }
 0x528   :  { %v11962_v14 = vpop.f32.mrb[13].mxu1  ;;  %v1642_v24 = vsel %vm1641_vm10, %v1313_v23, -inf }
 0x529   :  { %1643 = vmax.xlane.f32.xlu0 %v1642_v24  ;;  %v1316_v25 = vpop.f32.mrb[14].mxu1 }
 0x52a   :  { %v11963_v26 = vpop.f32.mrb[15].mxu1 }
 0x52f   :  { %v1359_v27 = vpop.f32.mrb[16].mxu1 }
 0x530   :  { %v11968_v28 = vpop.f32.mrb[17].mxu1  ;;  %v1645_v29 = vsel %vm1641_vm10, %v1359_v27, -inf }
 0x531   :  { %1646 = vmax.xlane.f32.xlu1 %v1645_v29  ;;  %v1362_v30 = vpop.f32.mrb[18].mxu1 }
 0x532   :  { %v11969_v31 = vpop.f32.mrb[19].mxu1 }
 0x59a   :  { %v1405_v32 = vpop.f32.mrb[20].mxu1 }
 0x59b   :  { %v11974_v35 = vpop.f32.mrb[21].mxu1  ;;  %v1648_v36 = vsel %vm1641_vm10, %v1405_v32, -inf }
 0x59c   :  { %1649 = vmax.xlane.f32.xlu0 %v1648_v36  ;;  %v1408_v37 = vpop.f32.mrb[22].mxu1 }
 0x59d   :  { %v11975_v38 = vpop.f32.mrb[23].mxu1 }
 0x59e   :  { %v14214_v43 = vpop.f32.mrb[12].mxu0 }
 0x59f   :  { %v11986_v44 = vpop.f32.mrb[13].mxu0  ;;  %v1654_v63 = vsel %vm1641_vm10, %v14214_v43, -inf }
 0x5a0   :  { %v1500_v47 = vpop.f32.mrb[14].mxu0 }
 0x5a1   :  { %v11987_v48 = vpop.f32.mrb[15].mxu0 }
 0x5a2   :  { %v1451_v51 = vpop.f32.mrb[24].mxu1 }
 0x5a3   :  { %v11980_v53 = vpop.f32.mrb[25].mxu1  ;;  %v1651_v56 = vsel %vm1641_vm10, %v1451_v51, -inf }
 0x5a4   :  { %1652 = vmax.xlane.f32.xlu0 %v1651_v56  ;;  %v1454_v58 = vpop.f32.mrb[26].mxu1 }
 0x5a5   :  { %v11981_v59 = vpop.f32.mrb[27].mxu1 }
 0x5a6   :  { %v14217_v60 = vpop.f32.mrb[16].mxu0 }
 0x5a7   :  { %v11998_v62 = vpop.f32.mrb[17].mxu0  ;;  %v1660_v45 = vsel %vm1641_vm10, %v14217_v60, -inf }
 0x5a8   :  { %v1592_v1 = vpop.f32.mrb[18].mxu0  ;;  %1655 = vmax.xlane.f32.xlu0 %v1654_v63 }
 0x5a9   :  { %v11999_v2 = vpop.f32.mrb[19].mxu0 }
 0x5aa   :  { %v1543_v4 = vpop.f32.mrb[28].mxu1 }
 0x5ab   :  { %v11992_v7 = vpop.f32.mrb[29].mxu1  ;;  %v1657_v3 = vsel %vm1641_vm10, %v1543_v4, -inf }
 0x5ac   :  { %1661 = vmax.xlane.f32.xlu0 %v1660_v45  ;;  %1658 = vmax.xlane.f32.xlu1 %v1657_v3  ;;  %v1546_v8 = vpop.f32.mrb[30].mxu1 }
 0x5ad   :  { %v11993_v10 = vpop.f32.mrb[31].mxu1 }
 0x5b2   :  { %v1635_v16 = vpop.f32.mrb[32].mxu1 }
 0x5b3   :  { %v12004_v17 = vpop.f32.mrb[33].mxu1  ;;  %v1663_v18 = vsel %vm1641_vm10, %v1635_v16, -inf }
 0x5b4   :  { %1664 = vmax.xlane.f32.xlu1 %v1663_v18  ;;  %v1638_v20 = vpop.f32.mrb[34].mxu1 }
 0x5b5   :  { %v12005_v13 = vpop.f32.mrb[35].mxu1 }
 0x5b6   :  { %v1644_v22 = vpop.xlane.xlu0 %1643 }
 0x5b7   :  { %v1666_v14 = vsub.f32 %v1313_v23, %v1644_v22 }
 0x5b9   :  { %v1674_v24 = vmul.f32 1.442695, %v1666_v14 }
 0x5bb   :  { %13215 = vpow2.f32 %v1674_v24 }
 0x5be   :  { %v1647_v25 = vpop.xlane.xlu1 %1646 }
 0x5bf   :  { %v1667_v26 = vsub.f32 %v1359_v27, %v1647_v25 }
 0x5c1   :  { %v1676_v28 = vmul.f32 1.442695, %v1667_v26 }
 0x5c3   :  { %13217 = vpow2.f32 %v1676_v28 }
 0x5c5   :  { %v13216_v29 = vpop.eup %13215 }
 0x5c6   :  { %v1690_v30 = vsel %vm1641_vm10, %v13216_v29, 0.0 }
 0x5c7   :  { %1691 = vadd.xlane.f32.xlu0 %v1690_v30 }
 0x5cd   :  { %v13218_v31 = vpop.eup %13217 }
 0x5ce   :  { %v1693_v35 = vsel %vm1641_vm10, %v13218_v31, 0.0 }
 0x5cf   :  { %1694 = vadd.xlane.f32.xlu1 %v1693_v35 }
 0x5e0   :  { %1262 = vrot.lane.b32.xlu1 %v14203_v21, %s13645_s11 }
 0x5e4   :  { %1264 = vrot.lane.b32.xlu1 %v14186_v5, %s13646_s0 }
 0x5e8   :  { %1266 = vrot.lane.b32.xlu1 %v14203_v21, %s13646_s0 }
 0x629   :  { %v1650_v23 = vpop.xlane.xlu0 %1649 }
 0x62a   :  { %v1668_v27 = vsub.f32 %v1405_v32, %v1650_v23 }
 0x62c   :  { %v1678_v36 = vmul.f32 1.442695, %v1668_v27 }
 0x62e   :  { %13219 = vpow2.f32 %v1678_v36 }
 0x631   :  { %v1653_v37 = vpop.xlane.xlu0 %1652 }
 0x632   :  { %v1669_v38 = vsub.f32 %v1451_v51, %v1653_v37 }
 0x634   :  { %v1680_v44 = vmul.f32 1.442695, %v1669_v38 }
 0x635   :  { %v1656_v2 = vpop.xlane.xlu0 %1655 }
 0x636   :  { %13221 = vpow2.f32 %v1680_v44  ;;  %v1670_v10 = vsub.f32 %v14214_v43, %v1656_v2 }
 0x638   :  { %v14233_v47 = vpop.eup %13219  ;;  %v1682_v17 = vmul.f32 1.442695, %v1670_v10 }
 0x639   :  { %v1659_v48 = vpop.xlane.xlu1 %1658  ;;  %v1696_v53 = vsel %vm1641_vm10, %v14233_v47, 0.0  ;;  %v1662_v45 = vpop.xlane.xlu0 %1661 }
 0x63a   :  { %v1671_v56 = vsub.f32 %v1543_v4, %v1659_v48  ;;  %1697 = vadd.xlane.f32.xlu0 %v1696_v53  ;;  %v1672_v18 = vsub.f32 %v14217_v60, %v1662_v45 }
 0x63c   :  { %v1684_v58 = vmul.f32 1.442695, %v1671_v56  ;;  %v1686_v22 = vmul.f32 1.442695, %v1672_v18 }
 0x63e   :  { %13223 = vpow2.f32 %v1684_v58 }
 0x640   :  { %v14237_v59 = vpop.eup %13221 }
 0x641   :  { %v1665_v62 = vpop.xlane.xlu1 %1664  ;;  %v1699_v32 = vsel %vm1641_vm10, %v14237_v59, 0.0 }
 0x642   :  { %v1673_v63 = vsub.f32 %v1635_v16, %v1665_v62  ;;  %1700 = vadd.xlane.f32.xlu1 %v1699_v32 }
 0x644   :  { %v1688_v51 = vmul.f32 1.442695, %v1673_v63 }
 0x646   :  { %13225 = vpow2.f32 %v1688_v51 }
 0x648   :  { %v14241_v1 = vpop.eup %13223 }
 0x649   :  { %v1705_v7 = vsel %vm1641_vm10, %v14241_v1, 0.0 }
 0x64a   :  { %1706 = vadd.xlane.f32.xlu1 %v1705_v7 }
 0x650   :  { %v14245_v4 = vpop.eup %13225  ;;  %1260 = vrot.lane.b32.xlu0 %v14186_v5, %s13645_s11 }
 0x651   :  { %v1711_v3 = vsel %vm1641_vm10, %v14245_v4, 0.0 }
 0x652   :  { %1712 = vadd.xlane.f32.xlu1 %v1711_v3 }
 0x654   :  { %v1692_v8 = vpop.xlane.xlu0 %1691 }
 0x655   :  { %13227 = vrcp.f32 %v1692_v8 }
 0x65c   :  { %v1695_v16 = vpop.xlane.xlu1 %1694 }
 0x65d   :  { %13229 = vrcp.f32 %v1695_v16 }
 0x65e   :  { %13231 = vpow2.f32 %v1682_v17 }
 0x65f   :  { %v13228_v20 = vpop.eup %13227  ;;  %13233 = vpow2.f32 %v1686_v22 }
 0x660   :  { %v1722_v13 = vmul.f32 %v13228_v20, %v13216_v29  ;;  %v1263_v25 = vpop.permute.xlu1 %1262 }
 0x661   :  { %v1881_v28 = vsel %vm628_vm0, %v1263_v25, 0 }
 0x662   :  { %v1730_v14 = vpack.c.bf16 %v1722_v13, %v1722_v13 }
 0x663   :  { %1270 = vrot.lane.b32.xlu1 %v14203_v21, %s13647_s12 }
 0x664   :  { %12009 = vmatmul.mubr.msk.bf16.vlgmr.msra.gmra.mrb[20].mxu0 %vm1738_vm11, %v1730_v14 }
 0x665   :  { %12020 = vmatprep.mubr.msk.bf16.mxu0 %vm13642_vm1, %v13641_v34 }
 0x667   :  { %v13230_v43 = vpop.eup %13229 }
 0x668   :  { %v1723_v24 = vmul.f32 %v13230_v43, %v13218_v31  ;;  %v13232_v26 = vpop.eup %13231  ;;  %v1265_v31 = vpop.permute.xlu1 %1264 }
 0x669   :  { %v1702_v21 = vsel %vm1641_vm10, %v13232_v26, 0.0  ;;  %v13234_v29 = vpop.eup %13233  ;;  %v1927_v53 = vsel %vm628_vm0, %v1265_v31, 0 }
 0x66a   :  { %v1731_v60 = vpack.c.bf16 %v1723_v24, %v1723_v24  ;;  %v1708_v30 = vsel %vm1641_vm10, %v13234_v29, 0.0 }
 0x66c   :  { %12015 = vmatmul.mubr.msk.bf16.vlgmr.msra.gmra.mrb[36].mxu1 %vm1738_vm11, %v1731_v60  ;;  %v1267_v23 = vpop.permute.xlu1 %1266 }
 0x66d   :  { %12025 = vmatpush3.bf16.msra.mxu1 %v1881_v28  ;;  %12026 = vmatprep.mubr.msk.bf16.mxu1 %vm13642_vm1, %v13641_v34  ;;  %v1973_v32 = vsel %vm628_vm0, %v1267_v23, 0 }
 0x66e   :  { %12036 = vmatprep.subr.bf16.mxu1 %v13641_v34 }
 0x66f   :  { %1703 = vadd.xlane.f32.xlu0 %v1702_v21 }
 0x673   :  { %1709 = vadd.xlane.f32.xlu0 %v1708_v30 }
 0x689   :  { %1268 = vrot.lane.b32.xlu0 %v14186_v5, %s13647_s12 }
 0x6c7   :  { %v1698_v35 = vpop.xlane.xlu0 %1697 }
 0x6c8   :  { %13235 = vrcp.f32 %v1698_v35 }
 0x6cb   :  { %v1261_v27 = vpop.permute.xlu0 %1260 }
 0x6cc   :  { %v1835_v36 = vsel %vm628_vm0, %v1261_v27, 0 }
 0x6cd   :  { %12019 = vmatpush3.bf16.msra.mxu0 %v1835_v36 }
 0x6ce   :  { %12030 = vmatprep.subr.bf16.mxu0 %v13641_v34 }
 0x6cf   :  { %v1701_v37 = vpop.xlane.xlu1 %1700 }
 0x6d0   :  { %13237 = vrcp.f32 %v1701_v37 }
 0x6d2   :  { %v13236_v38 = vpop.eup %13235 }
 0x6d3   :  { %v1724_v44 = vmul.f32 %v13236_v38, %v14233_v47 }
 0x6d5   :  { %v1732_v48 = vpack.c.bf16 %v1724_v44, %v1724_v44  ;;  %v12895_v44 = vld [vmem:[%s16873_s2 + $0x1c] ss:$52 sps:$4 sm:$0xff]  }
 0x6d7   :  { %12021 = vmatmul.mubr.msk.bf16.vlgmr.msra.gmra.mrb[24].mxu0 %vm1738_vm11, %v1732_v48  ;;  %v1707_v5 = vpop.xlane.xlu1 %1706  ;;  %v12896_v48 = vld [vmem:[%s16873_s2 + $0x84] ss:$52 sps:$4 sm:$0xff]  }
 0x6d8   :  { %12031 = vmatpush3.bf16.msra.mxu0 %v1927_v53  ;;  %12032 = vmatprep.mubr.msk.bf16.mxu0 %vm13642_vm1, %v13641_v34  ;;  %13239 = vrcp.f32 %v1707_v5 }
 0x6d9   :  { %12042 = vmatprep.subr.bf16.mxu0 %v13641_v34 }
 0x6da   :  { %v13238_v56 = vpop.eup %13237 }
 0x6db   :  { %v1725_v58 = vmul.f32 %v13238_v56, %v14237_v59 }
 0x6dd   :  { %v1733_v62 = vpack.c.bf16 %v1725_v58, %v1725_v58  ;;  %v12897_v58 = vld [vmem:[%s16873_s2 + $0xec] ss:$52 sps:$4 sm:$0xff]  }
 0x6df   :  { %12027 = vmatmul.mubr.msk.bf16.vlgmr.msra.gmra.mrb[40].mxu1 %vm1738_vm11, %v1733_v62  ;;  %v1713_v47 = vpop.xlane.xlu1 %1712 }
 0x6e0   :  { %12037 = vmatpush3.bf16.msra.mxu1 %v1973_v32  ;;  %13241 = vrcp.f32 %v1713_v47  ;;  %12038 = vmatprep.mubr.msk.bf16.mxu1 %vm13642_vm1, %v13641_v34  ;;  %v12898_v32 = vld [vmem:[%s16873_s2 + $0x154] ss:$52 sps:$4 sm:$0xff]  }
 0x6e1   :  { %12048 = vmatprep.subr.bf16.mxu1 %v13641_v34 }
 0x6e2   :  { %v13240_v63 = vpop.eup %13239 }
 0x6e3   :  { %v1727_v51 = vmul.f32 %v13240_v63, %v14241_v1  ;;  %v1271_v2 = vpop.permute.xlu1 %1270 }
 0x6e4   :  { %v2065_v59 = vsel %vm628_vm0, %v1271_v2, 0 }
 0x6e5   :  { %v1735_v7 = vpack.c.bf16 %v1727_v51, %v1727_v51 }
 0x6e7   :  { %12039 = vmatmul.mubr.msk.bf16.vlgmr.msra.gmra.mrb[44].mxu1 %vm1738_vm11, %v1735_v7  ;;  %v12899_v7 = vld [vmem:[%s16873_s2 + $0x1bc] ss:$52 sps:$4 sm:$0xff]  }
 0x6e8   :  { %12049 = vmatpush3.bf16.msra.mxu1 %v2065_v59  ;;  %12050 = vmatprep.mubr.msk.bf16.mxu1 %vm13642_vm1, %v13641_v34  ;;  %v12900_v59 = vld [vmem:[%s16873_s2 + $0x224] ss:$52 sps:$4 sm:$0xff]  }
 0x6ea   :  { %v13242_v45 = vpop.eup %13241 }
 0x6eb   :  { %v1729_v3 = vmul.f32 %v13242_v45, %v14245_v4  ;;  %v12901_v45 = vld [vmem:[%s16873_s2 + $0x28c] ss:$52 sps:$4 sm:$0xff]  }
 0x6ed   :  { %v1737_v8 = vpack.c.bf16 %v1729_v3, %v1729_v3 }
 0x6ef   :  { %12051 = vmatmul.mubr.msk.bf16.vlgmr.msra.gmra.mrb[48].mxu1 %vm1738_vm11, %v1737_v8  ;;  %v621_v8 = vrot.slane %v13717_v11, %v13998_v46 }
 0x6f0   :  { %2590 = vmatprep.mubr.bf16.mxu1 %v13644_v33 }
 0x6fc   :  { %v1704_v10 = vpop.xlane.xlu0 %1703 }
 0x6fd   :  { %13243 = vrcp.f32 %v1704_v10  ;;  %v12902_v10 = vld [vmem:[%s16873_s2 + $0x2f4] ss:$52 sps:$4 sm:$0xff]  }
 0x700   :  { %v1710_v1 = vpop.xlane.xlu0 %1709 }
 0x701   :  { %13245 = vrcp.f32 %v1710_v1 }
 0x704   :  { %v1269_v18 = vpop.permute.xlu0 %1268 }
 0x705   :  { %v2019_v22 = vsel %vm628_vm0, %v1269_v18, 0  ;;  %v625_v18 = vadd.f32 %v621_v8, %v13988_v41 }
 0x707   :  { %v13244_v16 = vpop.eup %13243 }
 0x708   :  { %v1726_v17 = vmul.f32 %v13244_v16, %v13232_v26 }
 0x70a   :  { %v1734_v20 = vpack.c.bf16 %v1726_v17, %v1726_v17 }
 0x70b   :  { %v13246_v13 = vpop.eup %13245 }
 0x70c   :  { %12033 = vmatmul.mubr.msk.bf16.vlgmr.msra.gmra.mrb[28].mxu0 %vm1738_vm11, %v1734_v20  ;;  %v1728_v4 = vmul.f32 %v13246_v13, %v13234_v29  ;;  %v664_v13 = vsel %vm660_vm12, %v625_v18, 0.0 }
 0x70d   :  { %12043 = vmatpush3.bf16.msra.mxu0 %v2019_v22  ;;  %12044 = vmatprep.mubr.msk.bf16.mxu0 %vm13642_vm1, %v13641_v34 }
 0x70e   :  { %12054 = vmatprep.subr.bf16.mxu0 %v13641_v34  ;;  %v1736_v14 = vpack.c.bf16 %v1728_v4, %v1728_v4 }
 0x714   :  { %12045 = vmatmul.mubr.msk.bf16.vlgmr.msra.gmra.mrb[32].mxu0 %vm1738_vm11, %v1736_v14  ;;  %v617_v14 = vrot.slane %v13720_v12, %v13998_v46 }
 0x715   :  { %12070 = vmatprep.mubr.msk.bf16.mxu0 %vm13642_vm1, %v13641_v34  ;;  %12055 = vmatpush3.bf16.msra.mxu0 %v12895_v44 }
 0x716   :  { %12056 = vmatprep.subr.bf16.mxu0 %v13641_v34 }
 0x719   :  { %12057 = vmatpush3.bf16.msra.mxu0 %v12896_v48 }
 0x71a   :  { %12058 = vmatprep.subr.bf16.mxu0 %v13641_v34 }
 0x71d   :  { %12059 = vmatpush3.bf16.msra.mxu0 %v12897_v58 }
 0x71e   :  { %12060 = vmatprep.subr.bf16.mxu0 %v13641_v34 }
 0x721   :  { %12061 = vmatpush3.bf16.msra.mxu0 %v12898_v32 }
 0x722   :  { %12062 = vmatprep.subr.bf16.mxu0 %v13641_v34 }
 0x725   :  { %12063 = vmatpush3.bf16.msra.mxu0 %v12899_v7 }
 0x726   :  { %12064 = vmatprep.subr.bf16.mxu0 %v13641_v34 }
 0x729   :  { %12065 = vmatpush3.bf16.msra.mxu0 %v12900_v59 }
 0x72a   :  { %12066 = vmatprep.subr.bf16.mxu0 %v13641_v34 }
 0x72d   :  { %12067 = vmatpush3.bf16.msra.mxu0 %v12901_v45 }
 0x72e   :  { %12068 = vmatprep.subr.bf16.mxu0 %v13641_v34 }
 0x731   :  { %12069 = vmatpush3.bf16.msra.mxu0 %v12902_v10 }
 0x737   :  { %v14297_v43 = vpop.f32.mrb[20].mxu0 }
 0x738   :  { %v12010_v24 = vpop.f32.mrb[21].mxu0 }
 0x739   :  { %v1782_v25 = vpop.f32.mrb[22].mxu0  ;;  %v624_v24 = vadd.f32 %v617_v14, %v13984_v39 }
 0x73a   :  { %v12011_v60 = vpop.f32.mrb[23].mxu0 }
 0x73b   :  { %v661_v25 = vsel %vm660_vm12, %v624_v24, 0.0  ;;  %v626_v60 = vadd.f32 %v617_v14, %v13986_v40 }
 0x73d   :  { %v667_v41 = vsel %vm660_vm12, %v626_v60, 0.0 }
 0x73f   :  { %v14299_v26 = vpop.f32.mrb[36].mxu1 }
 0x740   :  { %v12016_v28 = vpop.f32.mrb[37].mxu1 }
 0x741   :  { %v1828_v21 = vpop.f32.mrb[38].mxu1  ;;  %v627_v28 = vadd.f32 %v621_v8, %v13990_v42 }
 0x742   :  { %v12017_v30 = vpop.f32.mrb[39].mxu1 }
 0x743   :  { %v670_v21 = vsel %vm660_vm12, %v627_v28, 0.0 }
 0x7aa   :  { %v1871_v31 = vpop.f32.mrb[24].mxu0 }
 0x7ab   :  { %2109 = vrot.lane.b32.xlu0 %v1871_v31, %s13647_s12  ;;  %v12022_v29 = vpop.f32.mrb[25].mxu0 }
 0x7ac   :  { %v1874_v35 = vpop.f32.mrb[26].mxu0 }
 0x7ad   :  { %v12023_v23 = vpop.f32.mrb[27].mxu0 }
 0x7b2   :  { %v1917_v27 = vpop.f32.mrb[40].mxu1 }
 0x7b3   :  { %2111 = vrot.lane.b32.xlu1 %v1917_v27, %s13647_s12  ;;  %v12028_v36 = vpop.f32.mrb[41].mxu1 }
 0x7b4   :  { %v1920_v37 = vpop.f32.mrb[42].mxu1 }
 0x7b5   :  { %v12029_v38 = vpop.f32.mrb[43].mxu1 }
 0x7ba   :  { %v2009_v53 = vpop.f32.mrb[44].mxu1 }
 0x7bb   :  { %2119 = vrot.lane.b32.xlu1 %v2009_v53, %s13646_s0  ;;  %v12040_v5 = vpop.f32.mrb[45].mxu1 }
 0x7bc   :  { %v2012_v56 = vpop.f32.mrb[46].mxu1 }
 0x7bd   :  { %v12041_v62 = vpop.f32.mrb[47].mxu1 }
 0x7c2   :  { %v2101_v47 = vpop.f32.mrb[48].mxu1 }
 0x7c3   :  { %2127 = vrot.lane.b32.xlu1 %v2101_v47, %s13645_s11  ;;  %v12052_v63 = vpop.f32.mrb[49].mxu1 }
 0x7c4   :  { %v2104_v51 = vpop.f32.mrb[50].mxu1 }
 0x7c5   :  { %v12053_v2 = vpop.f32.mrb[51].mxu1 }
 0x7df   :  { %v1963_v3 = vpop.f32.mrb[28].mxu0 }
 0x7e0   :  { %2117 = vrot.lane.b32.xlu0 %v1963_v3, %s13646_s0  ;;  %v12034_v1 = vpop.f32.mrb[29].mxu0 }
 0x7e1   :  { %v1966_v16 = vpop.f32.mrb[30].mxu0 }
 0x7e2   :  { %v12035_v17 = vpop.f32.mrb[31].mxu0 }
 0x7e7   :  { %v2055_v20 = vpop.f32.mrb[32].mxu0  ;;  %665 = vadd.xlane.f32.xlu1 %v664_v13 }
 0x7e8   :  { %2125 = vrot.lane.b32.xlu0 %v2055_v20, %s13645_s11  ;;  %v12046_v11 = vpop.f32.mrb[33].mxu0 }
 0x7e9   :  { %v2058_v22 = vpop.f32.mrb[34].mxu0 }
 0x7ea   :  { %v12047_v4 = vpop.f32.mrb[35].mxu0 }
 0x807   :  { %662 = vadd.xlane.f32.xlu0 %v661_v25  ;;  %v14368_v25 = vsub.s32 6, %v13711_v6 }
 0x80b   :  { %668 = vadd.xlane.f32.xlu0 %v667_v41 }
 0x80f   :  { %671 = vadd.xlane.f32.xlu0 %v670_v21 }
 0x81d   :  { %v2110_v31 = vpop.permute.xlu0 %2109 }
 0x81e   :  { %v2131_v39 = vsel %vm1272_vm9, %v14297_v43, %v2110_v31  ;;  %v14376_v31 = vld [vmem:[%s16876_s5] sm:$0xff] }
 0x825   :  { %v2112_v30 = vpop.permute.xlu1 %2111 }
 0x826   :  { %v2132_v40 = vsel %vm1272_vm9, %v14299_v26, %v2112_v30 }
 0x82d   :  { %v2120_v29 = vpop.permute.xlu1 %2119 }
 0x82e   :  { %v2135_v23 = vsel %vm2133_vm13, %v2132_v40, %v2120_v29  ;;  %v2154_v29 = vrot.slane %v14376_v31, %v14368_v25 }
 0x835   :  { %v2128_v12 = vpop.permute.xlu1 %2127 }
 0x836   :  { %v2138_v36 = vsel %vm2136_vm14, %v2135_v23, %v2128_v12 }
 0x852   :  { %v2118_v35 = vpop.permute.xlu0 %2117 }
 0x853   :  { %v2134_v42 = vsel %vm2133_vm13, %v2131_v39, %v2118_v35  ;;  %v13591_v39 = vld [vmem:[%s16878_s7 + $0x9] ss:$0 sm:$0xff] }
 0x85a   :  { %v2126_v27 = vpop.permute.xlu0 %2125 }
 0x85b   :  { %v2137_v37 = vsel %vm2136_vm14, %v2134_v42, %v2126_v27 }
 0x85c   :  { %v2141_v38 = vcombine.low %v2137_v37, %v2138_v36 }
 0x85e   :  { %v2148_v44 = vrot.slane %v2141_v38, %v14003_v49 }
 0x860   :  { %v2150_v48 = vpack.c.bf16 %v2148_v44, %v2148_v44  ;;  %v731_v44 = vld [vmem:[%s16876_s5 + $0x10] sm:$0x3] }
 0x862   :  { %12071 = vmatmul.mubr.bf16.vlgmr.msra.gmra.mrb[36].mxu0 %v2150_v48 }
 0x874   :  { %v666_v53 = vpop.xlane.xlu1 %665 }
 0x875   :  { %v674_v5 = vmul.f32 0.0078125, %v666_v53 }
 0x877   :  { %v678_v43 = vsub.f32 %v625_v18, %v674_v5 }
 0x879   :  { %v682_v56 = vmul.f32 %v678_v43, %v678_v43 }
 0x87b   :  { %v688_v26 = vsel %vm660_vm12, %v682_v56, 0.0 }
 0x87c   :  { %689 = vadd.xlane.f32.xlu1 %v688_v26  ;;  %v2275_v26 = vrot.slane %v731_v44, 7 }
 0x894   :  { %v663_v58 = vpop.xlane.xlu0 %662 }
 0x895   :  { %v673_v62 = vmul.f32 0.0078125, %v663_v58 }
 0x897   :  { %v677_v32 = vsub.f32 %v624_v24, %v673_v62 }
 0x898   :  { %v669_v47 = vpop.xlane.xlu0 %668 }
 0x899   :  { %v675_v63 = vmul.f32 0.0078125, %v669_v47  ;;  %v681_v51 = vmul.f32 %v677_v32, %v677_v32 }
 0x89b   :  { %v679_v2 = vsub.f32 %v626_v60, %v675_v63  ;;  %v685_v7 = vsel %vm660_vm12, %v681_v51, 0.0 }
 0x89c   :  { %686 = vadd.xlane.f32.xlu0 %v685_v7  ;;  %v672_v59 = vpop.xlane.xlu0 %671 }
 0x89d   :  { %v676_v45 = vmul.f32 0.0078125, %v672_v59  ;;  %v683_v3 = vmul.f32 %v679_v2, %v679_v2 }
 0x89f   :  { %v14361_v8 = vsub.f32 %v627_v28, %v676_v45  ;;  %v691_v10 = vsel %vm660_vm12, %v683_v3, 0.0  ;;  %v13590_v28 = vld [vmem:[%s16878_s7 + $0x8] ss:$0 sm:$0xff] }
 0x8a0   :  { %692 = vadd.xlane.f32.xlu0 %v691_v10 }
 0x8a1   :  { %v684_v1 = vmul.f32 %v14361_v8, %v14361_v8 }
 0x8a3   :  { %v694_v16 = vsel %vm660_vm12, %v684_v1, 0.0  ;;  %v2309_v1 = vsel %vm628_vm0, %v13971_v0, %v2275_v26 }
 0x8a4   :  { %695 = vadd.xlane.f32.xlu1 %v694_v16 }
 0x909   :  { %v690_v17 = vpop.xlane.xlu1 %689 }
 0x90a   :  { %v698_v18 = vmul.f32 0.0078125, %v690_v17 }
 0x90c   :  { %v702_v20 = vadd.f32 1e-05, %v698_v18 }
 0x90e   :  { %13247 = vrsqrt.f32 %v702_v20 }
 0x918   :  { %v13248_v14 = vpop.eup %13247 }
 0x919   :  { %v710_v21 = vmul.f32 %v13248_v14, %v678_v43 }
 0x91b   :  { %v718_v40 = vmul.f32 %v13590_v28, %v710_v21 }
 0x91d   :  { %v726_v53 = vadd.f32 %v13591_v39, %v718_v40  ;;  %v12911_v40 = vld [vmem:[%s16873_s2 + $0xd4] ss:$52 sps:$4 sm:$0xff]  }
 0x91f   :  { %v2282_v51 = vrot.slane %v726_v53, 5 }
 0x929   :  { %v687_v13 = vpop.xlane.xlu0 %686 }
 0x92a   :  { %v697_v11 = vmul.f32 0.0078125, %v687_v13 }
 0x92c   :  { %v701_v22 = vadd.f32 1e-05, %v697_v11 }
 0x92d   :  { %v693_v4 = vpop.xlane.xlu0 %692 }
 0x92e   :  { %13249 = vrsqrt.f32 %v701_v22  ;;  %v699_v24 = vmul.f32 0.0078125, %v693_v4 }
 0x930   :  { %v703_v60 = vadd.f32 1e-05, %v699_v24 }
 0x931   :  { %v696_v41 = vpop.xlane.xlu1 %695 }
 0x932   :  { %13251 = vrsqrt.f32 %v703_v60  ;;  %v700_v30 = vmul.f32 0.0078125, %v696_v41 }
 0x934   :  { %v704_v35 = vadd.f32 1e-05, %v700_v30 }
 0x935   :  { %v2237_v12 = vpop.f32.mrb[36].mxu0 }
 0x936   :  { %13253 = vrsqrt.f32 %v704_v35  ;;  %v2238_v23 = vadd.f32 %v2237_v12, %v2154_v29  ;;  %v12072_v42 = vpop.f32.mrb[37].mxu0  ;;  %v12905_v29 = vld [vmem:[%s16873_s2 + $0x4] ss:$52 sps:$4 sm:$0xff]   ;;  %v12908_v35 = vld [vmem:[%s16873_s2 + $0x6c] ss:$52 sps:$4 sm:$0xff]  }
 0x937   :  { %v2240_v27 = vpop.f32.mrb[38].mxu0  ;;  %2558 = vmatprep.subr.bf16.mxu1 %v12905_v29  ;;  %v12912_v12 = vld [vmem:[%s16873_s2 + $0x8] ss:$52 sps:$4 sm:$0xff]  }
 0x938   :  { %v13250_v36 = vpop.eup %13249  ;;  %v2250_v37 = vrot.slane %v2238_v23, %v14003_v49  ;;  %v12073_v38 = vpop.f32.mrb[39].mxu0  ;;  %12074 = vmatprep.subr.bf16.mxu0 %v12912_v12  ;;  %v12909_v23 = vld [vmem:[%s16873_s2 + $0xd0] ss:$52 sps:$4 sm:$0xff]  }
 0x939   :  { %v709_v48 = vmul.f32 %v13250_v36, %v677_v32  ;;  %v2310_v32 = vsel %vm628_vm0, %v13967_v61, %v2275_v26  ;;  %12075 = vmatpush3.bf16.msra.mxu0 %v12912_v12 }
 0x93a   :  { %v2251_v5 = vcombine.high %v2250_v37, %v2250_v37  ;;  %v2254_v43 = vadd.f32 %v2250_v37, %v14006_v54 }
 0x93b   :  { %v717_v56 = vmul.f32 %v13590_v28, %v709_v48 }
 0x93c   :  { %v13252_v58 = vpop.eup %13251  ;;  %v2255_v62 = vadd.f32 %v2251_v5, %v14012_v57  ;;  %v2264_v47 = vrot.slane %v2254_v43, %v13714_v9 }
 0x93d   :  { %v725_v63 = vadd.f32 %v13591_v39, %v717_v56  ;;  %v711_v7 = vmul.f32 %v13252_v58, %v679_v2  ;;  %v2312_v2 = vsel %vm602_vm5, %v2310_v32, %v2282_v51  ;;  %v12915_v51 = vld [vmem:[%s16873_s2 + $0x13c] ss:$52 sps:$4 sm:$0xff]  }
 0x93e   :  { %v2265_v59 = vcombine.high %v2264_v47, %v2264_v47  ;;  %v2292_v54 = vrot.slane %v2264_v47, %v13998_v46  ;;  %v2272_v16 = vrot.slane %v2255_v62, %v13714_v9 }
 0x93f   :  { %v2281_v45 = vrot.slane %v725_v63, 5  ;;  %v719_v3 = vmul.f32 %v13590_v28, %v711_v7  ;;  %v12916_v7 = vld [vmem:[%s16873_s2 + $0x70] ss:$52 sps:$4 sm:$0xff]  }
 0x940   :  { %v13254_v10 = vpop.eup %13253  ;;  %v2296_v57 = vrot.slane %v2265_v59, %v13998_v46  ;;  %v2300_v22 = vrot.slane %v2272_v16, %v13998_v46  ;;  %v2273_v4 = vcombine.high %v2272_v16, %v2272_v16  ;;  %v12913_v59 = vld [vmem:[%s16873_s2 + $0x138] ss:$52 sps:$4 sm:$0xff]   ;;  %12076 = vmatprep.subr.bf16.mxu0 %v12916_v7  ;;  %v12928_v16 = vld [vmem:[%s16873_s2 + $0x1a8] ss:$52 sps:$4 sm:$0xff]  }
 0x941   :  { %v2311_v17 = vsel %vm602_vm5, %v2309_v1, %v2281_v45  ;;  %v727_v18 = vadd.f32 %v13591_v39, %v719_v3  ;;  %v712_v20 = vmul.f32 %v13254_v10, %v14361_v8  ;;  %12077 = vmatpush3.bf16.msra.mxu0 %v12916_v7  ;;  %v12919_v45 = vld [vmem:[%s16873_s2 + $0x1a4] ss:$52 sps:$4 sm:$0xff]   ;;  %v12917_v3 = vld [vmem:[%s16873_s2 + $0x1a0] ss:$52 sps:$4 sm:$0xff]  }
 0x942   :  { %v14401_v61 = vsel %vm2315_vm15, %v2311_v17, %v2292_v54  ;;  %v14404_v13 = vsel %vm2315_vm15, %v2312_v2, %v2296_v57  ;;  %v2304_v41 = vrot.slane %v2273_v4, %v13998_v46  ;;  %v12923_v10 = vld [vmem:[%s16873_s2 + $0x20c] ss:$52 sps:$4 sm:$0xff]   ;;  %v12927_v57 = vld [vmem:[%s16873_s2 + $0x274] ss:$52 sps:$4 sm:$0xff]   ;;  %v12925_v17 = vld [vmem:[%s16873_s2 + $0x270] ss:$52 sps:$4 sm:$0xff]  }
 0x943   :  { %2320 = vadd.xlane.f32.xlu0 %v14401_v61  ;;  %2322 = vadd.xlane.f32.xlu1 %v14404_v13  ;;  %v2283_v0 = vrot.slane %v727_v18, 5  ;;  %v720_v11 = vmul.f32 %v13590_v28, %v712_v20  ;;  %v12903_v28 = vld [vmem:[%s16873_s2] ss:$52 sps:$4 sm:$0xff]   ;;  %v12931_v2 = vld [vmem:[%s16873_s2 + $0x2dc] ss:$52 sps:$4 sm:$0xff]  }
 0x944   :  { %2559 = vmatpush1.bf16.msra.mxu1 %v12903_v28  ;;  %v12924_v54 = vld [vmem:[%s16873_s2 + $0x140] ss:$52 sps:$4 sm:$0xff]   ;;  %v12932_v18 = vld [vmem:[%s16873_s2 + $0x210] ss:$52 sps:$4 sm:$0xff]   ;;  %v12929_v20 = vld [vmem:[%s16873_s2 + $0x2d8] ss:$52 sps:$4 sm:$0xff]  }
 0x945   :  { %v2313_v14 = vsel %vm602_vm5, %v2309_v1, %v2283_v0  ;;  %v728_v24 = vadd.f32 %v13591_v39, %v720_v11  ;;  %v12906_v39 = vld [vmem:[%s16873_s2 + $0x68] ss:$52 sps:$4 sm:$0xff]   ;;  %2560 = vmatprep.subr.bf16.mxu1 %v12908_v35  ;;  %v12933_v0 = vld [vmem:[%s16873_s2 + $0x278] ss:$52 sps:$4 sm:$0xff]   ;;  %v12934_v11 = vld [vmem:[%s16873_s2 + $0x2e0] ss:$52 sps:$4 sm:$0xff]  }
 0x946   :  { %v14411_v8 = vsel %vm2315_vm15, %v2313_v14, %v2300_v22  ;;  %v12921_v1 = vld [vmem:[%s16873_s2 + $0x208] ss:$52 sps:$4 sm:$0xff]  }
 0x947   :  { %2324 = vadd.xlane.f32.xlu0 %v14411_v8  ;;  %v2284_v60 = vrot.slane %v728_v24, 5 }
 0x948   :  { %2561 = vmatpush1.bf16.msra.mxu1 %v12906_v39  ;;  %v14515_v39 = vsub.s32 7, %v13711_v6 }
 0x949   :  { %v2314_v21 = vsel %vm602_vm5, %v2310_v32, %v2284_v60  ;;  %2562 = vmatprep.subr.bf16.mxu1 %v12911_v40  ;;  %v12920_v32 = vld [vmem:[%s16873_s2 + $0xd8] ss:$52 sps:$4 sm:$0xff]  }
 0x94a   :  { %v14417_v30 = vsel %vm2315_vm15, %v2314_v21, %v2304_v41  ;;  %12078 = vmatprep.subr.bf16.mxu0 %v12920_v32 }
 0x94b   :  { %2326 = vadd.xlane.f32.xlu1 %v14417_v30  ;;  %12079 = vmatpush3.bf16.msra.mxu0 %v12920_v32 }
 0x94c   :  { %2563 = vmatpush1.bf16.msra.mxu1 %v12909_v23  ;;  %12080 = vmatprep.subr.bf16.mxu0 %v12924_v54  ;;  %v14520_v23 = vld [vmem:[%s16876_s5 + $0x8] sm:$0xff] }
 0x94d   :  { %2564 = vmatprep.subr.bf16.mxu1 %v12915_v51 }
 0x94f   :  { %12081 = vmatpush3.bf16.msra.mxu0 %v12924_v54 }
 0x950   :  { %2565 = vmatpush1.bf16.msra.mxu1 %v12913_v59  ;;  %12082 = vmatprep.subr.bf16.mxu0 %v12928_v16 }
 0x951   :  { %2566 = vmatprep.subr.bf16.mxu1 %v12919_v45 }
 0x953   :  { %12083 = vmatpush3.bf16.msra.mxu0 %v12928_v16 }
 0x954   :  { %2567 = vmatpush1.bf16.msra.mxu1 %v12917_v3  ;;  %12084 = vmatprep.subr.bf16.mxu0 %v12932_v18 }
 0x955   :  { %2568 = vmatprep.subr.bf16.mxu1 %v12923_v10 }
 0x957   :  { %12085 = vmatpush3.bf16.msra.mxu0 %v12932_v18 }
 0x958   :  { %2569 = vmatpush1.bf16.msra.mxu1 %v12921_v1  ;;  %12086 = vmatprep.subr.bf16.mxu0 %v12933_v0 }
 0x959   :  { %2570 = vmatprep.subr.bf16.mxu1 %v12927_v57 }
 0x95b   :  { %12087 = vmatpush3.bf16.msra.mxu0 %v12933_v0 }
 0x95c   :  { %2571 = vmatpush1.bf16.msra.mxu1 %v12925_v17  ;;  %12088 = vmatprep.subr.bf16.mxu0 %v12934_v11 }
 0x95d   :  { %2572 = vmatprep.subr.bf16.mxu1 %v12931_v2 }
 0x95f   :  { %12089 = vmatpush3.bf16.msra.mxu0 %v12934_v11 }
 0x960   :  { %2573 = vmatpush1.bf16.msra.mxu1 %v12929_v20  ;;  %12112 = vmatprep.subr.bf16.mxu0 %v13641_v34 }
 0x961   :  { %12094 = vmatprep.subr.bf16.mxu1 %v13641_v34 }
 0x9d0   :  { %v2321_v42 = vpop.xlane.xlu0 %2320  ;;  %v2323_v27 = vpop.xlane.xlu1 %2322 }
 0x9d1   :  { %v2328_v36 = vmul.f32 0.0078125, %v2321_v42  ;;  %v2329_v37 = vmul.f32 0.0078125, %v2323_v27  ;;  %v2367_v42 = vrot.slane %v14376_v31, %v14515_v39 }
 0x9d3   :  { %v14442_v38 = vsub.f32 %v14401_v61, %v2328_v36  ;;  %v14445_v44 = vsub.f32 %v14404_v13, %v2329_v37 }
 0x9d4   :  { %v2325_v48 = vpop.xlane.xlu0 %2324 }
 0x9d5   :  { %v2330_v53 = vmul.f32 0.0078125, %v2325_v48  ;;  %v2336_v5 = vmul.f32 %v14442_v38, %v14442_v38  ;;  %v2337_v43 = vmul.f32 %v14445_v44, %v14445_v44  ;;  %v2375_v48 = vrot.slane %v14520_v23, %v13998_v46 }
 0x9d7   :  { %2340 = vadd.xlane.f32.xlu0 %v2336_v5  ;;  %2342 = vadd.xlane.f32.xlu1 %v2337_v43  ;;  %v14452_v56 = vsub.f32 %v14411_v8, %v2330_v53 }
 0x9d8   :  { %v2327_v26 = vpop.xlane.xlu1 %2326 }
 0x9d9   :  { %v2331_v58 = vmul.f32 0.0078125, %v2327_v26  ;;  %v2338_v62 = vmul.f32 %v14452_v56, %v14452_v56 }
 0x9db   :  { %2344 = vadd.xlane.f32.xlu0 %v2338_v62  ;;  %v14457_v47 = vsub.f32 %v14417_v30, %v2331_v58 }
 0x9dd   :  { %v2339_v63 = vmul.f32 %v14457_v47, %v14457_v47 }
 0x9df   :  { %2346 = vadd.xlane.f32.xlu1 %v2339_v63 }
 0xa64   :  { %v2341_v22 = vpop.xlane.xlu0 %2340  ;;  %v2343_v4 = vpop.xlane.xlu1 %2342 }
 0xa65   :  { %v2348_v14 = vmul.f32 0.0078125, %v2341_v22  ;;  %v2349_v24 = vmul.f32 0.0078125, %v2343_v4 }
 0xa67   :  { %v2352_v60 = vadd.f32 1e-05, %v2348_v14  ;;  %v2353_v41 = vadd.f32 1e-05, %v2349_v24 }
 0xa68   :  { %v2345_v21 = vpop.xlane.xlu0 %2344 }
 0xa69   :  { %13255 = vrsqrt.f32 %v2352_v60  ;;  %v2350_v28 = vmul.f32 0.0078125, %v2345_v21 }
 0xa6a   :  { %13257 = vrsqrt.f32 %v2353_v41 }
 0xa6b   :  { %v2354_v29 = vadd.f32 1e-05, %v2350_v28 }
 0xa6c   :  { %v2347_v35 = vpop.xlane.xlu1 %2346 }
 0xa6d   :  { %13259 = vrsqrt.f32 %v2354_v29  ;;  %v2351_v12 = vmul.f32 0.0078125, %v2347_v35 }
 0xa6f   :  { %v2355_v40 = vadd.f32 1e-05, %v2351_v12 }
 0xa71   :  { %13261 = vrsqrt.f32 %v2355_v40 }
 0xa73   :  { %v13256_v27 = vpop.eup %13255 }
 0xa74   :  { %v13258_v36 = vpop.eup %13257  ;;  %v2360_v37 = vmul.f32 %v13256_v27, %v14442_v38 }
 0xa75   :  { %v2361_v6 = vmul.f32 %v13258_v36, %v14445_v44 }
 0xa76   :  { %v2368_v53 = vmul.f32 %v2367_v42, %v2360_v37 }
 0xa77   :  { %v13260_v5 = vpop.eup %13259  ;;  %v2369_v43 = vmul.f32 %v2367_v42, %v2361_v6 }
 0xa78   :  { %v2376_v26 = vadd.f32 %v2375_v48, %v2368_v53  ;;  %v2362_v58 = vmul.f32 %v13260_v5, %v14452_v56  ;;  %v2663_v56 = vrot.slane %v14520_v23, %v14111_v50  ;;  %v2687_v5 = vrot.slane %v14520_v23, %v14128_v15 }
 0xa79   :  { %v2377_v62 = vadd.f32 %v2375_v48, %v2369_v43 }
 0xa7a   :  { %v2370_v7 = vmul.f32 %v2367_v42, %v2362_v58 }
 0xa7b   :  { %v13262_v63 = vpop.eup %13261  ;;  %v2428_v51 = vpack.c.bf16 %v2377_v62, %v2376_v26 }
 0xa7c   :  { %v2363_v31 = vmul.f32 %v13262_v63, %v14457_v47  ;;  %v2378_v59 = vadd.f32 %v2375_v48, %v2370_v7  ;;  %v2675_v47 = vrot.slane %v14520_v23, %v14116_v52 }
 0xa7d   :  { %2591 = vmatmul.mubr.bf16.vlgmr.msra.gmra.mrb[52].mxu1 %v2428_v51  ;;  %12090 = vmatprep.mubr.bf16.mxu0 %v2428_v51 }
 0xa7e   :  { %2600 = vmatprep.mubr.bf16.mxu1 %v13644_v33  ;;  %v2371_v38 = vmul.f32 %v2367_v42, %v2363_v31 }
 0xa80   :  { %v2379_v45 = vadd.f32 %v2375_v48, %v2371_v38 }
 0xa82   :  { %v2429_v44 = vpack.c.bf16 %v2379_v45, %v2378_v59 }
 0xa84   :  { %12091 = vmatmul.mubr.bf16.vlgmr.msra.gmra.mrb[40].mxu0 %v2429_v44 }
 0xa85   :  { %2601 = vmatmul.mubr.bf16.gmra.mrb[56].mxu1 %v2429_v44  ;;  %12114 = vmatprep.mubr.msk.bf16.mxu0 %vm13642_vm1, %v13641_v34 }
 0xa86   :  { %12096 = vmatprep.mubr.msk.bf16.mxu1 %vm13642_vm1, %v13641_v34 }
 0xb50   :  { %v2592_v32 = vpop.f32.mrb[52].mxu1 }
 0xb51   :  { %v2664_v3 = vadd.f32 %v2663_v56, %v2592_v32  ;;  %v2594_v10 = vpop.f32.mrb[53].mxu1 }
 0xb52   :  { %v2676_v54 = vadd.f32 %v2675_v47, %v2594_v10  ;;  %v2596_v1 = vpop.f32.mrb[54].mxu1 }
 0xb53   :  { %v2668_v57 = vpack.c.bf16 %v2664_v3, %v2664_v3  ;;  %v2598_v16 = vpop.f32.mrb[55].mxu1  ;;  %v2665_v0 = vadd.f32 %v2663_v56, %v2596_v1 }
 0xb54   :  { %v2680_v17 = vpack.c.bf16 %v2676_v54, %v2676_v54  ;;  %v2677_v2 = vadd.f32 %v2675_v47, %v2598_v16 }
 0xb55   :  { %2700 = vrot.lane.b32.xlu1 %v2668_v57, %s13645_s11  ;;  %v2669_v28 = vpack.c.bf16 %v2665_v0, %v2665_v0 }
 0xb56   :  { %v2681_v18 = vpack.c.bf16 %v2677_v2, %v2677_v2  ;;  %2728 = vrot.lane.b32.xlu0 %v2680_v17, %s13645_s11  ;;  %v2784_v20 = vsel %vm1272_vm9, %v2680_v17, 0 }
 0xb57   :  { %12095 = vmatpush3.bf16.xpose.msra.mxu1 %v2784_v20  ;;  %v12092_v11 = vpop.f32.mrb[40].mxu0 }
 0xb58   :  { %v2602_v22 = vpop.f32.mrb[56].mxu1  ;;  %v2645_v4 = vpop.f32.mrb[41].mxu0  ;;  %12100 = vmatprep.subr.bf16.mxu1 %v13641_v34  ;;  %v2830_v27 = vsel %vm1272_vm9, %v2681_v18, 0  ;;  %v2690_v58 = vadd.f32 %v12092_v11, %v2687_v5 }
 0xb59   :  { %2730 = vrot.lane.b32.xlu1 %v2681_v18, %s13645_s11  ;;  %v2604_v14 = vpop.f32.mrb[57].mxu1  ;;  %v12093_v24 = vpop.f32.mrb[42].mxu0  ;;  %v2666_v35 = vadd.f32 %v2663_v56, %v2602_v22  ;;  %v2688_v43 = vadd.f32 %v2687_v5, %v2645_v4 }
 0xb5a   :  { %v2678_v60 = vadd.f32 %v2675_v47, %v2604_v14  ;;  %v2606_v41 = vpop.f32.mrb[58].mxu1  ;;  %v2648_v21 = vpop.f32.mrb[43].mxu0  ;;  %v2691_v63 = vadd.f32 %v12093_v24, %v2687_v5  ;;  %v14591_v51 = vpack.c.bf16 %v2690_v58, %v2690_v58 }
 0xb5b   :  { %v2608_v29 = vpop.f32.mrb[59].mxu1  ;;  %v2667_v36 = vadd.f32 %v2663_v56, %v2606_v41  ;;  %v2670_v37 = vpack.c.bf16 %v2666_v35, %v2666_v35  ;;  %v2689_v26 = vadd.f32 %v2687_v5, %v2648_v21  ;;  %v14584_v62 = vpack.c.bf16 %v2688_v43, %v2688_v43 }
 0xb5c   :  { %v2682_v12 = vpack.c.bf16 %v2678_v60, %v2678_v60  ;;  %v2679_v40 = vadd.f32 %v2675_v47, %v2608_v29  ;;  %v14597_v31 = vpack.c.bf16 %v2691_v63, %v2691_v63 }
 0xb5d   :  { %2702 = vrot.lane.b32.xlu1 %v2669_v28, %s13645_s11  ;;  %v2671_v6 = vpack.c.bf16 %v2667_v36, %v2667_v36  ;;  %v14589_v23 = vpack.c.bf16 %v2689_v26, %v2689_v26 }
 0xb5e   :  { %v2683_v42 = vpack.c.bf16 %v2679_v40, %v2679_v40  ;;  %12097 = vmatmul.mubr.msk.bf16.vlgmr.msra.gmra.mrb[60].mxu1 %vm1272_vm9, %v2668_v57  ;;  %2732 = vrot.lane.b32.xlu0 %v2682_v12, %s13645_s11  ;;  %v2876_v53 = vsel %vm1272_vm9, %v2682_v12, 0 }
 0xb5f   :  { %12101 = vmatpush3.bf16.xpose.msra.mxu1 %v2830_v27  ;;  %12102 = vmatprep.mubr.msk.bf16.mxu1 %vm13642_vm1, %v13641_v34 }
 0xb60   :  { %v2922_v48 = vsel %vm1272_vm9, %v2683_v42, 0  ;;  %12106 = vmatprep.subr.bf16.mxu1 %v13641_v34 }
 0xb61   :  { %2734 = vrot.lane.b32.xlu1 %v2683_v42, %s13645_s11  ;;  %12113 = vmatpush3.bf16.xpose.msra.mxu0 %v2922_v48 }
 0xb62   :  { %2704 = vrot.lane.b32.xlu0 %v2670_v37, %s13645_s11  ;;  %12124 = vmatprep.subr.bf16.mxu0 %v13641_v34 }
 0xb65   :  { %2706 = vrot.lane.b32.xlu1 %v2671_v6, %s13645_s11 }
 0xb66   :  { %12103 = vmatmul.mubr.msk.bf16.vlgmr.msra.gmra.mrb[64].mxu1 %vm1272_vm9, %v2669_v28  ;;  %2736 = vrot.lane.b32.xlu0 %v2680_v17, %s13646_s0 }
 0xb67   :  { %12107 = vmatpush3.bf16.xpose.msra.mxu1 %v2876_v53  ;;  %12108 = vmatprep.mubr.msk.bf16.mxu1 %vm13642_vm1, %v13641_v34 }
 0xb68   :  { %12115 = vmatmul.mubr.msk.bf16.vlgmr.msra.gmra.mrb[44].mxu0 %vm1272_vm9, %v2671_v6  ;;  %12118 = vmatprep.subr.bf16.mxu1 %v13641_v34 }
 0xb69   :  { %2738 = vrot.lane.b32.xlu1 %v2681_v18, %s13646_s0  ;;  %12126 = vmatprep.mubr.msk.bf16.mxu0 %vm13642_vm1, %v13641_v34 }
 0xb6a   :  { %2708 = vrot.lane.b32.xlu0 %v2668_v57, %s13646_s0 }
 0xb6d   :  { %2710 = vrot.lane.b32.xlu1 %v2669_v28, %s13646_s0 }
 0xb6e   :  { %2740 = vrot.lane.b32.xlu0 %v2682_v12, %s13646_s0  ;;  %12109 = vmatmul.mubr.msk.bf16.vlgmr.msra.gmra.mrb[68].mxu1 %vm1272_vm9, %v2670_v37 }
 0xb6f   :  { %12120 = vmatprep.mubr.msk.bf16.mxu1 %vm13642_vm1, %v13641_v34 }
 0xb71   :  { %2742 = vrot.lane.b32.xlu1 %v2683_v42, %s13646_s0 }
 0xb72   :  { %2712 = vrot.lane.b32.xlu0 %v2670_v37, %s13646_s0 }
 0xb75   :  { %2714 = vrot.lane.b32.xlu1 %v2671_v6, %s13646_s0 }
 0xb76   :  { %2744 = vrot.lane.b32.xlu0 %v2680_v17, %s13647_s12 }
 0xb79   :  { %2746 = vrot.lane.b32.xlu1 %v2681_v18, %s13647_s12 }
 0xb7a   :  { %2716 = vrot.lane.b32.xlu0 %v2668_v57, %s13647_s12 }
 0xb7d   :  { %2718 = vrot.lane.b32.xlu1 %v2669_v28, %s13647_s12 }
 0xb7e   :  { %2748 = vrot.lane.b32.xlu0 %v2682_v12, %s13647_s12 }
 0xb81   :  { %2750 = vrot.lane.b32.xlu1 %v2683_v42, %s13647_s12 }
 0xb82   :  { %2720 = vrot.lane.b32.xlu0 %v2670_v37, %s13647_s12  ;;  %v3713_v37 = vsel %vm660_vm12, %v14584_v62, 0 }
 0xb85   :  { %2722 = vrot.lane.b32.xlu1 %v2671_v6, %s13647_s12  ;;  %v3759_v6 = vsel %vm660_vm12, %v14589_v23, 0 }
 0xb86   :  { %2756 = vrot.lane.b32.xlu0 %v14584_v62, %s13645_s11 }
 0xb89   :  { %2758 = vrot.lane.b32.xlu1 %v14589_v23, %s13645_s11 }
 0xb8a   :  { %2760 = vrot.lane.b32.xlu0 %v14591_v51, %s13645_s11 }
 0xb8d   :  { %2762 = vrot.lane.b32.xlu1 %v14597_v31, %s13645_s11 }
 0xbc7   :  { %v2701_v7 = vpop.permute.xlu1 %2700 }
 0xbc8   :  { %v2729_v38 = vpop.permute.xlu0 %2728 }
 0xbc9   :  { %v2968_v59 = vsel %vm1272_vm9, %v2729_v38, 0 }
 0xbca   :  { %12119 = vmatpush3.bf16.xpose.msra.mxu1 %v2968_v59 }
 0xbcb   :  { %v2731_v45 = vpop.permute.xlu1 %2730  ;;  %12130 = vmatprep.subr.bf16.mxu1 %v13641_v34 }
 0xbcc   :  { %v3014_v44 = vsel %vm1272_vm9, %v2731_v45, 0 }
 0xbcd   :  { %12125 = vmatpush3.bf16.xpose.msra.mxu0 %v3014_v44 }
 0xbce   :  { %12136 = vmatprep.subr.bf16.mxu0 %v13641_v34 }
 0xbcf   :  { %v2703_v56 = vpop.permute.xlu1 %2702 }
 0xbd0   :  { %v2733_v47 = vpop.permute.xlu0 %2732 }
 0xbd1   :  { %v3060_v32 = vsel %vm1272_vm9, %v2733_v47, 0  ;;  %12121 = vmatmul.mubr.msk.bf16.vlgmr.msra.gmra.mrb[72].mxu1 %vm1272_vm9, %v2701_v7 }
 0xbd2   :  { %12131 = vmatpush3.bf16.xpose.msra.mxu1 %v3060_v32  ;;  %12132 = vmatprep.mubr.msk.bf16.mxu1 %vm13642_vm1, %v13641_v34 }
 0xbd3   :  { %v2735_v3 = vpop.permute.xlu1 %2734  ;;  %12142 = vmatprep.subr.bf16.mxu1 %v13641_v34 }
 0xbd4   :  { %v3106_v10 = vsel %vm1272_vm9, %v2735_v3, 0  ;;  %v2705_v54 = vpop.permute.xlu0 %2704  ;;  %12127 = vmatmul.mubr.msk.bf16.vlgmr.msra.gmra.mrb[48].mxu0 %vm1272_vm9, %v2703_v56 }
 0xbd5   :  { %12137 = vmatpush3.bf16.xpose.msra.mxu0 %v3106_v10  ;;  %12138 = vmatprep.mubr.msk.bf16.mxu0 %vm13642_vm1, %v13641_v34 }
 0xbd6   :  { %12148 = vmatprep.subr.bf16.mxu0 %v13641_v34 }
 0xbd7   :  { %v2707_v1 = vpop.permute.xlu1 %2706 }
 0xbd8   :  { %v2737_v57 = vpop.permute.xlu0 %2736 }
 0xbd9   :  { %v3152_v16 = vsel %vm1272_vm9, %v2737_v57, 0  ;;  %12133 = vmatmul.mubr.msk.bf16.vlgmr.msra.gmra.mrb[76].mxu1 %vm1272_vm9, %v2705_v54 }
 0xbda   :  { %12143 = vmatpush3.bf16.xpose.msra.mxu1 %v3152_v16  ;;  %12144 = vmatprep.mubr.msk.bf16.mxu1 %vm13642_vm1, %v13641_v34 }
 0xbdb   :  { %v2739_v17 = vpop.permute.xlu1 %2738  ;;  %12154 = vmatprep.subr.bf16.mxu1 %v13641_v34 }
 0xbdc   :  { %v3198_v2 = vsel %vm1272_vm9, %v2739_v17, 0  ;;  %v2709_v18 = vpop.permute.xlu0 %2708  ;;  %12139 = vmatmul.mubr.msk.bf16.vlgmr.msra.gmra.mrb[52].mxu0 %vm1272_vm9, %v2707_v1 }
 0xbdd   :  { %12149 = vmatpush3.bf16.xpose.msra.mxu0 %v3198_v2  ;;  %12150 = vmatprep.mubr.msk.bf16.mxu0 %vm13642_vm1, %v13641_v34 }
 0xbde   :  { %12160 = vmatprep.subr.bf16.mxu0 %v13641_v34 }
 0xbdf   :  { %v2711_v20 = vpop.permute.xlu1 %2710 }
 0xbe0   :  { %v2741_v0 = vpop.permute.xlu0 %2740 }
 0xbe1   :  { %v3244_v11 = vsel %vm1272_vm9, %v2741_v0, 0  ;;  %12145 = vmatmul.mubr.msk.bf16.vlgmr.msra.gmra.mrb[80].mxu1 %vm1272_vm9, %v2709_v18 }
 0xbe2   :  { %12155 = vmatpush3.bf16.xpose.msra.mxu1 %v3244_v11  ;;  %12156 = vmatprep.mubr.msk.bf16.mxu1 %vm13642_vm1, %v13641_v34 }
 0xbe3   :  { %v2743_v22 = vpop.permute.xlu1 %2742  ;;  %12166 = vmatprep.subr.bf16.mxu1 %v13641_v34 }
 0xbe4   :  { %v3290_v4 = vsel %vm1272_vm9, %v2743_v22, 0  ;;  %v2713_v14 = vpop.permute.xlu0 %2712  ;;  %12151 = vmatmul.mubr.msk.bf16.vlgmr.msra.gmra.mrb[56].mxu0 %vm1272_vm9, %v2711_v20 }
 0xbe5   :  { %12161 = vmatpush3.bf16.xpose.msra.mxu0 %v3290_v4  ;;  %12162 = vmatprep.mubr.msk.bf16.mxu0 %vm13642_vm1, %v13641_v34 }
 0xbe6   :  { %12172 = vmatprep.subr.bf16.mxu0 %v13641_v34 }
 0xbe7   :  { %v2715_v24 = vpop.permute.xlu1 %2714 }
 0xbe8   :  { %v2745_v60 = vpop.permute.xlu0 %2744 }
 0xbe9   :  { %v3336_v41 = vsel %vm1272_vm9, %v2745_v60, 0  ;;  %12157 = vmatmul.mubr.msk.bf16.vlgmr.msra.gmra.mrb[84].mxu1 %vm1272_vm9, %v2713_v14 }
 0xbea   :  { %12167 = vmatpush3.bf16.xpose.msra.mxu1 %v3336_v41  ;;  %12168 = vmatprep.mubr.msk.bf16.mxu1 %vm13642_vm1, %v13641_v34 }
 0xbeb   :  { %v2747_v21 = vpop.permute.xlu1 %2746  ;;  %12178 = vmatprep.subr.bf16.mxu1 %v13641_v34 }
 0xbec   :  { %v3382_v28 = vsel %vm1272_vm9, %v2747_v21, 0  ;;  %v2717_v29 = vpop.permute.xlu0 %2716  ;;  %12163 = vmatmul.mubr.msk.bf16.vlgmr.msra.gmra.mrb[60].mxu0 %vm1272_vm9, %v2715_v24 }
 0xbed   :  { %12173 = vmatpush3.bf16.xpose.msra.mxu0 %v3382_v28  ;;  %12174 = vmatprep.mubr.msk.bf16.mxu0 %vm13642_vm1, %v13641_v34 }
 0xbee   :  { %12184 = vmatprep.subr.bf16.mxu0 %v13641_v34 }
 0xbef   :  { %v2719_v35 = vpop.permute.xlu1 %2718 }
 0xbf0   :  { %v2749_v12 = vpop.permute.xlu0 %2748 }
 0xbf1   :  { %v3428_v40 = vsel %vm1272_vm9, %v2749_v12, 0  ;;  %12169 = vmatmul.mubr.msk.bf16.vlgmr.msra.gmra.mrb[88].mxu1 %vm1272_vm9, %v2717_v29 }
 0xbf2   :  { %12179 = vmatpush3.bf16.xpose.msra.mxu1 %v3428_v40  ;;  %12180 = vmatprep.mubr.msk.bf16.mxu1 %vm13642_vm1, %v13641_v34 }
 0xbf3   :  { %v2751_v42 = vpop.permute.xlu1 %2750  ;;  %12190 = vmatprep.subr.bf16.mxu1 %v13641_v34 }
 0xbf4   :  { %v3474_v27 = vsel %vm1272_vm9, %v2751_v42, 0  ;;  %12175 = vmatmul.mubr.msk.bf16.vlgmr.msra.gmra.mrb[64].mxu0 %vm1272_vm9, %v2719_v35  ;;  %v2721_v36 = vpop.permute.xlu0 %2720 }
 0xbf5   :  { %12185 = vmatpush3.bf16.xpose.msra.mxu0 %v3474_v27  ;;  %12186 = vmatprep.mubr.msk.bf16.mxu0 %vm13642_vm1, %v13641_v34 }
 0xbf6   :  { %12196 = vmatprep.subr.bf16.mxu0 %v13641_v34 }
 0xbf7   :  { %v2723_v48 = vpop.permute.xlu1 %2722 }
 0xbf9   :  { %12181 = vmatmul.mubr.msk.bf16.vlgmr.msra.gmra.mrb[92].mxu1 %vm1272_vm9, %v2721_v36 }
 0xbfa   :  { %12191 = vmatpush3.bf16.msra.mxu1 %v3713_v37  ;;  %12192 = vmatprep.mubr.msk.bf16.mxu1 %vm13642_vm1, %v13641_v34 }
 0xbfb   :  { %12202 = vmatprep.subr.bf16.mxu1 %v13641_v34 }
 0xbfc   :  { %12187 = vmatmul.mubr.msk.bf16.vlgmr.msra.gmra.mrb[68].mxu0 %vm1272_vm9, %v2723_v48 }
 0xbfd   :  { %12197 = vmatpush3.bf16.msra.mxu0 %v3759_v6  ;;  %12198 = vmatprep.mubr.msk.bf16.mxu0 %vm13642_vm1, %v13641_v34 }
 0xbfe   :  { %12208 = vmatprep.subr.bf16.mxu0 %v13641_v34 }
 0xc31   :  { %v14667_v53 = vpop.f32.mrb[60].mxu1 }
 0xc32   :  { %v12098_v5 = vpop.f32.mrb[61].mxu1  ;;  %v3517_v43 = vsel %vm3516_vm6, %v14667_v53, -inf }
 0xc33   :  { %3518 = vmax.xlane.f32.xlu0 %v3517_v43  ;;  %v2823_v26 = vpop.f32.mrb[62].mxu1 }
 0xc34   :  { %v12099_v58 = vpop.f32.mrb[63].mxu1 }
 0xc39   :  { %v14671_v63 = vpop.f32.mrb[64].mxu1 }
 0xc3a   :  { %v12104_v7 = vpop.f32.mrb[65].mxu1  ;;  %v3520_v38 = vsel %vm3516_vm6, %v14671_v63, -inf }
 0xc3b   :  { %v2869_v59 = vpop.f32.mrb[66].mxu1  ;;  %3521 = vmax.xlane.f32.xlu1 %v3520_v38  ;;  %v14675_v45 = vpop.f32.mrb[44].mxu0 }
 0xc3c   :  { %v12105_v44 = vpop.f32.mrb[67].mxu1  ;;  %v12116_v56 = vpop.f32.mrb[45].mxu0  ;;  %v3526_v47 = vsel %vm3516_vm6, %v14675_v45, -inf }
 0xc3d   :  { %3527 = vmax.xlane.f32.xlu0 %v3526_v47  ;;  %v2961_v32 = vpop.f32.mrb[46].mxu0 }
 0xc3e   :  { %v12117_v3 = vpop.f32.mrb[47].mxu0 }
 0xc41   :  { %v14679_v10 = vpop.f32.mrb[68].mxu1 }
 0xc42   :  { %v12110_v54 = vpop.f32.mrb[69].mxu1  ;;  %v3523_v1 = vsel %vm3516_vm6, %v14679_v10, -inf }
 0xc43   :  { %v2915_v57 = vpop.f32.mrb[70].mxu1  ;;  %3524 = vmax.xlane.f32.xlu0 %v3523_v1 }
 0xc44   :  { %v12111_v16 = vpop.f32.mrb[71].mxu1 }
 0xca4   :  { %v14683_v17 = vpop.f32.mrb[72].mxu1 }
 0xca5   :  { %v12122_v2 = vpop.f32.mrb[73].mxu1  ;;  %v3529_v18 = vsel %vm3516_vm6, %v14683_v17, -inf }
 0xca6   :  { %v3007_v20 = vpop.f32.mrb[74].mxu1  ;;  %3530 = vmax.xlane.f32.xlu0 %v3529_v18 }
 0xca7   :  { %v12123_v0 = vpop.f32.mrb[75].mxu1  ;;  %v14687_v11 = vpop.f32.mrb[48].mxu0 }
 0xca8   :  { %v12128_v22 = vpop.f32.mrb[49].mxu0  ;;  %v3532_v4 = vsel %vm3516_vm6, %v14687_v11, -inf }
 0xca9   :  { %3533 = vmax.xlane.f32.xlu1 %v3532_v4  ;;  %v3053_v14 = vpop.f32.mrb[50].mxu0 }
 0xcaa   :  { %v12129_v24 = vpop.f32.mrb[51].mxu0 }
 0xcac   :  { %v14691_v60 = vpop.f32.mrb[76].mxu1 }
 0xcad   :  { %v12134_v41 = vpop.f32.mrb[77].mxu1  ;;  %v3535_v21 = vsel %vm3516_vm6, %v14691_v60, -inf }
 0xcae   :  { %v3099_v28 = vpop.f32.mrb[78].mxu1  ;;  %3536 = vmax.xlane.f32.xlu0 %v3535_v21 }
 0xcaf   :  { %v12135_v29 = vpop.f32.mrb[79].mxu1  ;;  %v14695_v35 = vpop.f32.mrb[52].mxu0 }
 0xcb0   :  { %v12140_v12 = vpop.f32.mrb[53].mxu0  ;;  %v3538_v40 = vsel %vm3516_vm6, %v14695_v35, -inf }
 0xcb1   :  { %3539 = vmax.xlane.f32.xlu1 %v3538_v40  ;;  %v3145_v42 = vpop.f32.mrb[54].mxu0 }
 0xcb2   :  { %v12141_v27 = vpop.f32.mrb[55].mxu0 }
 0xcb4   :  { %v14699_v36 = vpop.f32.mrb[80].mxu1 }
 0xcb5   :  { %v12146_v37 = vpop.f32.mrb[81].mxu1  ;;  %v3541_v48 = vsel %vm3516_vm6, %v14699_v36, -inf }
 0xcb6   :  { %v3191_v6 = vpop.f32.mrb[82].mxu1  ;;  %3542 = vmax.xlane.f32.xlu0 %v3541_v48 }
 0xcb7   :  { %v12147_v5 = vpop.f32.mrb[83].mxu1  ;;  %v14703_v43 = vpop.f32.mrb[56].mxu0 }
 0xcb8   :  { %v12152_v26 = vpop.f32.mrb[57].mxu0  ;;  %v3544_v58 = vsel %vm3516_vm6, %v14703_v43, -inf  ;;  %v14731_v5 = vpop.permute.xlu0 %2756 }
 0xcb9   :  { %3545 = vmax.xlane.f32.xlu1 %v3544_v58  ;;  %v3237_v7 = vpop.f32.mrb[58].mxu0 }
 0xcba   :  { %v12153_v38 = vpop.f32.mrb[59].mxu0  ;;  %v14741_v7 = vpop.permute.xlu1 %2758 }
 0xcbc   :  { %v14707_v59 = vpop.f32.mrb[84].mxu1  ;;  %v14735_v26 = vpop.permute.xlu0 %2760 }
 0xcbd   :  { %v12158_v44 = vpop.f32.mrb[85].mxu1  ;;  %v3547_v56 = vsel %vm3516_vm6, %v14707_v59, -inf }
 0xcbe   :  { %v3283_v47 = vpop.f32.mrb[86].mxu1  ;;  %3548 = vmax.xlane.f32.xlu0 %v3547_v56  ;;  %v14743_v44 = vpop.permute.xlu1 %2762 }
 0xcbf   :  { %v12159_v32 = vpop.f32.mrb[87].mxu1  ;;  %v14711_v3 = vpop.f32.mrb[60].mxu0 }
 0xcc0   :  { %v12164_v54 = vpop.f32.mrb[61].mxu0  ;;  %v3550_v1 = vsel %vm3516_vm6, %v14711_v3, -inf  ;;  %v3519_v58 = vpop.xlane.xlu0 %3518 }
 0xcc1   :  { %3551 = vmax.xlane.f32.xlu1 %v3550_v1  ;;  %v3329_v57 = vpop.f32.mrb[62].mxu0  ;;  %v3565_v56 = vsub.f32 %v14667_v53, %v3519_v58 }
 0xcc2   :  { %v12165_v16 = vpop.f32.mrb[63].mxu0 }
 0xcc3   :  { %v3581_v32 = vmul.f32 1.442695, %v3565_v56 }
 0xcc4   :  { %v14715_v2 = vpop.f32.mrb[88].mxu1 }
 0xcc5   :  { %v12170_v18 = vpop.f32.mrb[89].mxu1  ;;  %v3553_v20 = vsel %vm3516_vm6, %v14715_v2, -inf  ;;  %13263 = vpow2.f32 %v3581_v32 }
 0xcc6   :  { %v3375_v0 = vpop.f32.mrb[90].mxu1  ;;  %3554 = vmax.xlane.f32.xlu0 %v3553_v20 }
 0xcc7   :  { %v12171_v22 = vpop.f32.mrb[91].mxu1  ;;  %v14719_v4 = vpop.f32.mrb[64].mxu0 }
 0xcc8   :  { %v12176_v14 = vpop.f32.mrb[65].mxu0  ;;  %v3556_v24 = vsel %vm3516_vm6, %v14719_v4, -inf  ;;  %v3522_v54 = vpop.xlane.xlu1 %3521 }
 0xcc9   :  { %3557 = vmax.xlane.f32.xlu1 %v3556_v24  ;;  %v3421_v41 = vpop.f32.mrb[66].mxu0  ;;  %v3566_v57 = vsub.f32 %v14671_v63, %v3522_v54 }
 0xcca   :  { %v12177_v21 = vpop.f32.mrb[67].mxu0  ;;  %v3528_v38 = vpop.xlane.xlu0 %3527 }
 0xccb   :  { %v3583_v18 = vmul.f32 1.442695, %v3566_v57  ;;  %v3568_v20 = vsub.f32 %v14675_v45, %v3528_v38 }
 0xccc   :  { %v14723_v28 = vpop.f32.mrb[92].mxu1 }
 0xccd   :  { %v12182_v29 = vpop.f32.mrb[93].mxu1  ;;  %v3559_v12 = vsel %vm3516_vm6, %v14723_v28, -inf  ;;  %v3587_v0 = vmul.f32 1.442695, %v3568_v20 }
 0xcce   :  { %v3467_v40 = vpop.f32.mrb[94].mxu1  ;;  %3560 = vmax.xlane.f32.xlu0 %v3559_v12 }
 0xccf   :  { %v12183_v42 = vpop.f32.mrb[95].mxu1  ;;  %v14727_v27 = vpop.f32.mrb[68].mxu0 }
 0xcd0   :  { %v12188_v37 = vpop.f32.mrb[69].mxu0  ;;  %v3525_v47 = vpop.xlane.xlu0 %3524  ;;  %v3562_v63 = vsel %vm3516_vm6, %v14727_v27, -inf }
 0xcd1   :  { %v3513_v48 = vpop.f32.mrb[70].mxu0  ;;  %v3567_v1 = vsub.f32 %v14679_v10, %v3525_v47  ;;  %v14749_v22 = vpop.eup %13263 }
 0xcd2   :  { %v12189_v6 = vpop.f32.mrb[71].mxu0  ;;  %v3613_v53 = vsel %vm3516_vm6, %v14749_v22, 0.0 }
 0xcd3   :  { %v3585_v16 = vmul.f32 1.442695, %v3567_v1 }
 0xcd5   :  { %13265 = vpow2.f32 %v3585_v16 }
 0xcd6   :  { %13267 = vpow2.f32 %v3583_v18 }
 0xcd7   :  { %13269 = vpow2.f32 %v3587_v0 }
 0xcda   :  { %2766 = vrot.lane.b32.xlu1 %v14589_v23, %s13646_s0 }
 0xcde   :  { %2768 = vrot.lane.b32.xlu1 %v14591_v51, %s13646_s0 }
 0xcdf   :  { %v14753_v14 = vpop.eup %13265 }
 0xce0   :  { %v14757_v10 = vpop.eup %13267  ;;  %v3619_v45 = vsel %vm3516_vm6, %v14753_v14, 0.0 }
 0xce1   :  { %v3616_v24 = vsel %vm3516_vm6, %v14757_v10, 0.0  ;;  %v14763_v41 = vpop.eup %13269 }
 0xce2   :  { %2770 = vrot.lane.b32.xlu1 %v14597_v31, %s13646_s0  ;;  %v3622_v21 = vsel %vm3516_vm6, %v14763_v41, 0.0 }
 0xce4   :  { %2764 = vrot.lane.b32.xlu0 %v14584_v62, %s13646_s0 }
 0xd03   :  { %3614 = vadd.xlane.f32.xlu0 %v3613_v53 }
 0xd06   :  { %3563 = vmax.xlane.f32.xlu1 %v3562_v63 }
 0xd07   :  { %3620 = vadd.xlane.f32.xlu0 %v3619_v45 }
 0xd0a   :  { %3617 = vadd.xlane.f32.xlu1 %v3616_v24 }
 0xd0e   :  { %3623 = vadd.xlane.f32.xlu1 %v3622_v21 }
 0xd33   :  { %v3531_v29 = vpop.xlane.xlu0 %3530 }
 0xd34   :  { %v3569_v12 = vsub.f32 %v14683_v17, %v3531_v29 }
 0xd36   :  { %v3589_v40 = vmul.f32 1.442695, %v3569_v12  ;;  %v3534_v42 = vpop.xlane.xlu1 %3533 }
 0xd37   :  { %v3570_v37 = vsub.f32 %v14687_v11, %v3534_v42 }
 0xd38   :  { %13271 = vpow2.f32 %v3589_v40 }
 0xd39   :  { %v3591_v48 = vmul.f32 1.442695, %v3570_v37 }
 0xd3b   :  { %13273 = vpow2.f32 %v3591_v48  ;;  %v3537_v6 = vpop.xlane.xlu0 %3536 }
 0xd3c   :  { %v3571_v58 = vsub.f32 %v14691_v60, %v3537_v6 }
 0xd3e   :  { %v3593_v38 = vmul.f32 1.442695, %v3571_v58  ;;  %v3540_v56 = vpop.xlane.xlu1 %3539 }
 0xd3f   :  { %v3572_v47 = vsub.f32 %v14695_v35, %v3540_v56 }
 0xd40   :  { %13275 = vpow2.f32 %v3593_v38 }
 0xd41   :  { %v3595_v32 = vmul.f32 1.442695, %v3572_v47 }
 0xd42   :  { %v14771_v54 = vpop.eup %13271 }
 0xd43   :  { %13277 = vpow2.f32 %v3595_v32  ;;  %v3543_v17 = vpop.xlane.xlu0 %3542  ;;  %v3625_v1 = vsel %vm3516_vm6, %v14771_v54, 0.0 }
 0xd44   :  { %v3573_v11 = vsub.f32 %v14699_v36, %v3543_v17  ;;  %3626 = vadd.xlane.f32.xlu0 %v3625_v1 }
 0xd45   :  { %v14776_v57 = vpop.eup %13273 }
 0xd46   :  { %v3597_v16 = vmul.f32 1.442695, %v3573_v11  ;;  %v3546_v60 = vpop.xlane.xlu1 %3545  ;;  %v3628_v18 = vsel %vm3516_vm6, %v14776_v57, 0.0 }
 0xd47   :  { %v3574_v35 = vsub.f32 %v14703_v43, %v3546_v60  ;;  %3629 = vadd.xlane.f32.xlu1 %v3628_v18 }
 0xd48   :  { %13279 = vpow2.f32 %v3597_v16 }
 0xd49   :  { %v3599_v20 = vmul.f32 1.442695, %v3574_v35 }
 0xd4a   :  { %v14781_v0 = vpop.eup %13275 }
 0xd4b   :  { %13281 = vpow2.f32 %v3599_v20  ;;  %v3549_v53 = vpop.xlane.xlu0 %3548  ;;  %v3631_v36 = vsel %vm3516_vm6, %v14781_v0, 0.0 }
 0xd4c   :  { %v3575_v63 = vsub.f32 %v14707_v59, %v3549_v53  ;;  %3632 = vadd.xlane.f32.xlu0 %v3631_v36 }
 0xd4d   :  { %v14786_v45 = vpop.eup %13277 }
 0xd4e   :  { %v3601_v24 = vmul.f32 1.442695, %v3575_v63  ;;  %v3634_v21 = vsel %vm3516_vm6, %v14786_v45, 0.0  ;;  %v3552_v37 = vpop.xlane.xlu1 %3551 }
 0xd4f   :  { %3635 = vadd.xlane.f32.xlu1 %v3634_v21  ;;  %v3576_v48 = vsub.f32 %v14711_v3, %v3552_v37 }
 0xd50   :  { %13283 = vpow2.f32 %v3601_v24 }
 0xd51   :  { %v3603_v38 = vmul.f32 1.442695, %v3576_v48 }
 0xd52   :  { %v14790_v43 = vpop.eup %13279 }
 0xd53   :  { %v3637_v29 = vsel %vm3516_vm6, %v14790_v43, 0.0  ;;  %v3555_v6 = vpop.xlane.xlu0 %3554  ;;  %13285 = vpow2.f32 %v3603_v38 }
 0xd54   :  { %3638 = vadd.xlane.f32.xlu0 %v3637_v29  ;;  %v3577_v56 = vsub.f32 %v14715_v2, %v3555_v6 }
 0xd55   :  { %v14794_v12 = vpop.eup %13281 }
 0xd56   :  { %v3640_v59 = vsel %vm3516_vm6, %v14794_v12, 0.0  ;;  %v3558_v58 = vpop.xlane.xlu1 %3557  ;;  %v3605_v17 = vmul.f32 1.442695, %v3577_v56  ;;  %v3805_v56 = vsel %vm660_vm12, %v14591_v51, 0 }
 0xd57   :  { %3641 = vadd.xlane.f32.xlu1 %v3640_v59  ;;  %v3578_v47 = vsub.f32 %v14719_v4, %v3558_v58 }
 0xd58   :  { %13287 = vpow2.f32 %v3605_v17 }
 0xd59   :  { %v3607_v11 = vmul.f32 1.442695, %v3578_v47 }
 0xd5a   :  { %v14798_v40 = vpop.eup %13283 }
 0xd5b   :  { %v3643_v42 = vsel %vm3516_vm6, %v14798_v40, 0.0  ;;  %v3561_v32 = vpop.xlane.xlu0 %3560  ;;  %13289 = vpow2.f32 %v3607_v11 }
 0xd5c   :  { %3644 = vadd.xlane.f32.xlu0 %v3643_v42  ;;  %v3579_v1 = vsub.f32 %v14723_v28, %v3561_v32 }
 0xd5d   :  { %v14812_v3 = vpop.eup %13285 }
 0xd5e   :  { %v3646_v2 = vsel %vm3516_vm6, %v14812_v3, 0.0 }
 0xd5f   :  { %v14820_v60 = vpop.permute.xlu0 %2764 }
 0xd62   :  { %v14818_v4 = vpop.eup %13287 }
 0xd63   :  { %v3649_v35 = vsel %vm3516_vm6, %v14818_v4, 0.0 }
 0xd65   :  { %v14822_v28 = vpop.eup %13289 }
 0xd66   :  { %v3652_v36 = vsel %vm3516_vm6, %v14822_v28, 0.0 }
 0xd68   :  { %2774 = vrot.lane.b32.xlu1 %v14589_v23, %s13647_s12  ;;  %v3609_v23 = vmul.f32 1.442695, %v3579_v1 }
 0xd6a   :  { %13291 = vpow2.f32 %v3609_v23 }
 0xd72   :  { %2772 = vrot.lane.b32.xlu0 %v14584_v62, %s13647_s12  ;;  %v14810_v62 = vpop.permute.xlu1 %2766 }
 0xd74   :  { %v14828_v20 = vpop.eup %13291 }
 0xd75   :  { %v3655_v24 = vsel %vm3516_vm6, %v14828_v20, 0.0 }
 0xd76   :  { %v14814_v16 = vpop.permute.xlu1 %2768 }
 0xd7a   :  { %v14824_v18 = vpop.permute.xlu1 %2770 }
 0xd8c   :  { %3647 = vadd.xlane.f32.xlu1 %v3646_v2  ;;  %v3897_v2 = vsel %vm660_vm12, %v14731_v5, 0 }
 0xd90   :  { %v3615_v53 = vpop.xlane.xlu0 %3614  ;;  %3650 = vadd.xlane.f32.xlu1 %v3649_v35 }
 0xd91   :  { %13293 = vrcp.f32 %v3615_v53  ;;  %3653 = vadd.xlane.f32.xlu0 %v3652_v36 }
 0xd93   :  { %v3564_v63 = vpop.xlane.xlu1 %3563 }
 0xd94   :  { %v3580_v21 = vsub.f32 %v14727_v27, %v3564_v63  ;;  %v3621_v29 = vpop.xlane.xlu0 %3620  ;;  %3656 = vadd.xlane.f32.xlu1 %v3655_v24 }
 0xd95   :  { %13295 = vrcp.f32 %v3621_v29 }
 0xd96   :  { %v3611_v59 = vmul.f32 1.442695, %v3580_v21 }
 0xd97   :  { %v3618_v42 = vpop.xlane.xlu1 %3617 }
 0xd98   :  { %13297 = vpow2.f32 %v3611_v59  ;;  %v3989_v59 = vsel %vm660_vm12, %v14735_v26, 0 }
 0xd99   :  { %13299 = vrcp.f32 %v3618_v42 }
 0xd9b   :  { %v13294_v37 = vpop.eup %13293  ;;  %v3624_v48 = vpop.xlane.xlu1 %3623 }
 0xd9c   :  { %v3677_v6 = vmul.f32 %v13294_v37, %v14749_v22  ;;  %13301 = vrcp.f32 %v3624_v48 }
 0xd9e   :  { %v3693_v58 = vpack.c.bf16 %v3677_v6, %v3677_v6 }
 0xd9f   :  { %v13296_v38 = vpop.eup %13295 }
 0xda0   :  { %12193 = vmatmul.mubr.msk.bf16.vlgmr.msra.gmra.mrb[96].mxu1 %vm3516_vm6, %v3693_v58  ;;  %v3679_v47 = vmul.f32 %v13296_v38, %v14753_v14  ;;  %v3851_v14 = vsel %vm660_vm12, %v14597_v31, 0  ;;  %v4081_v38 = vsel %vm660_vm12, %v14820_v60, 0 }
 0xda1   :  { %12203 = vmatpush3.bf16.msra.mxu1 %v3805_v56  ;;  %12204 = vmatprep.mubr.msk.bf16.mxu1 %vm13642_vm1, %v13641_v34 }
 0xda2   :  { %v14841_v27 = vpop.eup %13297  ;;  %12214 = vmatprep.subr.bf16.mxu1 %v13641_v34  ;;  %v3695_v11 = vpack.c.bf16 %v3679_v47, %v3679_v47  ;;  %v4127_v47 = vsel %vm660_vm12, %v14810_v62, 0 }
 0xda3   :  { %v13300_v32 = vpop.eup %13299  ;;  %v3658_v22 = vsel %vm3516_vm6, %v14841_v27, 0.0 }
 0xda4   :  { %3659 = vadd.xlane.f32.xlu0 %v3658_v22  ;;  %v3678_v17 = vmul.f32 %v13300_v32, %v14757_v10 }
 0xda5   :  { %2778 = vrot.lane.b32.xlu1 %v14597_v31, %s13647_s12  ;;  %v3943_v31 = vsel %vm660_vm12, %v14741_v7, 0 }
 0xda6   :  { %v3694_v1 = vpack.c.bf16 %v3678_v17, %v3678_v17  ;;  %v13302_v23 = vpop.eup %13301  ;;  %v4173_v17 = vsel %vm660_vm12, %v14814_v16, 0 }
 0xda7   :  { %v3680_v10 = vmul.f32 %v13302_v23, %v14763_v41 }
 0xda8   :  { %12199 = vmatmul.mubr.msk.bf16.vlgmr.msra.gmra.mrb[72].mxu0 %vm3516_vm6, %v3694_v1  ;;  %12205 = vmatmul.mubr.msk.bf16.vlgmr.msra.gmra.mrb[100].mxu1 %vm3516_vm6, %v3695_v11  ;;  %v4219_v1 = vsel %vm660_vm12, %v14824_v18, 0 }
 0xda9   :  { %12209 = vmatpush3.bf16.msra.mxu0 %v3851_v14  ;;  %12215 = vmatpush3.bf16.msra.mxu1 %v3897_v2  ;;  %v3696_v5 = vpack.c.bf16 %v3680_v10, %v3680_v10 }
 0xdaa   :  { %12210 = vmatprep.mubr.msk.bf16.mxu0 %vm13642_vm1, %v13641_v34  ;;  %12220 = vmatprep.subr.bf16.mxu0 %v13641_v34 }
 0xdab   :  { %12216 = vmatprep.mubr.msk.bf16.mxu1 %vm13642_vm1, %v13641_v34  ;;  %12226 = vmatprep.subr.bf16.mxu1 %v13641_v34 }
 0xdb0   :  { %12211 = vmatmul.mubr.msk.bf16.vlgmr.msra.gmra.mrb[76].mxu0 %vm3516_vm6, %v3696_v5 }
 0xdb1   :  { %12221 = vmatpush3.bf16.msra.mxu0 %v3943_v31  ;;  %12222 = vmatprep.mubr.msk.bf16.mxu0 %vm13642_vm1, %v13641_v34 }
 0xdb2   :  { %12232 = vmatprep.subr.bf16.mxu0 %v13641_v34 }
 0xdba   :  { %2776 = vrot.lane.b32.xlu0 %v14591_v51, %s13647_s12 }
 0xdd1   :  { %v3627_v41 = vpop.xlane.xlu0 %3626 }
 0xdd2   :  { %13303 = vrcp.f32 %v3627_v41 }
 0xdd4   :  { %v3630_v35 = vpop.xlane.xlu1 %3629 }
 0xdd5   :  { %13305 = vrcp.f32 %v3630_v35 }
 0xdd9   :  { %v3633_v53 = vpop.xlane.xlu0 %3632 }
 0xdda   :  { %13307 = vrcp.f32 %v3633_v53 }
 0xddc   :  { %v13304_v36 = vpop.eup %13303  ;;  %v3636_v63 = vpop.xlane.xlu1 %3635 }
 0xddd   :  { %13309 = vrcp.f32 %v3636_v63  ;;  %v3681_v7 = vmul.f32 %v13304_v36, %v14771_v54  ;;  %v4035_v54 = vsel %vm660_vm12, %v14743_v44, 0 }
 0xddf   :  { %v13306_v24 = vpop.eup %13305  ;;  %v3697_v21 = vpack.c.bf16 %v3681_v7, %v3681_v7 }
 0xde0   :  { %v3682_v29 = vmul.f32 %v13306_v24, %v14776_v57 }
 0xde1   :  { %12217 = vmatmul.mubr.msk.bf16.vlgmr.msra.gmra.mrb[104].mxu1 %vm3516_vm6, %v3697_v21  ;;  %v3639_v51 = vpop.xlane.xlu0 %3638 }
 0xde2   :  { %12227 = vmatpush3.bf16.msra.mxu1 %v3989_v59  ;;  %13311 = vrcp.f32 %v3639_v51  ;;  %v3698_v42 = vpack.c.bf16 %v3682_v29, %v3682_v29  ;;  %12228 = vmatprep.mubr.msk.bf16.mxu1 %vm13642_vm1, %v13641_v34 }
 0xde3   :  { %12238 = vmatprep.subr.bf16.mxu1 %v13641_v34 }
 0xde4   :  { %v13308_v37 = vpop.eup %13307  ;;  %12223 = vmatmul.mubr.msk.bf16.vlgmr.msra.gmra.mrb[80].mxu0 %vm3516_vm6, %v3698_v42  ;;  %v3642_v57 = vpop.xlane.xlu1 %3641 }
 0xde5   :  { %12233 = vmatpush3.bf16.msra.mxu0 %v4035_v54  ;;  %13313 = vrcp.f32 %v3642_v57  ;;  %v3683_v26 = vmul.f32 %v13308_v37, %v14781_v0  ;;  %12234 = vmatprep.mubr.msk.bf16.mxu0 %vm13642_vm1, %v13641_v34 }
 0xde6   :  { %12244 = vmatprep.subr.bf16.mxu0 %v13641_v34 }
 0xde7   :  { %v13310_v48 = vpop.eup %13309  ;;  %v3699_v6 = vpack.c.bf16 %v3683_v26, %v3683_v26 }
 0xde8   :  { %v3684_v58 = vmul.f32 %v13310_v48, %v14786_v45  ;;  %v2775_v18 = vpop.permute.xlu1 %2774 }
 0xde9   :  { %12229 = vmatmul.mubr.msk.bf16.vlgmr.msra.gmra.mrb[108].mxu1 %vm3516_vm6, %v3699_v6  ;;  %v3645_v44 = vpop.xlane.xlu0 %3644  ;;  %v4311_v36 = vsel %vm660_vm12, %v2775_v18, 0 }
 0xdea   :  { %12239 = vmatpush3.bf16.msra.mxu1 %v4081_v38  ;;  %13315 = vrcp.f32 %v3645_v44  ;;  %v3700_v56 = vpack.c.bf16 %v3684_v58, %v3684_v58  ;;  %12240 = vmatprep.mubr.msk.bf16.mxu1 %vm13642_vm1, %v13641_v34 }
 0xdeb   :  { %12250 = vmatprep.subr.bf16.mxu1 %v13641_v34 }
 0xdec   :  { %v13312_v0 = vpop.eup %13311  ;;  %12235 = vmatmul.mubr.msk.bf16.vlgmr.msra.gmra.mrb[84].mxu0 %vm3516_vm6, %v3700_v56 }
 0xded   :  { %12245 = vmatpush3.bf16.msra.mxu0 %v4127_v47  ;;  %v3685_v45 = vmul.f32 %v13312_v0, %v14790_v43  ;;  %12246 = vmatprep.mubr.msk.bf16.mxu0 %vm13642_vm1, %v13641_v34  ;;  %v2773_v16 = vpop.permute.xlu0 %2772 }
 0xdee   :  { %12256 = vmatprep.subr.bf16.mxu0 %v13641_v34  ;;  %v4265_v23 = vsel %vm660_vm12, %v2773_v16, 0 }
 0xdef   :  { %v13314_v60 = vpop.eup %13313  ;;  %v3701_v32 = vpack.c.bf16 %v3685_v45, %v3685_v45 }
 0xdf0   :  { %v3686_v22 = vmul.f32 %v13314_v60, %v14794_v12 }
 0xdf1   :  { %12241 = vmatmul.mubr.msk.bf16.vlgmr.msra.gmra.mrb[112].mxu1 %vm3516_vm6, %v3701_v32 }
 0xdf2   :  { %12251 = vmatpush3.bf16.msra.mxu1 %v4173_v17  ;;  %v3702_v62 = vpack.c.bf16 %v3686_v22, %v3686_v22  ;;  %12252 = vmatprep.mubr.msk.bf16.mxu1 %vm13642_vm1, %v13641_v34 }
 0xdf3   :  { %12262 = vmatprep.subr.bf16.mxu1 %v13641_v34 }
 0xdf4   :  { %v13316_v43 = vpop.eup %13315  ;;  %12247 = vmatmul.mubr.msk.bf16.vlgmr.msra.gmra.mrb[88].mxu0 %vm3516_vm6, %v3702_v62 }
 0xdf5   :  { %12257 = vmatpush3.bf16.msra.mxu0 %v4219_v1  ;;  %v3687_v12 = vmul.f32 %v13316_v43, %v14798_v40  ;;  %12258 = vmatprep.mubr.msk.bf16.mxu0 %vm13642_vm1, %v13641_v34 }
 0xdf6   :  { %12268 = vmatprep.subr.bf16.mxu0 %v13641_v34 }
 0xdf7   :  { %v3703_v11 = vpack.c.bf16 %v3687_v12, %v3687_v12 }
 0xdf9   :  { %12253 = vmatmul.mubr.msk.bf16.vlgmr.msra.gmra.mrb[116].mxu1 %vm3516_vm6, %v3703_v11 }
 0xdfa   :  { %12263 = vmatpush3.bf16.msra.mxu1 %v4265_v23  ;;  %12264 = vmatprep.mubr.msk.bf16.mxu1 %vm13642_vm1, %v13641_v34 }
 0xdfb   :  { %12274 = vmatprep.subr.bf16.mxu1 %v13641_v34 }
 0xe19   :  { %v3648_v2 = vpop.xlane.xlu1 %3647 }
 0xe1a   :  { %13317 = vrcp.f32 %v3648_v2 }
 0xe1d   :  { %v3651_v40 = vpop.xlane.xlu1 %3650 }
 0xe1e   :  { %13319 = vrcp.f32 %v3651_v40  ;;  %v3654_v14 = vpop.xlane.xlu0 %3653 }
 0xe1f   :  { %13321 = vrcp.f32 %v3654_v14 }
 0xe21   :  { %v3657_v5 = vpop.xlane.xlu1 %3656 }
 0xe22   :  { %13323 = vrcp.f32 %v3657_v5  ;;  %v12935_v5 = vld [vmem:[%s16873_s2 + $0xc] ss:$52 sps:$4 sm:$0xff]  }
 0xe24   :  { %v13318_v10 = vpop.eup %13317 }
 0xe25   :  { %v3688_v31 = vmul.f32 %v13318_v10, %v14812_v3  ;;  %v2779_v3 = vpop.permute.xlu1 %2778 }
 0xe26   :  { %v4403_v59 = vsel %vm660_vm12, %v2779_v3, 0 }
 0xe27   :  { %v3704_v41 = vpack.c.bf16 %v3688_v31, %v3688_v31 }
 0xe28   :  { %v13320_v35 = vpop.eup %13319 }
 0xe29   :  { %v13322_v53 = vpop.eup %13321  ;;  %12259 = vmatmul.mubr.msk.bf16.vlgmr.msra.gmra.mrb[92].mxu0 %vm3516_vm6, %v3704_v41  ;;  %v3689_v63 = vmul.f32 %v13320_v35, %v14818_v4 }
 0xe2a   :  { %12269 = vmatpush3.bf16.msra.mxu0 %v4311_v36  ;;  %12270 = vmatprep.mubr.msk.bf16.mxu0 %vm13642_vm1, %v13641_v34  ;;  %v3690_v24 = vmul.f32 %v13322_v53, %v14822_v28 }
 0xe2b   :  { %v3705_v7 = vpack.c.bf16 %v3689_v63, %v3689_v63  ;;  %12280 = vmatprep.subr.bf16.mxu0 %v13641_v34 }
 0xe2c   :  { %v3706_v21 = vpack.c.bf16 %v3690_v24, %v3690_v24  ;;  %v13324_v29 = vpop.eup %13323 }
 0xe2d   :  { %12265 = vmatmul.mubr.msk.bf16.vlgmr.msra.gmra.mrb[120].mxu1 %vm3516_vm6, %v3705_v7  ;;  %v3691_v28 = vmul.f32 %v13324_v29, %v14828_v20 }
 0xe2e   :  { %12276 = vmatprep.mubr.msk.bf16.mxu1 %vm13642_vm1, %v13641_v34 }
 0xe2f   :  { %v3707_v37 = vpack.c.bf16 %v3691_v28, %v3691_v28 }
 0xe31   :  { %v3660_v4 = vpop.xlane.xlu0 %3659  ;;  %12271 = vmatmul.mubr.msk.bf16.vlgmr.msra.gmra.mrb[96].mxu0 %vm3516_vm6, %v3706_v21 }
 0xe32   :  { %13325 = vrcp.f32 %v3660_v4  ;;  %12281 = vmatpush3.bf16.msra.mxu0 %v4403_v59  ;;  %12282 = vmatprep.mubr.msk.bf16.mxu0 %vm13642_vm1, %v13641_v34 }
 0xe35   :  { %v2777_v51 = vpop.permute.xlu0 %2776 }
 0xe36   :  { %v4357_v42 = vsel %vm660_vm12, %v2777_v51, 0 }
 0xe37   :  { %12275 = vmatpush3.bf16.msra.mxu1 %v4357_v42 }
 0xe38   :  { %12286 = vmatprep.subr.bf16.mxu1 %v12935_v5 }
 0xe3a   :  { %12277 = vmatmul.mubr.msk.bf16.vlgmr.msra.gmra.mrb[124].mxu1 %vm3516_vm6, %v3707_v37 }
 0xe3b   :  { %12287 = vmatpush3.bf16.msra.mxu1 %v12935_v5 }
 0xe3c   :  { %v13326_v54 = vpop.eup %13325 }
 0xe3d   :  { %v3692_v57 = vmul.f32 %v13326_v54, %v14841_v27 }
 0xe3f   :  { %v3708_v26 = vpack.c.bf16 %v3692_v57, %v3692_v57 }
 0xe41   :  { %12283 = vmatmul.mubr.msk.bf16.vlgmr.msra.gmra.mrb[100].mxu0 %vm3516_vm6, %v3708_v26 }
 0xe42   :  { %4920 = vmatprep.mubr.bf16.mxu0 %v13644_v33 }
 0xe73   :  { %v14940_v48 = vpop.f32.mrb[96].mxu1 }
 0xe74   :  { %v12194_v6 = vpop.f32.mrb[97].mxu1 }
 0xe75   :  { %v3752_v58 = vpop.f32.mrb[98].mxu1  ;;  %v12936_v6 = vld [vmem:[%s16873_s2 + $0x74] ss:$52 sps:$4 sm:$0xff]  }
 0xe76   :  { %v12195_v20 = vpop.f32.mrb[99].mxu1  ;;  %v12937_v58 = vld [vmem:[%s16873_s2 + $0xdc] ss:$52 sps:$4 sm:$0xff]   ;;  %12288 = vmatprep.subr.bf16.mxu1 %v12936_v6 }
 0xe77   :  { %12289 = vmatpush3.bf16.msra.mxu1 %v12936_v6  ;;  %v12938_v20 = vld [vmem:[%s16873_s2 + $0x144] ss:$52 sps:$4 sm:$0xff]  }
 0xe78   :  { %12290 = vmatprep.subr.bf16.mxu1 %v12937_v58 }
 0xe7b   :  { %v14942_v38 = vpop.f32.mrb[72].mxu0  ;;  %v14944_v44 = vpop.f32.mrb[100].mxu1  ;;  %12291 = vmatpush3.bf16.msra.mxu1 %v12937_v58 }
 0xe7c   :  { %v12200_v56 = vpop.f32.mrb[73].mxu0  ;;  %v12206_v0 = vpop.f32.mrb[101].mxu1  ;;  %12292 = vmatprep.subr.bf16.mxu1 %v12938_v20 }
 0xe7d   :  { %v3798_v47 = vpop.f32.mrb[74].mxu0  ;;  %v3844_v45 = vpop.f32.mrb[102].mxu1  ;;  %v12939_v56 = vld [vmem:[%s16873_s2 + $0x1ac] ss:$52 sps:$4 sm:$0xff]  }
 0xe7e   :  { %v12201_v60 = vpop.f32.mrb[75].mxu0  ;;  %v12207_v27 = vpop.f32.mrb[103].mxu1 }
 0xe7f   :  { %12293 = vmatpush3.bf16.msra.mxu1 %v12938_v20 }
 0xe80   :  { %12294 = vmatprep.subr.bf16.mxu1 %v12939_v56 }
 0xe83   :  { %v14946_v32 = vpop.f32.mrb[76].mxu0  ;;  %12295 = vmatpush3.bf16.msra.mxu1 %v12939_v56 }
 0xe84   :  { %v12212_v22 = vpop.f32.mrb[77].mxu0 }
 0xe85   :  { %v3890_v17 = vpop.f32.mrb[78].mxu0  ;;  %v12940_v22 = vld [vmem:[%s16873_s2 + $0x214] ss:$52 sps:$4 sm:$0xff]  }
 0xe86   :  { %v12213_v62 = vpop.f32.mrb[79].mxu0  ;;  %12296 = vmatprep.subr.bf16.mxu1 %v12940_v22 }
 0xe87   :  { %12297 = vmatpush3.bf16.msra.mxu1 %v12940_v22 }
 0xeb4   :  { %v3933_v43 = vpop.f32.mrb[104].mxu1 }
 0xeb5   :  { %v12218_v1 = vpop.f32.mrb[105].mxu1 }
 0xeb6   :  { %v3936_v12 = vpop.f32.mrb[106].mxu1 }
 0xeb7   :  { %v12219_v16 = vpop.f32.mrb[107].mxu1  ;;  %v3979_v11 = vpop.f32.mrb[80].mxu0  ;;  %v12941_v12 = vld [vmem:[%s16873_s2 + $0x27c] ss:$52 sps:$4 sm:$0xff]  }
 0xeb8   :  { %v12746_v23 = vpack.i.bf16 %v3979_v11, %v3933_v43  ;;  %v12224_v18 = vpop.f32.mrb[81].mxu0  ;;  %12298 = vmatprep.subr.bf16.mxu1 %v12941_v12 }
 0xeb9   :  { %v3982_v2 = vpop.f32.mrb[82].mxu0  ;;  %12299 = vmatpush3.bf16.msra.mxu1 %v12941_v12 }
 0xeba   :  { %12747 = vrot.lane.b32.xlu0 %v12746_v23, %s13647_s12  ;;  %v12225_v40 = vpop.f32.mrb[83].mxu0 }
 0xebb   :  { %v12942_v40 = vld [vmem:[%s16873_s2 + $0x2e4] ss:$52 sps:$4 sm:$0xff]  }
 0xebc   :  { %v4025_v14 = vpop.f32.mrb[108].mxu1  ;;  %12300 = vmatprep.subr.bf16.mxu1 %v12942_v40 }
 0xebd   :  { %v12230_v10 = vpop.f32.mrb[109].mxu1  ;;  %12301 = vmatpush3.bf16.msra.mxu1 %v12942_v40 }
 0xebe   :  { %v4028_v31 = vpop.f32.mrb[110].mxu1 }
 0xebf   :  { %v12231_v41 = vpop.f32.mrb[111].mxu1  ;;  %v4071_v35 = vpop.f32.mrb[84].mxu0 }
 0xec0   :  { %v12751_v53 = vpack.i.bf16 %v4071_v35, %v4025_v14  ;;  %v12236_v36 = vpop.f32.mrb[85].mxu0 }
 0xec1   :  { %v4074_v63 = vpop.f32.mrb[86].mxu0 }
 0xec2   :  { %12752 = vrot.lane.b32.xlu1 %v12751_v53, %s13647_s12  ;;  %v12237_v7 = vpop.f32.mrb[87].mxu0 }
 0xec4   :  { %v4117_v24 = vpop.f32.mrb[112].mxu1 }
 0xec5   :  { %v12242_v3 = vpop.f32.mrb[113].mxu1 }
 0xec6   :  { %v4120_v21 = vpop.f32.mrb[114].mxu1 }
 0xec7   :  { %v12243_v29 = vpop.f32.mrb[115].mxu1  ;;  %v4163_v59 = vpop.f32.mrb[88].mxu0 }
 0xec8   :  { %v12756_v4 = vpack.i.bf16 %v4163_v59, %v4117_v24  ;;  %v12248_v28 = vpop.f32.mrb[89].mxu0 }
 0xec9   :  { %v4166_v51 = vpop.f32.mrb[90].mxu0 }
 0xeca   :  { %12757 = vrot.lane.b32.xlu0 %v12756_v4, %s13646_s0  ;;  %v12249_v42 = vpop.f32.mrb[91].mxu0 }
 0xecc   :  { %v4209_v37 = vpop.f32.mrb[116].mxu1 }
 0xecd   :  { %v12254_v54 = vpop.f32.mrb[117].mxu1 }
 0xece   :  { %v4212_v57 = vpop.f32.mrb[118].mxu1 }
 0xecf   :  { %v12255_v26 = vpop.f32.mrb[119].mxu1 }
 0xefc   :  { %v4255_v0 = vpop.f32.mrb[92].mxu0 }
 0xefd   :  { %v12761_v47 = vpack.i.bf16 %v4255_v0, %v4209_v37  ;;  %v12260_v45 = vpop.f32.mrb[93].mxu0 }
 0xefe   :  { %v4258_v60 = vpop.f32.mrb[94].mxu0 }
 0xeff   :  { %12762 = vrot.lane.b32.xlu1 %v12761_v47, %s13646_s0  ;;  %v12261_v27 = vpop.f32.mrb[95].mxu0 }
 0xf00   :  { %v4301_v17 = vpop.f32.mrb[120].mxu1 }
 0xf01   :  { %v12266_v62 = vpop.f32.mrb[121].mxu1 }
 0xf02   :  { %v4304_v43 = vpop.f32.mrb[122].mxu1 }
 0xf03   :  { %v12267_v1 = vpop.f32.mrb[123].mxu1 }
 0xf04   :  { %v4347_v16 = vpop.f32.mrb[96].mxu0 }
 0xf05   :  { %v12766_v11 = vpack.i.bf16 %v4347_v16, %v4301_v17  ;;  %v12272_v23 = vpop.f32.mrb[97].mxu0 }
 0xf06   :  { %v4350_v18 = vpop.f32.mrb[98].mxu0 }
 0xf07   :  { %12767 = vrot.lane.b32.xlu0 %v12766_v11, %s13645_s11  ;;  %v12273_v2 = vpop.f32.mrb[99].mxu0 }
 0xf0d   :  { %v4393_v14 = vpop.f32.mrb[124].mxu1 }
 0xf0e   :  { %v12278_v10 = vpop.f32.mrb[125].mxu1 }
 0xf0f   :  { %v4396_v5 = vpop.f32.mrb[126].mxu1 }
 0xf10   :  { %v12279_v31 = vpop.f32.mrb[127].mxu1 }
 0xf14   :  { %v4439_v41 = vpop.f32.mrb[100].mxu0 }
 0xf15   :  { %v12771_v35 = vpack.i.bf16 %v4439_v41, %v4393_v14  ;;  %v12284_v53 = vpop.f32.mrb[101].mxu0 }
 0xf16   :  { %v4442_v36 = vpop.f32.mrb[102].mxu0 }
 0xf17   :  { %12772 = vrot.lane.b32.xlu1 %v12771_v35, %s13645_s11  ;;  %v12285_v63 = vpop.f32.mrb[103].mxu0  ;;  %v12948_v36 = vld [vmem:[%s16873_s2 + $0x30] ss:$52 sps:$4 sm:$0xff]  }
 0xf18   :  { %v12954_v63 = vld [vmem:[%s16873_s2 + $0x98] ss:$52 sps:$4 sm:$0xff]   ;;  %4941 = vmatprep.subr.bf16.mxu1 %v12948_v36 }
 0xf2c   :  { %v12748_v7 = vpop.permute.xlu0 %12747 }
 0xf2d   :  { %v12750_v3 = vunpack.i.h.bf16 %v12748_v7  ;;  %v12749_v21 = vunpack.i.l.bf16 %v12748_v7  ;;  %v12949_v7 = vld [vmem:[%s16873_s2 + $0x8c] ss:$52 sps:$4 sm:$0xff]  }
 0xf2f   :  { %v4494_v28 = vsel %vm1272_vm9, %v14942_v38, %v12750_v3  ;;  %v4493_v51 = vsel %vm1272_vm9, %v14940_v48, %v12749_v21 }
 0xf34   :  { %v12753_v20 = vpop.permute.xlu1 %12752 }
 0xf35   :  { %v12755_v0 = vunpack.i.h.bf16 %v12753_v20  ;;  %v12754_v47 = vunpack.i.l.bf16 %v12753_v20 }
 0xf37   :  { %v4496_v48 = vsel %vm1272_vm9, %v14946_v32, %v12755_v0  ;;  %v4495_v27 = vsel %vm1272_vm9, %v14944_v44, %v12754_v47  ;;  %v14998_v32 = vld [vmem:[%s16876_s5 + $0x8] sm:$0xff]  ;;  %v12960_v47 = vld [vmem:[%s16873_s2 + $0x100] ss:$52 sps:$4 sm:$0xff]  }
 0xf38   :  { %v4510_v44 = vrot.slane %v14998_v32, %v14131_v19  ;;  %v12957_v0 = vld [vmem:[%s16873_s2 + $0xf8] ss:$52 sps:$4 sm:$0xff]  }
 0xf3c   :  { %v12758_v24 = vpop.permute.xlu0 %12757 }
 0xf3d   :  { %v12760_v29 = vunpack.i.h.bf16 %v12758_v24  ;;  %v12759_v59 = vunpack.i.l.bf16 %v12758_v24  ;;  %v12952_v24 = vld [vmem:[%s16873_s2 + $0x94] ss:$52 sps:$4 sm:$0xff]  }
 0xf3f   :  { %v4497_v54 = vsel %vm2133_vm13, %v4493_v51, %v12759_v59  ;;  %v4498_v57 = vsel %vm2133_vm13, %v4494_v28, %v12760_v29 }
 0xf71   :  { %v12763_v56 = vpop.permute.xlu1 %12762 }
 0xf72   :  { %v12765_v38 = vunpack.i.h.bf16 %v12763_v56  ;;  %v12764_v45 = vunpack.i.l.bf16 %v12763_v56 }
 0xf74   :  { %v4500_v62 = vsel %vm2133_vm13, %v4496_v48, %v12765_v38  ;;  %v4499_v43 = vsel %vm2133_vm13, %v4495_v27, %v12764_v45  ;;  %v12955_v38 = vld [vmem:[%s16873_s2 + $0xf4] ss:$52 sps:$4 sm:$0xff]   ;;  %v12958_v45 = vld [vmem:[%s16873_s2 + $0xfc] ss:$52 sps:$4 sm:$0xff]  }
 0xf75   :  { %v12966_v48 = vld [vmem:[%s16873_s2 + $0x168] ss:$52 sps:$4 sm:$0xff]  }
 0xf76   :  { %v12961_v27 = vld [vmem:[%s16873_s2 + $0x15c] ss:$52 sps:$4 sm:$0xff]  }
 0xf79   :  { %v12768_v4 = vpop.permute.xlu0 %12767 }
 0xf7a   :  { %v12770_v42 = vunpack.i.h.bf16 %v12768_v4  ;;  %v12769_v37 = vunpack.i.l.bf16 %v12768_v4 }
 0xf7c   :  { %v4501_v26 = vsel %vm2136_vm14, %v4497_v54, %v12769_v37  ;;  %v4502_v6 = vsel %vm2136_vm14, %v4498_v57, %v12770_v42 }
 0xf7d   :  { %v4505_v58 = vpack.c.bf16 %v4502_v6, %v4501_v26 }
 0xf7f   :  { %12302 = vmatprep.mubr.bf16.mxu1 %v4505_v58 }
 0xf89   :  { %v12773_v60 = vpop.permute.xlu1 %12772 }
 0xf8a   :  { %v12775_v22 = vunpack.i.h.bf16 %v12773_v60  ;;  %v12774_v17 = vunpack.i.l.bf16 %v12773_v60  ;;  %v12963_v60 = vld [vmem:[%s16873_s2 + $0x160] ss:$52 sps:$4 sm:$0xff]  }
 0xf8c   :  { %v4504_v1 = vsel %vm2136_vm14, %v4500_v62, %v12775_v22  ;;  %v4503_v12 = vsel %vm2136_vm14, %v4499_v43, %v12774_v17  ;;  %v12964_v22 = vld [vmem:[%s16873_s2 + $0x164] ss:$52 sps:$4 sm:$0xff]   ;;  %v12969_v17 = vld [vmem:[%s16873_s2 + $0x1c8] ss:$52 sps:$4 sm:$0xff]  }
 0xf8d   :  { %v4506_v16 = vpack.c.bf16 %v4504_v1, %v4503_v12  ;;  %v12972_v62 = vld [vmem:[%s16873_s2 + $0x1d0] ss:$52 sps:$4 sm:$0xff]   ;;  %v12970_v1 = vld [vmem:[%s16873_s2 + $0x1cc] ss:$52 sps:$4 sm:$0xff]  }
 0xf8e   :  { %v12967_v43 = vld [vmem:[%s16873_s2 + $0x1c4] ss:$52 sps:$4 sm:$0xff]   ;;  %v12973_v12 = vld [vmem:[%s16873_s2 + $0x22c] ss:$52 sps:$4 sm:$0xff]  }
 0xf8f   :  { %12303 = vmatmul.mubr.bf16.vlgmr.msra.gmra.mrb[128].mxu1 %v4506_v16  ;;  %v12975_v16 = vld [vmem:[%s16873_s2 + $0x230] ss:$52 sps:$4 sm:$0xff]  }
 0xf90   :  { %4973 = vmatprep.mubr.bf16.mxu1 %v13644_v33 }
0x1062   :  { %v12304_v11 = vpop.f32.mrb[128].mxu1 }
0x1063   :  { %v4593_v23 = vpop.f32.mrb[129].mxu1  ;;  %v4602_v14 = vadd.f32 %v12304_v11, %v4510_v44  ;;  %v12978_v11 = vld [vmem:[%s16873_s2 + $0x238] ss:$52 sps:$4 sm:$0xff]  }
0x1064   :  { %v4594_v18 = vadd.f32 %v4593_v23, %v4510_v44  ;;  %v12305_v2 = vpop.f32.mrb[130].mxu1  ;;  %v12981_v23 = vld [vmem:[%s16873_s2 + $0x298] ss:$52 sps:$4 sm:$0xff]  }
0x1065   :  { %v4596_v40 = vpop.f32.mrb[131].mxu1  ;;  %v15010_v41 = vadd.f32 %v4602_v14, %v14411_v8  ;;  %v4605_v35 = vadd.f32 %v12305_v2, %v4510_v44  ;;  %v12946_v8 = vld [vmem:[%s16873_s2 + $0x2c] ss:$52 sps:$4 sm:$0xff]   ;;  %v12979_v2 = vld [vmem:[%s16873_s2 + $0x294] ss:$52 sps:$4 sm:$0xff]  }
0x1066   :  { %v15003_v10 = vadd.f32 %v4594_v18, %v14401_v61  ;;  %v4597_v5 = vadd.f32 %v4596_v40, %v4510_v44  ;;  %v12943_v61 = vld [vmem:[%s16873_s2 + $0x24] ss:$52 sps:$4 sm:$0xff]   ;;  %4942 = vmatpush1.bf16.msra.mxu1 %v12946_v8  ;;  %v12976_v44 = vld [vmem:[%s16873_s2 + $0x234] ss:$52 sps:$4 sm:$0xff]   ;;  %v12982_v40 = vld [vmem:[%s16873_s2 + $0x29c] ss:$52 sps:$4 sm:$0xff]  }
0x1067   :  { %v15015_v53 = vadd.f32 %v4605_v35, %v14417_v30  ;;  %v12951_v30 = vld [vmem:[%s16873_s2 + $0x90] ss:$52 sps:$4 sm:$0xff]   ;;  %4943 = vmatprep.subr.bf16.mxu1 %v12954_v63  ;;  %v12984_v18 = vld [vmem:[%s16873_s2 + $0x2a0] ss:$52 sps:$4 sm:$0xff]  }
0x1068   :  { %v15006_v31 = vadd.f32 %v4597_v5, %v14404_v13  ;;  %4612 = vadd.xlane.f32.xlu0 %v15003_v10  ;;  %v12945_v13 = vld [vmem:[%s16873_s2 + $0x28] ss:$52 sps:$4 sm:$0xff]   ;;  %v12987_v14 = vld [vmem:[%s16873_s2 + $0x300] ss:$52 sps:$4 sm:$0xff]  }
0x1069   :  { %4888 = vmatprep.subr.bf16.mxu0 %v12945_v13  ;;  %v12990_v5 = vld [vmem:[%s16873_s2 + $0x308] ss:$52 sps:$4 sm:$0xff]  }
0x106a   :  { %4614 = vadd.xlane.f32.xlu1 %v15006_v31  ;;  %4889 = vmatpush1.bf16.msra.mxu0 %v12943_v61  ;;  %v12985_v35 = vld [vmem:[%s16873_s2 + $0x2fc] ss:$52 sps:$4 sm:$0xff]   ;;  %v12988_v61 = vld [vmem:[%s16873_s2 + $0x304] ss:$52 sps:$4 sm:$0xff]  }
0x106b   :  { %4890 = vmatprep.subr.bf16.mxu0 %v12951_v30  ;;  %4944 = vmatpush1.bf16.msra.mxu1 %v12952_v24 }
0x106c   :  { %4616 = vadd.xlane.f32.xlu0 %v15010_v41  ;;  %4945 = vmatprep.subr.bf16.mxu1 %v12960_v47 }
0x106e   :  { %4891 = vmatpush1.bf16.msra.mxu0 %v12949_v7 }
0x106f   :  { %4892 = vmatprep.subr.bf16.mxu0 %v12957_v0  ;;  %4946 = vmatpush1.bf16.msra.mxu1 %v12958_v45 }
0x1070   :  { %4618 = vadd.xlane.f32.xlu0 %v15015_v53  ;;  %4947 = vmatprep.subr.bf16.mxu1 %v12966_v48 }
0x1072   :  { %4893 = vmatpush1.bf16.msra.mxu0 %v12955_v38 }
0x1073   :  { %4894 = vmatprep.subr.bf16.mxu0 %v12963_v60  ;;  %4948 = vmatpush1.bf16.msra.mxu1 %v12964_v22 }
0x1074   :  { %4949 = vmatprep.subr.bf16.mxu1 %v12972_v62 }
0x1076   :  { %4895 = vmatpush1.bf16.msra.mxu0 %v12961_v27 }
0x1077   :  { %4896 = vmatprep.subr.bf16.mxu0 %v12969_v17  ;;  %4950 = vmatpush1.bf16.msra.mxu1 %v12970_v1  ;;  %v12993_v1 = vld [vmem:[%s16874_s3] sm:$0xff]  }
0x1078   :  { %4951 = vmatprep.subr.bf16.mxu1 %v12978_v11  ;;  %v12997_v11 = vld [vmem:[%s16874_s3 + $0x8] sm:$0xff]  }
0x107a   :  { %4897 = vmatpush1.bf16.msra.mxu0 %v12967_v43 }
0x107b   :  { %4898 = vmatprep.subr.bf16.mxu0 %v12975_v16  ;;  %4952 = vmatpush1.bf16.msra.mxu1 %v12976_v44  ;;  %v12995_v16 = vld [vmem:[%s16874_s3 + $0x48] sm:$0xff]  }
0x107c   :  { %4953 = vmatprep.subr.bf16.mxu1 %v12984_v18  ;;  %v12996_v44 = vld [vmem:[%s16874_s3 + $0xc8] sm:$0xff]   ;;  %v12999_v18 = vld [vmem:[%s16874_s3 + $0x50] sm:$0xff]  }
0x107e   :  { %4899 = vmatpush1.bf16.msra.mxu0 %v12973_v12  ;;  %v12994_v12 = vld [vmem:[%s16874_s3 + $0x80] sm:$0xff]  }
0x107f   :  { %4900 = vmatprep.subr.bf16.mxu0 %v12981_v23  ;;  %4954 = vmatpush1.bf16.msra.mxu1 %v12982_v40  ;;  %v12998_v23 = vld [vmem:[%s16874_s3 + $0x88] sm:$0xff]   ;;  %v13001_v40 = vld [vmem:[%s16874_s3 + $0x10] sm:$0xff]  }
0x1080   :  { %4955 = vmatprep.subr.bf16.mxu1 %v12990_v5  ;;  %v13003_v5 = vld [vmem:[%s16874_s3 + $0x58] sm:$0xff]  }
0x1082   :  { %4901 = vmatpush1.bf16.msra.mxu0 %v12979_v2  ;;  %v13000_v2 = vld [vmem:[%s16874_s3 + $0xd0] sm:$0xff]  }
0x1083   :  { %4902 = vmatprep.subr.bf16.mxu0 %v12987_v14  ;;  %4956 = vmatpush1.bf16.msra.mxu1 %v12988_v61  ;;  %v13002_v14 = vld [vmem:[%s16874_s3 + $0x90] sm:$0xff]   ;;  %v13005_v61 = vld [vmem:[%s16874_s3 + $0x18] sm:$0xff]  }
0x1086   :  { %4903 = vmatpush1.bf16.msra.mxu0 %v12985_v35  ;;  %v13004_v35 = vld [vmem:[%s16874_s3 + $0xd8] sm:$0xff]  }
0x10f5   :  { %v4613_v3 = vpop.xlane.xlu0 %4612 }
0x10f6   :  { %v4620_v21 = vmul.f32 0.0078125, %v4613_v3 }
0x10f7   :  { %v4615_v29 = vpop.xlane.xlu1 %4614 }
0x10f8   :  { %v15043_v59 = vsub.f32 %v15003_v10, %v4620_v21  ;;  %v4621_v4 = vmul.f32 0.0078125, %v4615_v29 }
0x10f9   :  { %v4617_v28 = vpop.xlane.xlu0 %4616 }
0x10fa   :  { %v15046_v51 = vsub.f32 %v15006_v31, %v4621_v4  ;;  %v4622_v42 = vmul.f32 0.0078125, %v4617_v28  ;;  %v4628_v37 = vmul.f32 %v15043_v59, %v15043_v59 }
0x10fc   :  { %v15051_v54 = vsub.f32 %v15010_v41, %v4622_v42  ;;  %4632 = vadd.xlane.f32.xlu0 %v4628_v37  ;;  %v4629_v57 = vmul.f32 %v15046_v51, %v15046_v51  ;;  %v4659_v42 = vrot.slane %v14998_v32, %v14168_v55 }
0x10fd   :  { %v4619_v26 = vpop.xlane.xlu0 %4618 }
0x10fe   :  { %v4623_v6 = vmul.f32 0.0078125, %v4619_v26  ;;  %4634 = vadd.xlane.f32.xlu1 %v4629_v57  ;;  %v4630_v58 = vmul.f32 %v15051_v54, %v15051_v54 }
0x1100   :  { %v15058_v20 = vsub.f32 %v15015_v53, %v4623_v6  ;;  %4636 = vadd.xlane.f32.xlu0 %v4630_v58 }
0x1102   :  { %v4631_v56 = vmul.f32 %v15058_v20, %v15058_v20 }
0x1104   :  { %4638 = vadd.xlane.f32.xlu1 %v4631_v56  ;;  %v4667_v56 = vrot.slane %v14998_v32, %v14368_v25 }
0x1189   :  { %v4633_v13 = vpop.xlane.xlu0 %4632 }
0x118a   :  { %v4640_v8 = vmul.f32 0.0078125, %v4633_v13  ;;  %v13006_v13 = vld [vmem:[%s16874_s3 + $0x98] sm:$0xff]  }
0x118b   :  { %v4635_v36 = vpop.xlane.xlu1 %4634 }
0x118c   :  { %v4644_v30 = vadd.f32 1e-05, %v4640_v8  ;;  %v4641_v63 = vmul.f32 0.0078125, %v4635_v36  ;;  %v13007_v8 = vld [vmem:[%s16874_s3 + $0x60] sm:$0xff]  }
0x118d   :  { %v4637_v7 = vpop.xlane.xlu0 %4636  ;;  %v13008_v36 = vld [vmem:[%s16874_s3 + $0xe0] sm:$0xff]  }
0x118e   :  { %13327 = vrsqrt.f32 %v4644_v30  ;;  %v4645_v24 = vadd.f32 1e-05, %v4641_v63  ;;  %v4642_v3 = vmul.f32 0.0078125, %v4637_v7  ;;  %v13009_v30 = vld [vmem:[%s16874_s3 + $0x20] sm:$0xff]   ;;  %v13011_v7 = vld [vmem:[%s16874_s3 + $0x68] sm:$0xff]  }
0x118f   :  { %v13010_v63 = vld [vmem:[%s16874_s3 + $0xa0] sm:$0xff]  }
0x1190   :  { %13329 = vrsqrt.f32 %v4645_v24  ;;  %v4646_v21 = vadd.f32 1e-05, %v4642_v3  ;;  %v13012_v24 = vld [vmem:[%s16874_s3 + $0xe8] sm:$0xff]  }
0x1191   :  { %v4639_v29 = vpop.xlane.xlu1 %4638  ;;  %v13013_v3 = vld [vmem:[%s16874_s3 + $0x28] sm:$0xff]  }
0x1192   :  { %13331 = vrsqrt.f32 %v4646_v21  ;;  %v4643_v4 = vmul.f32 0.0078125, %v4639_v29  ;;  %v13014_v21 = vld [vmem:[%s16874_s3 + $0xa8] sm:$0xff]   ;;  %v13015_v29 = vld [vmem:[%s16874_s3 + $0x70] sm:$0xff]  }
0x1194   :  { %v4647_v28 = vadd.f32 1e-05, %v4643_v4  ;;  %v13016_v4 = vld [vmem:[%s16874_s3 + $0xf0] sm:$0xff]  }
0x1196   :  { %13333 = vrsqrt.f32 %v4647_v28  ;;  %v13017_v28 = vld [vmem:[%s16874_s3 + $0x30] sm:$0xff]  }
0x1198   :  { %v13328_v37 = vpop.eup %13327 }
0x1199   :  { %v4652_v57 = vmul.f32 %v13328_v37, %v15043_v59  ;;  %v13019_v37 = vld [vmem:[%s16874_s3 + $0x78] sm:$0xff]  }
0x119a   :  { %v13330_v26 = vpop.eup %13329 }
0x119b   :  { %v4653_v6 = vmul.f32 %v13330_v26, %v15046_v51  ;;  %v4660_v58 = vmul.f32 %v4659_v42, %v4652_v57  ;;  %v13020_v57 = vld [vmem:[%s16874_s3 + $0xf8] sm:$0xff]  }
0x119c   :  { %v13332_v0 = vpop.eup %13331  ;;  %v13021_v26 = vld [vmem:[%s16874_s3 + $0x38] sm:$0xff]  }
0x119d   :  { %v4661_v47 = vmul.f32 %v4659_v42, %v4653_v6  ;;  %v4668_v38 = vadd.f32 %v4667_v56, %v4660_v58  ;;  %v4654_v60 = vmul.f32 %v13332_v0, %v15051_v54  ;;  %v12991_v54 = vld [vmem:[%s16874_s3 + $0x40] sm:$0xff]   ;;  %v13022_v6 = vld [vmem:[%s16874_s3 + $0xb8] sm:$0xff]  }
0x119e   :  { %11645 = vmatprep.subr.bf16.mxu0 %v12991_v54  ;;  %v4706_v58 = vld [vmem:[%s16877_s6] sm:$0xf] }
0x119f   :  { %v4669_v45 = vadd.f32 %v4667_v56, %v4661_v47  ;;  %v4662_v59 = vmul.f32 %v4659_v42, %v4654_v60  ;;  %v15246_v0 = vrot.slane %v4706_v58, %v14116_v52  ;;  %v15249_v47 = vrot.slane %v4706_v58, %v14111_v50 }
0x11a0   :  { %v13334_v48 = vpop.eup %13333 }
0x11a1   :  { %v4704_v27 = vpack.c.bf16 %v4669_v45, %v4668_v38  ;;  %v4655_v22 = vmul.f32 %v13334_v48, %v15058_v20  ;;  %v4670_v62 = vadd.f32 %v4667_v56, %v4662_v59  ;;  %v12992_v20 = vld [vmem:[%s16874_s3 + $0xc0] sm:$0xff]   ;;  %v15252_v38 = vrot.slane %v4706_v58, %v14128_v15 }
0x11a2   :  { %11673 = vmatprep.subr.bf16.mxu1 %v12992_v20 }
0x11a3   :  { %4921 = vmatmul.mubr.bf16.vlgmr.msra.gmra.mrb[104].mxu0 %v4704_v27  ;;  %4974 = vmatmul.mubr.bf16.vlgmr.msra.gmra.mrb[132].mxu1 %v4704_v27  ;;  %v4663_v17 = vmul.f32 %v4659_v42, %v4655_v22  ;;  %v13018_v42 = vld [vmem:[%s16874_s3 + $0xb0] sm:$0xff]  }
0x11a4   :  { %4930 = vmatprep.mubr.bf16.mxu0 %v13644_v33  ;;  %4983 = vmatprep.mubr.bf16.mxu1 %v13644_v33 }
0x11a5   :  { %v4671_v51 = vadd.f32 %v4667_v56, %v4663_v17  ;;  %11646 = vmatpush3.bf16.msra.mxu0 %v12993_v1  ;;  %11674 = vmatpush3.bf16.msra.mxu1 %v12994_v12  ;;  %v4711_v56 = vrot.slane %v4706_v58, %v13998_v46 }
0x11a6   :  { %11647 = vmatprep.subr.bf16.mxu0 %v12995_v16  ;;  %11675 = vmatprep.subr.bf16.mxu1 %v12996_v44 }
0x11a7   :  { %v4705_v43 = vpack.c.bf16 %v4671_v51, %v4670_v62 }
0x11a9   :  { %11648 = vmatpush3.bf16.msra.mxu0 %v12997_v11  ;;  %11676 = vmatpush3.bf16.msra.mxu1 %v12998_v23 }
0x11aa   :  { %11649 = vmatprep.subr.bf16.mxu0 %v12999_v18  ;;  %11677 = vmatprep.subr.bf16.mxu1 %v13000_v2 }
0x11ab   :  { %4931 = vmatmul.mubr.bf16.gmra.mrb[108].mxu0 %v4705_v43  ;;  %4984 = vmatmul.mubr.bf16.gmra.mrb[136].mxu1 %v4705_v43 }
0x11ad   :  { %11650 = vmatpush3.bf16.msra.mxu0 %v13001_v40  ;;  %11678 = vmatpush3.bf16.msra.mxu1 %v13002_v14 }
0x11ae   :  { %11651 = vmatprep.subr.bf16.mxu0 %v13003_v5  ;;  %11679 = vmatprep.subr.bf16.mxu1 %v13004_v35 }
0x11b1   :  { %11652 = vmatpush3.bf16.msra.mxu0 %v13005_v61  ;;  %11680 = vmatpush3.bf16.msra.mxu1 %v13006_v13 }
0x11b2   :  { %11653 = vmatprep.subr.bf16.mxu0 %v13007_v8  ;;  %11681 = vmatprep.subr.bf16.mxu1 %v13008_v36 }
0x11b5   :  { %11654 = vmatpush3.bf16.msra.mxu0 %v13009_v30  ;;  %11682 = vmatpush3.bf16.msra.mxu1 %v13010_v63 }
0x11b6   :  { %11655 = vmatprep.subr.bf16.mxu0 %v13011_v7  ;;  %11683 = vmatprep.subr.bf16.mxu1 %v13012_v24 }
0x11b9   :  { %11656 = vmatpush3.bf16.msra.mxu0 %v13013_v3  ;;  %11684 = vmatpush3.bf16.msra.mxu1 %v13014_v21 }
0x11ba   :  { %11657 = vmatprep.subr.bf16.mxu0 %v13015_v29  ;;  %11685 = vmatprep.subr.bf16.mxu1 %v13016_v4 }
0x11bd   :  { %11658 = vmatpush3.bf16.msra.mxu0 %v13017_v28  ;;  %11686 = vmatpush3.bf16.msra.mxu1 %v13018_v42 }
0x11be   :  { %11659 = vmatprep.subr.bf16.mxu0 %v13019_v37  ;;  %11687 = vmatprep.subr.bf16.mxu1 %v13020_v57 }
0x11c1   :  { %11660 = vmatpush3.bf16.msra.mxu0 %v13021_v26  ;;  %11688 = vmatpush3.bf16.msra.mxu1 %v13022_v6 }
0x11c2   :  { %12306 = vmatprep.subr.bf16.mxu0 %v13641_v34 }
0x1276   :  { %v4922_v45 = vpop.f32.mrb[104].mxu0  ;;  %v4975_v60 = vpop.f32.mrb[132].mxu1 }
0x1277   :  { %v15254_v48 = vadd.f32 %v4922_v45, %v4711_v56  ;;  %v15257_v27 = vadd.f32 %v4975_v60, %v15246_v0  ;;  %v4924_v22 = vpop.f32.mrb[105].mxu0  ;;  %v4977_v59 = vpop.f32.mrb[133].mxu1 }
0x1278   :  { %v15260_v17 = vadd.f32 %v4924_v22, %v15249_v47  ;;  %v15263_v51 = vadd.f32 %v4977_v59, %v15252_v38  ;;  %v4926_v62 = vpop.f32.mrb[106].mxu0  ;;  %v4979_v43 = vpop.f32.mrb[134].mxu1 }
0x1279   :  { %v10940_v54 = vmul.f32 -1.702, %v15254_v48  ;;  %v10942_v20 = vmul.f32 -1.702, %v15257_v27  ;;  %v15267_v1 = vadd.f32 %v4926_v62, %v4711_v56  ;;  %v15270_v12 = vadd.f32 %v4979_v43, %v15246_v0  ;;  %v4928_v16 = vpop.f32.mrb[107].mxu0  ;;  %v4981_v44 = vpop.f32.mrb[135].mxu1 }
0x127a   :  { %v10941_v11 = vmul.f32 -1.702, %v15260_v17  ;;  %v10943_v23 = vmul.f32 -1.702, %v15263_v51  ;;  %v15275_v18 = vadd.f32 %v4928_v16, %v15249_v47  ;;  %v15278_v2 = vadd.f32 %v4981_v44, %v15252_v38 }
0x127b   :  { %v5026_v40 = vmul.f32 1.442695, %v10940_v54  ;;  %v5030_v14 = vmul.f32 1.442695, %v10942_v20  ;;  %v10944_v5 = vmul.f32 -1.702, %v15267_v1 }
0x127c   :  { %v5028_v35 = vmul.f32 1.442695, %v10941_v11  ;;  %v5032_v61 = vmul.f32 1.442695, %v10943_v23  ;;  %v10946_v13 = vmul.f32 -1.702, %v15270_v12 }
0x127d   :  { %13335 = vpow2.f32 %v5026_v40  ;;  %v5034_v8 = vmul.f32 1.442695, %v10944_v5  ;;  %v10945_v36 = vmul.f32 -1.702, %v15275_v18  ;;  %v10947_v30 = vmul.f32 -1.702, %v15278_v2 }
0x127e   :  { %13337 = vpow2.f32 %v5030_v14  ;;  %v5038_v63 = vmul.f32 1.442695, %v10946_v13  ;;  %v4932_v7 = vpop.f32.mrb[108].mxu0  ;;  %v4985_v24 = vpop.f32.mrb[136].mxu1 }
0x127f   :  { %13339 = vpow2.f32 %v5028_v35  ;;  %v5036_v3 = vmul.f32 1.442695, %v10945_v36  ;;  %v15284_v21 = vadd.f32 %v4932_v7, %v4711_v56  ;;  %v4934_v29 = vpop.f32.mrb[109].mxu0  ;;  %v4987_v4 = vpop.f32.mrb[137].mxu1  ;;  %v5040_v28 = vmul.f32 1.442695, %v10947_v30 }
0x1280   :  { %13341 = vpow2.f32 %v5032_v61  ;;  %v15287_v42 = vadd.f32 %v4985_v24, %v15246_v0  ;;  %v15290_v37 = vadd.f32 %v4934_v29, %v15249_v47  ;;  %v4936_v57 = vpop.f32.mrb[110].mxu0  ;;  %v4989_v26 = vpop.f32.mrb[138].mxu1  ;;  %v15299_v44 = vadd.f32 %v4987_v4, %v15252_v38 }
0x1281   :  { %13343 = vpow2.f32 %v5034_v8  ;;  %v10948_v6 = vmul.f32 -1.702, %v15284_v21  ;;  %v15293_v58 = vadd.f32 %v4936_v57, %v4711_v56  ;;  %v4938_v45 = vpop.f32.mrb[111].mxu0  ;;  %v4991_v60 = vpop.f32.mrb[139].mxu1  ;;  %v15303_v36 = vadd.f32 %v4989_v26, %v15246_v0 }
0x1282   :  { %13345 = vpow2.f32 %v5038_v63  ;;  %v10950_v22 = vmul.f32 -1.702, %v15287_v42  ;;  %v10949_v59 = vmul.f32 -1.702, %v15290_v37  ;;  %v10951_v61 = vmul.f32 -1.702, %v15299_v44 }
0x1283   :  { %13347 = vpow2.f32 %v5036_v3  ;;  %v5042_v62 = vmul.f32 1.442695, %v10948_v6  ;;  %v10952_v43 = vmul.f32 -1.702, %v15293_v58  ;;  %v15306_v7 = vadd.f32 %v4938_v45, %v15249_v47 }
0x1284   :  { %13349 = vpow2.f32 %v5040_v28  ;;  %v5046_v54 = vmul.f32 1.442695, %v10950_v22  ;;  %v5044_v20 = vmul.f32 1.442695, %v10949_v59  ;;  %v15309_v29 = vadd.f32 %v4991_v60, %v15252_v38 }
0x1285   :  { %13351 = vpow2.f32 %v5042_v62  ;;  %v5050_v16 = vmul.f32 1.442695, %v10952_v43  ;;  %v5048_v57 = vmul.f32 1.442695, %v10951_v61  ;;  %v10954_v26 = vmul.f32 -1.702, %v15303_v36 }
0x1286   :  { %13353 = vpow2.f32 %v5046_v54  ;;  %v10953_v47 = vmul.f32 -1.702, %v15306_v7  ;;  %v10955_v59 = vmul.f32 -1.702, %v15309_v29 }
0x1287   :  { %v13336_v56 = vpop.eup %13335  ;;  %13355 = vpow2.f32 %v5044_v20  ;;  %v5054_v60 = vmul.f32 1.442695, %v10954_v26 }
0x1288   :  { %v13338_v11 = vpop.eup %13337  ;;  %v5058_v23 = vadd.f32 1.0, %v13336_v56  ;;  %13357 = vpow2.f32 %v5050_v16  ;;  %v5052_v20 = vmul.f32 1.442695, %v10953_v47  ;;  %v5056_v56 = vmul.f32 1.442695, %v10955_v59 }
0x1289   :  { %v13340_v40 = vpop.eup %13339  ;;  %v5060_v14 = vadd.f32 1.0, %v13338_v11 }
0x128a   :  { %v13342_v5 = vpop.eup %13341  ;;  %13359 = vrcp.f32 %v5058_v23  ;;  %v5059_v35 = vadd.f32 1.0, %v13340_v40 }
0x128b   :  { %v13344_v13 = vpop.eup %13343  ;;  %13361 = vrcp.f32 %v5060_v14  ;;  %v5061_v8 = vadd.f32 1.0, %v13342_v5 }
0x128c   :  { %v13346_v30 = vpop.eup %13345  ;;  %13363 = vrcp.f32 %v5059_v35  ;;  %v5062_v63 = vadd.f32 1.0, %v13344_v13 }
0x128d   :  { %v13348_v24 = vpop.eup %13347  ;;  %13365 = vrcp.f32 %v5061_v8  ;;  %v5064_v3 = vadd.f32 1.0, %v13346_v30 }
0x128e   :  { %v13350_v4 = vpop.eup %13349  ;;  %13367 = vrcp.f32 %v5062_v63  ;;  %v5063_v28 = vadd.f32 1.0, %v13348_v24 }
0x128f   :  { %v13352_v6 = vpop.eup %13351  ;;  %13369 = vrcp.f32 %v5064_v3  ;;  %v5065_v0 = vadd.f32 1.0, %v13350_v4 }
0x1290   :  { %13371 = vrcp.f32 %v5063_v28  ;;  %v5066_v22 = vadd.f32 1.0, %v13352_v6  ;;  %v13354_v45 = vpop.eup %13353 }
0x1291   :  { %13373 = vrcp.f32 %v5065_v0  ;;  %v13356_v62 = vpop.eup %13355  ;;  %v5068_v6 = vadd.f32 1.0, %v13354_v45 }
0x1292   :  { %13375 = vpow2.f32 %v5048_v57  ;;  %v13358_v38 = vpop.eup %13357 }
0x1293   :  { %13377 = vrcp.f32 %v5066_v22  ;;  %v5070_v54 = vadd.f32 1.0, %v13358_v38 }
0x1294   :  { %v13360_v43 = vpop.eup %13359 }
0x1295   :  { %v13362_v16 = vpop.eup %13361  ;;  %13379 = vrcp.f32 %v5070_v54  ;;  %v5106_v5 = vmul.f32 %v13360_v43, %v15254_v48 }
0x1296   :  { %v13364_v11 = vpop.eup %13363  ;;  %13381 = vpow2.f32 %v5054_v60  ;;  %v5108_v13 = vmul.f32 %v13362_v16, %v15257_v27  ;;  %v13023_v27 = vld [vmem:[%s16873_s2 + $0x360] ss:$52 sps:$4 sm:$0xff]  }
0x1297   :  { %v13366_v23 = vpop.eup %13365  ;;  %13383 = vpow2.f32 %v5052_v20  ;;  %v5107_v63 = vmul.f32 %v13364_v11, %v15260_v17 }
0x1298   :  { %v13368_v40 = vpop.eup %13367  ;;  %13385 = vpow2.f32 %v5056_v56  ;;  %v5109_v28 = vmul.f32 %v13366_v23, %v15263_v51 }
0x1299   :  { %v13370_v14 = vpop.eup %13369  ;;  %v5110_v35 = vmul.f32 %v13368_v40, %v15267_v1  ;;  %13387 = vrcp.f32 %v5068_v6 }
0x129a   :  { %v13372_v61 = vpop.eup %13371  ;;  %v5112_v8 = vmul.f32 %v13370_v14, %v15270_v12  ;;  %v5067_v12 = vadd.f32 1.0, %v13356_v62 }
0x129b   :  { %v13374_v30 = vpop.eup %13373  ;;  %v5186_v24 = vpack.c.bf16 %v5110_v35, %v5106_v5  ;;  %v5111_v3 = vmul.f32 %v13372_v61, %v15275_v18 }
0x129c   :  { %v13376_v4 = vpop.eup %13375  ;;  %v5188_v57 = vpack.c.bf16 %v5112_v8, %v5108_v13  ;;  %v5113_v48 = vmul.f32 %v13374_v30, %v15278_v2  ;;  %13389 = vrcp.f32 %v5067_v12  ;;  %v13030_v8 = vld [vmem:[%s16873_s2 + $0x638] ss:$52 sps:$4 sm:$0xff]  }
0x129d   :  { %v5187_v1 = vpack.c.bf16 %v5111_v3, %v5107_v63  ;;  %v13378_v0 = vpop.eup %13377  ;;  %v5069_v22 = vadd.f32 1.0, %v13376_v4  ;;  %v5197_v63 = vrot.slane %v14998_v32, %v14515_v39 }
0x129e   :  { %v5189_v26 = vpack.c.bf16 %v5113_v48, %v5109_v28  ;;  %v5114_v51 = vmul.f32 %v13378_v0, %v15284_v21 }
0x129f   :  { %5422 = vmatprep.mubr.bf16.mxu0 %v5187_v1  ;;  %v13380_v17 = vpop.eup %13379  ;;  %13391 = vrcp.f32 %v5069_v22 }
0x12a0   :  { %5471 = vmatprep.mubr.bf16.mxu1 %v5189_v26  ;;  %5423 = vmatmul.mubr.bf16.vlgmr.msra.gmra.mrb[112].mxu0 %v5186_v24  ;;  %v13382_v18 = vpop.eup %13381  ;;  %v5118_v2 = vmul.f32 %v13380_v17, %v15293_v58 }
0x12a1   :  { %5472 = vmatmul.mubr.bf16.vlgmr.msra.gmra.mrb[140].mxu1 %v5188_v57  ;;  %12307 = vmatpush3.bf16.msra.mxu0 %v13023_v27  ;;  %v13384_v47 = vpop.eup %13383  ;;  %v5072_v45 = vadd.f32 1.0, %v13382_v18 }
0x12a2   :  { %12308 = vmatprep.subr.bf16.mxu0 %v13641_v34  ;;  %v13386_v59 = vpop.eup %13385  ;;  %v5071_v62 = vadd.f32 1.0, %v13384_v47  ;;  %v5190_v38 = vpack.c.bf16 %v5118_v2, %v5114_v51 }
0x12a3   :  { %13393 = vrcp.f32 %v5072_v45  ;;  %v5073_v60 = vadd.f32 1.0, %v13386_v59  ;;  %v13388_v43 = vpop.eup %13387 }
0x12a4   :  { %13395 = vrcp.f32 %v5071_v62  ;;  %v5116_v16 = vmul.f32 %v13388_v43, %v15287_v42  ;;  %v13024_v42 = vld [vmem:[%s16873_s2 + $0x3c8] ss:$52 sps:$4 sm:$0xff]  }
0x12a5   :  { %13397 = vrcp.f32 %v5073_v60  ;;  %12309 = vmatpush3.bf16.msra.mxu0 %v13024_v42 }
0x12a6   :  { %v13390_v21 = vpop.eup %13389  ;;  %12310 = vmatprep.subr.bf16.mxu0 %v13641_v34 }
0x12a7   :  { %v5115_v23 = vmul.f32 %v13390_v21, %v15290_v37  ;;  %v13025_v37 = vld [vmem:[%s16873_s2 + $0x430] ss:$52 sps:$4 sm:$0xff]  }
0x12a9   :  { %v13392_v54 = vpop.eup %13391  ;;  %12311 = vmatpush3.bf16.msra.mxu0 %v13025_v37 }
0x12aa   :  { %v5117_v14 = vmul.f32 %v13392_v54, %v15299_v44  ;;  %12312 = vmatprep.subr.bf16.mxu0 %v13641_v34  ;;  %v13026_v44 = vld [vmem:[%s16873_s2 + $0x498] ss:$52 sps:$4 sm:$0xff]  }
0x12ad   :  { %v13394_v20 = vpop.eup %13393  ;;  %12313 = vmatpush3.bf16.msra.mxu0 %v13026_v44 }
0x12ae   :  { %v13396_v58 = vpop.eup %13395  ;;  %v5120_v56 = vmul.f32 %v13394_v20, %v15303_v36  ;;  %12314 = vmatprep.subr.bf16.mxu0 %v13641_v34  ;;  %v13027_v36 = vld [vmem:[%s16873_s2 + $0x500] ss:$52 sps:$4 sm:$0xff]  }
0x12af   :  { %v13398_v11 = vpop.eup %13397  ;;  %v5119_v40 = vmul.f32 %v13396_v58, %v15306_v7  ;;  %v13028_v7 = vld [vmem:[%s16873_s2 + $0x568] ss:$52 sps:$4 sm:$0xff]  }
0x12b0   :  { %v5121_v5 = vmul.f32 %v13398_v11, %v15309_v29  ;;  %v5192_v35 = vpack.c.bf16 %v5120_v56, %v5116_v16  ;;  %v13029_v29 = vld [vmem:[%s16873_s2 + $0x5d0] ss:$52 sps:$4 sm:$0xff]  }
0x12b1   :  { %v5191_v61 = vpack.c.bf16 %v5119_v40, %v5115_v23  ;;  %12315 = vmatpush3.bf16.msra.mxu0 %v13027_v36 }
0x12b2   :  { %v5193_v13 = vpack.c.bf16 %v5121_v5, %v5117_v14  ;;  %12316 = vmatprep.subr.bf16.mxu0 %v13641_v34 }
0x12b3   :  { %5430 = vmatprep.mubr.bf16.mxu0 %v5191_v61 }
0x12b4   :  { %5479 = vmatprep.mubr.bf16.mxu1 %v5193_v13  ;;  %5431 = vmatmul.mubr.bf16.gmra.mrb[116].mxu0 %v5190_v38 }
0x12b5   :  { %5480 = vmatmul.mubr.bf16.gmra.mrb[144].mxu1 %v5192_v35  ;;  %12322 = vmatprep.mubr.msk.bf16.mxu0 %vm13642_vm1, %v13641_v34 }
0x12b6   :  { %5894 = vmatprep.mubr.bf16.mxu1 %v13644_v33  ;;  %12317 = vmatpush3.bf16.msra.mxu0 %v13028_v7 }
0x12b7   :  { %12318 = vmatprep.subr.bf16.mxu0 %v13641_v34 }
0x12ba   :  { %12319 = vmatpush3.bf16.msra.mxu0 %v13029_v29 }
0x12bb   :  { %12320 = vmatprep.subr.bf16.mxu0 %v13641_v34 }
0x12be   :  { %12321 = vmatpush3.bf16.msra.mxu0 %v13030_v8 }
0x12bf   :  { %12326 = vmatprep.subr.bf16.mxu0 %v13641_v34 }
0x1373   :  { %v11661_v30 = vpop.f32.mrb[112].mxu0 }
0x1374   :  { %v11689_v24 = vpop.f32.mrb[140].mxu1  ;;  %v11662_v3 = vpop.f32.mrb[113].mxu0 }
0x1375   :  { %v11663_v4 = vadd.f32 %v11662_v3, %v11661_v30  ;;  %v11690_v28 = vpop.f32.mrb[141].mxu1  ;;  %v11664_v57 = vpop.f32.mrb[114].mxu0 }
0x1376   :  { %v11691_v48 = vadd.f32 %v11690_v28, %v11689_v24  ;;  %v11692_v6 = vpop.f32.mrb[142].mxu1  ;;  %v11665_v1 = vpop.f32.mrb[115].mxu0 }
0x1377   :  { %v5425_v27 = vadd.f32 %v11663_v4, %v5197_v63  ;;  %v11666_v0 = vadd.f32 %v11665_v1, %v11664_v57  ;;  %v11693_v12 = vpop.f32.mrb[143].mxu1 }
0x1378   :  { %v11694_v26 = vadd.f32 %v11693_v12, %v11692_v6  ;;  %v13033_v12 = vld [vmem:[%s16873_s2 + $0x354] ss:$52 sps:$4 sm:$0xff]  }
0x1379   :  { %v5474_v22 = vadd.f32 %v11691_v48, %v5425_v27  ;;  %v5428_v17 = vadd.f32 %v11666_v0, %v5197_v63  ;;  %v13031_v0 = vld [vmem:[%s16873_s2 + $0x350] ss:$52 sps:$4 sm:$0xff]   ;;  %5862 = vmatprep.subr.bf16.mxu1 %v13033_v12 }
0x137a   :  { %5863 = vmatpush1.bf16.msra.mxu1 %v13031_v0 }
0x137b   :  { %v5477_v18 = vadd.f32 %v11694_v26, %v5428_v17  ;;  %v15373_v16 = vadd.f32 %v5474_v22, %v15003_v10  ;;  %v13034_v26 = vld [vmem:[%s16873_s2 + $0x358] ss:$52 sps:$4 sm:$0xff]  }
0x137d   :  { %v15368_v51 = vadd.f32 %v5477_v18, %v15006_v31  ;;  %v5513_v5 = vpack.c.bf16 %v15373_v16, %v15373_v16 }
0x137f   :  { %v5514_v38 = vpack.c.bf16 %v15368_v51, %v15368_v51  ;;  %v5525_v37 = vunpack.c.l.b16 %v5513_v5  ;;  %v13050_v5 = vld [vmem:[%s16873_s2 + $0x4f8] ss:$52 sps:$4 sm:$0xff]  }
0x1381   :  { %v5526_v23 = vunpack.c.l.b16 %v5514_v38 }
0x1383   :  { %v5529_v13 = vrot.slane %v5526_v23, 7  ;;  %v13049_v23 = vld [vmem:[%s16873_s2 + $0x4f4] ss:$52 sps:$4 sm:$0xff]  }
0x1387   :  { %v11667_v2 = vpop.f32.mrb[116].mxu0 }
0x1388   :  { %v11695_v32 = vpop.f32.mrb[144].mxu1  ;;  %v11668_v47 = vpop.f32.mrb[117].mxu0 }
0x1389   :  { %v11669_v45 = vadd.f32 %v11668_v47, %v11667_v2  ;;  %v11696_v59 = vpop.f32.mrb[145].mxu1  ;;  %v11670_v62 = vpop.f32.mrb[118].mxu0 }
0x138a   :  { %v11697_v60 = vadd.f32 %v11696_v59, %v11695_v32  ;;  %v11698_v43 = vpop.f32.mrb[146].mxu1  ;;  %v11671_v21 = vpop.f32.mrb[119].mxu0 }
0x138b   :  { %v5433_v54 = vadd.f32 %v11669_v45, %v5197_v63  ;;  %v11672_v20 = vadd.f32 %v11671_v21, %v11670_v62  ;;  %v11699_v58 = vpop.f32.mrb[147].mxu1  ;;  %v13038_v21 = vld [vmem:[%s16873_s2 + $0x3c0] ss:$52 sps:$4 sm:$0xff]  }
0x138c   :  { %v11700_v31 = vadd.f32 %v11699_v58, %v11698_v43  ;;  %v13035_v43 = vld [vmem:[%s16873_s2 + $0x3b8] ss:$52 sps:$4 sm:$0xff]   ;;  %v13042_v58 = vld [vmem:[%s16873_s2 + $0x428] ss:$52 sps:$4 sm:$0xff]  }
0x138d   :  { %v5482_v56 = vadd.f32 %v11697_v60, %v5433_v54  ;;  %v5436_v11 = vadd.f32 %v11672_v20, %v5197_v63  ;;  %v13037_v60 = vld [vmem:[%s16873_s2 + $0x3bc] ss:$52 sps:$4 sm:$0xff]   ;;  %v13041_v54 = vld [vmem:[%s16873_s2 + $0x424] ss:$52 sps:$4 sm:$0xff]   ;;  %v13039_v20 = vld [vmem:[%s16873_s2 + $0x420] ss:$52 sps:$4 sm:$0xff]  }
0x138e   :  { %5864 = vmatprep.subr.bf16.mxu1 %v13037_v60 }
0x138f   :  { %v15376_v40 = vadd.f32 %v5482_v56, %v15010_v41  ;;  %v5485_v14 = vadd.f32 %v11700_v31, %v5436_v11  ;;  %v5530_v41 = vsel %vm759_vm2, %v5529_v13, %v5525_v37  ;;  %5865 = vmatpush1.bf16.msra.mxu1 %v13035_v43  ;;  %v13045_v31 = vld [vmem:[%s16873_s2 + $0x48c] ss:$52 sps:$4 sm:$0xff]   ;;  %v13043_v56 = vld [vmem:[%s16873_s2 + $0x488] ss:$52 sps:$4 sm:$0xff]   ;;  %v13046_v11 = vld [vmem:[%s16873_s2 + $0x490] ss:$52 sps:$4 sm:$0xff]  }
0x1390   :  { %5866 = vmatprep.subr.bf16.mxu1 %v13041_v54  ;;  %v13051_v13 = vld [vmem:[%s16873_s2 + $0x558] ss:$52 sps:$4 sm:$0xff]  }
0x1391   :  { %v5515_v35 = vpack.c.bf16 %v15376_v40, %v15376_v40  ;;  %v15383_v61 = vadd.f32 %v5485_v14, %v15015_v53  ;;  %v15395_v53 = vld [vmem:[%s16876_s5 + $0x18] sm:$0xff]  ;;  %v13047_v14 = vld [vmem:[%s16873_s2 + $0x4f0] ss:$52 sps:$4 sm:$0xff]  }
0x1392   :  { %v5520_v63 = vrot.slane %v15395_v53, %v13998_v46  ;;  %v13057_v37 = vld [vmem:[%s16873_s2 + $0x5c4] ss:$52 sps:$4 sm:$0xff]   ;;  %v5671_v12 = vrot.slane %v15395_v53, %v14116_v52 }
0x1393   :  { %v5527_v10 = vunpack.c.l.b16 %v5515_v35  ;;  %v5516_v42 = vpack.c.bf16 %v15383_v61, %v15383_v61  ;;  %5867 = vmatpush1.bf16.msra.mxu1 %v13039_v20  ;;  %v13053_v35 = vld [vmem:[%s16873_s2 + $0x55c] ss:$52 sps:$4 sm:$0xff]  }
0x1394   :  { %5868 = vmatprep.subr.bf16.mxu1 %v13045_v31  ;;  %v5968_v31 = vrot.slane %v15395_v53, %v14128_v15 }
0x1395   :  { %v5531_v44 = vrot.slane %v5527_v10, 6  ;;  %v5528_v36 = vunpack.c.l.b16 %v5516_v42  ;;  %v13054_v10 = vld [vmem:[%s16873_s2 + $0x560] ss:$52 sps:$4 sm:$0xff]  }
0x1396   :  { %v13055_v42 = vld [vmem:[%s16873_s2 + $0x5c0] ss:$52 sps:$4 sm:$0xff]  }
0x1397   :  { %v5532_v7 = vsel %vm762_vm3, %v5531_v44, %v5530_v41  ;;  %v5533_v29 = vrot.slane %v5528_v36, 5  ;;  %5869 = vmatpush1.bf16.msra.mxu1 %v13043_v56  ;;  %v13058_v44 = vld [vmem:[%s16873_s2 + $0x5c8] ss:$52 sps:$4 sm:$0xff]   ;;  %v13061_v36 = vld [vmem:[%s16873_s2 + $0x62c] ss:$52 sps:$4 sm:$0xff]  }
0x1398   :  { %5870 = vmatprep.subr.bf16.mxu1 %v13049_v23  ;;  %v13059_v41 = vld [vmem:[%s16873_s2 + $0x628] ss:$52 sps:$4 sm:$0xff]   ;;  %v5976_v23 = vrot.slane %v15395_v53, %v14131_v19 }
0x1399   :  { %v5534_v8 = vsel %vm765_vm4, %v5533_v29, %v5532_v7  ;;  %v13062_v7 = vld [vmem:[%s16873_s2 + $0x630] ss:$52 sps:$4 sm:$0xff]  }
0x139a   :  { %v5535_v30 = vpack.c.b16 %v5534_v8, %v5534_v8 }
0x139b   :  { %5871 = vmatpush1.bf16.msra.mxu1 %v13047_v14 }
0x139c   :  { %12323 = vmatmul.mubr.bf16.vlgmr.msra.gmra.mrb[120].mxu0 %v5535_v30  ;;  %5872 = vmatprep.subr.bf16.mxu1 %v13053_v35 }
0x139d   :  { %12342 = vmatprep.mubr.msk.bf16.mxu0 %vm13642_vm1, %v13641_v34  ;;  %12327 = vmatpush3.bf16.msra.mxu0 %v13034_v26 }
0x139e   :  { %12328 = vmatprep.subr.bf16.mxu0 %v13641_v34 }
0x139f   :  { %5873 = vmatpush1.bf16.msra.mxu1 %v13051_v13 }
0x13a0   :  { %5874 = vmatprep.subr.bf16.mxu1 %v13057_v37 }
0x13a1   :  { %12329 = vmatpush3.bf16.msra.mxu0 %v13038_v21 }
0x13a2   :  { %12330 = vmatprep.subr.bf16.mxu0 %v13641_v34 }
0x13a3   :  { %5875 = vmatpush1.bf16.msra.mxu1 %v13055_v42 }
0x13a4   :  { %5876 = vmatprep.subr.bf16.mxu1 %v13061_v36 }
0x13a5   :  { %12331 = vmatpush3.bf16.msra.mxu0 %v13042_v58 }
0x13a6   :  { %12332 = vmatprep.subr.bf16.mxu0 %v13641_v34 }
0x13a7   :  { %5877 = vmatpush1.bf16.msra.mxu1 %v13059_v41 }
0x13a8   :  { %12346 = vmatprep.subr.bf16.mxu1 %v13641_v34 }
0x13a9   :  { %12333 = vmatpush3.bf16.msra.mxu0 %v13046_v11 }
0x13aa   :  { %12334 = vmatprep.subr.bf16.mxu0 %v13641_v34 }
0x13ad   :  { %12335 = vmatpush3.bf16.msra.mxu0 %v13050_v5 }
0x13ae   :  { %12336 = vmatprep.subr.bf16.mxu0 %v13641_v34 }
0x13b1   :  { %12337 = vmatpush3.bf16.msra.mxu0 %v13054_v10 }
0x13b2   :  { %12338 = vmatprep.subr.bf16.mxu0 %v13641_v34 }
0x13b5   :  { %12339 = vmatpush3.bf16.msra.mxu0 %v13058_v44 }
0x13b6   :  { %12340 = vmatprep.subr.bf16.mxu0 %v13641_v34 }
0x13b9   :  { %12341 = vmatpush3.bf16.msra.mxu0 %v13062_v7 }
0x13ba   :  { %12352 = vmatprep.subr.bf16.mxu0 %v13641_v34 }
0x146f   :  { %v5619_v24 = vpop.f32.mrb[120].mxu0 }
0x1470   :  { %v5620_v3 = vadd.f32 %v5619_v24, %v5520_v63  ;;  %v12324_v4 = vpop.f32.mrb[121].mxu0 }
0x1471   :  { %v5622_v28 = vpop.f32.mrb[122].mxu0  ;;  %v5665_v4 = vrot.slane %v15395_v53, %v14111_v50 }
0x1472   :  { %v15400_v57 = vrot.slane %v5620_v3, %v14003_v49  ;;  %v12325_v48 = vpop.f32.mrb[123].mxu0 }
0x1474   :  { %v5636_v6 = vsel %vm868_vm8, %v15400_v57, 0.0  ;;  %v15406_v1 = vcombine.high %v15400_v57, %v15400_v57 }
0x1475   :  { %5637 = vadd.xlane.f32.xlu0 %v5636_v6 }
0x1476   :  { %v5639_v27 = vsel %vm868_vm8, %v15406_v1, 0.0 }
0x1477   :  { %5640 = vadd.xlane.f32.xlu1 %v5639_v27 }
0x1502   :  { %v5638_v22 = vpop.xlane.xlu0 %5637 }
0x1503   :  { %v5642_v17 = vmul.f32 0.0078125, %v5638_v22 }
0x1504   :  { %v5641_v18 = vpop.xlane.xlu1 %5640 }
0x1505   :  { %v15421_v2 = vsub.f32 %v15400_v57, %v5642_v17  ;;  %v5643_v32 = vmul.f32 0.0078125, %v5641_v18 }
0x1507   :  { %v15424_v47 = vsub.f32 %v15406_v1, %v5643_v32  ;;  %v5646_v45 = vmul.f32 %v15421_v2, %v15421_v2 }
0x1509   :  { %v5648_v59 = vsel %vm868_vm8, %v5646_v45, 0.0  ;;  %v5647_v62 = vmul.f32 %v15424_v47, %v15424_v47 }
0x150a   :  { %5649 = vadd.xlane.f32.xlu0 %v5648_v59 }
0x150b   :  { %v5651_v38 = vsel %vm868_vm8, %v5647_v62, 0.0 }
0x150c   :  { %5652 = vadd.xlane.f32.xlu1 %v5651_v38 }
0x1597   :  { %v5650_v29 = vpop.xlane.xlu0 %5649 }
0x1598   :  { %v5654_v8 = vmul.f32 0.0078125, %v5650_v29 }
0x1599   :  { %v5653_v30 = vpop.xlane.xlu1 %5652 }
0x159a   :  { %v5656_v63 = vadd.f32 1e-05, %v5654_v8  ;;  %v5655_v24 = vmul.f32 0.0078125, %v5653_v30 }
0x159c   :  { %13399 = vrsqrt.f32 %v5656_v63  ;;  %v5657_v3 = vadd.f32 1e-05, %v5655_v24 }
0x159e   :  { %13401 = vrsqrt.f32 %v5657_v3 }
0x15a6   :  { %v13400_v28 = vpop.eup %13399 }
0x15a7   :  { %v5660_v48 = vmul.f32 %v13400_v28, %v15421_v2 }
0x15a8   :  { %v13402_v6 = vpop.eup %13401 }
0x15a9   :  { %v5666_v27 = vmul.f32 %v5665_v4, %v5660_v48  ;;  %v5661_v0 = vmul.f32 %v13402_v6, %v15424_v47 }
0x15ab   :  { %v5667_v26 = vmul.f32 %v5665_v4, %v5661_v0  ;;  %v5672_v22 = vadd.f32 %v5671_v12, %v5666_v27 }
0x15ad   :  { %v5673_v17 = vadd.f32 %v5671_v12, %v5667_v26  ;;  %v5988_v12 = vrot.slane %v15395_v53, %v14168_v55 }
0x15af   :  { %v5724_v18 = vcombine.low %v5672_v22, %v5673_v17 }
0x15b1   :  { %v5731_v32 = vrot.slane %v5724_v18, %v14003_v49 }
0x15b3   :  { %v5733_v45 = vpack.c.bf16 %v5731_v32, %v5731_v32 }
0x15b5   :  { %5895 = vmatmul.mubr.bf16.vlgmr.msra.gmra.mrb[148].mxu1 %v5733_v45  ;;  %12343 = vmatmul.mubr.bf16.vlgmr.msra.gmra.mrb[124].mxu0 %v5733_v45 }
0x15b6   :  { %12348 = vmatprep.mubr.msk.bf16.mxu1 %vm13642_vm1, %v13641_v34  ;;  %12354 = vmatprep.mubr.msk.bf16.mxu0 %vm13642_vm1, %v13641_v34 }
0x1688   :  { %v5896_v2 = vpop.f32.mrb[148].mxu1  ;;  %v5937_v47 = vpop.f32.mrb[124].mxu0 }
0x1689   :  { %v5898_v59 = vpop.f32.mrb[149].mxu1  ;;  %v12344_v62 = vpop.f32.mrb[125].mxu0  ;;  %v5960_v20 = vrot.slane %v5937_v47, %v14003_v49 }
0x168a   :  { %v5946_v38 = vcombine.low %v5896_v2, %v5898_v59  ;;  %v5900_v60 = vpop.f32.mrb[150].mxu1  ;;  %v5940_v43 = vpop.f32.mrb[126].mxu0 }
0x168b   :  { %v5901_v21 = vpop.f32.mrb[151].mxu1  ;;  %v12345_v54 = vpop.f32.mrb[127].mxu0 }
0x168c   :  { %v5953_v58 = vrot.slane %v5946_v38, %v14003_v49 }
0x168e   :  { %v15518_v56 = vcombine.low %v5953_v58, %v5960_v20  ;;  %v15520_v11 = vcombine.high %v5953_v58, %v5960_v20 }
0x1690   :  { %v5977_v14 = vrot.slane %v15518_v56, 2  ;;  %v5978_v5 = vrot.slane %v15520_v11, 2  ;;  %v5969_v35 = vadd.f32 %v5968_v31, %v15518_v56  ;;  %v5970_v7 = vadd.f32 %v5968_v31, %v15520_v11 }
0x1691   :  { %v5989_v26 = vrot.slane %v15518_v56, 4  ;;  %v5990_v18 = vrot.slane %v15520_v11, 4 }
0x1692   :  { %v5981_v13 = vadd.f32 %v5977_v14, %v5976_v23  ;;  %v5982_v10 = vadd.f32 %v5978_v5, %v5976_v23  ;;  %v5971_v42 = vpack.c.bf16 %v5969_v35, %v5969_v35  ;;  %v5972_v29 = vpack.c.bf16 %v5970_v7, %v5970_v7 }
0x1693   :  { %v5993_v32 = vadd.f32 %v5989_v26, %v5988_v12  ;;  %v5994_v47 = vadd.f32 %v5990_v18, %v5988_v12 }
0x1694   :  { %v5983_v37 = vpack.c.bf16 %v5981_v13, %v5981_v13  ;;  %v5984_v44 = vpack.c.bf16 %v5982_v10, %v5982_v10  ;;  %5999 = vrot.lane.b32.xlu1 %v5971_v42, %s13645_s11 }
0x1695   :  { %v15577_v62 = vpack.c.bf16 %v5993_v32, %v5993_v32  ;;  %v15580_v60 = vpack.c.bf16 %v5994_v47, %v5994_v47 }
0x1696   :  { %6013 = vrot.lane.b32.xlu0 %v5983_v37, %s13645_s11  ;;  %v6043_v36 = vsel %vm1272_vm9, %v5983_v37, 0  ;;  %v6089_v41 = vsel %vm1272_vm9, %v5984_v44, 0 }
0x1697   :  { %12347 = vmatpush3.bf16.xpose.msra.mxu1 %v6043_v36  ;;  %12353 = vmatpush3.bf16.xpose.msra.mxu0 %v6089_v41  ;;  %v6507_v43 = vsel %vm628_vm0, %v15577_v62, 0  ;;  %v6553_v54 = vsel %vm628_vm0, %v15580_v60, 0 }
0x1698   :  { %12358 = vmatprep.subr.bf16.mxu1 %v13641_v34  ;;  %12364 = vmatprep.subr.bf16.mxu0 %v13641_v34 }
0x1699   :  { %6015 = vrot.lane.b32.xlu1 %v5984_v44, %s13645_s11 }
0x169a   :  { %6017 = vrot.lane.b32.xlu0 %v5983_v37, %s13646_s0 }
0x169d   :  { %6001 = vrot.lane.b32.xlu1 %v5972_v29, %s13645_s11 }
0x169e   :  { %12355 = vmatmul.mubr.msk.bf16.vlgmr.msra.gmra.mrb[128].mxu0 %vm1272_vm9, %v5972_v29  ;;  %6003 = vrot.lane.b32.xlu0 %v5971_v42, %s13646_s0 }
0x169f   :  { %12349 = vmatmul.mubr.msk.bf16.vlgmr.msra.gmra.mrb[152].mxu1 %vm1272_vm9, %v5971_v42  ;;  %12366 = vmatprep.mubr.msk.bf16.mxu0 %vm13642_vm1, %v13641_v34 }
0x16a0   :  { %12360 = vmatprep.mubr.msk.bf16.mxu1 %vm13642_vm1, %v13641_v34 }
0x16a1   :  { %6019 = vrot.lane.b32.xlu1 %v5984_v44, %s13646_s0 }
0x16a2   :  { %6021 = vrot.lane.b32.xlu0 %v5983_v37, %s13647_s12 }
0x16a5   :  { %6005 = vrot.lane.b32.xlu1 %v5972_v29, %s13646_s0 }
0x16a6   :  { %6007 = vrot.lane.b32.xlu0 %v5971_v42, %s13647_s12 }
0x16a9   :  { %6023 = vrot.lane.b32.xlu1 %v5984_v44, %s13647_s12 }
0x16ad   :  { %6009 = vrot.lane.b32.xlu1 %v5972_v29, %s13647_s12 }
0x1706   :  { %v6000_v8 = vpop.permute.xlu1 %5999 }
0x1708   :  { %v6014_v30 = vpop.permute.xlu0 %6013 }
0x1709   :  { %v6135_v63 = vsel %vm1272_vm9, %v6014_v30, 0 }
0x170a   :  { %12359 = vmatpush3.bf16.xpose.msra.mxu1 %v6135_v63 }
0x170b   :  { %v6016_v24 = vpop.permute.xlu1 %6015  ;;  %12370 = vmatprep.subr.bf16.mxu1 %v13641_v34 }
0x170c   :  { %v6181_v3 = vsel %vm1272_vm9, %v6016_v24, 0  ;;  %v6018_v4 = vpop.permute.xlu0 %6017 }
0x170d   :  { %12365 = vmatpush3.bf16.xpose.msra.mxu0 %v6181_v3  ;;  %v6227_v6 = vsel %vm1272_vm9, %v6018_v4, 0 }
0x170e   :  { %12376 = vmatprep.subr.bf16.mxu0 %v13641_v34 }
0x170f   :  { %v6002_v28 = vpop.permute.xlu1 %6001 }
0x1710   :  { %v6004_v48 = vpop.permute.xlu0 %6003 }
0x1711   :  { %12361 = vmatmul.mubr.msk.bf16.vlgmr.msra.gmra.mrb[156].mxu1 %vm1272_vm9, %v6000_v8 }
0x1712   :  { %12371 = vmatpush3.bf16.xpose.msra.mxu1 %v6227_v6  ;;  %12372 = vmatprep.mubr.msk.bf16.mxu1 %vm13642_vm1, %v13641_v34 }
0x1713   :  { %v6020_v27 = vpop.permute.xlu1 %6019  ;;  %12382 = vmatprep.subr.bf16.mxu1 %v13641_v34 }
0x1714   :  { %v6273_v0 = vsel %vm1272_vm9, %v6020_v27, 0  ;;  %12367 = vmatmul.mubr.msk.bf16.vlgmr.msra.gmra.mrb[132].mxu0 %vm1272_vm9, %v6002_v28  ;;  %v6022_v22 = vpop.permute.xlu0 %6021 }
0x1715   :  { %12377 = vmatpush3.bf16.xpose.msra.mxu0 %v6273_v0  ;;  %12378 = vmatprep.mubr.msk.bf16.mxu0 %vm13642_vm1, %v13641_v34  ;;  %v6319_v45 = vsel %vm1272_vm9, %v6022_v22, 0 }
0x1716   :  { %12388 = vmatprep.subr.bf16.mxu0 %v13641_v34 }
0x1717   :  { %v6006_v17 = vpop.permute.xlu1 %6005 }
0x1718   :  { %v6008_v38 = vpop.permute.xlu0 %6007 }
0x1719   :  { %12373 = vmatmul.mubr.msk.bf16.vlgmr.msra.gmra.mrb[160].mxu1 %vm1272_vm9, %v6004_v48 }
0x171a   :  { %12383 = vmatpush3.bf16.xpose.msra.mxu1 %v6319_v45  ;;  %12384 = vmatprep.mubr.msk.bf16.mxu1 %vm13642_vm1, %v13641_v34 }
0x171b   :  { %v6024_v2 = vpop.permute.xlu1 %6023  ;;  %12394 = vmatprep.subr.bf16.mxu1 %v13641_v34 }
0x171c   :  { %v6365_v59 = vsel %vm1272_vm9, %v6024_v2, 0  ;;  %12379 = vmatmul.mubr.msk.bf16.vlgmr.msra.gmra.mrb[136].mxu0 %vm1272_vm9, %v6006_v17 }
0x171d   :  { %12389 = vmatpush3.bf16.xpose.msra.mxu0 %v6365_v59  ;;  %12390 = vmatprep.mubr.msk.bf16.mxu0 %vm13642_vm1, %v13641_v34 }
0x171e   :  { %12400 = vmatprep.subr.bf16.mxu0 %v13641_v34 }
0x171f   :  { %v6010_v21 = vpop.permute.xlu1 %6009 }
0x1721   :  { %12385 = vmatmul.mubr.msk.bf16.vlgmr.msra.gmra.mrb[164].mxu1 %vm1272_vm9, %v6008_v38 }
0x1722   :  { %12395 = vmatpush3.bf16.msra.mxu1 %v6507_v43  ;;  %12396 = vmatprep.mubr.msk.bf16.mxu1 %vm13642_vm1, %v13641_v34 }
0x1723   :  { %12406 = vmatprep.subr.bf16.mxu1 %v13641_v34 }
0x1724   :  { %12391 = vmatmul.mubr.msk.bf16.vlgmr.msra.gmra.mrb[140].mxu0 %vm1272_vm9, %v6010_v21 }
0x1725   :  { %12401 = vmatpush3.bf16.msra.mxu0 %v6553_v54  ;;  %12402 = vmatprep.mubr.msk.bf16.mxu0 %vm13642_vm1, %v13641_v34 }
0x1726   :  { %12412 = vmatprep.subr.bf16.mxu0 %v13641_v34 }
0x1771   :  { %v6125_v20 = vpop.f32.mrb[128].mxu0 }
0x1772   :  { %v6079_v58 = vpop.f32.mrb[152].mxu1  ;;  %v12356_v31 = vpop.f32.mrb[129].mxu0  ;;  %v6410_v56 = vsel %vm1641_vm10, %v6125_v20, -inf }
0x1773   :  { %v12350_v11 = vpop.f32.mrb[153].mxu1  ;;  %v6407_v23 = vsel %vm1641_vm10, %v6079_v58, -inf  ;;  %6411 = vmax.xlane.f32.xlu1 %v6410_v56  ;;  %v6128_v14 = vpop.f32.mrb[130].mxu0 }
0x1774   :  { %6408 = vmax.xlane.f32.xlu0 %v6407_v23  ;;  %v6082_v5 = vpop.f32.mrb[154].mxu1  ;;  %v12357_v35 = vpop.f32.mrb[131].mxu0 }
0x1775   :  { %v12351_v13 = vpop.f32.mrb[155].mxu1 }
0x17e4   :  { %v6171_v10 = vpop.f32.mrb[156].mxu1 }
0x17e5   :  { %v12362_v42 = vpop.f32.mrb[157].mxu1  ;;  %v6413_v37 = vsel %vm1641_vm10, %v6171_v10, -inf }
0x17e6   :  { %6414 = vmax.xlane.f32.xlu0 %v6413_v37  ;;  %v6174_v44 = vpop.f32.mrb[158].mxu1 }
0x17e7   :  { %v6217_v36 = vpop.f32.mrb[132].mxu0  ;;  %v12363_v41 = vpop.f32.mrb[159].mxu1 }
0x17e8   :  { %v12368_v7 = vpop.f32.mrb[133].mxu0  ;;  %v6416_v8 = vsel %vm1641_vm10, %v6217_v36, -inf }
0x17e9   :  { %v6220_v29 = vpop.f32.mrb[134].mxu0 }
0x17ea   :  { %v12369_v30 = vpop.f32.mrb[135].mxu0  ;;  %6417 = vmax.xlane.f32.xlu0 %v6416_v8 }
0x17ec   :  { %v15598_v63 = vpop.f32.mrb[160].mxu1 }
0x17ed   :  { %v12374_v24 = vpop.f32.mrb[161].mxu1  ;;  %v6419_v3 = vsel %vm1641_vm10, %v15598_v63, -inf }
0x17ee   :  { %v6266_v4 = vpop.f32.mrb[162].mxu1  ;;  %6420 = vmax.xlane.f32.xlu0 %v6419_v3 }
0x17ef   :  { %v6309_v28 = vpop.f32.mrb[136].mxu0  ;;  %v12375_v48 = vpop.f32.mrb[163].mxu1 }
0x17f0   :  { %v12380_v6 = vpop.f32.mrb[137].mxu0  ;;  %v6422_v27 = vsel %vm1641_vm10, %v6309_v28, -inf }
0x17f1   :  { %6423 = vmax.xlane.f32.xlu1 %v6422_v27  ;;  %v6312_v0 = vpop.f32.mrb[138].mxu0 }
0x17f2   :  { %v12381_v12 = vpop.f32.mrb[139].mxu0 }
0x17f4   :  { %v15603_v26 = vpop.f32.mrb[164].mxu1 }
0x17f5   :  { %v12386_v22 = vpop.f32.mrb[165].mxu1  ;;  %v6425_v17 = vsel %vm1641_vm10, %v15603_v26, -inf }
0x17f6   :  { %v6358_v18 = vpop.f32.mrb[166].mxu1  ;;  %6426 = vmax.xlane.f32.xlu0 %v6425_v17 }
0x17f7   :  { %v6401_v32 = vpop.f32.mrb[140].mxu0  ;;  %v12387_v45 = vpop.f32.mrb[167].mxu1 }
0x17f8   :  { %v12392_v2 = vpop.f32.mrb[141].mxu0  ;;  %v6428_v47 = vsel %vm1641_vm10, %v6401_v32, -inf }
0x17f9   :  { %6429 = vmax.xlane.f32.xlu1 %v6428_v47  ;;  %v6404_v59 = vpop.f32.mrb[142].mxu0 }
0x17fa   :  { %v12393_v38 = vpop.f32.mrb[143].mxu0 }
0x1800   :  { %v6412_v43 = vpop.xlane.xlu1 %6411 }
0x1801   :  { %v6409_v21 = vpop.xlane.xlu0 %6408  ;;  %v6432_v54 = vsub.f32 %v6125_v20, %v6412_v43 }
0x1802   :  { %v6431_v31 = vsub.f32 %v6079_v58, %v6409_v21 }
0x1803   :  { %v6441_v56 = vmul.f32 1.442695, %v6432_v54 }
0x1804   :  { %v6439_v11 = vmul.f32 1.442695, %v6431_v31 }
0x1805   :  { %13403 = vpow2.f32 %v6441_v56 }
0x1806   :  { %13405 = vpow2.f32 %v6439_v11 }
0x180f   :  { %v13404_v23 = vpop.eup %13403 }
0x1810   :  { %v13406_v14 = vpop.eup %13405  ;;  %v6458_v5 = vsel %vm1641_vm10, %v13404_v23, 0.0 }
0x1811   :  { %v6455_v35 = vsel %vm1641_vm10, %v13406_v14, 0.0  ;;  %6459 = vadd.xlane.f32.xlu1 %v6458_v5 }
0x1812   :  { %6456 = vadd.xlane.f32.xlu0 %v6455_v35 }
0x1822   :  { %6029 = vrot.lane.b32.xlu1 %v15580_v60, %s13645_s11 }
0x1826   :  { %6031 = vrot.lane.b32.xlu1 %v15577_v62, %s13646_s0 }
0x182a   :  { %6033 = vrot.lane.b32.xlu1 %v15580_v60, %s13646_s0 }
0x1873   :  { %v6415_v20 = vpop.xlane.xlu0 %6414 }
0x1874   :  { %v6433_v58 = vsub.f32 %v6171_v10, %v6415_v20 }
0x1876   :  { %v6443_v13 = vmul.f32 1.442695, %v6433_v58 }
0x1877   :  { %v6418_v42 = vpop.xlane.xlu0 %6417 }
0x1878   :  { %13407 = vpow2.f32 %v6443_v13  ;;  %v6434_v37 = vsub.f32 %v6217_v36, %v6418_v42 }
0x187a   :  { %v6445_v44 = vmul.f32 1.442695, %v6434_v37 }
0x187b   :  { %v6421_v0 = vpop.xlane.xlu0 %6420 }
0x187c   :  { %13409 = vpow2.f32 %v6445_v44  ;;  %v6435_v18 = vsub.f32 %v15598_v63, %v6421_v0 }
0x187e   :  { %v6424_v41 = vpop.xlane.xlu1 %6423 }
0x187f   :  { %v6436_v7 = vsub.f32 %v6309_v28, %v6424_v41 }
0x1881   :  { %v6449_v29 = vmul.f32 1.442695, %v6436_v7 }
0x1882   :  { %v15616_v8 = vpop.eup %13407 }
0x1883   :  { %13411 = vpow2.f32 %v6449_v29  ;;  %v6461_v30 = vsel %vm1641_vm10, %v15616_v8, 0.0  ;;  %v6427_v12 = vpop.xlane.xlu0 %6426 }
0x1884   :  { %6462 = vadd.xlane.f32.xlu0 %v6461_v30  ;;  %v6437_v45 = vsub.f32 %v15603_v26, %v6427_v12 }
0x1886   :  { %v15620_v24 = vpop.eup %13409  ;;  %v6430_v3 = vpop.xlane.xlu1 %6429  ;;  %v6451_v38 = vmul.f32 1.442695, %v6437_v45 }
0x1887   :  { %v6438_v10 = vsub.f32 %v6401_v32, %v6430_v3  ;;  %v6464_v4 = vsel %vm1641_vm10, %v15620_v24, 0.0  ;;  %v6447_v32 = vmul.f32 1.442695, %v6435_v18 }
0x1888   :  { %6465 = vadd.xlane.f32.xlu1 %v6464_v4 }
0x1889   :  { %v6453_v36 = vmul.f32 1.442695, %v6438_v10 }
0x188b   :  { %13413 = vpow2.f32 %v6453_v36 }
0x188d   :  { %v15624_v48 = vpop.eup %13411 }
0x188e   :  { %v6470_v28 = vsel %vm1641_vm10, %v15624_v48, 0.0 }
0x188f   :  { %6471 = vadd.xlane.f32.xlu1 %v6470_v28 }
0x1895   :  { %v15628_v6 = vpop.eup %13413 }
0x1896   :  { %v6476_v27 = vsel %vm1641_vm10, %v15628_v6, 0.0 }
0x1897   :  { %6477 = vadd.xlane.f32.xlu1 %v6476_v27 }
0x189a   :  { %6027 = vrot.lane.b32.xlu0 %v15577_v62, %s13645_s11 }
0x189e   :  { %v6460_v22 = vpop.xlane.xlu1 %6459 }
0x189f   :  { %v6457_v17 = vpop.xlane.xlu0 %6456  ;;  %13415 = vrcp.f32 %v6460_v22 }
0x18a0   :  { %13417 = vrcp.f32 %v6457_v17 }
0x18a1   :  { %13419 = vpow2.f32 %v6447_v32 }
0x18a2   :  { %v6030_v43 = vpop.permute.xlu1 %6029  ;;  %13421 = vpow2.f32 %v6451_v38 }
0x18a3   :  { %v6645_v56 = vsel %vm628_vm0, %v6030_v43, 0 }
0x18a8   :  { %6037 = vrot.lane.b32.xlu1 %v15580_v60, %s13647_s12 }
0x18a9   :  { %v13416_v2 = vpop.eup %13415 }
0x18aa   :  { %v13418_v47 = vpop.eup %13417  ;;  %v6488_v59 = vmul.f32 %v13416_v2, %v13404_v23  ;;  %v6032_v23 = vpop.permute.xlu1 %6031 }
0x18ab   :  { %v6487_v21 = vmul.f32 %v13418_v47, %v13406_v14  ;;  %v13420_v60 = vpop.eup %13419 }
0x18ac   :  { %v6496_v54 = vpack.c.bf16 %v6488_v59, %v6488_v59  ;;  %v6467_v63 = vsel %vm1641_vm10, %v13420_v60, 0.0  ;;  %v13422_v26 = vpop.eup %13421 }
0x18ad   :  { %v6495_v31 = vpack.c.bf16 %v6487_v21, %v6487_v21  ;;  %v6473_v11 = vsel %vm1641_vm10, %v13422_v26, 0.0 }
0x18ae   :  { %12403 = vmatmul.mubr.msk.bf16.vlgmr.msra.gmra.mrb[144].mxu0 %vm1738_vm11, %v6496_v54  ;;  %v6034_v14 = vpop.permute.xlu1 %6033 }
0x18af   :  { %12397 = vmatmul.mubr.msk.bf16.vlgmr.msra.gmra.mrb[168].mxu1 %vm1738_vm11, %v6495_v31  ;;  %12413 = vmatpush3.bf16.msra.mxu0 %v6645_v56  ;;  %v6737_v3 = vsel %vm628_vm0, %v6034_v14, 0 }
0x18b0   :  { %12408 = vmatprep.mubr.msk.bf16.mxu1 %vm13642_vm1, %v13641_v34  ;;  %12414 = vmatprep.mubr.msk.bf16.mxu0 %vm13642_vm1, %v13641_v34 }
0x18b1   :  { %12424 = vmatprep.subr.bf16.mxu0 %v13641_v34 }
0x18b9   :  { %6468 = vadd.xlane.f32.xlu0 %v6467_v63 }
0x18bd   :  { %6474 = vadd.xlane.f32.xlu0 %v6473_v11 }
0x18d3   :  { %6035 = vrot.lane.b32.xlu0 %v15577_v62, %s13647_s12  ;;  %v6691_v62 = vsel %vm628_vm0, %v6032_v23, 0 }
0x1911   :  { %v6463_v5 = vpop.xlane.xlu0 %6462 }
0x1912   :  { %13423 = vrcp.f32 %v6463_v5 }
0x1915   :  { %v6028_v35 = vpop.permute.xlu0 %6027  ;;  %v6466_v20 = vpop.xlane.xlu1 %6465 }
0x1916   :  { %v6599_v58 = vsel %vm628_vm0, %v6028_v35, 0  ;;  %13425 = vrcp.f32 %v6466_v20 }
0x1917   :  { %12407 = vmatpush3.bf16.msra.mxu1 %v6599_v58  ;;  %v13063_v58 = vld [vmem:[%s16873_s2 + $0x35c] ss:$52 sps:$4 sm:$0xff]  }
0x1918   :  { %12418 = vmatprep.subr.bf16.mxu1 %v13641_v34 }
0x191c   :  { %v13424_v13 = vpop.eup %13423  ;;  %v6472_v42 = vpop.xlane.xlu1 %6471 }
0x191d   :  { %13427 = vrcp.f32 %v6472_v42  ;;  %v6489_v37 = vmul.f32 %v13424_v13, %v15616_v8  ;;  %v13064_v13 = vld [vmem:[%s16873_s2 + $0x3c4] ss:$52 sps:$4 sm:$0xff]  }
0x191f   :  { %v6497_v44 = vpack.c.bf16 %v6489_v37, %v6489_v37 }
0x1920   :  { %v13426_v41 = vpop.eup %13425 }
0x1921   :  { %12409 = vmatmul.mubr.msk.bf16.vlgmr.msra.gmra.mrb[172].mxu1 %vm1738_vm11, %v6497_v44  ;;  %v6490_v7 = vmul.f32 %v13426_v41, %v15620_v24  ;;  %v13065_v41 = vld [vmem:[%s16873_s2 + $0x42c] ss:$52 sps:$4 sm:$0xff]  }
0x1922   :  { %12419 = vmatpush3.bf16.msra.mxu1 %v6691_v62  ;;  %12420 = vmatprep.mubr.msk.bf16.mxu1 %vm13642_vm1, %v13641_v34 }
0x1923   :  { %v6498_v29 = vpack.c.bf16 %v6490_v7, %v6490_v7  ;;  %12430 = vmatprep.subr.bf16.mxu1 %v13641_v34  ;;  %v13066_v7 = vld [vmem:[%s16873_s2 + $0x494] ss:$52 sps:$4 sm:$0xff]  }
0x1924   :  { %v6478_v30 = vpop.xlane.xlu1 %6477 }
0x1925   :  { %13429 = vrcp.f32 %v6478_v30  ;;  %12415 = vmatmul.mubr.msk.bf16.vlgmr.msra.gmra.mrb[148].mxu0 %vm1738_vm11, %v6498_v29 }
0x1926   :  { %12425 = vmatpush3.bf16.msra.mxu0 %v6737_v3  ;;  %12426 = vmatprep.mubr.msk.bf16.mxu0 %vm13642_vm1, %v13641_v34 }
0x1927   :  { %v13428_v8 = vpop.eup %13427  ;;  %12436 = vmatprep.subr.bf16.mxu0 %v13641_v34 }
0x1928   :  { %v6492_v24 = vmul.f32 %v13428_v8, %v15624_v48  ;;  %v6038_v10 = vpop.permute.xlu1 %6037 }
0x1929   :  { %v6829_v36 = vsel %vm628_vm0, %v6038_v10, 0  ;;  %v13068_v10 = vld [vmem:[%s16873_s2 + $0x564] ss:$52 sps:$4 sm:$0xff]  }
0x192a   :  { %v6500_v4 = vpack.c.bf16 %v6492_v24, %v6492_v24  ;;  %v13067_v24 = vld [vmem:[%s16873_s2 + $0x4fc] ss:$52 sps:$4 sm:$0xff]  }
0x192d   :  { %12427 = vmatmul.mubr.msk.bf16.vlgmr.msra.gmra.mrb[152].mxu0 %vm1738_vm11, %v6500_v4  ;;  %v13069_v4 = vld [vmem:[%s16873_s2 + $0x5cc] ss:$52 sps:$4 sm:$0xff]  }
0x192e   :  { %12437 = vmatpush3.bf16.msra.mxu0 %v6829_v36  ;;  %12438 = vmatprep.mubr.msk.bf16.mxu0 %vm13642_vm1, %v13641_v34  ;;  %v13070_v36 = vld [vmem:[%s16873_s2 + $0x634] ss:$52 sps:$4 sm:$0xff]  }
0x192f   :  { %v13430_v28 = vpop.eup %13429 }
0x1930   :  { %v6494_v27 = vmul.f32 %v13430_v28, %v15628_v6 }
0x1932   :  { %v6502_v0 = vpack.c.bf16 %v6494_v27, %v6494_v27 }
0x1935   :  { %12439 = vmatmul.mubr.msk.bf16.vlgmr.msra.gmra.mrb[156].mxu0 %vm1738_vm11, %v6502_v0 }
0x1936   :  { %7341 = vmatprep.mubr.bf16.mxu0 %v13644_v33 }
0x1946   :  { %v6469_v12 = vpop.xlane.xlu0 %6468 }
0x1947   :  { %13431 = vrcp.f32 %v6469_v12 }
0x194a   :  { %v6475_v48 = vpop.xlane.xlu0 %6474 }
0x194b   :  { %13433 = vrcp.f32 %v6475_v48 }
0x194e   :  { %v6036_v18 = vpop.permute.xlu0 %6035 }
0x194f   :  { %v6783_v2 = vsel %vm628_vm0, %v6036_v18, 0 }
0x1951   :  { %v13432_v22 = vpop.eup %13431 }
0x1952   :  { %v6491_v17 = vmul.f32 %v13432_v22, %v13420_v60 }
0x1954   :  { %v6499_v32 = vpack.c.bf16 %v6491_v17, %v6491_v17 }
0x1955   :  { %v13434_v45 = vpop.eup %13433 }
0x1956   :  { %12421 = vmatmul.mubr.msk.bf16.vlgmr.msra.gmra.mrb[176].mxu1 %vm1738_vm11, %v6499_v32  ;;  %v6493_v6 = vmul.f32 %v13434_v45, %v13422_v26 }
0x1957   :  { %12431 = vmatpush3.bf16.msra.mxu1 %v6783_v2  ;;  %12432 = vmatprep.mubr.msk.bf16.mxu1 %vm13642_vm1, %v13641_v34 }
0x1958   :  { %12442 = vmatprep.subr.bf16.mxu1 %v13641_v34  ;;  %v6501_v47 = vpack.c.bf16 %v6493_v6, %v6493_v6 }
0x195e   :  { %12433 = vmatmul.mubr.msk.bf16.vlgmr.msra.gmra.mrb[180].mxu1 %vm1738_vm11, %v6501_v47 }
0x195f   :  { %12458 = vmatprep.mubr.msk.bf16.mxu1 %vm13642_vm1, %v13641_v34  ;;  %12443 = vmatpush3.bf16.msra.mxu1 %v13063_v58 }
0x1960   :  { %12444 = vmatprep.subr.bf16.mxu1 %v13641_v34 }
0x1963   :  { %12445 = vmatpush3.bf16.msra.mxu1 %v13064_v13 }
0x1964   :  { %12446 = vmatprep.subr.bf16.mxu1 %v13641_v34 }
0x1967   :  { %12447 = vmatpush3.bf16.msra.mxu1 %v13065_v41 }
0x1968   :  { %12448 = vmatprep.subr.bf16.mxu1 %v13641_v34 }
0x196b   :  { %12449 = vmatpush3.bf16.msra.mxu1 %v13066_v7 }
0x196c   :  { %12450 = vmatprep.subr.bf16.mxu1 %v13641_v34 }
0x196f   :  { %12451 = vmatpush3.bf16.msra.mxu1 %v13067_v24 }
0x1970   :  { %12452 = vmatprep.subr.bf16.mxu1 %v13641_v34 }
0x1973   :  { %12453 = vmatpush3.bf16.msra.mxu1 %v13068_v10 }
0x1974   :  { %12454 = vmatprep.subr.bf16.mxu1 %v13641_v34 }
0x1977   :  { %12455 = vmatpush3.bf16.msra.mxu1 %v13069_v4 }
0x1978   :  { %12456 = vmatprep.subr.bf16.mxu1 %v13641_v34 }
0x197b   :  { %12457 = vmatpush3.bf16.msra.mxu1 %v13070_v36 }
0x1981   :  { %v15680_v59 = vpop.f32.mrb[144].mxu0 }
0x1982   :  { %v15682_v38 = vpop.f32.mrb[168].mxu1  ;;  %v12404_v43 = vpop.f32.mrb[145].mxu0 }
0x1983   :  { %v12398_v21 = vpop.f32.mrb[169].mxu1  ;;  %v6592_v54 = vpop.f32.mrb[146].mxu0 }
0x1984   :  { %v6546_v31 = vpop.f32.mrb[170].mxu1  ;;  %v12405_v56 = vpop.f32.mrb[147].mxu0 }
0x1985   :  { %v12399_v60 = vpop.f32.mrb[171].mxu1 }
0x19f4   :  { %v6635_v63 = vpop.f32.mrb[172].mxu1 }
0x19f5   :  { %6873 = vrot.lane.b32.xlu0 %v6635_v63, %s13647_s12  ;;  %v12410_v26 = vpop.f32.mrb[173].mxu1 }
0x19f6   :  { %v6638_v11 = vpop.f32.mrb[174].mxu1 }
0x19f7   :  { %v12411_v23 = vpop.f32.mrb[175].mxu1 }
0x19f8   :  { %v6681_v14 = vpop.f32.mrb[148].mxu0 }
0x19f9   :  { %6875 = vrot.lane.b32.xlu1 %v6681_v14, %s13647_s12  ;;  %v12416_v5 = vpop.f32.mrb[149].mxu0 }
0x19fa   :  { %v6684_v35 = vpop.f32.mrb[150].mxu0 }
0x19fb   :  { %v12417_v20 = vpop.f32.mrb[151].mxu0 }
0x1a00   :  { %v6773_v42 = vpop.f32.mrb[152].mxu0 }
0x1a01   :  { %6883 = vrot.lane.b32.xlu1 %v6773_v42, %s13646_s0  ;;  %v12428_v37 = vpop.f32.mrb[153].mxu0 }
0x1a02   :  { %v6776_v44 = vpop.f32.mrb[154].mxu0 }
0x1a03   :  { %v12429_v62 = vpop.f32.mrb[155].mxu0 }
0x1a08   :  { %v6865_v29 = vpop.f32.mrb[156].mxu0 }
0x1a09   :  { %6891 = vrot.lane.b32.xlu1 %v6865_v29, %s13645_s11  ;;  %v12440_v30 = vpop.f32.mrb[157].mxu0 }
0x1a0a   :  { %v6868_v3 = vpop.f32.mrb[158].mxu0 }
0x1a0b   :  { %v12441_v8 = vpop.f32.mrb[159].mxu0 }
0x1a29   :  { %v6727_v28 = vpop.f32.mrb[176].mxu1 }
0x1a2a   :  { %6881 = vrot.lane.b32.xlu0 %v6727_v28, %s13646_s0  ;;  %v12422_v27 = vpop.f32.mrb[177].mxu1 }
0x1a2b   :  { %v6730_v0 = vpop.f32.mrb[178].mxu1 }
0x1a2c   :  { %v12423_v12 = vpop.f32.mrb[179].mxu1 }
0x1a31   :  { %v6819_v48 = vpop.f32.mrb[180].mxu1 }
0x1a32   :  { %6889 = vrot.lane.b32.xlu0 %v6819_v48, %s13645_s11  ;;  %v12434_v22 = vpop.f32.mrb[181].mxu1 }
0x1a33   :  { %v6822_v17 = vpop.f32.mrb[182].mxu1 }
0x1a34   :  { %v12435_v18 = vpop.f32.mrb[183].mxu1  ;;  %v13071_v17 = vld [vmem:[%s16873_s2 + $0x340] ss:$52 sps:$4 sm:$0xff]  }
0x1a35   :  { %v13073_v18 = vld [vmem:[%s16873_s2 + $0x344] ss:$52 sps:$4 sm:$0xff]  }
0x1a36   :  { %7309 = vmatprep.subr.bf16.mxu0 %v13073_v18 }
0x1a37   :  { %7310 = vmatpush1.bf16.msra.mxu0 %v13071_v17 }
0x1a67   :  { %v6874_v45 = vpop.permute.xlu0 %6873 }
0x1a68   :  { %v6895_v43 = vsel %vm1272_vm9, %v15682_v38, %v6874_v45  ;;  %v6916_v38 = vrot.slane %v15395_v53, %v14368_v25  ;;  %v13077_v45 = vld [vmem:[%s16873_s2 + $0x348] ss:$52 sps:$4 sm:$0xff]  }
0x1a69   :  { %12462 = vmatprep.subr.bf16.mxu1 %v13077_v45 }
0x1a6b   :  { %v6876_v32 = vpop.permute.xlu1 %6875 }
0x1a6c   :  { %v6896_v21 = vsel %vm1272_vm9, %v15680_v59, %v6876_v32  ;;  %v10990_v59 = vld [vmem:[%s16876_s5 + $0x28] sm:$0x3]  ;;  %v13076_v32 = vld [vmem:[%s16873_s2 + $0x3ac] ss:$52 sps:$4 sm:$0xff]  }
0x1a6d   :  { %v7037_v42 = vrot.slane %v10990_v59, 7  ;;  %7311 = vmatprep.subr.bf16.mxu0 %v13076_v32 }
0x1a6f   :  { %v7059_v53 = vsel %vm628_vm0, %v15373_v16, %v7037_v42  ;;  %v7060_v30 = vsel %vm628_vm0, %v15368_v51, %v7037_v42  ;;  %v7062_v12 = vsel %vm628_vm0, %v15383_v61, %v7037_v42 }
0x1a70   :  { %v7063_v8 = vsel %vm602_vm5, %v7059_v53, %v15373_v16  ;;  %v7064_v36 = vsel %vm602_vm5, %v7060_v30, %v15368_v51  ;;  %v7066_v48 = vsel %vm602_vm5, %v7062_v12, %v15383_v61  ;;  %v13092_v53 = vld [vmem:[%s16873_s2 + $0x54c] ss:$52 sps:$4 sm:$0xff]   ;;  %v13096_v30 = vld [vmem:[%s16873_s2 + $0x5b4] ss:$52 sps:$4 sm:$0xff]  }
0x1a73   :  { %v6884_v2 = vpop.permute.xlu1 %6883 }
0x1a74   :  { %v6898_v54 = vsel %vm2133_vm13, %v6896_v21, %v6884_v2  ;;  %v13074_v2 = vld [vmem:[%s16873_s2 + $0x3a8] ss:$52 sps:$4 sm:$0xff]  }
0x1a75   :  { %7312 = vmatpush1.bf16.msra.mxu0 %v13074_v2 }
0x1a7b   :  { %v6892_v47 = vpop.permute.xlu1 %6891 }
0x1a7c   :  { %v6900_v60 = vsel %vm2136_vm14, %v6898_v54, %v6892_v47 }
0x1a9c   :  { %v6882_v6 = vpop.permute.xlu0 %6881 }
0x1a9d   :  { %v6897_v31 = vsel %vm2133_vm13, %v6895_v43, %v6882_v6 }
0x1aa4   :  { %v6890_v56 = vpop.permute.xlu0 %6889 }
0x1aa5   :  { %v6899_v63 = vsel %vm2136_vm14, %v6897_v31, %v6890_v56 }
0x1aa6   :  { %v6903_v26 = vcombine.low %v6899_v63, %v6900_v60 }
0x1aa8   :  { %v6910_v11 = vrot.slane %v6903_v26, %v14003_v49 }
0x1aaa   :  { %v6912_v23 = vpack.c.bf16 %v6910_v11, %v6910_v11 }
0x1aac   :  { %12459 = vmatmul.mubr.bf16.vlgmr.msra.gmra.mrb[184].mxu1 %v6912_v23 }
0x1aad   :  { %12463 = vmatpush3.bf16.msra.mxu1 %v13077_v45 }
0x1b7f   :  { %v6999_v14 = vpop.f32.mrb[184].mxu1 }
0x1b80   :  { %v7000_v5 = vadd.f32 %v6999_v14, %v6916_v38  ;;  %v12460_v35 = vpop.f32.mrb[185].mxu1 }
0x1b81   :  { %v7002_v20 = vpop.f32.mrb[186].mxu1  ;;  %v13080_v35 = vld [vmem:[%s16873_s2 + $0x414] ss:$52 sps:$4 sm:$0xff]  }
0x1b82   :  { %v7012_v58 = vrot.slane %v7000_v5, %v14003_v49  ;;  %v12461_v13 = vpop.f32.mrb[187].mxu1  ;;  %v13078_v20 = vld [vmem:[%s16873_s2 + $0x410] ss:$52 sps:$4 sm:$0xff]   ;;  %7313 = vmatprep.subr.bf16.mxu0 %v13080_v35 }
0x1b83   :  { %7314 = vmatpush1.bf16.msra.mxu0 %v13078_v20  ;;  %v13084_v13 = vld [vmem:[%s16873_s2 + $0x47c] ss:$52 sps:$4 sm:$0xff]  }
0x1b84   :  { %v7013_v37 = vcombine.high %v7012_v58, %v7012_v58  ;;  %v7016_v44 = vadd.f32 %v7012_v58, %v15400_v57  ;;  %v7061_v57 = vsel %vm628_vm0, %v15376_v40, %v7037_v42  ;;  %v13081_v58 = vld [vmem:[%s16873_s2 + $0x3b0] ss:$52 sps:$4 sm:$0xff]   ;;  %v13082_v42 = vld [vmem:[%s16873_s2 + $0x478] ss:$52 sps:$4 sm:$0xff]   ;;  %7315 = vmatprep.subr.bf16.mxu0 %v13084_v13 }
0x1b85   :  { %v7065_v28 = vsel %vm602_vm5, %v7061_v57, %v15376_v40  ;;  %12464 = vmatprep.subr.bf16.mxu1 %v13081_v58  ;;  %v13100_v57 = vld [vmem:[%s16873_s2 + $0x61c] ss:$52 sps:$4 sm:$0xff]  }
0x1b86   :  { %v7017_v41 = vadd.f32 %v7013_v37, %v15406_v1  ;;  %v7026_v62 = vrot.slane %v7016_v44, %v13714_v9  ;;  %12465 = vmatpush3.bf16.msra.mxu1 %v13081_v58  ;;  %v13085_v37 = vld [vmem:[%s16873_s2 + $0x418] ss:$52 sps:$4 sm:$0xff]  }
0x1b87   :  { %7316 = vmatpush1.bf16.msra.mxu0 %v13082_v42  ;;  %12466 = vmatprep.subr.bf16.mxu1 %v13085_v37  ;;  %v13088_v44 = vld [vmem:[%s16873_s2 + $0x4e4] ss:$52 sps:$4 sm:$0xff]  }
0x1b88   :  { %v7042_v7 = vrot.slane %v7026_v62, %v13998_v46  ;;  %v7027_v29 = vcombine.high %v7026_v62, %v7026_v62  ;;  %v7034_v3 = vrot.slane %v7017_v41, %v13714_v9  ;;  %v13086_v41 = vld [vmem:[%s16873_s2 + $0x4e0] ss:$52 sps:$4 sm:$0xff]   ;;  %7317 = vmatprep.subr.bf16.mxu0 %v13088_v44 }
0x1b89   :  { %v13089_v62 = vld [vmem:[%s16873_s2 + $0x480] ss:$52 sps:$4 sm:$0xff]  }
0x1b8a   :  { %v15750_v1 = vsel %vm2315_vm15, %v7063_v8, %v7042_v7  ;;  %v7046_v24 = vrot.slane %v7027_v29, %v13998_v46  ;;  %v7050_v10 = vrot.slane %v7034_v3, %v13998_v46  ;;  %v7035_v4 = vcombine.high %v7034_v3, %v7034_v3  ;;  %12467 = vmatpush3.bf16.msra.mxu1 %v13085_v37  ;;  %v13090_v7 = vld [vmem:[%s16873_s2 + $0x548] ss:$52 sps:$4 sm:$0xff]   ;;  %v13094_v3 = vld [vmem:[%s16873_s2 + $0x5b0] ss:$52 sps:$4 sm:$0xff]  }
0x1b8b   :  { %7071 = vadd.xlane.f32.xlu0 %v15750_v1  ;;  %7318 = vmatpush1.bf16.msra.mxu0 %v13086_v41  ;;  %v13093_v29 = vld [vmem:[%s16873_s2 + $0x4e8] ss:$52 sps:$4 sm:$0xff]   ;;  %v13097_v8 = vld [vmem:[%s16873_s2 + $0x550] ss:$52 sps:$4 sm:$0xff]  }
0x1b8c   :  { %v15758_v9 = vsel %vm2315_vm15, %v7064_v36, %v7046_v24  ;;  %v15764_v27 = vsel %vm2315_vm15, %v7065_v28, %v7050_v10  ;;  %v7054_v0 = vrot.slane %v7035_v4, %v13998_v46  ;;  %12468 = vmatprep.subr.bf16.mxu1 %v13089_v62  ;;  %7319 = vmatprep.subr.bf16.mxu0 %v13092_v53  ;;  %v13098_v24 = vld [vmem:[%s16873_s2 + $0x618] ss:$52 sps:$4 sm:$0xff]   ;;  %v13102_v4 = vld [vmem:[%s16873_s2 + $0x620] ss:$52 sps:$4 sm:$0xff]  }
0x1b8d   :  { %7073 = vadd.xlane.f32.xlu1 %v15758_v9  ;;  %v13101_v10 = vld [vmem:[%s16873_s2 + $0x5b8] ss:$52 sps:$4 sm:$0xff]  }
0x1b8e   :  { %v15773_v22 = vsel %vm2315_vm15, %v7066_v48, %v7054_v0  ;;  %12469 = vmatpush3.bf16.msra.mxu1 %v13089_v62 }
0x1b8f   :  { %7075 = vadd.xlane.f32.xlu0 %v15764_v27  ;;  %7320 = vmatpush1.bf16.msra.mxu0 %v13090_v7 }
0x1b90   :  { %12470 = vmatprep.subr.bf16.mxu1 %v13093_v29  ;;  %7321 = vmatprep.subr.bf16.mxu0 %v13096_v30 }
0x1b92   :  { %12471 = vmatpush3.bf16.msra.mxu1 %v13093_v29 }
0x1b93   :  { %7077 = vadd.xlane.f32.xlu0 %v15773_v22  ;;  %7322 = vmatpush1.bf16.msra.mxu0 %v13094_v3 }
0x1b94   :  { %12472 = vmatprep.subr.bf16.mxu1 %v13097_v8  ;;  %7323 = vmatprep.subr.bf16.mxu0 %v13100_v57 }
0x1b96   :  { %12473 = vmatpush3.bf16.msra.mxu1 %v13097_v8 }
0x1b97   :  { %7324 = vmatpush1.bf16.msra.mxu0 %v13098_v24  ;;  %12474 = vmatprep.subr.bf16.mxu1 %v13101_v10 }
0x1b98   :  { %12482 = vmatprep.subr.bf16.mxu0 %v13641_v34 }
0x1b9a   :  { %12475 = vmatpush3.bf16.msra.mxu1 %v13101_v10 }
0x1b9b   :  { %12476 = vmatprep.subr.bf16.mxu1 %v13102_v4 }
0x1b9e   :  { %12477 = vmatpush3.bf16.msra.mxu1 %v13102_v4 }
0x1b9f   :  { %12500 = vmatprep.subr.bf16.mxu1 %v13641_v34 }
0x1c18   :  { %v7072_v6 = vpop.xlane.xlu0 %7071 }
0x1c19   :  { %v7079_v47 = vmul.f32 0.0078125, %v7072_v6 }
0x1c1a   :  { %v7074_v43 = vpop.xlane.xlu1 %7073 }
0x1c1b   :  { %v15792_v21 = vsub.f32 %v15750_v1, %v7079_v47  ;;  %v7080_v54 = vmul.f32 0.0078125, %v7074_v43  ;;  %v13588_v43 = vld [vmem:[%s16876_s5 + $0x18] sm:$0xff] }
0x1c1c   :  { %v7076_v31 = vpop.xlane.xlu0 %7075 }
0x1c1d   :  { %v15795_v56 = vsub.f32 %v15758_v9, %v7080_v54  ;;  %v7081_v60 = vmul.f32 0.0078125, %v7076_v31  ;;  %v7087_v63 = vmul.f32 %v15792_v21, %v15792_v21  ;;  %v7118_v54 = vrot.slane %v13588_v43, %v14515_v39 }
0x1c1f   :  { %v15800_v26 = vsub.f32 %v15764_v27, %v7081_v60  ;;  %7091 = vadd.xlane.f32.xlu0 %v7087_v63  ;;  %v7088_v11 = vmul.f32 %v15795_v56, %v15795_v56  ;;  %v15877_v60 = vld [vmem:[%s16876_s5 + $0x20] sm:$0xff] }
0x1c20   :  { %v7078_v23 = vpop.xlane.xlu0 %7077 }
0x1c21   :  { %v7082_v38 = vmul.f32 0.0078125, %v7078_v23  ;;  %7093 = vadd.xlane.f32.xlu1 %v7088_v11  ;;  %v7089_v14 = vmul.f32 %v15800_v26, %v15800_v26 }
0x1c23   :  { %v15807_v59 = vsub.f32 %v15773_v22, %v7082_v38  ;;  %7095 = vadd.xlane.f32.xlu0 %v7089_v14  ;;  %v7126_v14 = vrot.slane %v15877_v60, %v13998_v46 }
0x1c25   :  { %v7090_v5 = vmul.f32 %v15807_v59, %v15807_v59 }
0x1c27   :  { %7097 = vadd.xlane.f32.xlu1 %v7090_v5 }
0x1cac   :  { %v7092_v36 = vpop.xlane.xlu0 %7091 }
0x1cad   :  { %v7099_v28 = vmul.f32 0.0078125, %v7092_v36 }
0x1cae   :  { %v7094_v0 = vpop.xlane.xlu1 %7093 }
0x1caf   :  { %v7103_v12 = vadd.f32 1e-05, %v7099_v28  ;;  %v7100_v48 = vmul.f32 0.0078125, %v7094_v0 }
0x1cb0   :  { %v7096_v17 = vpop.xlane.xlu0 %7095 }
0x1cb1   :  { %13435 = vrsqrt.f32 %v7103_v12  ;;  %v7104_v18 = vadd.f32 1e-05, %v7100_v48  ;;  %v7101_v32 = vmul.f32 0.0078125, %v7096_v17 }
0x1cb3   :  { %13437 = vrsqrt.f32 %v7104_v18  ;;  %v7105_v45 = vadd.f32 1e-05, %v7101_v32 }
0x1cb4   :  { %v7098_v2 = vpop.xlane.xlu1 %7097 }
0x1cb5   :  { %13439 = vrsqrt.f32 %v7105_v45  ;;  %v7102_v6 = vmul.f32 0.0078125, %v7098_v2 }
0x1cb7   :  { %v7106_v47 = vadd.f32 1e-05, %v7102_v6 }
0x1cb9   :  { %13441 = vrsqrt.f32 %v7106_v47 }
0x1cbb   :  { %v13436_v31 = vpop.eup %13435 }
0x1cbc   :  { %v7111_v63 = vmul.f32 %v13436_v31, %v15792_v21 }
0x1cbd   :  { %v13438_v11 = vpop.eup %13437 }
0x1cbe   :  { %v7112_v23 = vmul.f32 %v13438_v11, %v15795_v56  ;;  %v7119_v38 = vmul.f32 %v7118_v54, %v7111_v63 }
0x1cbf   :  { %v13440_v5 = vpop.eup %13439 }
0x1cc0   :  { %v7113_v35 = vmul.f32 %v13440_v5, %v15800_v26  ;;  %v7120_v20 = vmul.f32 %v7118_v54, %v7112_v23  ;;  %v7127_v58 = vadd.f32 %v7126_v14, %v7119_v38  ;;  %v7414_v26 = vrot.slane %v15877_v60, %v14111_v50 }
0x1cc2   :  { %v7128_v13 = vadd.f32 %v7126_v14, %v7120_v20  ;;  %v7121_v41 = vmul.f32 %v7118_v54, %v7113_v35 }
0x1cc3   :  { %v13442_v42 = vpop.eup %13441 }
0x1cc4   :  { %v7114_v37 = vmul.f32 %v13442_v42, %v15807_v59  ;;  %v7179_v44 = vpack.c.bf16 %v7128_v13, %v7127_v58  ;;  %v7129_v56 = vadd.f32 %v7126_v14, %v7121_v41  ;;  %v7426_v59 = vrot.slane %v15877_v60, %v14116_v52 }
0x1cc5   :  { %v7438_v58 = vrot.slane %v15877_v60, %v14128_v15 }
0x1cc6   :  { %7342 = vmatmul.mubr.bf16.vlgmr.msra.gmra.mrb[160].mxu0 %v7179_v44  ;;  %12478 = vmatprep.mubr.bf16.mxu1 %v7179_v44  ;;  %v7122_v21 = vmul.f32 %v7118_v54, %v7114_v37 }
0x1cc7   :  { %7351 = vmatprep.mubr.bf16.mxu0 %v13644_v33 }
0x1cc8   :  { %v7130_v62 = vadd.f32 %v7126_v14, %v7122_v21 }
0x1cca   :  { %v7180_v53 = vpack.c.bf16 %v7130_v62, %v7129_v56 }
0x1ccc   :  { %12479 = vmatmul.mubr.bf16.vlgmr.msra.gmra.mrb[188].mxu1 %v7180_v53 }
0x1ccd   :  { %12502 = vmatprep.mubr.msk.bf16.mxu1 %vm13642_vm1, %v13641_v34 }
0x1cce   :  { %7352 = vmatmul.mubr.bf16.gmra.mrb[164].mxu0 %v7180_v53 }
0x1ccf   :  { %12484 = vmatprep.mubr.msk.bf16.mxu0 %vm13642_vm1, %v13641_v34 }
0x1d99   :  { %v7343_v7 = vpop.f32.mrb[160].mxu0 }
0x1d9a   :  { %v7415_v29 = vadd.f32 %v7414_v26, %v7343_v7  ;;  %v7345_v30 = vpop.f32.mrb[161].mxu0 }
0x1d9b   :  { %v7427_v3 = vadd.f32 %v7426_v59, %v7345_v30  ;;  %v7347_v8 = vpop.f32.mrb[162].mxu0 }
0x1d9c   :  { %v7419_v57 = vpack.c.bf16 %v7415_v29, %v7415_v29  ;;  %v7349_v24 = vpop.f32.mrb[163].mxu0  ;;  %v7416_v12 = vadd.f32 %v7414_v26, %v7347_v8 }
0x1d9d   :  { %v7431_v10 = vpack.c.bf16 %v7427_v3, %v7427_v3  ;;  %v7428_v4 = vadd.f32 %v7426_v59, %v7349_v24 }
0x1d9e   :  { %7451 = vrot.lane.b32.xlu1 %v7419_v57, %s13645_s11  ;;  %v7420_v47 = vpack.c.bf16 %v7416_v12, %v7416_v12 }
0x1d9f   :  { %v7432_v36 = vpack.c.bf16 %v7428_v4, %v7428_v4  ;;  %v15895_v28 = vpop.f32.mrb[188].mxu1  ;;  %7479 = vrot.lane.b32.xlu0 %v7431_v10, %s13645_s11  ;;  %v7535_v0 = vsel %vm1272_vm9, %v7431_v10, 0 }
0x1da0   :  { %v7396_v48 = vpop.f32.mrb[189].mxu1  ;;  %12483 = vmatpush3.bf16.xpose.msra.mxu0 %v7535_v0  ;;  %v7441_v37 = vadd.f32 %v15895_v28, %v7438_v58 }
0x1da1   :  { %v7353_v17 = vpop.f32.mrb[164].mxu0  ;;  %v12481_v18 = vpop.f32.mrb[190].mxu1  ;;  %12488 = vmatprep.subr.bf16.mxu0 %v13641_v34  ;;  %v7581_v23 = vsel %vm1272_vm9, %v7432_v36, 0  ;;  %v7439_v13 = vadd.f32 %v7438_v58, %v7396_v48 }
0x1da2   :  { %v7399_v32 = vpop.f32.mrb[191].mxu1  ;;  %7481 = vrot.lane.b32.xlu1 %v7432_v36, %s13645_s11  ;;  %v7355_v45 = vpop.f32.mrb[165].mxu0  ;;  %v7417_v54 = vadd.f32 %v7414_v26, %v7353_v17  ;;  %v7442_v60 = vadd.f32 %v12481_v18, %v7438_v58  ;;  %v15949_v21 = vpack.c.bf16 %v7441_v37, %v7441_v37 }
0x1da3   :  { %v7429_v2 = vadd.f32 %v7426_v59, %v7355_v45  ;;  %v7357_v6 = vpop.f32.mrb[166].mxu0  ;;  %v7440_v42 = vadd.f32 %v7438_v58, %v7399_v32  ;;  %v15942_v44 = vpack.c.bf16 %v7439_v13, %v7439_v13 }
0x1da4   :  { %v7359_v43 = vpop.f32.mrb[167].mxu0  ;;  %v7418_v38 = vadd.f32 %v7414_v26, %v7357_v6  ;;  %v7421_v14 = vpack.c.bf16 %v7417_v54, %v7417_v54  ;;  %v15955_v56 = vpack.c.bf16 %v7442_v60, %v7442_v60 }
0x1da5   :  { %v7433_v31 = vpack.c.bf16 %v7429_v2, %v7429_v2  ;;  %v7430_v63 = vadd.f32 %v7426_v59, %v7359_v43  ;;  %v15947_v41 = vpack.c.bf16 %v7440_v42, %v7440_v42 }
0x1da6   :  { %7453 = vrot.lane.b32.xlu1 %v7420_v47, %s13645_s11  ;;  %v7422_v35 = vpack.c.bf16 %v7418_v38, %v7418_v38 }
0x1da7   :  { %v7434_v11 = vpack.c.bf16 %v7430_v63, %v7430_v63  ;;  %12485 = vmatmul.mubr.msk.bf16.vlgmr.msra.gmra.mrb[168].mxu0 %vm1272_vm9, %v7419_v57  ;;  %7483 = vrot.lane.b32.xlu0 %v7433_v31, %s13645_s11  ;;  %v7627_v20 = vsel %vm1272_vm9, %v7433_v31, 0  ;;  %v8509_v13 = vsel %vm660_vm12, %v15947_v41, 0 }
0x1da8   :  { %12489 = vmatpush3.bf16.xpose.msra.mxu0 %v7581_v23  ;;  %12490 = vmatprep.mubr.msk.bf16.mxu0 %vm13642_vm1, %v13641_v34 }
0x1da9   :  { %v7673_v5 = vsel %vm1272_vm9, %v7434_v11, 0  ;;  %12494 = vmatprep.subr.bf16.mxu0 %v13641_v34 }
0x1daa   :  { %7485 = vrot.lane.b32.xlu1 %v7434_v11, %s13645_s11  ;;  %12501 = vmatpush3.bf16.xpose.msra.mxu1 %v7673_v5 }
0x1dab   :  { %7455 = vrot.lane.b32.xlu0 %v7421_v14, %s13645_s11  ;;  %12512 = vmatprep.subr.bf16.mxu1 %v13641_v34 }
0x1dae   :  { %7457 = vrot.lane.b32.xlu1 %v7422_v35, %s13645_s11 }
0x1daf   :  { %12491 = vmatmul.mubr.msk.bf16.vlgmr.msra.gmra.mrb[172].mxu0 %vm1272_vm9, %v7420_v47  ;;  %7487 = vrot.lane.b32.xlu0 %v7431_v10, %s13646_s0 }
0x1db0   :  { %12495 = vmatpush3.bf16.xpose.msra.mxu0 %v7627_v20  ;;  %12496 = vmatprep.mubr.msk.bf16.mxu0 %vm13642_vm1, %v13641_v34  ;;  %v8463_v20 = vsel %vm660_vm12, %v15942_v44, 0 }
0x1db1   :  { %12503 = vmatmul.mubr.msk.bf16.vlgmr.msra.gmra.mrb[192].mxu1 %vm1272_vm9, %v7422_v35  ;;  %12506 = vmatprep.subr.bf16.mxu0 %v13641_v34 }
0x1db2   :  { %7489 = vrot.lane.b32.xlu1 %v7432_v36, %s13646_s0  ;;  %12514 = vmatprep.mubr.msk.bf16.mxu1 %vm13642_vm1, %v13641_v34 }
0x1db3   :  { %7459 = vrot.lane.b32.xlu0 %v7419_v57, %s13646_s0 }
0x1db6   :  { %7461 = vrot.lane.b32.xlu1 %v7420_v47, %s13646_s0 }
0x1db7   :  { %7491 = vrot.lane.b32.xlu0 %v7433_v31, %s13646_s0  ;;  %12497 = vmatmul.mubr.msk.bf16.vlgmr.msra.gmra.mrb[176].mxu0 %vm1272_vm9, %v7421_v14 }
0x1db8   :  { %12508 = vmatprep.mubr.msk.bf16.mxu0 %vm13642_vm1, %v13641_v34 }
0x1dba   :  { %7493 = vrot.lane.b32.xlu1 %v7434_v11, %s13646_s0 }
0x1dbb   :  { %7463 = vrot.lane.b32.xlu0 %v7421_v14, %s13646_s0 }
0x1dbe   :  { %7465 = vrot.lane.b32.xlu1 %v7422_v35, %s13646_s0 }
0x1dbf   :  { %7495 = vrot.lane.b32.xlu0 %v7431_v10, %s13647_s12 }
0x1dc2   :  { %7497 = vrot.lane.b32.xlu1 %v7432_v36, %s13647_s12 }
0x1dc3   :  { %7467 = vrot.lane.b32.xlu0 %v7419_v57, %s13647_s12 }
0x1dc6   :  { %7469 = vrot.lane.b32.xlu1 %v7420_v47, %s13647_s12 }
0x1dc7   :  { %7499 = vrot.lane.b32.xlu0 %v7433_v31, %s13647_s12 }
0x1dca   :  { %7501 = vrot.lane.b32.xlu1 %v7434_v11, %s13647_s12 }
0x1dcb   :  { %7471 = vrot.lane.b32.xlu0 %v7421_v14, %s13647_s12 }
0x1dce   :  { %7473 = vrot.lane.b32.xlu1 %v7422_v35, %s13647_s12 }
0x1dcf   :  { %7507 = vrot.lane.b32.xlu0 %v15942_v44, %s13645_s11 }
0x1dd2   :  { %7509 = vrot.lane.b32.xlu1 %v15947_v41, %s13645_s11 }
0x1dd3   :  { %7511 = vrot.lane.b32.xlu0 %v15949_v21, %s13645_s11 }
0x1dd6   :  { %7513 = vrot.lane.b32.xlu1 %v15955_v56, %s13645_s11 }
0x1e10   :  { %v7452_v62 = vpop.permute.xlu1 %7451 }
0x1e11   :  { %v7480_v53 = vpop.permute.xlu0 %7479 }
0x1e12   :  { %v7719_v26 = vsel %vm1272_vm9, %v7480_v53, 0 }
0x1e13   :  { %12507 = vmatpush3.bf16.xpose.msra.mxu0 %v7719_v26 }
0x1e14   :  { %v7482_v59 = vpop.permute.xlu1 %7481  ;;  %12518 = vmatprep.subr.bf16.mxu0 %v13641_v34 }
0x1e15   :  { %v7765_v7 = vsel %vm1272_vm9, %v7482_v59, 0 }
0x1e16   :  { %12513 = vmatpush3.bf16.xpose.msra.mxu1 %v7765_v7 }
0x1e17   :  { %12524 = vmatprep.subr.bf16.mxu1 %v13641_v34 }
0x1e18   :  { %v7454_v29 = vpop.permute.xlu1 %7453 }
0x1e19   :  { %v7484_v30 = vpop.permute.xlu0 %7483 }
0x1e1a   :  { %v7811_v3 = vsel %vm1272_vm9, %v7484_v30, 0  ;;  %12509 = vmatmul.mubr.msk.bf16.vlgmr.msra.gmra.mrb[180].mxu0 %vm1272_vm9, %v7452_v62 }
0x1e1b   :  { %12519 = vmatpush3.bf16.xpose.msra.mxu0 %v7811_v3  ;;  %12520 = vmatprep.mubr.msk.bf16.mxu0 %vm13642_vm1, %v13641_v34 }
0x1e1c   :  { %v7486_v8 = vpop.permute.xlu1 %7485  ;;  %12530 = vmatprep.subr.bf16.mxu0 %v13641_v34 }
0x1e1d   :  { %v7857_v57 = vsel %vm1272_vm9, %v7486_v8, 0  ;;  %v7456_v24 = vpop.permute.xlu0 %7455  ;;  %12515 = vmatmul.mubr.msk.bf16.vlgmr.msra.gmra.mrb[196].mxu1 %vm1272_vm9, %v7454_v29 }
0x1e1e   :  { %12525 = vmatpush3.bf16.xpose.msra.mxu1 %v7857_v57  ;;  %12526 = vmatprep.mubr.msk.bf16.mxu1 %vm13642_vm1, %v13641_v34 }
0x1e1f   :  { %12536 = vmatprep.subr.bf16.mxu1 %v13641_v34 }
0x1e20   :  { %v7458_v10 = vpop.permute.xlu1 %7457 }
0x1e21   :  { %v7488_v4 = vpop.permute.xlu0 %7487 }
0x1e22   :  { %v7903_v36 = vsel %vm1272_vm9, %v7488_v4, 0  ;;  %12521 = vmatmul.mubr.msk.bf16.vlgmr.msra.gmra.mrb[184].mxu0 %vm1272_vm9, %v7456_v24 }
0x1e23   :  { %12531 = vmatpush3.bf16.xpose.msra.mxu0 %v7903_v36  ;;  %12532 = vmatprep.mubr.msk.bf16.mxu0 %vm13642_vm1, %v13641_v34 }
0x1e24   :  { %v7490_v28 = vpop.permute.xlu1 %7489  ;;  %12542 = vmatprep.subr.bf16.mxu0 %v13641_v34 }
0x1e25   :  { %v7949_v0 = vsel %vm1272_vm9, %v7490_v28, 0  ;;  %v7460_v12 = vpop.permute.xlu0 %7459  ;;  %12527 = vmatmul.mubr.msk.bf16.vlgmr.msra.gmra.mrb[200].mxu1 %vm1272_vm9, %v7458_v10 }
0x1e26   :  { %12537 = vmatpush3.bf16.xpose.msra.mxu1 %v7949_v0  ;;  %12538 = vmatprep.mubr.msk.bf16.mxu1 %vm13642_vm1, %v13641_v34 }
0x1e27   :  { %12548 = vmatprep.subr.bf16.mxu1 %v13641_v34 }
0x1e28   :  { %v7462_v48 = vpop.permute.xlu1 %7461 }
0x1e29   :  { %v7492_v17 = vpop.permute.xlu0 %7491 }
0x1e2a   :  { %v7995_v18 = vsel %vm1272_vm9, %v7492_v17, 0  ;;  %12533 = vmatmul.mubr.msk.bf16.vlgmr.msra.gmra.mrb[188].mxu0 %vm1272_vm9, %v7460_v12 }
0x1e2b   :  { %12543 = vmatpush3.bf16.xpose.msra.mxu0 %v7995_v18  ;;  %12544 = vmatprep.mubr.msk.bf16.mxu0 %vm13642_vm1, %v13641_v34 }
0x1e2c   :  { %v7494_v32 = vpop.permute.xlu1 %7493  ;;  %12554 = vmatprep.subr.bf16.mxu0 %v13641_v34 }
0x1e2d   :  { %v8041_v45 = vsel %vm1272_vm9, %v7494_v32, 0  ;;  %v7464_v2 = vpop.permute.xlu0 %7463  ;;  %12539 = vmatmul.mubr.msk.bf16.vlgmr.msra.gmra.mrb[204].mxu1 %vm1272_vm9, %v7462_v48 }
0x1e2e   :  { %12549 = vmatpush3.bf16.xpose.msra.mxu1 %v8041_v45  ;;  %12550 = vmatprep.mubr.msk.bf16.mxu1 %vm13642_vm1, %v13641_v34 }
0x1e2f   :  { %12560 = vmatprep.subr.bf16.mxu1 %v13641_v34 }
0x1e30   :  { %v7466_v6 = vpop.permute.xlu1 %7465 }
0x1e31   :  { %v7496_v47 = vpop.permute.xlu0 %7495 }
0x1e32   :  { %v8087_v43 = vsel %vm1272_vm9, %v7496_v47, 0  ;;  %12545 = vmatmul.mubr.msk.bf16.vlgmr.msra.gmra.mrb[192].mxu0 %vm1272_vm9, %v7464_v2 }
0x1e33   :  { %12555 = vmatpush3.bf16.xpose.msra.mxu0 %v8087_v43  ;;  %12556 = vmatprep.mubr.msk.bf16.mxu0 %vm13642_vm1, %v13641_v34 }
0x1e34   :  { %v7498_v54 = vpop.permute.xlu1 %7497  ;;  %12566 = vmatprep.subr.bf16.mxu0 %v13641_v34 }
0x1e35   :  { %v8133_v31 = vsel %vm1272_vm9, %v7498_v54, 0  ;;  %v7468_v63 = vpop.permute.xlu0 %7467  ;;  %12551 = vmatmul.mubr.msk.bf16.vlgmr.msra.gmra.mrb[208].mxu1 %vm1272_vm9, %v7466_v6 }
0x1e36   :  { %12561 = vmatpush3.bf16.xpose.msra.mxu1 %v8133_v31  ;;  %12562 = vmatprep.mubr.msk.bf16.mxu1 %vm13642_vm1, %v13641_v34 }
0x1e37   :  { %12572 = vmatprep.subr.bf16.mxu1 %v13641_v34 }
0x1e38   :  { %v7470_v11 = vpop.permute.xlu1 %7469 }
0x1e39   :  { %v7500_v23 = vpop.permute.xlu0 %7499 }
0x1e3a   :  { %v8179_v38 = vsel %vm1272_vm9, %v7500_v23, 0  ;;  %12557 = vmatmul.mubr.msk.bf16.vlgmr.msra.gmra.mrb[196].mxu0 %vm1272_vm9, %v7468_v63 }
0x1e3b   :  { %12567 = vmatpush3.bf16.xpose.msra.mxu0 %v8179_v38  ;;  %12568 = vmatprep.mubr.msk.bf16.mxu0 %vm13642_vm1, %v13641_v34 }
0x1e3c   :  { %v7502_v14 = vpop.permute.xlu1 %7501  ;;  %12578 = vmatprep.subr.bf16.mxu0 %v13641_v34 }
0x1e3d   :  { %v8225_v5 = vsel %vm1272_vm9, %v7502_v14, 0  ;;  %12563 = vmatmul.mubr.msk.bf16.vlgmr.msra.gmra.mrb[212].mxu1 %vm1272_vm9, %v7470_v11  ;;  %v7472_v35 = vpop.permute.xlu0 %7471 }
0x1e3e   :  { %12573 = vmatpush3.bf16.xpose.msra.mxu1 %v8225_v5  ;;  %12574 = vmatprep.mubr.msk.bf16.mxu1 %vm13642_vm1, %v13641_v34 }
0x1e3f   :  { %12584 = vmatprep.subr.bf16.mxu1 %v13641_v34 }
0x1e40   :  { %v7474_v58 = vpop.permute.xlu1 %7473 }
0x1e42   :  { %12569 = vmatmul.mubr.msk.bf16.vlgmr.msra.gmra.mrb[200].mxu0 %vm1272_vm9, %v7472_v35 }
0x1e43   :  { %12579 = vmatpush3.bf16.msra.mxu0 %v8463_v20  ;;  %12580 = vmatprep.mubr.msk.bf16.mxu0 %vm13642_vm1, %v13641_v34 }
0x1e44   :  { %12590 = vmatprep.subr.bf16.mxu0 %v13641_v34 }
0x1e45   :  { %12575 = vmatmul.mubr.msk.bf16.vlgmr.msra.gmra.mrb[216].mxu1 %vm1272_vm9, %v7474_v58 }
0x1e46   :  { %12585 = vmatpush3.bf16.msra.mxu1 %v8509_v13  ;;  %12586 = vmatprep.mubr.msk.bf16.mxu1 %vm13642_vm1, %v13641_v34 }
0x1e47   :  { %12596 = vmatprep.subr.bf16.mxu1 %v13641_v34 }
0x1e7a   :  { %v16025_v42 = vpop.f32.mrb[168].mxu0 }
0x1e7b   :  { %v12486_v37 = vpop.f32.mrb[169].mxu0  ;;  %v8267_v60 = vsel %vm3516_vm6, %v16025_v42, -inf }
0x1e7c   :  { %8268 = vmax.xlane.f32.xlu0 %v8267_v60  ;;  %v7574_v62 = vpop.f32.mrb[170].mxu0 }
0x1e7d   :  { %v12487_v53 = vpop.f32.mrb[171].mxu0 }
0x1e82   :  { %v16029_v26 = vpop.f32.mrb[172].mxu0 }
0x1e83   :  { %v12492_v59 = vpop.f32.mrb[173].mxu0  ;;  %v8270_v7 = vsel %vm3516_vm6, %v16029_v26, -inf }
0x1e84   :  { %v7620_v29 = vpop.f32.mrb[174].mxu0  ;;  %8271 = vmax.xlane.f32.xlu1 %v8270_v7  ;;  %v16033_v30 = vpop.f32.mrb[192].mxu1 }
0x1e85   :  { %v12493_v3 = vpop.f32.mrb[175].mxu0  ;;  %v12504_v8 = vpop.f32.mrb[193].mxu1  ;;  %v8276_v57 = vsel %vm3516_vm6, %v16033_v30, -inf }
0x1e86   :  { %8277 = vmax.xlane.f32.xlu0 %v8276_v57  ;;  %v7712_v24 = vpop.f32.mrb[194].mxu1 }
0x1e87   :  { %v12505_v10 = vpop.f32.mrb[195].mxu1 }
0x1e8a   :  { %v16037_v4 = vpop.f32.mrb[176].mxu0 }
0x1e8b   :  { %v12498_v36 = vpop.f32.mrb[177].mxu0  ;;  %v8273_v28 = vsel %vm3516_vm6, %v16037_v4, -inf }
0x1e8c   :  { %v7666_v0 = vpop.f32.mrb[178].mxu0  ;;  %8274 = vmax.xlane.f32.xlu0 %v8273_v28 }
0x1e8d   :  { %v12499_v12 = vpop.f32.mrb[179].mxu0 }
0x1eed   :  { %v16041_v48 = vpop.f32.mrb[180].mxu0 }
0x1eee   :  { %v12510_v17 = vpop.f32.mrb[181].mxu0  ;;  %v8279_v18 = vsel %vm3516_vm6, %v16041_v48, -inf }
0x1eef   :  { %v7758_v32 = vpop.f32.mrb[182].mxu0  ;;  %8280 = vmax.xlane.f32.xlu0 %v8279_v18 }
0x1ef0   :  { %v12511_v45 = vpop.f32.mrb[183].mxu0  ;;  %v16045_v2 = vpop.f32.mrb[196].mxu1 }
0x1ef1   :  { %v12516_v6 = vpop.f32.mrb[197].mxu1  ;;  %v8282_v47 = vsel %vm3516_vm6, %v16045_v2, -inf }
0x1ef2   :  { %8283 = vmax.xlane.f32.xlu1 %v8282_v47  ;;  %v7804_v43 = vpop.f32.mrb[198].mxu1 }
0x1ef3   :  { %v12517_v54 = vpop.f32.mrb[199].mxu1 }
0x1ef5   :  { %v16049_v31 = vpop.f32.mrb[184].mxu0 }
0x1ef6   :  { %v12522_v63 = vpop.f32.mrb[185].mxu0  ;;  %v8285_v11 = vsel %vm3516_vm6, %v16049_v31, -inf }
0x1ef7   :  { %v7850_v23 = vpop.f32.mrb[186].mxu0  ;;  %8286 = vmax.xlane.f32.xlu0 %v8285_v11 }
0x1ef8   :  { %v12523_v38 = vpop.f32.mrb[187].mxu0  ;;  %v16053_v14 = vpop.f32.mrb[200].mxu1 }
0x1ef9   :  { %v12528_v5 = vpop.f32.mrb[201].mxu1  ;;  %v8288_v35 = vsel %vm3516_vm6, %v16053_v14, -inf }
0x1efa   :  { %8289 = vmax.xlane.f32.xlu1 %v8288_v35  ;;  %v7896_v20 = vpop.f32.mrb[202].mxu1 }
0x1efb   :  { %v12529_v58 = vpop.f32.mrb[203].mxu1 }
0x1efd   :  { %v16057_v13 = vpop.f32.mrb[188].mxu0 }
0x1efe   :  { %v12534_v37 = vpop.f32.mrb[189].mxu0  ;;  %v8291_v60 = vsel %vm3516_vm6, %v16057_v13, -inf }
0x1eff   :  { %v7942_v62 = vpop.f32.mrb[190].mxu0  ;;  %8292 = vmax.xlane.f32.xlu0 %v8291_v60 }
0x1f00   :  { %v12535_v53 = vpop.f32.mrb[191].mxu0  ;;  %v16061_v59 = vpop.f32.mrb[204].mxu1 }
0x1f01   :  { %v12540_v7 = vpop.f32.mrb[205].mxu1  ;;  %v8294_v29 = vsel %vm3516_vm6, %v16061_v59, -inf }
0x1f02   :  { %8295 = vmax.xlane.f32.xlu1 %v8294_v29  ;;  %v7988_v3 = vpop.f32.mrb[206].mxu1 }
0x1f03   :  { %v12541_v8 = vpop.f32.mrb[207].mxu1  ;;  %v16089_v3 = vpop.permute.xlu0 %7507 }
0x1f05   :  { %v16065_v57 = vpop.f32.mrb[192].mxu0 }
0x1f06   :  { %v12546_v24 = vpop.f32.mrb[193].mxu0  ;;  %v8297_v10 = vsel %vm3516_vm6, %v16065_v57, -inf }
0x1f07   :  { %v8034_v36 = vpop.f32.mrb[194].mxu0  ;;  %8298 = vmax.xlane.f32.xlu0 %v8297_v10  ;;  %v16093_v8 = vpop.permute.xlu0 %7511 }
0x1f08   :  { %v12547_v28 = vpop.f32.mrb[195].mxu0  ;;  %v16069_v0 = vpop.f32.mrb[208].mxu1 }
0x1f09   :  { %v12552_v12 = vpop.f32.mrb[209].mxu1  ;;  %v8300_v17 = vsel %vm3516_vm6, %v16069_v0, -inf  ;;  %v16099_v10 = vpop.permute.xlu1 %7509 }
0x1f0a   :  { %8301 = vmax.xlane.f32.xlu1 %v8300_v17  ;;  %v8080_v18 = vpop.f32.mrb[210].mxu1 }
0x1f0b   :  { %v12553_v32 = vpop.f32.mrb[211].mxu1  ;;  %v8269_v24 = vpop.xlane.xlu0 %8268 }
0x1f0c   :  { %v8315_v12 = vsub.f32 %v16025_v42, %v8269_v24 }
0x1f0d   :  { %v16073_v45 = vpop.f32.mrb[196].mxu0  ;;  %v16101_v28 = vpop.permute.xlu1 %7513 }
0x1f0e   :  { %v12558_v6 = vpop.f32.mrb[197].mxu0  ;;  %v8303_v47 = vsel %vm3516_vm6, %v16073_v45, -inf  ;;  %v8331_v18 = vmul.f32 1.442695, %v8315_v12 }
0x1f0f   :  { %v8126_v43 = vpop.f32.mrb[198].mxu0  ;;  %8304 = vmax.xlane.f32.xlu0 %v8303_v47 }
0x1f10   :  { %v12559_v54 = vpop.f32.mrb[199].mxu0  ;;  %v16077_v63 = vpop.f32.mrb[212].mxu1  ;;  %13443 = vpow2.f32 %v8331_v18 }
0x1f11   :  { %v12564_v11 = vpop.f32.mrb[213].mxu1  ;;  %v8306_v23 = vsel %vm3516_vm6, %v16077_v63, -inf  ;;  %v8272_v32 = vpop.xlane.xlu1 %8271 }
0x1f12   :  { %8307 = vmax.xlane.f32.xlu1 %v8306_v23  ;;  %v8172_v38 = vpop.f32.mrb[214].mxu1  ;;  %v8316_v47 = vsub.f32 %v16029_v26, %v8272_v32 }
0x1f13   :  { %v12565_v5 = vpop.f32.mrb[215].mxu1  ;;  %v8278_v36 = vpop.xlane.xlu0 %8277 }
0x1f14   :  { %v8333_v54 = vmul.f32 1.442695, %v8316_v47  ;;  %v8318_v11 = vsub.f32 %v16033_v30, %v8278_v36 }
0x1f15   :  { %v16081_v35 = vpop.f32.mrb[200].mxu0 }
0x1f16   :  { %v12570_v20 = vpop.f32.mrb[201].mxu0  ;;  %v8309_v58 = vsel %vm3516_vm6, %v16081_v35, -inf  ;;  %v8337_v23 = vmul.f32 1.442695, %v8318_v11 }
0x1f17   :  { %v8218_v37 = vpop.f32.mrb[202].mxu0  ;;  %8310 = vmax.xlane.f32.xlu0 %v8309_v58 }
0x1f18   :  { %v12571_v60 = vpop.f32.mrb[203].mxu0  ;;  %v16085_v62 = vpop.f32.mrb[216].mxu1 }
0x1f19   :  { %v12576_v53 = vpop.f32.mrb[217].mxu1  ;;  %v8275_v17 = vpop.xlane.xlu0 %8274  ;;  %v8312_v26 = vsel %vm3516_vm6, %v16085_v62, -inf }
0x1f1a   :  { %v8264_v7 = vpop.f32.mrb[218].mxu1  ;;  %v8317_v6 = vsub.f32 %v16037_v4, %v8275_v17  ;;  %v16107_v38 = vpop.eup %13443 }
0x1f1b   :  { %v12577_v29 = vpop.f32.mrb[219].mxu1  ;;  %v8363_v42 = vsel %vm3516_vm6, %v16107_v38, 0.0 }
0x1f1c   :  { %v8335_v43 = vmul.f32 1.442695, %v8317_v6 }
0x1f1e   :  { %13445 = vpow2.f32 %v8335_v43 }
0x1f1f   :  { %13447 = vpow2.f32 %v8333_v54 }
0x1f20   :  { %13449 = vpow2.f32 %v8337_v23 }
0x1f23   :  { %7517 = vrot.lane.b32.xlu1 %v15947_v41, %s13646_s0 }
0x1f27   :  { %7519 = vrot.lane.b32.xlu1 %v15949_v21, %s13646_s0 }
0x1f28   :  { %v16111_v5 = vpop.eup %13445 }
0x1f29   :  { %v16115_v4 = vpop.eup %13447  ;;  %v8369_v30 = vsel %vm3516_vm6, %v16111_v5, 0.0 }
0x1f2a   :  { %v8366_v20 = vsel %vm3516_vm6, %v16115_v4, 0.0  ;;  %v16121_v58 = vpop.eup %13449 }
0x1f2b   :  { %7521 = vrot.lane.b32.xlu1 %v15955_v56, %s13646_s0  ;;  %v8372_v37 = vsel %vm3516_vm6, %v16121_v58, 0.0 }
0x1f2d   :  { %7515 = vrot.lane.b32.xlu0 %v15942_v44, %s13646_s0 }
0x1f4c   :  { %8364 = vadd.xlane.f32.xlu0 %v8363_v42 }
0x1f4f   :  { %8313 = vmax.xlane.f32.xlu1 %v8312_v26 }
0x1f50   :  { %8370 = vadd.xlane.f32.xlu0 %v8369_v30 }
0x1f53   :  { %8367 = vadd.xlane.f32.xlu1 %v8366_v20 }
0x1f57   :  { %8373 = vadd.xlane.f32.xlu1 %v8372_v37 }
0x1f7c   :  { %v8281_v60 = vpop.xlane.xlu0 %8280 }
0x1f7d   :  { %v8319_v53 = vsub.f32 %v16041_v48, %v8281_v60 }
0x1f7f   :  { %v8339_v7 = vmul.f32 1.442695, %v8319_v53  ;;  %v8284_v29 = vpop.xlane.xlu1 %8283 }
0x1f80   :  { %v8320_v24 = vsub.f32 %v16045_v2, %v8284_v29 }
0x1f81   :  { %13451 = vpow2.f32 %v8339_v7 }
0x1f82   :  { %v8341_v36 = vmul.f32 1.442695, %v8320_v24 }
0x1f84   :  { %13453 = vpow2.f32 %v8341_v36  ;;  %v8287_v12 = vpop.xlane.xlu0 %8286 }
0x1f85   :  { %v8321_v17 = vsub.f32 %v16049_v31, %v8287_v12 }
0x1f87   :  { %v8343_v18 = vmul.f32 1.442695, %v8321_v17  ;;  %v8290_v32 = vpop.xlane.xlu1 %8289 }
0x1f88   :  { %v8322_v6 = vsub.f32 %v16053_v14, %v8290_v32 }
0x1f89   :  { %13455 = vpow2.f32 %v8343_v18 }
0x1f8a   :  { %v8345_v47 = vmul.f32 1.442695, %v8322_v6 }
0x1f8b   :  { %v16129_v43 = vpop.eup %13451 }
0x1f8c   :  { %13457 = vpow2.f32 %v8345_v47  ;;  %v8293_v48 = vpop.xlane.xlu0 %8292  ;;  %v8375_v54 = vsel %vm3516_vm6, %v16129_v43, 0.0 }
0x1f8d   :  { %v8323_v2 = vsub.f32 %v16057_v13, %v8293_v48  ;;  %8376 = vadd.xlane.f32.xlu0 %v8375_v54 }
0x1f8e   :  { %v16134_v11 = vpop.eup %13453 }
0x1f8f   :  { %v8347_v23 = vmul.f32 1.442695, %v8323_v2  ;;  %v8296_v31 = vpop.xlane.xlu1 %8295  ;;  %v8378_v42 = vsel %vm3516_vm6, %v16134_v11, 0.0 }
0x1f90   :  { %v8324_v14 = vsub.f32 %v16061_v59, %v8296_v31  ;;  %8379 = vadd.xlane.f32.xlu1 %v8378_v42 }
0x1f91   :  { %13459 = vpow2.f32 %v8347_v23 }
0x1f92   :  { %v8349_v26 = vmul.f32 1.442695, %v8324_v14 }
0x1f93   :  { %v16139_v30 = vpop.eup %13455 }
0x1f94   :  { %13461 = vpow2.f32 %v8349_v26  ;;  %v8299_v20 = vpop.xlane.xlu0 %8298  ;;  %v8381_v13 = vsel %vm3516_vm6, %v16139_v30, 0.0 }
0x1f95   :  { %v8325_v37 = vsub.f32 %v16065_v57, %v8299_v20  ;;  %8382 = vadd.xlane.f32.xlu0 %v8381_v13 }
0x1f96   :  { %v16144_v60 = vpop.eup %13457 }
0x1f97   :  { %v8351_v53 = vmul.f32 1.442695, %v8325_v37  ;;  %v8384_v7 = vsel %vm3516_vm6, %v16144_v60, 0.0  ;;  %v8302_v17 = vpop.xlane.xlu1 %8301 }
0x1f98   :  { %8385 = vadd.xlane.f32.xlu1 %v8384_v7  ;;  %v8326_v18 = vsub.f32 %v16069_v0, %v8302_v17 }
0x1f99   :  { %13463 = vpow2.f32 %v8351_v53 }
0x1f9a   :  { %v8353_v47 = vmul.f32 1.442695, %v8326_v18 }
0x1f9b   :  { %v16148_v59 = vpop.eup %13459 }
0x1f9c   :  { %v8387_v29 = vsel %vm3516_vm6, %v16148_v59, 0.0  ;;  %v8305_v32 = vpop.xlane.xlu0 %8304  ;;  %13465 = vpow2.f32 %v8353_v47 }
0x1f9d   :  { %8388 = vadd.xlane.f32.xlu0 %v8387_v29  ;;  %v8327_v48 = vsub.f32 %v16073_v45, %v8305_v32 }
0x1f9e   :  { %v16152_v24 = vpop.eup %13461 }
0x1f9f   :  { %v8390_v57 = vsel %vm3516_vm6, %v16152_v24, 0.0  ;;  %v8308_v6 = vpop.xlane.xlu1 %8307  ;;  %v8355_v23 = vmul.f32 1.442695, %v8327_v48 }
0x1fa0   :  { %8391 = vadd.xlane.f32.xlu1 %v8390_v57  ;;  %v8328_v54 = vsub.f32 %v16077_v63, %v8308_v6 }
0x1fa1   :  { %13467 = vpow2.f32 %v8355_v23  ;;  %v8555_v23 = vsel %vm660_vm12, %v15949_v21, 0 }
0x1fa2   :  { %v8357_v42 = vmul.f32 1.442695, %v8328_v54 }
0x1fa3   :  { %v16156_v36 = vpop.eup %13463 }
0x1fa4   :  { %v8393_v12 = vsel %vm3516_vm6, %v16156_v36, 0.0  ;;  %v8311_v2 = vpop.xlane.xlu0 %8310  ;;  %13469 = vpow2.f32 %v8357_v42 }
0x1fa5   :  { %8394 = vadd.xlane.f32.xlu0 %v8393_v12  ;;  %v8329_v31 = vsub.f32 %v16081_v35, %v8311_v2 }
0x1fa6   :  { %v16170_v0 = vpop.eup %13465 }
0x1fa7   :  { %v8396_v45 = vsel %vm3516_vm6, %v16170_v0, 0.0 }
0x1fa8   :  { %v16178_v26 = vpop.permute.xlu0 %7515 }
0x1fab   :  { %v16176_v63 = vpop.eup %13467 }
0x1fac   :  { %v8399_v13 = vsel %vm3516_vm6, %v16176_v63, 0.0 }
0x1fae   :  { %v16180_v35 = vpop.eup %13469 }
0x1faf   :  { %v8402_v7 = vsel %vm3516_vm6, %v16180_v35, 0.0 }
0x1fb1   :  { %7525 = vrot.lane.b32.xlu1 %v15947_v41, %s13647_s12  ;;  %v8359_v41 = vmul.f32 1.442695, %v8329_v31 }
0x1fb3   :  { %13471 = vpow2.f32 %v8359_v41 }
0x1fbb   :  { %7523 = vrot.lane.b32.xlu0 %v15942_v44, %s13647_s12  ;;  %v16168_v44 = vpop.permute.xlu1 %7517 }
0x1fbd   :  { %v16186_v37 = vpop.eup %13471 }
0x1fbe   :  { %v8405_v57 = vsel %vm3516_vm6, %v16186_v37, 0.0 }
0x1fbf   :  { %v16172_v14 = vpop.permute.xlu1 %7519 }
0x1fc3   :  { %v16182_v20 = vpop.permute.xlu1 %7521 }
0x1fd5   :  { %8397 = vadd.xlane.f32.xlu1 %v8396_v45 }
0x1fd9   :  { %v8365_v53 = vpop.xlane.xlu0 %8364  ;;  %8400 = vadd.xlane.f32.xlu1 %v8399_v13 }
0x1fda   :  { %13473 = vrcp.f32 %v8365_v53  ;;  %8403 = vadd.xlane.f32.xlu0 %v8402_v7  ;;  %v8647_v7 = vsel %vm660_vm12, %v16089_v3, 0 }
0x1fdc   :  { %v8314_v29 = vpop.xlane.xlu1 %8313 }
0x1fdd   :  { %v8330_v12 = vsub.f32 %v16085_v62, %v8314_v29  ;;  %v8371_v17 = vpop.xlane.xlu0 %8370  ;;  %8406 = vadd.xlane.f32.xlu1 %v8405_v57 }
0x1fde   :  { %13475 = vrcp.f32 %v8371_v17 }
0x1fdf   :  { %v8361_v18 = vmul.f32 1.442695, %v8330_v12 }
0x1fe0   :  { %v8368_v32 = vpop.xlane.xlu1 %8367 }
0x1fe1   :  { %13477 = vpow2.f32 %v8361_v18 }
0x1fe2   :  { %13479 = vrcp.f32 %v8368_v32 }
0x1fe4   :  { %v13474_v6 = vpop.eup %13473  ;;  %v8374_v47 = vpop.xlane.xlu1 %8373 }
0x1fe5   :  { %v8427_v48 = vmul.f32 %v13474_v6, %v16107_v38  ;;  %13481 = vrcp.f32 %v8374_v47  ;;  %v8739_v47 = vsel %vm660_vm12, %v16093_v8, 0 }
0x1fe7   :  { %v8443_v54 = vpack.c.bf16 %v8427_v48, %v8427_v48 }
0x1fe8   :  { %v13476_v2 = vpop.eup %13475 }
0x1fe9   :  { %12581 = vmatmul.mubr.msk.bf16.vlgmr.msra.gmra.mrb[204].mxu0 %vm3516_vm6, %v8443_v54  ;;  %v8429_v31 = vmul.f32 %v13476_v2, %v16111_v5  ;;  %v8601_v5 = vsel %vm660_vm12, %v15955_v56, 0  ;;  %v8785_v54 = vsel %vm660_vm12, %v16101_v28, 0 }
0x1fea   :  { %12591 = vmatpush3.bf16.msra.mxu0 %v8555_v23  ;;  %12592 = vmatprep.mubr.msk.bf16.mxu0 %vm13642_vm1, %v13641_v34 }
0x1feb   :  { %v16199_v62 = vpop.eup %13477  ;;  %12602 = vmatprep.subr.bf16.mxu0 %v13641_v34  ;;  %v8445_v13 = vpack.c.bf16 %v8429_v31, %v8429_v31 }
0x1fec   :  { %v13480_v42 = vpop.eup %13479  ;;  %v8408_v38 = vsel %vm3516_vm6, %v16199_v62, 0.0 }
0x1fed   :  { %v8428_v41 = vmul.f32 %v13480_v42, %v16115_v4  ;;  %8409 = vadd.xlane.f32.xlu0 %v8408_v38  ;;  %v8831_v42 = vsel %vm660_vm12, %v16178_v26, 0 }
0x1fee   :  { %7529 = vrot.lane.b32.xlu1 %v15955_v56, %s13647_s12  ;;  %v8693_v56 = vsel %vm660_vm12, %v16099_v10, 0 }
0x1fef   :  { %v8444_v45 = vpack.c.bf16 %v8428_v41, %v8428_v41  ;;  %v13482_v53 = vpop.eup %13481  ;;  %v8877_v41 = vsel %vm660_vm12, %v16168_v44, 0 }
0x1ff0   :  { %v8430_v4 = vmul.f32 %v13482_v53, %v16121_v58  ;;  %v8923_v53 = vsel %vm660_vm12, %v16172_v14, 0 }
0x1ff1   :  { %12587 = vmatmul.mubr.msk.bf16.vlgmr.msra.gmra.mrb[220].mxu1 %vm3516_vm6, %v8444_v45  ;;  %12593 = vmatmul.mubr.msk.bf16.vlgmr.msra.gmra.mrb[208].mxu0 %vm3516_vm6, %v8445_v13 }
0x1ff2   :  { %12597 = vmatpush3.bf16.msra.mxu1 %v8601_v5  ;;  %12603 = vmatpush3.bf16.msra.mxu0 %v8647_v7  ;;  %v8446_v3 = vpack.c.bf16 %v8430_v4, %v8430_v4  ;;  %v8969_v7 = vsel %vm660_vm12, %v16182_v20, 0 }
0x1ff3   :  { %12598 = vmatprep.mubr.msk.bf16.mxu1 %vm13642_vm1, %v13641_v34  ;;  %12608 = vmatprep.subr.bf16.mxu1 %v13641_v34 }
0x1ff4   :  { %12604 = vmatprep.mubr.msk.bf16.mxu0 %vm13642_vm1, %v13641_v34  ;;  %12614 = vmatprep.subr.bf16.mxu0 %v13641_v34 }
0x1ff9   :  { %12599 = vmatmul.mubr.msk.bf16.vlgmr.msra.gmra.mrb[224].mxu1 %vm3516_vm6, %v8446_v3 }
0x1ffa   :  { %12609 = vmatpush3.bf16.msra.mxu1 %v8693_v56  ;;  %12610 = vmatprep.mubr.msk.bf16.mxu1 %vm13642_vm1, %v13641_v34 }
0x1ffb   :  { %12620 = vmatprep.subr.bf16.mxu1 %v13641_v34 }
0x2003   :  { %7527 = vrot.lane.b32.xlu0 %v15949_v21, %s13647_s12 }
0x201a   :  { %v8377_v58 = vpop.xlane.xlu0 %8376 }
0x201b   :  { %13483 = vrcp.f32 %v8377_v58 }
0x201d   :  { %v8380_v29 = vpop.xlane.xlu1 %8379 }
0x201e   :  { %13485 = vrcp.f32 %v8380_v29 }
0x2022   :  { %v8383_v57 = vpop.xlane.xlu0 %8382 }
0x2023   :  { %13487 = vrcp.f32 %v8383_v57 }
0x2025   :  { %v13484_v12 = vpop.eup %13483  ;;  %v8386_v17 = vpop.xlane.xlu1 %8385 }
0x2026   :  { %v8431_v10 = vmul.f32 %v13484_v12, %v16129_v43  ;;  %13489 = vrcp.f32 %v8386_v17 }
0x2028   :  { %v13486_v18 = vpop.eup %13485  ;;  %v8447_v32 = vpack.c.bf16 %v8431_v10, %v8431_v10 }
0x2029   :  { %v8432_v6 = vmul.f32 %v13486_v18, %v16134_v11 }
0x202a   :  { %12605 = vmatmul.mubr.msk.bf16.vlgmr.msra.gmra.mrb[212].mxu0 %vm3516_vm6, %v8447_v32  ;;  %v8389_v21 = vpop.xlane.xlu0 %8388 }
0x202b   :  { %12615 = vmatpush3.bf16.msra.mxu0 %v8739_v47  ;;  %13491 = vrcp.f32 %v8389_v21  ;;  %v8448_v48 = vpack.c.bf16 %v8432_v6, %v8432_v6  ;;  %12616 = vmatprep.mubr.msk.bf16.mxu0 %vm13642_vm1, %v13641_v34 }
0x202c   :  { %12626 = vmatprep.subr.bf16.mxu0 %v13641_v34 }
0x202d   :  { %v13488_v43 = vpop.eup %13487  ;;  %12611 = vmatmul.mubr.msk.bf16.vlgmr.msra.gmra.mrb[228].mxu1 %vm3516_vm6, %v8448_v48  ;;  %v8392_v11 = vpop.xlane.xlu1 %8391 }
0x202e   :  { %v8433_v8 = vmul.f32 %v13488_v43, %v16139_v30  ;;  %12621 = vmatpush3.bf16.msra.mxu1 %v8785_v54  ;;  %13493 = vrcp.f32 %v8392_v11  ;;  %12622 = vmatprep.mubr.msk.bf16.mxu1 %vm13642_vm1, %v13641_v34 }
0x202f   :  { %12632 = vmatprep.subr.bf16.mxu1 %v13641_v34 }
0x2030   :  { %v13490_v2 = vpop.eup %13489  ;;  %v8449_v23 = vpack.c.bf16 %v8433_v8, %v8433_v8 }
0x2031   :  { %v8434_v31 = vmul.f32 %v13490_v2, %v16144_v60  ;;  %v7526_v20 = vpop.permute.xlu1 %7525 }
0x2032   :  { %12617 = vmatmul.mubr.msk.bf16.vlgmr.msra.gmra.mrb[216].mxu0 %vm3516_vm6, %v8449_v23  ;;  %v8395_v28 = vpop.xlane.xlu0 %8394  ;;  %v9061_v18 = vsel %vm660_vm12, %v7526_v20, 0 }
0x2033   :  { %12627 = vmatpush3.bf16.msra.mxu0 %v8831_v42  ;;  %13495 = vrcp.f32 %v8395_v28  ;;  %v8450_v30 = vpack.c.bf16 %v8434_v31, %v8434_v31  ;;  %12628 = vmatprep.mubr.msk.bf16.mxu0 %vm13642_vm1, %v13641_v34 }
0x2034   :  { %12638 = vmatprep.subr.bf16.mxu0 %v13641_v34 }
0x2035   :  { %v13492_v38 = vpop.eup %13491  ;;  %12623 = vmatmul.mubr.msk.bf16.vlgmr.msra.gmra.mrb[232].mxu1 %vm3516_vm6, %v8450_v30 }
0x2036   :  { %v8435_v60 = vmul.f32 %v13492_v38, %v16148_v59  ;;  %12633 = vmatpush3.bf16.msra.mxu1 %v8877_v41  ;;  %12634 = vmatprep.mubr.msk.bf16.mxu1 %vm13642_vm1, %v13641_v34  ;;  %v7524_v14 = vpop.permute.xlu0 %7523 }
0x2037   :  { %12644 = vmatprep.subr.bf16.mxu1 %v13641_v34  ;;  %v9015_v4 = vsel %vm660_vm12, %v7524_v14, 0 }
0x2038   :  { %v13494_v26 = vpop.eup %13493  ;;  %v8451_v45 = vpack.c.bf16 %v8435_v60, %v8435_v60 }
0x2039   :  { %v8436_v13 = vmul.f32 %v13494_v26, %v16152_v24 }
0x203a   :  { %12629 = vmatmul.mubr.msk.bf16.vlgmr.msra.gmra.mrb[220].mxu0 %vm3516_vm6, %v8451_v45 }
0x203b   :  { %12639 = vmatpush3.bf16.msra.mxu0 %v8923_v53  ;;  %v8452_v44 = vpack.c.bf16 %v8436_v13, %v8436_v13  ;;  %12640 = vmatprep.mubr.msk.bf16.mxu0 %vm13642_vm1, %v13641_v34 }
0x203c   :  { %12650 = vmatprep.subr.bf16.mxu0 %v13641_v34 }
0x203d   :  { %v13496_v59 = vpop.eup %13495  ;;  %12635 = vmatmul.mubr.msk.bf16.vlgmr.msra.gmra.mrb[236].mxu1 %vm3516_vm6, %v8452_v44 }
0x203e   :  { %v8437_v24 = vmul.f32 %v13496_v59, %v16156_v36  ;;  %12645 = vmatpush3.bf16.msra.mxu1 %v8969_v7  ;;  %12646 = vmatprep.mubr.msk.bf16.mxu1 %vm13642_vm1, %v13641_v34 }
0x203f   :  { %12656 = vmatprep.subr.bf16.mxu1 %v13641_v34 }
0x2040   :  { %v8453_v5 = vpack.c.bf16 %v8437_v24, %v8437_v24 }
0x2042   :  { %12641 = vmatmul.mubr.msk.bf16.vlgmr.msra.gmra.mrb[224].mxu0 %vm3516_vm6, %v8453_v5 }
0x2043   :  { %12651 = vmatpush3.bf16.msra.mxu0 %v9015_v4  ;;  %12652 = vmatprep.mubr.msk.bf16.mxu0 %vm13642_vm1, %v13641_v34 }
0x2044   :  { %12662 = vmatprep.subr.bf16.mxu0 %v13641_v34 }
0x2062   :  { %v8398_v36 = vpop.xlane.xlu1 %8397 }
0x2063   :  { %13497 = vrcp.f32 %v8398_v36 }
0x2066   :  { %v8401_v3 = vpop.xlane.xlu1 %8400 }
0x2067   :  { %13499 = vrcp.f32 %v8401_v3  ;;  %v8404_v56 = vpop.xlane.xlu0 %8403 }
0x2068   :  { %13501 = vrcp.f32 %v8404_v56 }
0x206a   :  { %v8407_v29 = vpop.xlane.xlu1 %8406 }
0x206b   :  { %13503 = vrcp.f32 %v8407_v29 }
0x206d   :  { %v13498_v58 = vpop.eup %13497 }
0x206e   :  { %v8438_v57 = vmul.f32 %v13498_v58, %v16170_v0  ;;  %v7530_v0 = vpop.permute.xlu1 %7529 }
0x2070   :  { %v8454_v12 = vpack.c.bf16 %v8438_v57, %v8438_v57 }
0x2071   :  { %v13500_v17 = vpop.eup %13499 }
0x2072   :  { %v13502_v10 = vpop.eup %13501  ;;  %v8439_v32 = vmul.f32 %v13500_v17, %v16176_v63  ;;  %12647 = vmatmul.mubr.msk.bf16.vlgmr.msra.gmra.mrb[240].mxu1 %vm3516_vm6, %v8454_v12  ;;  %v9153_v63 = vsel %vm660_vm12, %v7530_v0, 0 }
0x2073   :  { %12657 = vmatpush3.bf16.msra.mxu1 %v9061_v18  ;;  %12658 = vmatprep.mubr.msk.bf16.mxu1 %vm13642_vm1, %v13641_v34  ;;  %v8440_v6 = vmul.f32 %v13502_v10, %v16180_v35 }
0x2074   :  { %v8455_v47 = vpack.c.bf16 %v8439_v32, %v8439_v32  ;;  %12668 = vmatprep.subr.bf16.mxu1 %v13641_v34  ;;  %v13103_v32 = vld [vmem:[%s16873_s2 + $0x34c] ss:$52 sps:$4 sm:$0xff]  }
0x2075   :  { %v8456_v21 = vpack.c.bf16 %v8440_v6, %v8440_v6  ;;  %v13504_v48 = vpop.eup %13503 }
0x2076   :  { %12653 = vmatmul.mubr.msk.bf16.vlgmr.msra.gmra.mrb[228].mxu0 %vm3516_vm6, %v8455_v47  ;;  %v8441_v35 = vmul.f32 %v13504_v48, %v16186_v37 }
0x2077   :  { %12664 = vmatprep.mubr.msk.bf16.mxu0 %vm13642_vm1, %v13641_v34 }
0x2078   :  { %v8457_v8 = vpack.c.bf16 %v8441_v35, %v8441_v35 }
0x207a   :  { %v8410_v43 = vpop.xlane.xlu0 %8409  ;;  %12659 = vmatmul.mubr.msk.bf16.vlgmr.msra.gmra.mrb[244].mxu1 %vm3516_vm6, %v8456_v21 }
0x207b   :  { %13505 = vrcp.f32 %v8410_v43  ;;  %12669 = vmatpush3.bf16.msra.mxu1 %v9153_v63  ;;  %12670 = vmatprep.mubr.msk.bf16.mxu1 %vm13642_vm1, %v13641_v34 }
0x207e   :  { %v7528_v54 = vpop.permute.xlu0 %7527 }
0x207f   :  { %v9107_v11 = vsel %vm660_vm12, %v7528_v54, 0 }
0x2080   :  { %12663 = vmatpush3.bf16.msra.mxu0 %v9107_v11 }
0x2081   :  { %12674 = vmatprep.subr.bf16.mxu0 %v13103_v32 }
0x2083   :  { %12665 = vmatmul.mubr.msk.bf16.vlgmr.msra.gmra.mrb[232].mxu0 %vm3516_vm6, %v8457_v8 }
0x2084   :  { %12675 = vmatpush3.bf16.msra.mxu0 %v13103_v32 }
0x2085   :  { %v13506_v2 = vpop.eup %13505 }
0x2086   :  { %v8442_v23 = vmul.f32 %v13506_v2, %v16199_v62 }
0x2088   :  { %v8458_v31 = vpack.c.bf16 %v8442_v23, %v8442_v23 }
0x208a   :  { %12671 = vmatmul.mubr.msk.bf16.vlgmr.msra.gmra.mrb[248].mxu1 %vm3516_vm6, %v8458_v31 }
0x208b   :  { %9671 = vmatprep.mubr.bf16.mxu1 %v13644_v33 }
0x20bc   :  { %v16298_v42 = vpop.f32.mrb[204].mxu0 }
0x20bd   :  { %v12582_v28 = vpop.f32.mrb[205].mxu0 }
0x20be   :  { %v8502_v30 = vpop.f32.mrb[206].mxu0 }
0x20bf   :  { %v12583_v37 = vpop.f32.mrb[207].mxu0 }
0x20c4   :  { %v16300_v38 = vpop.f32.mrb[220].mxu1  ;;  %v16302_v41 = vpop.f32.mrb[208].mxu0 }
0x20c5   :  { %v12588_v60 = vpop.f32.mrb[221].mxu1  ;;  %v12594_v26 = vpop.f32.mrb[209].mxu0 }
0x20c6   :  { %v8548_v45 = vpop.f32.mrb[222].mxu1  ;;  %v8594_v13 = vpop.f32.mrb[210].mxu0  ;;  %v13104_v60 = vld [vmem:[%s16873_s2 + $0x3b4] ss:$52 sps:$4 sm:$0xff]   ;;  %v13105_v26 = vld [vmem:[%s16873_s2 + $0x41c] ss:$52 sps:$4 sm:$0xff]  }
0x20c7   :  { %v12589_v53 = vpop.f32.mrb[223].mxu1  ;;  %v12595_v62 = vpop.f32.mrb[211].mxu0  ;;  %12676 = vmatprep.subr.bf16.mxu0 %v13104_v60  ;;  %v13106_v45 = vld [vmem:[%s16873_s2 + $0x484] ss:$52 sps:$4 sm:$0xff]   ;;  %v13107_v13 = vld [vmem:[%s16873_s2 + $0x4ec] ss:$52 sps:$4 sm:$0xff]  }
0x20c8   :  { %12677 = vmatpush3.bf16.msra.mxu0 %v13104_v60 }
0x20c9   :  { %12678 = vmatprep.subr.bf16.mxu0 %v13105_v26 }
0x20cc   :  { %v16304_v44 = vpop.f32.mrb[224].mxu1  ;;  %12679 = vmatpush3.bf16.msra.mxu0 %v13105_v26 }
0x20cd   :  { %v12600_v59 = vpop.f32.mrb[225].mxu1  ;;  %12680 = vmatprep.subr.bf16.mxu0 %v13106_v45 }
0x20ce   :  { %v8640_v7 = vpop.f32.mrb[226].mxu1 }
0x20cf   :  { %v12601_v24 = vpop.f32.mrb[227].mxu1 }
0x20d0   :  { %12681 = vmatpush3.bf16.msra.mxu0 %v13106_v45 }
0x20d1   :  { %12682 = vmatprep.subr.bf16.mxu0 %v13107_v13 }
0x20d4   :  { %12683 = vmatpush3.bf16.msra.mxu0 %v13107_v13 }
0x20fd   :  { %v8683_v14 = vpop.f32.mrb[212].mxu0 }
0x20fe   :  { %v12606_v5 = vpop.f32.mrb[213].mxu0 }
0x20ff   :  { %v8686_v4 = vpop.f32.mrb[214].mxu0 }
0x2100   :  { %v12607_v20 = vpop.f32.mrb[215].mxu0  ;;  %v8729_v36 = vpop.f32.mrb[228].mxu1 }
0x2101   :  { %v12776_v3 = vpack.i.bf16 %v8729_v36, %v8683_v14  ;;  %v12612_v56 = vpop.f32.mrb[229].mxu1  ;;  %v13108_v14 = vld [vmem:[%s16873_s2 + $0x554] ss:$52 sps:$4 sm:$0xff]  }
0x2102   :  { %v8732_v58 = vpop.f32.mrb[230].mxu1  ;;  %12684 = vmatprep.subr.bf16.mxu0 %v13108_v14 }
0x2103   :  { %12777 = vrot.lane.b32.xlu0 %v12776_v3, %s13647_s12  ;;  %v12613_v29 = vpop.f32.mrb[231].mxu1  ;;  %v13109_v3 = vld [vmem:[%s16873_s2 + $0x5bc] ss:$52 sps:$4 sm:$0xff]   ;;  %12685 = vmatpush3.bf16.msra.mxu0 %v13108_v14 }
0x2104   :  { %12686 = vmatprep.subr.bf16.mxu0 %v13109_v3 }
0x2105   :  { %v8775_v57 = vpop.f32.mrb[216].mxu0 }
0x2106   :  { %v12618_v12 = vpop.f32.mrb[217].mxu0 }
0x2107   :  { %v8778_v17 = vpop.f32.mrb[218].mxu0  ;;  %12687 = vmatpush3.bf16.msra.mxu0 %v13109_v3 }
0x2108   :  { %v12619_v10 = vpop.f32.mrb[219].mxu0  ;;  %v8821_v18 = vpop.f32.mrb[232].mxu1  ;;  %v13110_v17 = vld [vmem:[%s16873_s2 + $0x624] ss:$52 sps:$4 sm:$0xff]  }
0x2109   :  { %v12781_v6 = vpack.i.bf16 %v8821_v18, %v8775_v57  ;;  %v12624_v47 = vpop.f32.mrb[233].mxu1  ;;  %12688 = vmatprep.subr.bf16.mxu0 %v13110_v17 }
0x210a   :  { %v8824_v0 = vpop.f32.mrb[234].mxu1 }
0x210b   :  { %12782 = vrot.lane.b32.xlu1 %v12781_v6, %s13647_s12  ;;  %v12625_v21 = vpop.f32.mrb[235].mxu1  ;;  %12689 = vmatpush3.bf16.msra.mxu0 %v13110_v17 }
0x210d   :  { %v8867_v48 = vpop.f32.mrb[220].mxu0 }
0x210e   :  { %v12630_v63 = vpop.f32.mrb[221].mxu0 }
0x210f   :  { %v8870_v43 = vpop.f32.mrb[222].mxu0 }
0x2110   :  { %v12631_v35 = vpop.f32.mrb[223].mxu0  ;;  %v8913_v54 = vpop.f32.mrb[236].mxu1 }
0x2111   :  { %v12786_v11 = vpack.i.bf16 %v8913_v54, %v8867_v48  ;;  %v12636_v8 = vpop.f32.mrb[237].mxu1 }
0x2112   :  { %v8916_v2 = vpop.f32.mrb[238].mxu1 }
0x2113   :  { %12787 = vrot.lane.b32.xlu0 %v12786_v11, %s13646_s0  ;;  %v12637_v23 = vpop.f32.mrb[239].mxu1 }
0x2115   :  { %v8959_v31 = vpop.f32.mrb[224].mxu0 }
0x2116   :  { %v12642_v28 = vpop.f32.mrb[225].mxu0 }
0x2117   :  { %v8962_v30 = vpop.f32.mrb[226].mxu0 }
0x2118   :  { %v12643_v37 = vpop.f32.mrb[227].mxu0 }
0x2145   :  { %v9005_v53 = vpop.f32.mrb[240].mxu1 }
0x2146   :  { %v12791_v62 = vpack.i.bf16 %v9005_v53, %v8959_v31  ;;  %v12648_v59 = vpop.f32.mrb[241].mxu1 }
0x2147   :  { %v9008_v7 = vpop.f32.mrb[242].mxu1 }
0x2148   :  { %12792 = vrot.lane.b32.xlu1 %v12791_v62, %s13646_s0  ;;  %v12649_v24 = vpop.f32.mrb[243].mxu1 }
0x2149   :  { %v9051_v5 = vpop.f32.mrb[228].mxu0 }
0x214a   :  { %v12654_v4 = vpop.f32.mrb[229].mxu0 }
0x214b   :  { %v9054_v20 = vpop.f32.mrb[230].mxu0 }
0x214c   :  { %v12655_v36 = vpop.f32.mrb[231].mxu0 }
0x214d   :  { %v9097_v56 = vpop.f32.mrb[244].mxu1 }
0x214e   :  { %v12796_v58 = vpack.i.bf16 %v9097_v56, %v9051_v5  ;;  %v12660_v29 = vpop.f32.mrb[245].mxu1 }
0x214f   :  { %v9100_v57 = vpop.f32.mrb[246].mxu1 }
0x2150   :  { %12797 = vrot.lane.b32.xlu0 %v12796_v58, %s13645_s11  ;;  %v12661_v12 = vpop.f32.mrb[247].mxu1 }
0x2156   :  { %v9143_v10 = vpop.f32.mrb[232].mxu0 }
0x2157   :  { %v12666_v18 = vpop.f32.mrb[233].mxu0 }
0x2158   :  { %v9146_v32 = vpop.f32.mrb[234].mxu0 }
0x2159   :  { %v12667_v6 = vpop.f32.mrb[235].mxu0 }
0x215d   :  { %v9189_v47 = vpop.f32.mrb[248].mxu1 }
0x215e   :  { %v12801_v0 = vpack.i.bf16 %v9189_v47, %v9143_v10  ;;  %v12672_v21 = vpop.f32.mrb[249].mxu1 }
0x215f   :  { %v9192_v48 = vpop.f32.mrb[250].mxu1 }
0x2160   :  { %12802 = vrot.lane.b32.xlu1 %v12801_v0, %s13645_s11  ;;  %v12673_v63 = vpop.f32.mrb[251].mxu1 }
0x2175   :  { %v12778_v43 = vpop.permute.xlu0 %12777 }
0x2176   :  { %v12780_v54 = vunpack.i.h.bf16 %v12778_v43  ;;  %v12779_v11 = vunpack.i.l.bf16 %v12778_v43  ;;  %v13116_v43 = vld [vmem:[%s16873_s2 + $0x370] ss:$52 sps:$4 sm:$0xff]  }
0x2177   :  { %9692 = vmatprep.subr.bf16.mxu0 %v13116_v43  ;;  %v13152_v43 = vld [vmem:[%s16873_s2 + $0x5e0] ss:$52 sps:$4 sm:$0xff]  }
0x2178   :  { %v9244_v31 = vsel %vm1272_vm9, %v16300_v38, %v12780_v54  ;;  %v9243_v28 = vsel %vm1272_vm9, %v16298_v42, %v12779_v11  ;;  %v13117_v54 = vld [vmem:[%s16873_s2 + $0x3cc] ss:$52 sps:$4 sm:$0xff]   ;;  %v13120_v11 = vld [vmem:[%s16873_s2 + $0x3d4] ss:$52 sps:$4 sm:$0xff]  }
0x217d   :  { %v12783_v62 = vpop.permute.xlu1 %12782 }
0x217e   :  { %v12785_v7 = vunpack.i.h.bf16 %v12783_v62  ;;  %v12784_v24 = vunpack.i.l.bf16 %v12783_v62 }
0x2180   :  { %v9246_v42 = vsel %vm1272_vm9, %v16304_v44, %v12785_v7  ;;  %v9245_v4 = vsel %vm1272_vm9, %v16302_v41, %v12784_v24  ;;  %v16356_v44 = vld [vmem:[%s16876_s5 + $0x20] sm:$0xff] }
0x2181   :  { %v9260_v41 = vrot.slane %v16356_v44, %v14131_v19 }
0x2185   :  { %v12788_v35 = vpop.permute.xlu0 %12787 }
0x2186   :  { %v12790_v8 = vunpack.i.h.bf16 %v12788_v35  ;;  %v12789_v2 = vunpack.i.l.bf16 %v12788_v35  ;;  %v13122_v35 = vld [vmem:[%s16873_s2 + $0x3d8] ss:$52 sps:$4 sm:$0xff]  }
0x2188   :  { %v9248_v60 = vsel %vm2133_vm13, %v9244_v31, %v12790_v8  ;;  %v9247_v26 = vsel %vm2133_vm13, %v9243_v28, %v12789_v2 }
0x21ba   :  { %v12793_v59 = vpop.permute.xlu1 %12792 }
0x21bb   :  { %v12795_v38 = vunpack.i.h.bf16 %v12793_v59  ;;  %v12794_v14 = vunpack.i.l.bf16 %v12793_v59  ;;  %v10482_v59 = vrot.slane %v15376_v40, 6 }
0x21bd   :  { %v9250_v3 = vsel %vm2133_vm13, %v9246_v42, %v12795_v38  ;;  %v9249_v56 = vsel %vm2133_vm13, %v9245_v4, %v12794_v14 }
0x21c2   :  { %v12798_v23 = vpop.permute.xlu0 %12797 }
0x21c3   :  { %v12800_v30 = vunpack.i.h.bf16 %v12798_v23  ;;  %v12799_v37 = vunpack.i.l.bf16 %v12798_v23 }
0x21c5   :  { %v9251_v45 = vsel %vm2136_vm14, %v9247_v26, %v12799_v37  ;;  %v9252_v13 = vsel %vm2136_vm14, %v9248_v60, %v12800_v30 }
0x21c6   :  { %v9255_v53 = vpack.c.bf16 %v9252_v13, %v9251_v45 }
0x21c8   :  { %12690 = vmatprep.mubr.bf16.mxu0 %v9255_v53  ;;  %v10480_v53 = vrot.slane %v15368_v51, 7 }
0x21ca   :  { %v10481_v14 = vsel %vm759_vm2, %v10480_v53, %v15373_v16 }
0x21cb   :  { %v10483_v42 = vsel %vm762_vm3, %v10482_v59, %v10481_v14 }
0x21d2   :  { %v12803_v5 = vpop.permute.xlu1 %12802 }
0x21d3   :  { %v12805_v20 = vunpack.i.h.bf16 %v12803_v5  ;;  %v12804_v36 = vunpack.i.l.bf16 %v12803_v5  ;;  %v10484_v5 = vrot.slane %v15383_v61, 5 }
0x21d5   :  { %v9254_v58 = vsel %vm2136_vm14, %v9250_v3, %v12805_v20  ;;  %v9253_v29 = vsel %vm2136_vm14, %v9249_v56, %v12804_v36  ;;  %v10485_v20 = vsel %vm765_vm4, %v10484_v5, %v10483_v42  ;;  %v13125_v3 = vld [vmem:[%s16873_s2 + $0x438] ss:$52 sps:$4 sm:$0xff]   ;;  %v13128_v56 = vld [vmem:[%s16873_s2 + $0x440] ss:$52 sps:$4 sm:$0xff]  }
0x21d6   :  { %v9256_v57 = vpack.c.bf16 %v9254_v58, %v9253_v29  ;;  %v10487_v36 = vsel %vm660_vm12, %v10485_v20, 0.0  ;;  %v13123_v58 = vld [vmem:[%s16873_s2 + $0x434] ss:$52 sps:$4 sm:$0xff]   ;;  %v13126_v29 = vld [vmem:[%s16873_s2 + $0x43c] ss:$52 sps:$4 sm:$0xff]  }
0x21d8   :  { %12691 = vmatmul.mubr.bf16.vlgmr.msra.gmra.mrb[236].mxu0 %v9256_v57  ;;  %v13131_v57 = vld [vmem:[%s16873_s2 + $0x4a0] ss:$52 sps:$4 sm:$0xff]  }
0x21d9   :  { %9724 = vmatprep.mubr.bf16.mxu0 %v13644_v33 }
0x22ab   :  { %v12692_v12 = vpop.f32.mrb[236].mxu0 }
0x22ac   :  { %v9343_v17 = vpop.f32.mrb[237].mxu0  ;;  %v9352_v6 = vadd.f32 %v12692_v12, %v9260_v41  ;;  %v13129_v12 = vld [vmem:[%s16873_s2 + $0x49c] ss:$52 sps:$4 sm:$0xff]  }
0x22ad   :  { %v9344_v10 = vadd.f32 %v9343_v17, %v9260_v41  ;;  %v12693_v18 = vpop.f32.mrb[238].mxu0  ;;  %v13132_v17 = vld [vmem:[%s16873_s2 + $0x4a4] ss:$52 sps:$4 sm:$0xff]  }
0x22ae   :  { %v9346_v32 = vpop.f32.mrb[239].mxu0  ;;  %v16368_v48 = vadd.f32 %v9352_v6, %v15764_v27  ;;  %v9355_v63 = vadd.f32 %v12693_v18, %v9260_v41  ;;  %v13114_v27 = vld [vmem:[%s16873_s2 + $0x36c] ss:$52 sps:$4 sm:$0xff]   ;;  %v13140_v18 = vld [vmem:[%s16873_s2 + $0x510] ss:$52 sps:$4 sm:$0xff]  }
0x22af   :  { %v16361_v47 = vadd.f32 %v9344_v10, %v15750_v1  ;;  %v9347_v0 = vadd.f32 %v9346_v32, %v9260_v41  ;;  %v13111_v1 = vld [vmem:[%s16873_s2 + $0x364] ss:$52 sps:$4 sm:$0xff]   ;;  %9693 = vmatpush1.bf16.msra.mxu0 %v13114_v27  ;;  %v13134_v41 = vld [vmem:[%s16873_s2 + $0x4a8] ss:$52 sps:$4 sm:$0xff]   ;;  %v13138_v6 = vld [vmem:[%s16873_s2 + $0x50c] ss:$52 sps:$4 sm:$0xff]  }
0x22b0   :  { %v16373_v19 = vadd.f32 %v9355_v63, %v15773_v22  ;;  %v13119_v22 = vld [vmem:[%s16873_s2 + $0x3d0] ss:$52 sps:$4 sm:$0xff]   ;;  %9694 = vmatprep.subr.bf16.mxu0 %v13122_v35  ;;  %v13137_v10 = vld [vmem:[%s16873_s2 + $0x508] ss:$52 sps:$4 sm:$0xff]   ;;  %v13146_v63 = vld [vmem:[%s16873_s2 + $0x578] ss:$52 sps:$4 sm:$0xff]  }
0x22b1   :  { %v16364_v21 = vadd.f32 %v9347_v0, %v15758_v9  ;;  %9362 = vadd.xlane.f32.xlu0 %v16361_v47  ;;  %v13113_v9 = vld [vmem:[%s16873_s2 + $0x368] ss:$52 sps:$4 sm:$0xff]   ;;  %v13135_v32 = vld [vmem:[%s16873_s2 + $0x504] ss:$52 sps:$4 sm:$0xff]  }
0x22b2   :  { %9639 = vmatprep.subr.bf16.mxu1 %v13113_v9  ;;  %v13143_v0 = vld [vmem:[%s16873_s2 + $0x570] ss:$52 sps:$4 sm:$0xff]   ;;  %v13144_v9 = vld [vmem:[%s16873_s2 + $0x574] ss:$52 sps:$4 sm:$0xff]   ;;  %v13149_v27 = vld [vmem:[%s16873_s2 + $0x5d8] ss:$52 sps:$4 sm:$0xff]  }
0x22b3   :  { %9364 = vadd.xlane.f32.xlu1 %v16364_v21  ;;  %9640 = vmatpush1.bf16.msra.mxu1 %v13111_v1  ;;  %v13141_v1 = vld [vmem:[%s16873_s2 + $0x56c] ss:$52 sps:$4 sm:$0xff]   ;;  %v13150_v35 = vld [vmem:[%s16873_s2 + $0x5dc] ss:$52 sps:$4 sm:$0xff]  }
0x22b4   :  { %9641 = vmatprep.subr.bf16.mxu1 %v13119_v22  ;;  %9695 = vmatpush1.bf16.msra.mxu0 %v13120_v11  ;;  %v13147_v22 = vld [vmem:[%s16873_s2 + $0x5d4] ss:$52 sps:$4 sm:$0xff]  }
0x22b5   :  { %9366 = vadd.xlane.f32.xlu0 %v16368_v48  ;;  %9696 = vmatprep.subr.bf16.mxu0 %v13128_v56  ;;  %v13158_v11 = vld [vmem:[%s16873_s2 + $0x648] ss:$52 sps:$4 sm:$0xff]  }
0x22b7   :  { %9642 = vmatpush1.bf16.msra.mxu1 %v13117_v54  ;;  %v13155_v54 = vld [vmem:[%s16873_s2 + $0x640] ss:$52 sps:$4 sm:$0xff]  }
0x22b8   :  { %9643 = vmatprep.subr.bf16.mxu1 %v13125_v3  ;;  %9697 = vmatpush1.bf16.msra.mxu0 %v13126_v29 }
0x22b9   :  { %9368 = vadd.xlane.f32.xlu0 %v16373_v19  ;;  %9698 = vmatprep.subr.bf16.mxu0 %v13134_v41 }
0x22bb   :  { %9644 = vmatpush1.bf16.msra.mxu1 %v13123_v58 }
0x22bc   :  { %9645 = vmatprep.subr.bf16.mxu1 %v13131_v57  ;;  %9699 = vmatpush1.bf16.msra.mxu0 %v13132_v17 }
0x22bd   :  { %9700 = vmatprep.subr.bf16.mxu0 %v13140_v18 }
0x22bf   :  { %9646 = vmatpush1.bf16.msra.mxu1 %v13129_v12 }
0x22c0   :  { %9647 = vmatprep.subr.bf16.mxu1 %v13137_v10  ;;  %9701 = vmatpush1.bf16.msra.mxu0 %v13138_v6 }
0x22c1   :  { %9702 = vmatprep.subr.bf16.mxu0 %v13146_v63 }
0x22c3   :  { %9648 = vmatpush1.bf16.msra.mxu1 %v13135_v32 }
0x22c4   :  { %9649 = vmatprep.subr.bf16.mxu1 %v13143_v0  ;;  %9703 = vmatpush1.bf16.msra.mxu0 %v13144_v9 }
0x22c5   :  { %9704 = vmatprep.subr.bf16.mxu0 %v13152_v43 }
0x22c7   :  { %9650 = vmatpush1.bf16.msra.mxu1 %v13141_v1 }
0x22c8   :  { %9651 = vmatprep.subr.bf16.mxu1 %v13149_v27  ;;  %9705 = vmatpush1.bf16.msra.mxu0 %v13150_v35 }
0x22c9   :  { %9706 = vmatprep.subr.bf16.mxu0 %v13158_v11 }
0x22cb   :  { %9652 = vmatpush1.bf16.msra.mxu1 %v13147_v22 }
0x22cc   :  { %9653 = vmatprep.subr.bf16.mxu1 %v13155_v54 }
0x233e   :  { %v9363_v8 = vpop.xlane.xlu0 %9362 }
0x233f   :  { %v9370_v2 = vmul.f32 0.0078125, %v9363_v8  ;;  %v13153_v8 = vld [vmem:[%s16873_s2 + $0x63c] ss:$52 sps:$4 sm:$0xff]  }
0x2340   :  { %v9365_v23 = vpop.xlane.xlu1 %9364  ;;  %9654 = vmatpush1.bf16.msra.mxu1 %v13153_v8 }
0x2341   :  { %v16401_v31 = vsub.f32 %v16361_v47, %v9370_v2  ;;  %v9371_v28 = vmul.f32 0.0078125, %v9365_v23  ;;  %v13156_v2 = vld [vmem:[%s16873_s2 + $0x644] ss:$52 sps:$4 sm:$0xff]  }
0x2342   :  { %v9367_v30 = vpop.xlane.xlu0 %9366  ;;  %9707 = vmatpush1.bf16.msra.mxu0 %v13156_v2 }
0x2343   :  { %v16404_v37 = vsub.f32 %v16364_v21, %v9371_v28  ;;  %v9372_v60 = vmul.f32 0.0078125, %v9367_v30  ;;  %v9378_v26 = vmul.f32 %v16401_v31, %v16401_v31 }
0x2345   :  { %v16409_v45 = vsub.f32 %v16368_v48, %v9372_v60  ;;  %9382 = vadd.xlane.f32.xlu0 %v9378_v26  ;;  %v9379_v13 = vmul.f32 %v16404_v37, %v16404_v37 }
0x2346   :  { %v9369_v62 = vpop.xlane.xlu0 %9368 }
0x2347   :  { %v9373_v7 = vmul.f32 0.0078125, %v9369_v62  ;;  %9384 = vadd.xlane.f32.xlu1 %v9379_v13  ;;  %v9380_v24 = vmul.f32 %v16409_v45, %v16409_v45 }
0x2349   :  { %v16418_v38 = vsub.f32 %v16373_v19, %v9373_v7  ;;  %9386 = vadd.xlane.f32.xlu0 %v9380_v24 }
0x234b   :  { %v9381_v4 = vmul.f32 %v16418_v38, %v16418_v38 }
0x234d   :  { %9388 = vadd.xlane.f32.xlu1 %v9381_v4  ;;  %v9409_v4 = vrot.slane %v16356_v44, %v14168_v55  ;;  %v9417_v55 = vrot.slane %v16356_v44, %v14368_v25 }
0x2351   :  { %10488 = vadd.xlane.f32.xlu1 %v10487_v36 }
0x23d2   :  { %v9383_v23 = vpop.xlane.xlu0 %9382 }
0x23d3   :  { %v9390_v28 = vmul.f32 0.0078125, %v9383_v23 }
0x23d4   :  { %v9385_v30 = vpop.xlane.xlu1 %9384 }
0x23d5   :  { %v9394_v60 = vadd.f32 1e-05, %v9390_v28  ;;  %v9391_v26 = vmul.f32 0.0078125, %v9385_v30  ;;  %v13160_v30 = vld [vmem:[%s16874_s3 + $0x140] sm:$0xff]  }
0x23d6   :  { %v9387_v13 = vpop.xlane.xlu0 %9386  ;;  %11844 = vmatprep.subr.bf16.mxu1 %v13160_v30 }
0x23d7   :  { %13507 = vrsqrt.f32 %v9394_v60  ;;  %v9395_v53 = vadd.f32 1e-05, %v9391_v26  ;;  %v9392_v62 = vmul.f32 0.0078125, %v9387_v13  ;;  %v13161_v60 = vld [vmem:[%s16874_s3 + $0x180] sm:$0xff]   ;;  %v13163_v26 = vld [vmem:[%s16874_s3 + $0x1c8] sm:$0xff]  }
0x23d8   :  { %v13164_v13 = vld [vmem:[%s16874_s3 + $0x148] sm:$0xff]  }
0x23d9   :  { %13509 = vrsqrt.f32 %v9395_v53  ;;  %v9396_v59 = vadd.f32 1e-05, %v9392_v62  ;;  %v13165_v53 = vld [vmem:[%s16874_s3 + $0x188] sm:$0xff]  }
0x23da   :  { %v9389_v7 = vpop.xlane.xlu1 %9388  ;;  %v13166_v62 = vld [vmem:[%s16874_s3 + $0x108] sm:$0xff]  }
0x23db   :  { %13511 = vrsqrt.f32 %v9396_v59  ;;  %v9393_v24 = vmul.f32 0.0078125, %v9389_v7  ;;  %v13167_v59 = vld [vmem:[%s16874_s3 + $0x1d0] sm:$0xff]  }
0x23dc   :  { %v13168_v7 = vld [vmem:[%s16874_s3 + $0x150] sm:$0xff]  }
0x23dd   :  { %v9397_v14 = vadd.f32 1e-05, %v9393_v24  ;;  %v13169_v24 = vld [vmem:[%s16874_s3 + $0x190] sm:$0xff]  }
0x23de   :  { %v10489_v5 = vpop.xlane.xlu1 %10488 }
0x23df   :  { %13513 = vrsqrt.f32 %v9397_v14  ;;  %v10490_v42 = vmul.f32 0.0078125, %v10489_v5  ;;  %v13170_v14 = vld [vmem:[%s16874_s3 + $0x110] sm:$0xff]   ;;  %v13171_v5 = vld [vmem:[%s16874_s3 + $0x1d8] sm:$0xff]  }
0x23e1   :  { %v13508_v20 = vpop.eup %13507  ;;  %v10492_v36 = vrot.slane %v10490_v42, 1  ;;  %v10493_v3 = vrot.slane %v10490_v42, 2  ;;  %v10494_v56 = vrot.slane %v10490_v42, 3  ;;  %v16504_v57 = vsub.f32 %v15373_v16, %v10490_v42  ;;  %v13172_v42 = vld [vmem:[%s16874_s3 + $0x158] sm:$0xff]  }
0x23e2   :  { %v9402_v58 = vmul.f32 %v13508_v20, %v16401_v31  ;;  %v13174_v20 = vld [vmem:[%s16874_s3 + $0x118] sm:$0xff]  }
0x23e3   :  { %v13510_v29 = vpop.eup %13509  ;;  %v16507_v41 = vsub.f32 %v15368_v51, %v10492_v36  ;;  %v16510_v12 = vsub.f32 %v15376_v40, %v10493_v3  ;;  %v16513_v17 = vsub.f32 %v15383_v61, %v10494_v56  ;;  %v10503_v61 = vmul.f32 %v16504_v57, %v16504_v57  ;;  %v13175_v36 = vld [vmem:[%s16874_s3 + $0x1e0] sm:$0xff]  }
0x23e4   :  { %v9403_v10 = vmul.f32 %v13510_v29, %v16404_v37  ;;  %v9410_v18 = vmul.f32 %v9409_v4, %v9402_v58  ;;  %v13176_v3 = vld [vmem:[%s16874_s3 + $0x160] sm:$0xff]   ;;  %v13179_v29 = vld [vmem:[%s16874_s3 + $0x1e8] sm:$0xff]  }
0x23e5   :  { %v13512_v31 = vpop.eup %13511  ;;  %v10504_v16 = vmul.f32 %v16507_v41, %v16507_v41  ;;  %v10505_v51 = vmul.f32 %v16510_v12, %v16510_v12  ;;  %v10506_v40 = vmul.f32 %v16513_v17, %v16513_v17  ;;  %v13177_v56 = vld [vmem:[%s16874_s3 + $0x1a0] sm:$0xff]  }
0x23e6   :  { %v9411_v32 = vmul.f32 %v9409_v4, %v9403_v10  ;;  %v9404_v25 = vmul.f32 %v13512_v31, %v16409_v45  ;;  %v9418_v37 = vadd.f32 %v9417_v55, %v9410_v18  ;;  %v13178_v58 = vld [vmem:[%s16874_s3 + $0x120] sm:$0xff]   ;;  %v13181_v10 = vld [vmem:[%s16874_s3 + $0x1a8] sm:$0xff]   ;;  %v13183_v31 = vld [vmem:[%s16874_s3 + $0x1f0] sm:$0xff]  }
0x23e7   :  { %v10511_v6 = vrot.slane %v10504_v16, 7  ;;  %v10513_v0 = vrot.slane %v10505_v51, 6  ;;  %v10515_v27 = vrot.slane %v10506_v40, 5  ;;  %v13182_v18 = vld [vmem:[%s16874_s3 + $0x128] sm:$0xff]   ;;  %v13184_v16 = vld [vmem:[%s16874_s3 + $0x170] sm:$0xff]  }
0x23e8   :  { %v9419_v63 = vadd.f32 %v9417_v55, %v9411_v32  ;;  %v9412_v11 = vmul.f32 %v9409_v4, %v9404_v25  ;;  %v13185_v51 = vld [vmem:[%s16874_s3 + $0x1b0] sm:$0xff]   ;;  %v13187_v32 = vld [vmem:[%s16874_s3 + $0x1f8] sm:$0xff]   ;;  %v11255_v25 = vld [vmem:[%s16877_s6 + $0x4] sm:$0xf] }
0x23e9   :  { %v13514_v1 = vpop.eup %13513  ;;  %v10512_v9 = vsel %vm759_vm2, %v10511_v6, %v10503_v61  ;;  %v13186_v40 = vld [vmem:[%s16874_s3 + $0x130] sm:$0xff]   ;;  %v13188_v61 = vld [vmem:[%s16874_s3 + $0x178] sm:$0xff]  }
0x23ea   :  { %v9405_v43 = vmul.f32 %v13514_v1, %v16418_v38  ;;  %v9454_v22 = vpack.c.bf16 %v9419_v63, %v9418_v37  ;;  %v10514_v35 = vsel %vm762_vm3, %v10513_v0, %v10512_v9  ;;  %v9420_v23 = vadd.f32 %v9417_v55, %v9412_v11  ;;  %v13159_v38 = vld [vmem:[%s16874_s3 + $0x1c0] sm:$0xff]   ;;  %v13189_v6 = vld [vmem:[%s16874_s3 + $0x1b8] sm:$0xff]  }
0x23eb   :  { %v10516_v54 = vsel %vm765_vm4, %v10515_v27, %v10514_v35  ;;  %11872 = vmatprep.subr.bf16.mxu0 %v13159_v38  ;;  %v13190_v0 = vld [vmem:[%s16874_s3 + $0x138] sm:$0xff]   ;;  %v9462_v37 = vrot.slane %v11255_v25, %v13998_v46  ;;  %v16637_v63 = vrot.slane %v11255_v25, %v14116_v52  ;;  %v16640_v1 = vrot.slane %v11255_v25, %v14111_v50 }
0x23ec   :  { %v9413_v8 = vmul.f32 %v9409_v4, %v9405_v43  ;;  %9672 = vmatmul.mubr.bf16.vlgmr.msra.gmra.mrb[252].mxu1 %v9454_v22  ;;  %9725 = vmatmul.mubr.bf16.vlgmr.msra.gmra.mrb[240].mxu0 %v9454_v22  ;;  %v10518_v2 = vsel %vm660_vm12, %v10516_v54, 0.0  ;;  %v13173_v4 = vld [vmem:[%s16874_s3 + $0x198] sm:$0xff]   ;;  %v16643_v9 = vrot.slane %v11255_v25, %v14128_v15 }
0x23ed   :  { %10519 = vadd.xlane.f32.xlu1 %v10518_v2  ;;  %9681 = vmatprep.mubr.bf16.mxu1 %v13644_v33 }
0x23ee   :  { %v9421_v45 = vadd.f32 %v9417_v55, %v9413_v8  ;;  %9734 = vmatprep.mubr.bf16.mxu0 %v13644_v33  ;;  %v13162_v33 = vld [vmem:[%s16874_s3 + $0x100] sm:$0xff]   ;;  %11873 = vmatpush3.bf16.msra.mxu0 %v13161_v60  ;;  %v13180_v55 = vld [vmem:[%s16874_s3 + $0x168] sm:$0xff]  }
0x23ef   :  { %11845 = vmatpush3.bf16.msra.mxu1 %v13162_v33  ;;  %11874 = vmatprep.subr.bf16.mxu0 %v13163_v26 }
0x23f0   :  { %v9455_v28 = vpack.c.bf16 %v9421_v45, %v9420_v23  ;;  %11846 = vmatprep.subr.bf16.mxu1 %v13164_v13 }
0x23f2   :  { %11875 = vmatpush3.bf16.msra.mxu0 %v13165_v53 }
0x23f3   :  { %11847 = vmatpush3.bf16.msra.mxu1 %v13166_v62  ;;  %11876 = vmatprep.subr.bf16.mxu0 %v13167_v59 }
0x23f4   :  { %9682 = vmatmul.mubr.bf16.gmra.mrb[0].mxu1 %v9455_v28  ;;  %9735 = vmatmul.mubr.bf16.gmra.mrb[244].mxu0 %v9455_v28 }
0x23f5   :  { %11848 = vmatprep.subr.bf16.mxu1 %v13168_v7 }
0x23f6   :  { %11877 = vmatpush3.bf16.msra.mxu0 %v13169_v24 }
0x23f7   :  { %11849 = vmatpush3.bf16.msra.mxu1 %v13170_v14  ;;  %11878 = vmatprep.subr.bf16.mxu0 %v13171_v5 }
0x23f8   :  { %11850 = vmatprep.subr.bf16.mxu1 %v13172_v42 }
0x23fa   :  { %11879 = vmatpush3.bf16.msra.mxu0 %v13173_v4 }
0x23fb   :  { %11851 = vmatpush3.bf16.msra.mxu1 %v13174_v20  ;;  %11880 = vmatprep.subr.bf16.mxu0 %v13175_v36 }
0x23fc   :  { %11852 = vmatprep.subr.bf16.mxu1 %v13176_v3 }
0x23fe   :  { %11881 = vmatpush3.bf16.msra.mxu0 %v13177_v56 }
0x23ff   :  { %11853 = vmatpush3.bf16.msra.mxu1 %v13178_v58  ;;  %11882 = vmatprep.subr.bf16.mxu0 %v13179_v29 }
0x2400   :  { %11854 = vmatprep.subr.bf16.mxu1 %v13180_v55 }
0x2402   :  { %11883 = vmatpush3.bf16.msra.mxu0 %v13181_v10 }
0x2403   :  { %11855 = vmatpush3.bf16.msra.mxu1 %v13182_v18  ;;  %11884 = vmatprep.subr.bf16.mxu0 %v13183_v31 }
0x2404   :  { %11856 = vmatprep.subr.bf16.mxu1 %v13184_v16 }
0x2406   :  { %11885 = vmatpush3.bf16.msra.mxu0 %v13185_v51 }
0x2407   :  { %11857 = vmatpush3.bf16.msra.mxu1 %v13186_v40  ;;  %11886 = vmatprep.subr.bf16.mxu0 %v13187_v32 }
0x2408   :  { %11858 = vmatprep.subr.bf16.mxu1 %v13188_v61 }
0x240a   :  { %11887 = vmatpush3.bf16.msra.mxu0 %v13189_v6 }
0x240b   :  { %11859 = vmatpush3.bf16.msra.mxu1 %v13190_v0  ;;  %12714 = vmatprep.subr.bf16.mxu0 %v13641_v34 }
0x240c   :  { %12694 = vmatprep.subr.bf16.mxu1 %v13641_v34 }
0x247a   :  { %v10520_v13 = vpop.xlane.xlu1 %10519 }
0x247b   :  { %v10521_v20 = vmul.f32 0.0078125, %v10520_v13 }
0x247d   :  { %v10522_v25 = vadd.f32 1e-05, %v10521_v20 }
0x24bf   :  { %v9673_v27 = vpop.f32.mrb[252].mxu1  ;;  %v9726_v43 = vpop.f32.mrb[240].mxu0 }
0x24c0   :  { %v16645_v22 = vadd.f32 %v9673_v27, %v9462_v37  ;;  %v16648_v35 = vadd.f32 %v9726_v43, %v16637_v63  ;;  %v9675_v54 = vpop.f32.mrb[253].mxu1  ;;  %v9728_v11 = vpop.f32.mrb[241].mxu0 }
0x24c1   :  { %v16651_v46 = vadd.f32 %v9675_v54, %v16640_v1  ;;  %v16654_v52 = vadd.f32 %v9728_v11, %v16643_v9  ;;  %v9677_v50 = vpop.f32.mrb[254].mxu1  ;;  %v9730_v8 = vpop.f32.mrb[242].mxu0 }
0x24c2   :  { %v11288_v15 = vmul.f32 -1.702, %v16645_v22  ;;  %v11290_v2 = vmul.f32 -1.702, %v16648_v35  ;;  %v16658_v45 = vadd.f32 %v9677_v50, %v9462_v37  ;;  %v16661_v23 = vadd.f32 %v9730_v8, %v16637_v63  ;;  %v9679_v28 = vpop.f32.mrb[255].mxu1  ;;  %v9732_v38 = vpop.f32.mrb[243].mxu0 }
0x24c3   :  { %v11289_v30 = vmul.f32 -1.702, %v16651_v46  ;;  %v11291_v60 = vmul.f32 -1.702, %v16654_v52  ;;  %v16666_v33 = vadd.f32 %v9679_v28, %v16640_v1  ;;  %v16669_v26 = vadd.f32 %v9732_v38, %v16643_v9 }
0x24c4   :  { %v9777_v53 = vmul.f32 1.442695, %v11288_v15  ;;  %v9781_v62 = vmul.f32 1.442695, %v11290_v2  ;;  %v11292_v59 = vmul.f32 -1.702, %v16658_v45 }
0x24c5   :  { %v9779_v7 = vmul.f32 1.442695, %v11289_v30  ;;  %v9783_v24 = vmul.f32 1.442695, %v11291_v60  ;;  %v11294_v14 = vmul.f32 -1.702, %v16661_v23 }
0x24c6   :  { %13515 = vpow2.f32 %v9777_v53  ;;  %v9785_v5 = vmul.f32 1.442695, %v11292_v59  ;;  %v11293_v42 = vmul.f32 -1.702, %v16666_v33  ;;  %v11295_v4 = vmul.f32 -1.702, %v16669_v26 }
0x24c7   :  { %13517 = vpow2.f32 %v9781_v62  ;;  %v9789_v36 = vmul.f32 1.442695, %v11294_v14  ;;  %v9683_v3 = vpop.f32.mrb[0].mxu1  ;;  %v9736_v56 = vpop.f32.mrb[244].mxu0 }
0x24c8   :  { %13519 = vpow2.f32 %v9779_v7  ;;  %v9787_v58 = vmul.f32 1.442695, %v11293_v42  ;;  %v16675_v29 = vadd.f32 %v9683_v3, %v9462_v37  ;;  %v9685_v55 = vpop.f32.mrb[1].mxu1  ;;  %v9738_v10 = vpop.f32.mrb[245].mxu0  ;;  %v9791_v18 = vmul.f32 1.442695, %v11295_v4 }
0x24c9   :  { %13521 = vpow2.f32 %v9783_v24  ;;  %v16678_v31 = vadd.f32 %v9736_v56, %v16637_v63  ;;  %v16681_v16 = vadd.f32 %v9685_v55, %v16640_v1  ;;  %v9687_v51 = vpop.f32.mrb[2].mxu1  ;;  %v9740_v40 = vpop.f32.mrb[246].mxu0 }
0x24ca   :  { %13523 = vpow2.f32 %v9785_v5  ;;  %v11296_v32 = vmul.f32 -1.702, %v16675_v29  ;;  %v16684_v61 = vadd.f32 %v9687_v51, %v9462_v37  ;;  %v9689_v6 = vpop.f32.mrb[3].mxu1  ;;  %v9742_v0 = vpop.f32.mrb[247].mxu0  ;;  %v16690_v37 = vadd.f32 %v9738_v10, %v16643_v9 }
0x24cb   :  { %13525 = vpow2.f32 %v9789_v36  ;;  %v11298_v27 = vmul.f32 -1.702, %v16678_v31  ;;  %v11297_v43 = vmul.f32 -1.702, %v16681_v16  ;;  %v16694_v24 = vadd.f32 %v9740_v40, %v16637_v63 }
0x24cc   :  { %13527 = vpow2.f32 %v9787_v58  ;;  %v9793_v54 = vmul.f32 1.442695, %v11296_v32  ;;  %v11300_v11 = vmul.f32 -1.702, %v16684_v61  ;;  %v11299_v62 = vmul.f32 -1.702, %v16690_v37 }
0x24cd   :  { %13529 = vpow2.f32 %v9791_v18  ;;  %v9797_v50 = vmul.f32 1.442695, %v11298_v27  ;;  %v9795_v8 = vmul.f32 1.442695, %v11297_v43  ;;  %v16697_v42 = vadd.f32 %v9689_v6, %v16640_v1 }
0x24ce   :  { %13531 = vpow2.f32 %v9793_v54  ;;  %v9801_v15 = vmul.f32 1.442695, %v11300_v11  ;;  %v16700_v36 = vadd.f32 %v9742_v0, %v16643_v9  ;;  %v9799_v58 = vmul.f32 1.442695, %v11299_v62 }
0x24cf   :  { %13533 = vrsqrt.f32 %v10522_v25  ;;  %v11302_v10 = vmul.f32 -1.702, %v16694_v24  ;;  %v11301_v51 = vmul.f32 -1.702, %v16697_v42 }
0x24d0   :  { %v13516_v2 = vpop.eup %13515  ;;  %13535 = vpow2.f32 %v9797_v50  ;;  %v11303_v9 = vmul.f32 -1.702, %v16700_v36 }
0x24d1   :  { %v13518_v28 = vpop.eup %13517  ;;  %v9809_v38 = vadd.f32 1.0, %v13516_v2  ;;  %13537 = vpow2.f32 %v9795_v8  ;;  %v9805_v0 = vmul.f32 1.442695, %v11302_v10  ;;  %v9803_v43 = vmul.f32 1.442695, %v11301_v51 }
0x24d2   :  { %v13520_v30 = vpop.eup %13519  ;;  %v9811_v60 = vadd.f32 1.0, %v13518_v28  ;;  %13539 = vpow2.f32 %v9801_v15  ;;  %v9807_v11 = vmul.f32 1.442695, %v11303_v9  ;;  %v11410_v51 = vld [vmem:[%s16878_s7 + $0xc] ss:$0 sm:$0xff] }
0x24d3   :  { %v13522_v13 = vpop.eup %13521  ;;  %13541 = vrcp.f32 %v9809_v38  ;;  %v9810_v53 = vadd.f32 1.0, %v13520_v30 }
0x24d4   :  { %v13524_v59 = vpop.eup %13523  ;;  %13543 = vrcp.f32 %v9811_v60  ;;  %v9812_v7 = vadd.f32 1.0, %v13522_v13 }
0x24d5   :  { %v13526_v14 = vpop.eup %13525  ;;  %13545 = vrcp.f32 %v9810_v53  ;;  %v9813_v5 = vadd.f32 1.0, %v13524_v59 }
0x24d6   :  { %v13528_v4 = vpop.eup %13527  ;;  %13547 = vrcp.f32 %v9812_v7  ;;  %v9815_v20 = vadd.f32 1.0, %v13526_v14 }
0x24d7   :  { %v13530_v3 = vpop.eup %13529  ;;  %13549 = vrcp.f32 %v9813_v5  ;;  %v9814_v56 = vadd.f32 1.0, %v13528_v4 }
0x24d8   :  { %v13532_v55 = vpop.eup %13531  ;;  %13551 = vrcp.f32 %v9815_v20  ;;  %v9816_v63 = vadd.f32 1.0, %v13530_v3 }
0x24d9   :  { %v16703_v18 = vpop.eup %13533  ;;  %13553 = vrcp.f32 %v9814_v56  ;;  %v9817_v1 = vadd.f32 1.0, %v13532_v55 }
0x24da   :  { %v13536_v40 = vpop.eup %13535  ;;  %13555 = vrcp.f32 %v9816_v63  ;;  %v10525_v62 = vrot.slane %v16703_v18, 1 }
0x24db   :  { %v13538_v32 = vpop.eup %13537  ;;  %13557 = vpow2.f32 %v9799_v58  ;;  %v9819_v20 = vadd.f32 1.0, %v13536_v40 }
0x24dc   :  { %v13540_v6 = vpop.eup %13539  ;;  %13559 = vrcp.f32 %v9817_v1  ;;  %v10533_v55 = vmul.f32 %v10525_v62, %v16507_v41  ;;  %v10527_v41 = vrot.slane %v16703_v18, 3 }
0x24dd   :  { %v13542_v25 = vpop.eup %13541  ;;  %v9821_v27 = vadd.f32 1.0, %v13540_v6 }
0x24de   :  { %v13544_v54 = vpop.eup %13543  ;;  %v9857_v28 = vmul.f32 %v13542_v25, %v16645_v22 }
0x24df   :  { %v13546_v50 = vpop.eup %13545  ;;  %13561 = vrcp.f32 %v9821_v27  ;;  %v9859_v60 = vmul.f32 %v13544_v54, %v16648_v35  ;;  %v10526_v35 = vrot.slane %v16703_v18, 2  ;;  %v11411_v27 = vld [vmem:[%s16878_s7 + $0xd] ss:$0 sm:$0xff]  ;;  %v13193_v54 = vld [vmem:[%s16875_s4 + $0x50] sm:$0xff]  }
0x24e0   :  { %v13548_v8 = vpop.eup %13547  ;;  %13563 = vpow2.f32 %v9805_v0  ;;  %v9858_v59 = vmul.f32 %v13546_v50, %v16651_v46  ;;  %v13191_v46 = vld [vmem:[%s16875_s4 + $0x40] sm:$0xff]  }
0x24e1   :  { %v13550_v15 = vpop.eup %13549  ;;  %13565 = vpow2.f32 %v9803_v43  ;;  %v9860_v4 = vmul.f32 %v13548_v8, %v16654_v52  ;;  %v10534_v40 = vmul.f32 %v10526_v35, %v16510_v12  ;;  %v10532_v12 = vmul.f32 %v16703_v18, %v16504_v57  ;;  %v13194_v57 = vld [vmem:[%s16875_s4 + $0x58] sm:$0xff]  }
0x24e2   :  { %v13552_v2 = vpop.eup %13551  ;;  %v9861_v38 = vmul.f32 %v13550_v15, %v16658_v45  ;;  %13567 = vpow2.f32 %v9807_v11  ;;  %v10535_v11 = vmul.f32 %v10527_v41, %v16513_v17  ;;  %v13195_v17 = vld [vmem:[%s16875_s4 + $0x60] sm:$0xff]   ;;  %v9949_v41 = vrot.slane %v16356_v44, %v14515_v39 }
0x24e3   :  { %v13554_v30 = vpop.eup %13553  ;;  %v9863_v13 = vmul.f32 %v13552_v2, %v16661_v23  ;;  %v9818_v23 = vadd.f32 1.0, %v13538_v32  ;;  %13569 = vrcp.f32 %v9819_v20  ;;  %v10542_v43 = vmul.f32 %v11410_v51, %v10534_v40 }
0x24e4   :  { %v13556_v53 = vpop.eup %13555  ;;  %v9938_v7 = vpack.c.bf16 %v9861_v38, %v9857_v28  ;;  %v9862_v14 = vmul.f32 %v13554_v30, %v16666_v33  ;;  %v10540_v8 = vmul.f32 %v11410_v51, %v10532_v12  ;;  %v10543_v2 = vmul.f32 %v11410_v51, %v10535_v11 }
0x24e5   :  { %v13558_v5 = vpop.eup %13557  ;;  %v9940_v22 = vpack.c.bf16 %v9863_v13, %v9859_v60  ;;  %v9864_v45 = vmul.f32 %v13556_v53, %v16669_v26  ;;  %13571 = vrcp.f32 %v9818_v23  ;;  %v10550_v18 = vadd.f32 %v11411_v27, %v10542_v43 }
0x24e6   :  { %v9939_v3 = vpack.c.bf16 %v9862_v14, %v9858_v59  ;;  %v13560_v56 = vpop.eup %13559  ;;  %v9820_v33 = vadd.f32 1.0, %v13558_v5  ;;  %v10548_v60 = vadd.f32 %v11411_v27, %v10540_v8  ;;  %v10551_v14 = vadd.f32 %v11411_v27, %v10543_v2 }
0x24e7   :  { %v9941_v58 = vpack.c.bf16 %v9864_v45, %v9860_v4  ;;  %v16722_v26 = vmul.f32 %v13560_v56, %v16675_v29  ;;  %v13192_v29 = vld [vmem:[%s16875_s4 + $0x48] sm:$0xff]   ;;  %v10571_v53 = vpack.c.bf16 %v10550_v18, %v10550_v18 }
0x24e8   :  { %10174 = vmatprep.mubr.bf16.mxu1 %v9939_v3  ;;  %13573 = vrcp.f32 %v9820_v33  ;;  %v10569_v20 = vpack.c.bf16 %v10548_v60, %v10548_v60 }
0x24e9   :  { %v13562_v63 = vpop.eup %13561  ;;  %10223 = vmatprep.mubr.bf16.mxu0 %v9941_v58  ;;  %10175 = vmatmul.mubr.bf16.vlgmr.msra.gmra.mrb[4].mxu1 %v9938_v7 }
0x24ea   :  { %v13564_v52 = vpop.eup %13563  ;;  %v16725_v10 = vmul.f32 %v13562_v63, %v16684_v61  ;;  %10224 = vmatmul.mubr.bf16.vlgmr.msra.gmra.mrb[248].mxu0 %v9940_v22  ;;  %v10541_v61 = vmul.f32 %v11410_v51, %v10533_v55 }
0x24eb   :  { %v13566_v1 = vpop.eup %13565  ;;  %v9823_v9 = vadd.f32 1.0, %v13564_v52  ;;  %12715 = vmatpush3.bf16.msra.mxu0 %v13191_v46  ;;  %v10572_v46 = vpack.c.bf16 %v10551_v14, %v10551_v14  ;;  %v13198_v52 = vld [vmem:[%s16875_s4 + $0x78] sm:$0xff]  }
0x24ec   :  { %v13568_v32 = vpop.eup %13567  ;;  %v9942_v6 = vpack.c.bf16 %v16725_v10, %v16722_v26  ;;  %v9822_v0 = vadd.f32 1.0, %v13566_v1  ;;  %12716 = vmatprep.subr.bf16.mxu0 %v13641_v34  ;;  %v10549_v50 = vadd.f32 %v11411_v27, %v10541_v61 }
0x24ed   :  { %13575 = vrcp.f32 %v9823_v9  ;;  %v9824_v25 = vadd.f32 1.0, %v13568_v32  ;;  %v13570_v15 = vpop.eup %13569  ;;  %v10580_v55 = vunpack.c.l.b16 %v10572_v46 }
0x24ee   :  { %13577 = vrcp.f32 %v9822_v0  ;;  %v10570_v28 = vpack.c.bf16 %v10549_v50, %v10549_v50  ;;  %v9867_v59 = vmul.f32 %v13570_v15, %v16678_v31  ;;  %v10579_v31 = vunpack.c.l.b16 %v10571_v53 }
0x24ef   :  { %13579 = vrcp.f32 %v9824_v25  ;;  %12717 = vmatpush3.bf16.msra.mxu0 %v13192_v29  ;;  %v13572_v38 = vpop.eup %13571  ;;  %v10585_v26 = vrot.slane %v10580_v55, 5 }
0x24f0   :  { %12718 = vmatprep.subr.bf16.mxu0 %v13641_v34  ;;  %v10578_v5 = vunpack.c.l.b16 %v10570_v28  ;;  %v9866_v22 = vmul.f32 %v13572_v38, %v16681_v16 }
0x24f2   :  { %v13574_v30 = vpop.eup %13573  ;;  %v10581_v16 = vrot.slane %v10578_v5, 7 }
0x24f3   :  { %12719 = vmatpush3.bf16.msra.mxu0 %v13193_v54  ;;  %v9868_v3 = vmul.f32 %v13574_v30, %v16690_v37  ;;  %v10583_v37 = vrot.slane %v10579_v31, 6 }
0x24f4   :  { %12720 = vmatprep.subr.bf16.mxu0 %v13641_v34 }
0x24f7   :  { %v13576_v13 = vpop.eup %13575  ;;  %12721 = vmatpush3.bf16.msra.mxu0 %v13194_v57 }
0x24f8   :  { %v13578_v62 = vpop.eup %13577  ;;  %v9871_v7 = vmul.f32 %v13576_v13, %v16694_v24  ;;  %12722 = vmatprep.subr.bf16.mxu0 %v13641_v34  ;;  %v13196_v24 = vld [vmem:[%s16875_s4 + $0x68] sm:$0xff]  }
0x24f9   :  { %v13580_v4 = vpop.eup %13579  ;;  %v9870_v45 = vmul.f32 %v13578_v62, %v16697_v42  ;;  %v10577_v42 = vunpack.c.l.b16 %v10569_v20 }
0x24fa   :  { %v9872_v56 = vmul.f32 %v13580_v4, %v16700_v36  ;;  %v9944_v35 = vpack.c.bf16 %v9871_v7, %v9867_v59  ;;  %v13197_v36 = vld [vmem:[%s16875_s4 + $0x70] sm:$0xff]  }
0x24fb   :  { %v9943_v23 = vpack.c.bf16 %v9870_v45, %v9866_v22  ;;  %12723 = vmatpush3.bf16.msra.mxu0 %v13195_v17  ;;  %v10582_v33 = vsel %vm759_vm2, %v10581_v16, %v10577_v42 }
0x24fc   :  { %v9945_v58 = vpack.c.bf16 %v9872_v56, %v9868_v3  ;;  %12724 = vmatprep.subr.bf16.mxu0 %v13641_v34  ;;  %v10584_v63 = vsel %vm762_vm3, %v10583_v37, %v10582_v33 }
0x24fd   :  { %10182 = vmatprep.mubr.bf16.mxu1 %v9943_v23  ;;  %v10586_v10 = vsel %vm765_vm4, %v10585_v26, %v10584_v63 }
0x24fe   :  { %10231 = vmatprep.mubr.bf16.mxu0 %v9945_v58  ;;  %10183 = vmatmul.mubr.bf16.gmra.mrb[8].mxu1 %v9942_v6  ;;  %v10587_v1 = vpack.c.b16 %v10586_v10, %v10586_v10 }
0x24ff   :  { %10232 = vmatmul.mubr.bf16.gmra.mrb[252].mxu0 %v9944_v35  ;;  %12710 = vmatprep.mubr.msk.bf16.mxu1 %vm13642_vm1, %v13641_v34 }
0x2500   :  { %12725 = vmatpush3.bf16.msra.mxu0 %v13196_v24  ;;  %12730 = vmatprep.mubr.msk.bf16.mxu0 %vm13642_vm1, %v13641_v34 }
0x2501   :  { %12726 = vmatprep.subr.bf16.mxu0 %v13641_v34 }
0x2504   :  { %12727 = vmatpush3.bf16.msra.mxu0 %v13197_v36 }
0x2505   :  { %12728 = vmatprep.subr.bf16.mxu0 %v13641_v34 }
0x2508   :  { %12729 = vmatpush3.bf16.msra.mxu0 %v13198_v52 }
0x250b   :  { %12731 = vmatmul.mubr.bf16.vlgmr.msra.gmra.mrb[0].mxu0 %v10587_v1 }
0x25bc   :  { %v11860_v51 = vpop.f32.mrb[4].mxu1 }
0x25bd   :  { %v11888_v40 = vpop.f32.mrb[248].mxu0  ;;  %v11861_v9 = vpop.f32.mrb[5].mxu1 }
0x25be   :  { %v11862_v29 = vadd.f32 %v11861_v9, %v11860_v51  ;;  %v11889_v32 = vpop.f32.mrb[249].mxu0  ;;  %v11863_v61 = vpop.f32.mrb[6].mxu1 }
0x25bf   :  { %v11890_v6 = vadd.f32 %v11889_v32, %v11888_v40  ;;  %v11891_v0 = vpop.f32.mrb[250].mxu0  ;;  %v11864_v25 = vpop.f32.mrb[7].mxu1 }
0x25c0   :  { %v10177_v12 = vadd.f32 %v11862_v29, %v9949_v41  ;;  %v11865_v27 = vadd.f32 %v11864_v25, %v11863_v61  ;;  %v11892_v43 = vpop.f32.mrb[251].mxu0 }
0x25c1   :  { %v11893_v54 = vadd.f32 %v11892_v43, %v11891_v0 }
0x25c2   :  { %v10226_v11 = vadd.f32 %v11890_v6, %v10177_v12  ;;  %v10180_v50 = vadd.f32 %v11865_v27, %v9949_v41 }
0x25c4   :  { %v10229_v8 = vadd.f32 %v11893_v54, %v10180_v50  ;;  %v10240_v22 = vadd.f32 %v10226_v11, %v16361_v47 }
0x25c6   :  { %v10241_v28 = vadd.f32 %v10229_v8, %v16364_v21 }
0x25c8   :  { %v10248_v14 = vrot.slane %v10241_v28, 7 }
0x25ca   :  { %v10249_v21 = vsel %vm759_vm2, %v10248_v14, %v10240_v22 }
0x25d1   :  { %v11866_v57 = vpop.f32.mrb[8].mxu1 }
0x25d2   :  { %v11894_v18 = vpop.f32.mrb[252].mxu0  ;;  %v11867_v15 = vpop.f32.mrb[9].mxu1 }
0x25d3   :  { %v11868_v2 = vadd.f32 %v11867_v15, %v11866_v57  ;;  %v11895_v39 = vpop.f32.mrb[253].mxu0  ;;  %v11869_v44 = vpop.f32.mrb[10].mxu1 }
0x25d4   :  { %v11896_v38 = vadd.f32 %v11895_v39, %v11894_v18  ;;  %v11897_v30 = vpop.f32.mrb[254].mxu0  ;;  %v11870_v60 = vpop.f32.mrb[11].mxu1 }
0x25d5   :  { %v10185_v13 = vadd.f32 %v11868_v2, %v9949_v41  ;;  %v11871_v17 = vadd.f32 %v11870_v60, %v11869_v44  ;;  %v11898_v53 = vpop.f32.mrb[255].mxu0  ;;  %v13201_v60 = vld [vmem:[%s16875_s4 + $0x10] sm:$0xff]  }
0x25d6   :  { %v11899_v62 = vadd.f32 %v11898_v53, %v11897_v30  ;;  %v13200_v30 = vld [vmem:[%s16875_s4 + $0x8] sm:$0xff]  }
0x25d7   :  { %v10234_v59 = vadd.f32 %v11896_v38, %v10185_v13  ;;  %v10188_v7 = vadd.f32 %v11871_v17, %v9949_v41  ;;  %v13202_v13 = vld [vmem:[%s16875_s4 + $0x18] sm:$0xff]   ;;  %v13203_v17 = vld [vmem:[%s16875_s4 + $0x20] sm:$0xff]   ;;  %v13204_v53 = vld [vmem:[%s16875_s4 + $0x28] sm:$0xff]  }
0x25d9   :  { %v10242_v5 = vadd.f32 %v10234_v59, %v16368_v48  ;;  %v10237_v4 = vadd.f32 %v11899_v62, %v10188_v7  ;;  %v13205_v62 = vld [vmem:[%s16875_s4 + $0x30] sm:$0xff]   ;;  %v13206_v59 = vld [vmem:[%s16875_s4 + $0x38] sm:$0xff]  }
0x25db   :  { %v10250_v45 = vrot.slane %v10242_v5, 6  ;;  %v10243_v20 = vadd.f32 %v10237_v4, %v16373_v19 }
0x25dd   :  { %v10252_v3 = vrot.slane %v10243_v20, 5  ;;  %v10251_v56 = vsel %vm762_vm3, %v10250_v45, %v10249_v21 }
0x25de   :  { %v10671_v35 = vpop.f32.mrb[0].mxu0 }
0x25df   :  { %v10253_v23 = vsel %vm765_vm4, %v10252_v3, %v10251_v56  ;;  %v10684_v31 = vrot.slane %v10671_v35, %v14003_v49  ;;  %v12732_v58 = vpop.f32.mrb[1].mxu0  ;;  %v11401_v56 = vld [vmem:[%s16878_s7 + $0xb] ss:$0 sm:$0xff] }
0x25e0   :  { %v10255_v24 = vsel %vm660_vm12, %v10253_v23, 0.0  ;;  %v10674_v48 = vpop.f32.mrb[2].mxu0 }
0x25e1   :  { %10256 = vadd.xlane.f32.xlu0 %v10255_v24  ;;  %v10685_v46 = vcombine.high %v10684_v31, %v10684_v31  ;;  %v10688_v47 = vsel %vm868_vm8, %v10684_v31, 0.0  ;;  %v12733_v16 = vpop.f32.mrb[3].mxu0 }
0x25e2   :  { %v10689_v19 = vrot.slane %v10688_v47, 4 }
0x25e3   :  { %v10695_v42 = vsel %vm868_vm8, %v10685_v46, 0.0 }
0x25e4   :  { %v10690_v37 = vadd.f32 %v10689_v19, %v10688_v47  ;;  %v10696_v36 = vrot.slane %v10695_v42, 4 }
0x25e6   :  { %v10691_v55 = vrot.slane %v10690_v37, 2  ;;  %v10697_v33 = vadd.f32 %v10696_v36, %v10695_v42 }
0x25e8   :  { %v10692_v63 = vadd.f32 %v10691_v55, %v10690_v37  ;;  %v10698_v52 = vrot.slane %v10697_v33, 2 }
0x25ea   :  { %v10693_v26 = vrot.slane %v10692_v63, 1  ;;  %v10699_v10 = vadd.f32 %v10698_v52, %v10697_v33 }
0x25ec   :  { %v10694_v1 = vadd.f32 %v10693_v26, %v10692_v63  ;;  %v10700_v51 = vrot.slane %v10699_v10, 1 }
0x25ee   :  { %v10702_v41 = vmul.f32 0.5, %v10694_v1  ;;  %v10701_v40 = vadd.f32 %v10700_v51, %v10699_v10 }
0x25f0   :  { %10704 = vst [vmem:[#allocation4] sm:$0x1] %v10702_v41  ;;  %v10703_v9 = vmul.f32 0.5, %v10701_v40 }
0x25f2   :  { %10705 = vst [vmem:[#allocation4 + $0x1] sm:$0x1] %v10703_v9 }
0x266e   :  { %v10257_v29 = vpop.xlane.xlu0 %10256 }
0x266f   :  { %v10258_v32 = vmul.f32 0.0078125, %v10257_v29 }
0x2671   :  { %v10260_v61 = vrot.slane %v10258_v32, 1  ;;  %v10261_v6 = vrot.slane %v10258_v32, 2  ;;  %v10262_v0 = vrot.slane %v10258_v32, 3  ;;  %v10267_v25 = vsub.f32 %v10240_v22, %v10258_v32  ;;  %v11400_v22 = vld [vmem:[%s16878_s7 + $0xa] ss:$0 sm:$0xff] }
0x2673   :  { %v10268_v12 = vsub.f32 %v10241_v28, %v10260_v61  ;;  %v10269_v27 = vsub.f32 %v10242_v5, %v10261_v6  ;;  %v10270_v43 = vsub.f32 %v10243_v20, %v10262_v0  ;;  %v10271_v8 = vmul.f32 %v10267_v25, %v10267_v25  ;;  %v13199_v28 = vld [vmem:[%s16875_s4] sm:$0xff]   ;;  %s13648_s4 = smov [#allocation4]  }
0x2674   :  { %12695 = vmatpush3.bf16.msra.mxu1 %v13199_v28  ;;  %s10723_s7 = sshll.u32 %s13648_s4, 4  ;;  %s10724_s7 = int_to_ptr.vmem [resolvable:$true] %s10723_s7 }
0x2675   :  { %v10272_v54 = vmul.f32 %v10268_v12, %v10268_v12  ;;  %v10273_v11 = vmul.f32 %v10269_v27, %v10269_v27  ;;  %v10274_v50 = vmul.f32 %v10270_v43, %v10270_v43  ;;  %12696 = vmatprep.subr.bf16.mxu1 %v13641_v34  ;;  %s13592_s21 = scalar_lea.vmem %s10724_s7, 32  ;;  %p13597_p1 = scmp.lt.s32.totalorder %s10724_s7, %s10724_s7 }
0x2676   :  { %p13593_p0 = scmp.ne.s32.totalorder %s10724_s7, %s13592_s21  ;;  %p13598_p2 = scmp.lt.s32.totalorder %s13592_s21, %s13592_s21 }
0x2677   :  { %v10279_v57 = vrot.slane %v10272_v54, 7  ;;  %v10281_v18 = vrot.slane %v10273_v11, 6  ;;  %v10283_v2 = vrot.slane %v10274_v50, 5 }
0x2678   :  { %12697 = vmatpush3.bf16.msra.mxu1 %v13200_v30  ;;  %p13599_p3 = por %p13598_p2, %p13597_p1 }
0x2679   :  { %v10280_v15 = vsel %vm759_vm2, %v10279_v57, %v10271_v8  ;;  %12698 = vmatprep.subr.bf16.mxu1 %v13641_v34 }
0x267a   :  { %v10282_v39 = vsel %vm762_vm3, %v10281_v18, %v10280_v15  ;;  %p13600_p4 = pnand %p13599_p3, %p13593_p0 }
0x267b   :  { %v10284_v44 = vsel %vm765_vm4, %v10283_v2, %v10282_v39 }
0x267c   :  { %v10286_v38 = vsel %vm660_vm12, %v10284_v44, 0.0  ;;  %12699 = vmatpush3.bf16.msra.mxu1 %v13201_v60 }
0x267d   :  { %10287 = vadd.xlane.f32.xlu0 %v10286_v38  ;;  %12700 = vmatprep.subr.bf16.mxu1 %v13641_v34 }
0x2680   :  { %12701 = vmatpush3.bf16.msra.mxu1 %v13202_v13 }
0x2681   :  { %12702 = vmatprep.subr.bf16.mxu1 %v13641_v34 }
0x2684   :  { %12703 = vmatpush3.bf16.msra.mxu1 %v13203_v17 }
0x2685   :  { %12704 = vmatprep.subr.bf16.mxu1 %v13641_v34 }
0x2688   :  { %12705 = vmatpush3.bf16.msra.mxu1 %v13204_v53 }
0x2689   :  { %12706 = vmatprep.subr.bf16.mxu1 %v13641_v34 }
0x268c   :  { %12707 = vmatpush3.bf16.msra.mxu1 %v13205_v62 }
0x268d   :  { %12708 = vmatprep.subr.bf16.mxu1 %v13641_v34 }
0x2690   :  { %12709 = vmatpush3.bf16.msra.mxu1 %v13206_v59 }
0x270a   :  { %v10288_v7 = vpop.xlane.xlu0 %10287 }
0x270b   :  { %v10289_v14 = vmul.f32 0.0078125, %v10288_v7 }
0x270d   :  { %v10290_v5 = vadd.f32 1e-05, %v10289_v14 }
0x270f   :  { %13581 = vrsqrt.f32 %v10290_v5 }
0x2719   :  { %v13582_v4 = vpop.eup %13581 }
0x271a   :  { %v10293_v45 = vrot.slane %v13582_v4, 1  ;;  %v10294_v20 = vrot.slane %v13582_v4, 2  ;;  %v10295_v21 = vrot.slane %v13582_v4, 3  ;;  %v10300_v3 = vmul.f32 %v13582_v4, %v10267_v25 }
0x271c   :  { %v10301_v35 = vmul.f32 %v10293_v45, %v10268_v12  ;;  %v10302_v34 = vmul.f32 %v10294_v20, %v10269_v27  ;;  %v10303_v23 = vmul.f32 %v10295_v21, %v10270_v43  ;;  %v10308_v31 = vmul.f32 %v11400_v22, %v10300_v3 }
0x271e   :  { %v10309_v58 = vmul.f32 %v11400_v22, %v10301_v35  ;;  %v10310_v24 = vmul.f32 %v11400_v22, %v10302_v34  ;;  %v10316_v48 = vadd.f32 %v11401_v56, %v10308_v31  ;;  %v10311_v46 = vmul.f32 %v11400_v22, %v10303_v23 }
0x2720   :  { %v10317_v47 = vadd.f32 %v11401_v56, %v10309_v58  ;;  %v10318_v16 = vadd.f32 %v11401_v56, %v10310_v24  ;;  %v10319_v19 = vadd.f32 %v11401_v56, %v10311_v46  ;;  %v10336_v42 = vpack.c.bf16 %v10316_v48, %v10316_v48 }
0x2722   :  { %v10337_v37 = vpack.c.bf16 %v10317_v47, %v10317_v47  ;;  %v10338_v36 = vpack.c.bf16 %v10318_v16, %v10318_v16  ;;  %v10339_v55 = vpack.c.bf16 %v10319_v19, %v10319_v19  ;;  %v10344_v26 = vunpack.c.l.b16 %v10336_v42 }
0x2724   :  { %v10345_v33 = vunpack.c.l.b16 %v10337_v37  ;;  %v10346_v63 = vunpack.c.l.b16 %v10338_v36  ;;  %v10347_v52 = vunpack.c.l.b16 %v10339_v55 }
0x2726   :  { %v10348_v10 = vrot.slane %v10345_v33, 7  ;;  %v10350_v1 = vrot.slane %v10346_v63, 6  ;;  %v10352_v41 = vrot.slane %v10347_v52, 5 }
0x2728   :  { %v10349_v51 = vsel %vm759_vm2, %v10348_v10, %v10344_v26 }
0x2729   :  { %v10351_v40 = vsel %vm762_vm3, %v10350_v1, %v10349_v51 }
0x272a   :  { %v10353_v9 = vsel %vm765_vm4, %v10352_v41, %v10351_v40 }
0x272b   :  { %v10354_v29 = vpack.c.b16 %v10353_v9, %v10353_v9 }
0x272d   :  { %12711 = vmatmul.mubr.bf16.vlgmr.msra.gmra.mrb[12].mxu1 %v10354_v29 }
0x272e   :  { %13603 = shalt.err (!%p13600_p4)
}
0x272f   :  { %s13604_s0 = scalar_lea.hbm %s16880_s9, 32 }
0x2730   :  { %p13605_p5 = scmp.ne.s32.totalorder %s16880_s9, %s13604_s0  ;;  %p13608_p6 = scmp.lt.u32.totalorder %s13604_s0, %s16880_s9 }
0x2732   :  { %p13610_p7 = pnand %p13608_p6, %p13605_p5 }
0x2734   :  { %13613 = shalt.err (!%p13610_p7)
}
0x2735   :  { %s13649_s1 = smov 16   ;;  %s13650_s26 = smov 1  }
0x2736   :  { %10729 = dma.vmem_to_hbm [thread:$0]  %s10724_s7, 32, %s16880_s9, [#allocation5], %s13649_s1, %s13649_s1, %s13650_s26  }
0x2737   :  { %s13651_s9 = smov [#allocation2]  }
0x2738   :  { %s10711_s29 = sshll.u32 %s13651_s9, 4  ;;  %s10712_s29 = int_to_ptr.vmem [resolvable:$true] %s10711_s29 }
0x2739   :  { %s13614_s30 = scalar_lea.vmem %s10712_s29, 32  ;;  %p13619_p9 = scmp.lt.s32.totalorder %s10712_s29, %s10712_s29 }
0x273a   :  { %p13615_p8 = scmp.ne.s32.totalorder %s10712_s29, %s13614_s30  ;;  %p13620_p10 = scmp.lt.s32.totalorder %s13614_s30, %s13614_s30 }
0x273c   :  { %p13621_p11 = por %p13620_p10, %p13619_p9 }
0x273e   :  { %p13622_p12 = pnand %p13621_p11, %p13615_p8 }
0x2800   :  { %v10438_v32 = vpop.f32.mrb[12].mxu1 }
0x2801   :  { %v10451_v61 = vrot.slane %v10438_v32, %v14003_v49  ;;  %v12712_v6 = vpop.f32.mrb[13].mxu1 }
0x2802   :  { %v10441_v0 = vpop.f32.mrb[14].mxu1 }
0x2803   :  { %v10452_v25 = vcombine.high %v10451_v61, %v10451_v61  ;;  %v10455_v12 = vsel %vm868_vm8, %v10451_v61, 0.0  ;;  %v12713_v27 = vpop.f32.mrb[15].mxu1 }
0x2804   :  { %v10456_v43 = vrot.slane %v10455_v12, 4 }
0x2805   :  { %v10462_v54 = vsel %vm868_vm8, %v10452_v25, 0.0 }
0x2806   :  { %v10457_v11 = vadd.f32 %v10456_v43, %v10455_v12  ;;  %v10463_v50 = vrot.slane %v10462_v54, 4 }
0x2808   :  { %v10458_v8 = vrot.slane %v10457_v11, 2  ;;  %v10464_v57 = vadd.f32 %v10463_v50, %v10462_v54 }
0x280a   :  { %v10459_v18 = vadd.f32 %v10458_v8, %v10457_v11  ;;  %v10465_v15 = vrot.slane %v10464_v57, 2 }
0x280c   :  { %v10460_v2 = vrot.slane %v10459_v18, 1  ;;  %v10466_v39 = vadd.f32 %v10465_v15, %v10464_v57 }
0x280e   :  { %v10461_v44 = vadd.f32 %v10460_v2, %v10459_v18  ;;  %v10467_v38 = vrot.slane %v10466_v39, 1 }
0x2810   :  { %v10468_v49 = vadd.f32 %v10467_v38, %v10466_v39  ;;  %v10470_v28 = vmul.f32 0.5, %v10461_v44 }
0x2812   :  { %v10471_v30 = vmul.f32 0.5, %v10468_v49  ;;  %10472 = vst [vmem:[#allocation2] sm:$0x1] %v10470_v28 }
0x2814   :  { %10473 = vst [vmem:[#allocation2 + $0x1] sm:$0x1] %v10471_v30 }
0x2815   :  { %13625 = shalt.err (!%p13622_p12)
}
0x2816   :  { %s13626_s10 = scalar_lea.hbm %s16879_s8, 32 }
0x2817   :  { %p13627_p13 = scmp.ne.s32.totalorder %s16879_s8, %s13626_s10  ;;  %p13630_p0 = scmp.lt.u32.totalorder %s13626_s10, %s16879_s8 }
0x2819   :  { %p13632_p1 = pnand %p13630_p0, %p13627_p13 }
0x281b   :  { %13635 = shalt.err (!%p13632_p1)
}
0x281c   :  { %10717 = dma.vmem_to_hbm [thread:$0]  %s10712_s29, 32, %s16879_s8, [#allocation3], %s13649_s1, %s13649_s1, %s13650_s26  }
0x281d   :  { %13636 = dma.done.wait [#allocation3], 32  }
0x281e   :  { %13637 = vsyncadd [#allocation3], 4294967264 }
0x281f   :  { %13638 = dma.done.wait [#allocation5], 32  }
0x2820   :  { %13639 = vsyncadd [#allocation5], 4294967264 }
0x2821   :  { %10736 = vsyncpa [#allocation3], 1 }
0x2822   :  { %10737 = vsyncpa [#allocation5], 1 }

</bundles_post_ra>
